<compile_context>
chip_gen: v7x
topology: tpu7x:2x2x1
jax: 0.10.0
libtpu: 0.0.40
codegen_flags: <defaults>
</compile_context>

<pallas_src>
import math
from functools import partial

import numpy as np
import jax
import jax.numpy as jnp
from jax.experimental import pallas as pl
from jax.experimental.pallas import tpu as pltpu


# ----------------------------------------------------------------------------
# Fused multi-head attention kernel
# ----------------------------------------------------------------------------

def _make_kernel(EE, PIX2, PIX3, M, D, NH, NF, C3D, HW, inv_sqrt_c):
    eps = 1e-5
    inv_hw = 1.0 / float(HW)

    def kernel(f2w_ref, f3w_ref, f3n_ref, w2_ref, w3_ref, wc_ref,
               gamma_ref, beta_ref, fuse_ref, att_ref):
        # ---- 2D path: all heads' 1x1 conv + adaptive max pool ---------------
        # rows are window-major: pooling = layout-preserving row split + max.
        y2 = jnp.dot(f2w_ref[...], w2_ref[...],
                     preferred_element_type=jnp.float32)          # (EE*PIX2, M)
        p2 = jnp.max(y2.reshape(EE, PIX2, M), axis=1)             # (EE, M)

        # ---- 3D path: all heads, all depths, 1x1 conv + pool over (H, W) ----
        # kron-folded weights -> output lanes are (m, d): fully lane dense.
        y3 = jnp.dot(f3w_ref[...], w3_ref[...],
                     preferred_element_type=jnp.float32)          # (EE*PIX3, M*D)
        p3 = jnp.max(y3.reshape(EE, PIX3, M * D), axis=1)         # (EE, M*D)

        # ---- scaled dot-product over (feat, pooled bins), per head ----------
        prod = p3.reshape(EE, M, D) * p2[:, :, None]              # (EE, M, D)
        s_md = jnp.sum(prod, axis=0)                              # (M, D)
        logits = jnp.sum(s_md.reshape(NH, NF, D), axis=1) * inv_sqrt_c   # (NH, D)

        # softmax over depth D (lane axis)
        lmax = jnp.max(logits, axis=1, keepdims=True)
        ex = jnp.exp(logits - lmax)
        att = ex / jnp.sum(ex, axis=1, keepdims=True)             # (NH, D)
        att_ref[...] = att

        # ---- depth-weighted fusion (both heads at once) + shared 1x1 conv ---
        f3 = f3n_ref[...].reshape(C3D, D, HW)                     # free row split
        fused = jnp.sum(att[:, None, :, None] * f3[None], axis=2)  # (NH, C3D, HW)
        out = jnp.dot(wc_ref[...], fused.reshape(NH * C3D, HW),
                      preferred_element_type=jnp.float32)         # (C3D, HW)

        # ---- BatchNorm2d (training-mode batch stats, B=1), one pass + ReLU --
        s1 = jnp.sum(out, axis=1, keepdims=True)
        s2 = jnp.sum(out * out, axis=1, keepdims=True)
        mean = s1 * inv_hw
        var = s2 * inv_hw - mean * mean
        scale = gamma_ref[...] * jax.lax.rsqrt(var + eps)
        shift = beta_ref[...] - mean * scale
        fuse_ref[...] = jnp.maximum(out * scale + shift, 0.0)     # (C3D, HW)

    return kernel


@partial(jax.jit, static_argnames=("num_embed",))
def multi_head_attention_forward(params, feat_2D, feat_3D, *, num_embed):
    """feat_2D: (1, C2D, H2, W2), feat_3D: (1, C3D, D, H, W)  [PyTorch layouts].

    Returns (fuse_attention (1, C3D, H, W), slice_att_v (1, D, num_head))."""
    B, C2D, H2, W2 = feat_2D.shape
    B3, C3D, D, H, W = feat_3D.shape
    assert B == 1 and B3 == 1, "reference matmul semantics require batch size 1"
    NH, NF, _ = params["w2d"].shape
    M = NH * NF
    E = num_embed
    # TODO(synk): general (non-divisible) AdaptiveMaxPool windows not implemented.
    assert H2 % E == 0 and W2 % E == 0 and H % E == 0 and W % E == 0
    EE = E * E
    PIX2 = (H2 // E) * (W2 // E)
    PIX3 = (H // E) * (W // E)
    HW = H * W
    inv_sqrt_c = 1.0 / math.sqrt(float(NF * E * E))   # C = num_feat*num_embed^2
    f32 = jnp.float32

    # -------- activations (layout plumbing, all fused under this jit) --------
    # 2D score path: rows = (eh, ew, hh, ww) window-major, cols = channel.
    t2 = feat_2D[0].astype(f32).reshape(C2D, E, H2 // E, E, W2 // E)
    f2w = jnp.transpose(t2, (1, 3, 2, 4, 0)).reshape(EE * PIX2, C2D)
    # 3D score path: rows = (eh, ew, hh, ww) window-major, cols = (c, d).
    t3 = feat_3D[0].astype(f32).reshape(C3D, D, E, H // E, E, W // E)
    f3w = jnp.transpose(t3, (2, 4, 3, 5, 0, 1)).reshape(EE * PIX3, C3D * D)
    # 3D fusion path: natural NCDHW layout, FREE reshape (no transpose, no copy).
    f3n = feat_3D[0].astype(f32).reshape(C3D * D, HW)

    # -------- weights ---------------------------------------------------------
    w2s = params["w2d"].astype(f32).reshape(M, C2D).T                 # (C2D, M)
    w3_all = params["w3d"].astype(f32).reshape(M, C3D)                # (M, C3D)
    # kron-fold: W3F[c*D+d, m*D+d'] = w3[m, c] * (d == d')
    w3f = jnp.einsum("mc,de->cdme", w3_all,
                     jnp.eye(D, dtype=f32)).reshape(C3D * D, M * D)
    wc = params["wc"].astype(f32)                                     # (C3D, NH*C3D)
    gamma = params["gamma"].astype(f32).reshape(C3D, 1)
    beta = params["beta"].astype(f32).reshape(C3D, 1)

    kernel = _make_kernel(EE, PIX2, PIX3, M, D, NH, NF, C3D, HW, inv_sqrt_c)

    fuse_t, att_hd = pl.pallas_call(
        kernel,
        out_shape=(jax.ShapeDtypeStruct((C3D, HW), f32),
                   jax.ShapeDtypeStruct((NH, D), f32)),
        grid=(1,),
        in_specs=[
            pl.BlockSpec((EE * PIX2, C2D), lambda i: (0, 0)),
            pl.BlockSpec((EE * PIX3, C3D * D), lambda i: (0, 0)),
            pl.BlockSpec((C3D * D, HW), lambda i: (0, 0)),
            pl.BlockSpec((C2D, M), lambda i: (0, 0)),
            pl.BlockSpec((C3D * D, M * D), lambda i: (0, 0)),
            pl.BlockSpec((C3D, NH * C3D), lambda i: (0, 0)),
            pl.BlockSpec((C3D, 1), lambda i: (0, 0)),
            pl.BlockSpec((C3D, 1), lambda i: (0, 0)),
        ],
        out_specs=(
            pl.BlockSpec((C3D, HW), lambda i: (0, 0)),
            pl.BlockSpec((NH, D), lambda i: (0, 0)),
        ),
        compiler_params=pltpu.CompilerParams(
            dimension_semantics=("arbitrary",)),
    )(f2w, f3w, f3n, w2s, w3f, wc, gamma, beta)

    fuse_attention = fuse_t.reshape(1, C3D, H, W)                 # (1, C3D, H, W)
    slice_att_v = jnp.transpose(att_hd, (1, 0))[None]             # (1, D, NH)
    return fuse_attention, slice_att_v


# ----------------------------------------------------------------------------
# Parameters + pure-JAX reference (for correctness check)
# ----------------------------------------------------------------------------

def init_params(key, num_head, num_feat_2D, num_feat_3D, num_feat):
    k1, k2, k3 = jax.random.split(key, 3)
    w2d = jax.random.normal(k1, (num_head, num_feat, num_feat_2D),
                            jnp.float32) / np.sqrt(float(num_feat_2D))
    w3d = jax.random.normal(k2, (num_head, num_feat, num_feat_3D),
                            jnp.float32) / np.sqrt(float(num_feat_3D))
    wc = jax.random.normal(k3, (num_feat_3D, num_head * num_feat_3D),
                           jnp.float32) / np.sqrt(float(num_head * num_feat_3D))
    gamma = jnp.ones((num_feat_3D,), jnp.float32)
    beta = jnp.zeros((num_feat_3D,), jnp.float32)
    return {"w2d": w2d, "w3d": w3d, "wc": wc, "gamma": gamma, "beta": beta}


def reference_forward(params, feat_2D, feat_3D, num_embed):
    """Plain-JAX mirror of the PyTorch forward (B = 1, divisible pooling)."""
    B, C2D, H2, W2 = feat_2D.shape
    _, C3D, D, H, W = feat_3D.shape
    NH, NF, _ = params["w2d"].shape
    E = num_embed
    fuse_list, att_list = [], []
    for h in range(NH):
        w2 = params["w2d"][h]                                     # (NF, C2D)
        w3 = params["w3d"][h]                                     # (NF, C3D)
        y2 = jnp.einsum('bchw,fc->bfhw', feat_2D, w2)
        p2 = y2.reshape(B, NF, E, H2 // E, E, W2 // E).max(axis=5).max(axis=3)
        y3 = jnp.einsum('bcdhw,fc->bfdhw', feat_3D, w3)
        p3 = y3.reshape(B, NF, D, E, H // E, E, W // E).max(axis=6).max(axis=4)
        f2s = p2.reshape(B, -1)                                   # (B, NF*E*E)
        f3s = jnp.transpose(p3, (0, 1, 3, 4, 2)).reshape(-1, D)   # (NF*E*E, D)
        C = f2s.shape[1]
        sa = jnp.matmul(f2s, f3s) / math.sqrt(float(C))           # (B, D)
        sa = jax.nn.softmax(sa, axis=1)
        att_list.append(sa)
        fuse = (feat_3D * sa.reshape(B, 1, D, 1, 1)).sum(axis=2)  # (B, C3D, H, W)
        fuse_list.append(fuse)
    fuse_cat = jnp.concatenate(fuse_list, axis=1)                 # (B, NH*C3D, H, W)
    out = jnp.einsum('bihw,oi->bohw', fuse_cat, params["wc"])     # (B, C3D, H, W)
    mean = out.mean(axis=(0, 2, 3), keepdims=True)
    var = jnp.square(out - mean).mean(axis=(0, 2, 3), keepdims=True)
    out = (out - mean) * jax.lax.rsqrt(var + 1e-5)
    out = out * params["gamma"].reshape(1, C3D, 1, 1) + params["beta"].reshape(1, C3D, 1, 1)
    out = jnp.maximum(out, 0.0)
    att = jnp.stack(att_list, axis=0)                             # (NH, B, D)
    att = jnp.transpose(att, (1, 2, 0))                           # (B, D, NH)
    return out, att


# ----------------------------------------------------------------------------
# Main
# ----------------------------------------------------------------------------

if __name__ == "__main__":
    num_head, num_feat_2D, num_feat_3D, num_feat, num_embed = 2, 4, 8, 16, 4
    B, H2, W2 = 1, 16, 16
    D, H, W = 8, 16, 16

    key = jax.random.PRNGKey(0)
    kp, kx, ky = jax.random.split(key, 3)
    params = init_params(kp, num_head, num_feat_2D, num_feat_3D, num_feat)

    feat_2D = jax.random.normal(kx, (B, num_feat_2D, H2, W2), jnp.float32)
    feat_3D = jax.random.normal(ky, (B, num_feat_3D, D, H, W), jnp.float32)

    fuse, att = multi_head_attention_forward(params, feat_2D, feat_3D,
                                             num_embed=num_embed)
    jax.block_until_ready(fuse)
    jax.block_until_ready(att)

    assert fuse.shape == (B, num_feat_3D, H, W)
    assert att.shape == (B, D, num_head)

    # correctness check against plain-JAX reference of the PyTorch forward
    fuse_ref, att_ref = reference_forward(params, feat_2D, feat_3D, num_embed)
    np.testing.assert_allclose(np.asarray(fuse), np.asarray(fuse_ref),
                               rtol=2e-2, atol=2e-2)
    np.testing.assert_allclose(np.asarray(att), np.asarray(att_ref),
                               rtol=2e-2, atol=2e-2)

    print("KERNEL_OK")
</pallas_src>

<mosaic_0001>
module attributes {stable_mosaic.version = 11 : i64} {
  func.func @kernel(%arg0: i32, %arg1: memref<256x4xf32, #tpu.memory_space<vmem>>, %arg2: memref<256x64xf32, #tpu.memory_space<vmem>>, %arg3: memref<64x256xf32, #tpu.memory_space<vmem>>, %arg4: memref<4x32xf32, #tpu.memory_space<vmem>>, %arg5: memref<64x256xf32, #tpu.memory_space<vmem>>, %arg6: memref<8x16xf32, #tpu.memory_space<vmem>>, %arg7: memref<8x1xf32, #tpu.memory_space<vmem>>, %arg8: memref<8x1xf32, #tpu.memory_space<vmem>>, %arg9: memref<8x256xf32, #tpu.memory_space<vmem>>, %arg10: memref<2x8xf32, #tpu.memory_space<vmem>>) attributes {dimension_semantics = [#tpu.dimension_semantics<arbitrary>], iteration_bounds = array<i64: 1>, scalar_prefetch = 0 : i64, scratch_operands = 0 : i64, tpu.core_type = #tpu.core_type<tc>, window_params = [{pipeline_mode = #tpu.pipeline_mode<synchronous>, transform_indices = @transform_0, window_bounds = array<i64: 256, 4>}, {pipeline_mode = #tpu.pipeline_mode<synchronous>, transform_indices = @transform_1, window_bounds = array<i64: 256, 64>}, {pipeline_mode = #tpu.pipeline_mode<synchronous>, transform_indices = @transform_2, window_bounds = array<i64: 64, 256>}, {pipeline_mode = #tpu.pipeline_mode<synchronous>, transform_indices = @transform_3, window_bounds = array<i64: 4, 32>}, {pipeline_mode = #tpu.pipeline_mode<synchronous>, transform_indices = @transform_4, window_bounds = array<i64: 64, 256>}, {pipeline_mode = #tpu.pipeline_mode<synchronous>, transform_indices = @transform_5, window_bounds = array<i64: 8, 16>}, {pipeline_mode = #tpu.pipeline_mode<synchronous>, transform_indices = @transform_6, window_bounds = array<i64: 8, 1>}, {pipeline_mode = #tpu.pipeline_mode<synchronous>, transform_indices = @transform_7, window_bounds = array<i64: 8, 1>}, {pipeline_mode = #tpu.pipeline_mode<synchronous>, transform_indices = @transform_8, window_bounds = array<i64: 8, 256>}, {pipeline_mode = #tpu.pipeline_mode<synchronous>, transform_indices = @transform_9, window_bounds = array<i64: 2, 8>}]} {
    %c0 = arith.constant 0 : index
    %c0_0 = arith.constant 0 : index
    %0 = vector.load %arg1[%c0, %c0_0] : memref<256x4xf32, #tpu.memory_space<vmem>>, vector<256x4xf32>
    %c0_1 = arith.constant 0 : index
    %c0_2 = arith.constant 0 : index
    %1 = vector.load %arg4[%c0_1, %c0_2] : memref<4x32xf32, #tpu.memory_space<vmem>>, vector<4x32xf32>
    %cst = arith.constant dense<0.000000e+00> : vector<256x32xf32>
    %2 = tpu.matmul %0, %1, %cst {dimension_numbers = #tpu.dot_dimension_numbers<[1], [0], [0], [1], [0, 0, 1, 1], [], []>} : vector<256x4xf32>, vector<4x32xf32>, vector<256x32xf32> -> vector<256x32xf32>
    %3 = vector.shape_cast %2 : vector<256x32xf32> to vector<16x16x32xf32>
    %cst_3 = arith.constant dense<0xFF800000> : vector<16x32xf32>
    %4 = vector.multi_reduction <maximumf>, %3, %cst_3 [1] : vector<16x16x32xf32> to vector<16x32xf32>
    %c0_4 = arith.constant 0 : index
    %c0_5 = arith.constant 0 : index
    %5 = vector.load %arg2[%c0_4, %c0_5] : memref<256x64xf32, #tpu.memory_space<vmem>>, vector<256x64xf32>
    %c0_6 = arith.constant 0 : index
    %c0_7 = arith.constant 0 : index
    %6 = vector.load %arg5[%c0_6, %c0_7] : memref<64x256xf32, #tpu.memory_space<vmem>>, vector<64x256xf32>
    %cst_8 = arith.constant dense<0.000000e+00> : vector<256x256xf32>
    %7 = tpu.matmul %5, %6, %cst_8 {dimension_numbers = #tpu.dot_dimension_numbers<[1], [0], [0], [1], [0, 0, 1, 1], [], []>} : vector<256x64xf32>, vector<64x256xf32>, vector<256x256xf32> -> vector<256x256xf32>
    %8 = vector.shape_cast %7 : vector<256x256xf32> to vector<16x16x256xf32>
    %cst_9 = arith.constant dense<0xFF800000> : vector<16x256xf32>
    %9 = vector.multi_reduction <maximumf>, %8, %cst_9 [1] : vector<16x16x256xf32> to vector<16x256xf32>
    %10 = vector.shape_cast %9 : vector<16x256xf32> to vector<16x32x8xf32>
    %11 = vector.shape_cast %4 : vector<16x32xf32> to vector<16x32x1xf32>
    %12 = vector.broadcast %11 : vector<16x32x1xf32> to vector<16x32x8xf32>
    %13 = arith.mulf %10, %12 : vector<16x32x8xf32>
    %cst_10 = arith.constant dense<0.000000e+00> : vector<32x8xf32>
    %14 = vector.multi_reduction <add>, %13, %cst_10 [0] : vector<16x32x8xf32> to vector<32x8xf32>
    %15 = vector.shape_cast %14 : vector<32x8xf32> to vector<2x16x8xf32>
    %cst_11 = arith.constant dense<0.000000e+00> : vector<2x8xf32>
    %16 = vector.multi_reduction <add>, %15, %cst_11 [1] : vector<2x16x8xf32> to vector<2x8xf32>
    %cst_12 = arith.constant 6.250000e-02 : f32
    %17 = vector.broadcast %cst_12 : f32 to vector<2x8xf32>
    %18 = arith.mulf %16, %17 : vector<2x8xf32>
    %cst_13 = arith.constant dense<0xFF800000> : vector<2xf32>
    %19 = vector.multi_reduction <maximumf>, %18, %cst_13 [1] : vector<2x8xf32> to vector<2xf32>
    %20 = vector.shape_cast %19 : vector<2xf32> to vector<2x1xf32>
    %21 = vector.broadcast %20 : vector<2x1xf32> to vector<2x8xf32>
    %22 = arith.subf %18, %21 : vector<2x8xf32>
    %23 = math.exp %22 : vector<2x8xf32>
    %cst_14 = arith.constant dense<0.000000e+00> : vector<2xf32>
    %24 = vector.multi_reduction <add>, %23, %cst_14 [1] : vector<2x8xf32> to vector<2xf32>
    %25 = vector.shape_cast %24 : vector<2xf32> to vector<2x1xf32>
    %26 = vector.broadcast %25 : vector<2x1xf32> to vector<2x8xf32>
    %27 = arith.divf %23, %26 : vector<2x8xf32>
    %c0_15 = arith.constant 0 : index
    %c0_16 = arith.constant 0 : index
    %28 = vector.load %arg10[%c0_15, %c0_16] : memref<2x8xf32, #tpu.memory_space<vmem>>, vector<2x8xf32>
    tpu.vector_store %arg10[%c0_15, %c0_16], %27 {strides = array<i32>} : memref<2x8xf32, #tpu.memory_space<vmem>>, vector<2x8xf32>,
    %c0_17 = arith.constant 0 : index
    %c0_18 = arith.constant 0 : index
    %29 = vector.load %arg3[%c0_17, %c0_18] : memref<64x256xf32, #tpu.memory_space<vmem>>, vector<64x256xf32>
    %30 = vector.shape_cast %29 : vector<64x256xf32> to vector<8x8x256xf32>
    %31 = vector.shape_cast %27 : vector<2x8xf32> to vector<2x1x8x1xf32>
    %32 = vector.shape_cast %30 : vector<8x8x256xf32> to vector<1x8x8x256xf32>
    %33 = vector.broadcast %31 : vector<2x1x8x1xf32> to vector<2x8x8x256xf32>
    %34 = vector.broadcast %32 : vector<1x8x8x256xf32> to vector<2x8x8x256xf32>
    %35 = arith.mulf %33, %34 : vector<2x8x8x256xf32>
    %cst_19 = arith.constant dense<0.000000e+00> : vector<2x8x256xf32>
    %36 = vector.multi_reduction <add>, %35, %cst_19 [2] : vector<2x8x8x256xf32> to vector<2x8x256xf32>
    %c0_20 = arith.constant 0 : index
    %c0_21 = arith.constant 0 : index
    %37 = vector.load %arg6[%c0_20, %c0_21] : memref<8x16xf32, #tpu.memory_space<vmem>>, vector<8x16xf32>
    %38 = vector.shape_cast %36 : vector<2x8x256xf32> to vector<16x256xf32>
    %cst_22 = arith.constant dense<0.000000e+00> : vector<8x256xf32>
    %39 = tpu.matmul %37, %38, %cst_22 {dimension_numbers = #tpu.dot_dimension_numbers<[1], [0], [0], [1], [0, 0, 1, 1], [], []>} : vector<8x16xf32>, vector<16x256xf32>, vector<8x256xf32> -> vector<8x256xf32>
    %cst_23 = arith.constant dense<0.000000e+00> : vector<8xf32>
    %40 = vector.multi_reduction <add>, %39, %cst_23 [1] : vector<8x256xf32> to vector<8xf32>
    %41 = vector.shape_cast %40 : vector<8xf32> to vector<8x1xf32>
    %42 = arith.mulf %39, %39 : vector<8x256xf32>
    %cst_24 = arith.constant dense<0.000000e+00> : vector<8xf32>
    %43 = vector.multi_reduction <add>, %42, %cst_24 [1] : vector<8x256xf32> to vector<8xf32>
    %44 = vector.shape_cast %43 : vector<8xf32> to vector<8x1xf32>
    %cst_25 = arith.constant 3.906250e-03 : f32
    %45 = vector.broadcast %cst_25 : f32 to vector<8x1xf32>
    %46 = arith.mulf %41, %45 : vector<8x1xf32>
    %cst_26 = arith.constant 3.906250e-03 : f32
    %47 = vector.broadcast %cst_26 : f32 to vector<8x1xf32>
    %48 = arith.mulf %44, %47 : vector<8x1xf32>
    %49 = arith.mulf %46, %46 : vector<8x1xf32>
    %50 = arith.subf %48, %49 : vector<8x1xf32>
    %c0_27 = arith.constant 0 : index
    %c0_28 = arith.constant 0 : index
    %51 = vector.load %arg7[%c0_27, %c0_28] : memref<8x1xf32, #tpu.memory_space<vmem>>, vector<8x1xf32>
    %cst_29 = arith.constant 9.99999974E-6 : f32
    %52 = vector.broadcast %cst_29 : f32 to vector<8x1xf32>
    %53 = arith.addf %50, %52 : vector<8x1xf32>
    %54 = math.rsqrt %53 : vector<8x1xf32>
    %55 = arith.mulf %51, %54 : vector<8x1xf32>
    %c0_30 = arith.constant 0 : index
    %c0_31 = arith.constant 0 : index
    %56 = vector.load %arg8[%c0_30, %c0_31] : memref<8x1xf32, #tpu.memory_space<vmem>>, vector<8x1xf32>
    %57 = arith.mulf %46, %55 : vector<8x1xf32>
    %58 = arith.subf %56, %57 : vector<8x1xf32>
    %59 = vector.broadcast %55 : vector<8x1xf32> to vector<8x256xf32>
    %60 = arith.mulf %39, %59 : vector<8x256xf32>
    %61 = vector.broadcast %58 : vector<8x1xf32> to vector<8x256xf32>
    %62 = arith.addf %60, %61 : vector<8x256xf32>
    %cst_32 = arith.constant 0.000000e+00 : f32
    %63 = vector.broadcast %cst_32 : f32 to vector<8x256xf32>
    %64 = arith.maximumf %62, %63 : vector<8x256xf32>
    %c0_33 = arith.constant 0 : index
    %c0_34 = arith.constant 0 : index
    %65 = vector.load %arg9[%c0_33, %c0_34] : memref<8x256xf32, #tpu.memory_space<vmem>>, vector<8x256xf32>
    tpu.vector_store %arg9[%c0_33, %c0_34], %64 {strides = array<i32>} : memref<8x256xf32, #tpu.memory_space<vmem>>, vector<8x256xf32>,
    return
  }
  func.func @transform_0(%arg0: i32) -> (i32, i32) {
    %c0_i32 = arith.constant 0 : i32
    %c0_i32_0 = arith.constant 0 : i32
    %c0_i32_1 = arith.constant 0 : i32
    return %c0_i32, %c0_i32_0 : i32, i32
  }
  func.func @transform_1(%arg0: i32) -> (i32, i32) {
    %c0_i32 = arith.constant 0 : i32
    %c0_i32_0 = arith.constant 0 : i32
    %c0_i32_1 = arith.constant 0 : i32
    return %c0_i32, %c0_i32_0 : i32, i32
  }
  func.func @transform_2(%arg0: i32) -> (i32, i32) {
    %c0_i32 = arith.constant 0 : i32
    %c0_i32_0 = arith.constant 0 : i32
    %c0_i32_1 = arith.constant 0 : i32
    return %c0_i32, %c0_i32_0 : i32, i32
  }
  func.func @transform_3(%arg0: i32) -> (i32, i32) {
    %c0_i32 = arith.constant 0 : i32
    %c0_i32_0 = arith.constant 0 : i32
    %c0_i32_1 = arith.constant 0 : i32
    return %c0_i32, %c0_i32_0 : i32, i32
  }
  func.func @transform_4(%arg0: i32) -> (i32, i32) {
    %c0_i32 = arith.constant 0 : i32
    %c0_i32_0 = arith.constant 0 : i32
    %c0_i32_1 = arith.constant 0 : i32
    return %c0_i32, %c0_i32_0 : i32, i32
  }
  func.func @transform_5(%arg0: i32) -> (i32, i32) {
    %c0_i32 = arith.constant 0 : i32
    %c0_i32_0 = arith.constant 0 : i32
    %c0_i32_1 = arith.constant 0 : i32
    return %c0_i32, %c0_i32_0 : i32, i32
  }
  func.func @transform_6(%arg0: i32) -> (i32, i32) {
    %c0_i32 = arith.constant 0 : i32
    %c0_i32_0 = arith.constant 0 : i32
    %c0_i32_1 = arith.constant 0 : i32
    return %c0_i32, %c0_i32_0 : i32, i32
  }
  func.func @transform_7(%arg0: i32) -> (i32, i32) {
    %c0_i32 = arith.constant 0 : i32
    %c0_i32_0 = arith.constant 0 : i32
    %c0_i32_1 = arith.constant 0 : i32
    return %c0_i32, %c0_i32_0 : i32, i32
  }
  func.func @transform_8(%arg0: i32) -> (i32, i32) {
    %c0_i32 = arith.constant 0 : i32
    %c0_i32_0 = arith.constant 0 : i32
    %c0_i32_1 = arith.constant 0 : i32
    return %c0_i32, %c0_i32_0 : i32, i32
  }
  func.func @transform_9(%arg0: i32) -> (i32, i32) {
    %c0_i32 = arith.constant 0 : i32
    %c0_i32_0 = arith.constant 0 : i32
    %c0_i32_1 = arith.constant 0 : i32
    return %c0_i32, %c0_i32_0 : i32, i32
  }
}

</mosaic_0001>

<bundles_post_ra>
// kernel: squeeze.3
= control target key start
LH: loop header
LB: loop body
LE: loop exit
PB: predicated region body
PF: predicated region fallthrough
CT: control target
= control target key end

     0   :  { %vm3_vm0 = vcmask 31744   ;;  %s807_s12 = smov 124   ;;  %s809_s23 = smov 116   ;;  %s1100_s0 = inlined_call_operand.vmem [shape: f32[1,4,16,16], index: 0, kind: input, shape index: {}]   ;;  %s1101_s1 = inlined_call_operand.vmem [shape: f32[4,4,4,4,4], index: 1, kind: output, shape index: {}]  }
   0x1   :  { %v721_v0 = vld [vmem:[%s1100_s0 + $0x10] sm:$0xff]   ;;  %v55_v1 = vld [vmem:[%s1100_s0] sm:$0xff]   ;;  %v722_v2 = vld [vmem:[%s1100_s0 + $0x18] sm:$0xff]  }
   0x2   :  { %74 = vrot.lane.b32.xlu1 %v721_v0, %s807_s12  ;;  %56 = vrot.lane.b32.xlu0 %v55_v1, %s807_s12  ;;  %v720_v3 = vld [vmem:[%s1100_s0 + $0x8] sm:$0xff]   ;;  %17 = vst.msk [vmem:[#allocation0 + $0x80] ss:$8 sm:$0xf] %vm3_vm0, %v721_v0   ;;  %v723_v5 = vld [vmem:[%s1100_s0 + $0x20] sm:$0xff]  }
   0x3   :  { %v724_v4 = vld [vmem:[%s1100_s0 + $0x28] sm:$0xff]   ;;  %19 = vst.msk [vmem:[#allocation0 + $0x80] ss:$8 sm:$0xf0] %vm3_vm0, %v721_v0   ;;  %v726_v6 = vld [vmem:[%s1100_s0 + $0x38] sm:$0xff]   ;;  %v725_v7 = vld [vmem:[%s1100_s0 + $0x30] sm:$0xff]  }
   0x4   :  { %4 = vst.msk [vmem:[#allocation0] ss:$8 sm:$0xf] %vm3_vm0, %v55_v1   ;;  %5 = vst.msk [vmem:[#allocation0] ss:$8 sm:$0xf0] %vm3_vm0, %v55_v1  }
   0x5   :  { %24 = vst.msk [vmem:[#allocation0 + $0xc0] ss:$8 sm:$0xf] %vm3_vm0, %v722_v2   ;;  %26 = vst.msk [vmem:[#allocation0 + $0xc0] ss:$8 sm:$0xf0] %vm3_vm0, %v722_v2  }
   0x6   :  { %10 = vst.msk [vmem:[#allocation0 + $0x40] ss:$8 sm:$0xf] %vm3_vm0, %v720_v3   ;;  %12 = vst.msk [vmem:[#allocation0 + $0x40] ss:$8 sm:$0xf0] %vm3_vm0, %v720_v3   ;;  %83 = vrot.lane.b32.xlu1 %v722_v2, %s807_s12  ;;  %65 = vrot.lane.b32.xlu0 %v720_v3, %s807_s12 }
   0x7   :  { %38 = vst.msk [vmem:[#allocation0 + $0x140] ss:$8 sm:$0xf] %vm3_vm0, %v724_v4   ;;  %40 = vst.msk [vmem:[#allocation0 + $0x140] ss:$8 sm:$0xf0] %vm3_vm0, %v724_v4  }
   0x8   :  { %31 = vst.msk [vmem:[#allocation0 + $0x100] ss:$8 sm:$0xf] %vm3_vm0, %v723_v5   ;;  %33 = vst.msk [vmem:[#allocation0 + $0x100] ss:$8 sm:$0xf0] %vm3_vm0, %v723_v5  }
   0x9   :  { %52 = vst.msk [vmem:[#allocation0 + $0x1c0] ss:$8 sm:$0xf] %vm3_vm0, %v726_v6   ;;  %54 = vst.msk [vmem:[#allocation0 + $0x1c0] ss:$8 sm:$0xf0] %vm3_vm0, %v726_v6  }
   0xa   :  { %45 = vst.msk [vmem:[#allocation0 + $0x180] ss:$8 sm:$0xf] %vm3_vm0, %v725_v7   ;;  %47 = vst.msk [vmem:[#allocation0 + $0x180] ss:$8 sm:$0xf0] %vm3_vm0, %v725_v7   ;;  %101 = vrot.lane.b32.xlu1 %v724_v4, %s807_s12  ;;  %92 = vrot.lane.b32.xlu0 %v723_v5, %s807_s12 }
   0xb   :  { %s808_s0 = smov 120  }
   0xe   :  { %119 = vrot.lane.b32.xlu1 %v726_v6, %s807_s12  ;;  %110 = vrot.lane.b32.xlu0 %v725_v7, %s807_s12 }
  0x12   :  { %136 = vrot.lane.b32.xlu1 %v720_v3, %s808_s0  ;;  %127 = vrot.lane.b32.xlu0 %v55_v1, %s808_s0 }
  0x16   :  { %154 = vrot.lane.b32.xlu1 %v722_v2, %s808_s0  ;;  %145 = vrot.lane.b32.xlu0 %v721_v0, %s808_s0 }
  0x1a   :  { %172 = vrot.lane.b32.xlu1 %v724_v4, %s808_s0  ;;  %163 = vrot.lane.b32.xlu0 %v723_v5, %s808_s0 }
  0x1e   :  { %190 = vrot.lane.b32.xlu1 %v726_v6, %s808_s0  ;;  %181 = vrot.lane.b32.xlu0 %v725_v7, %s808_s0 }
  0x22   :  { %207 = vrot.lane.b32.xlu1 %v720_v3, %s809_s23  ;;  %198 = vrot.lane.b32.xlu0 %v55_v1, %s809_s23 }
  0x26   :  { %225 = vrot.lane.b32.xlu1 %v722_v2, %s809_s23  ;;  %216 = vrot.lane.b32.xlu0 %v721_v0, %s809_s23 }
  0x2a   :  { %243 = vrot.lane.b32.xlu1 %v724_v4, %s809_s23  ;;  %234 = vrot.lane.b32.xlu0 %v723_v5, %s809_s23 }
  0x2e   :  { %261 = vrot.lane.b32.xlu1 %v726_v6, %s809_s23  ;;  %252 = vrot.lane.b32.xlu0 %v725_v7, %s809_s23 }
  0x74   :  { %v75_v8 = vpop.permute.xlu1 %74   ;;  %v57_v9 = vpop.permute.xlu0 %56  }
  0x75   :  { %78 = vst.msk [vmem:[#allocation0 + $0x81] ss:$8 sm:$0xf] %vm3_vm0, %v75_v8   ;;  %80 = vst.msk [vmem:[#allocation0 + $0x81] ss:$8 sm:$0xf0] %vm3_vm0, %v75_v8  }
  0x76   :  { %60 = vst.msk [vmem:[#allocation0 + $0x1] ss:$8 sm:$0xf] %vm3_vm0, %v57_v9   ;;  %62 = vst.msk [vmem:[#allocation0 + $0x1] ss:$8 sm:$0xf0] %vm3_vm0, %v57_v9  }
  0x78   :  { %v84_v10 = vpop.permute.xlu1 %83   ;;  %v66_v11 = vpop.permute.xlu0 %65  }
  0x79   :  { %87 = vst.msk [vmem:[#allocation0 + $0xc1] ss:$8 sm:$0xf] %vm3_vm0, %v84_v10   ;;  %89 = vst.msk [vmem:[#allocation0 + $0xc1] ss:$8 sm:$0xf0] %vm3_vm0, %v84_v10  }
  0x7a   :  { %69 = vst.msk [vmem:[#allocation0 + $0x41] ss:$8 sm:$0xf] %vm3_vm0, %v66_v11   ;;  %71 = vst.msk [vmem:[#allocation0 + $0x41] ss:$8 sm:$0xf0] %vm3_vm0, %v66_v11  }
  0x7c   :  { %v102_v12 = vpop.permute.xlu1 %101   ;;  %v93_v13 = vpop.permute.xlu0 %92  }
  0x7d   :  { %105 = vst.msk [vmem:[#allocation0 + $0x141] ss:$8 sm:$0xf] %vm3_vm0, %v102_v12   ;;  %107 = vst.msk [vmem:[#allocation0 + $0x141] ss:$8 sm:$0xf0] %vm3_vm0, %v102_v12  }
  0x7e   :  { %96 = vst.msk [vmem:[#allocation0 + $0x101] ss:$8 sm:$0xf] %vm3_vm0, %v93_v13   ;;  %98 = vst.msk [vmem:[#allocation0 + $0x101] ss:$8 sm:$0xf0] %vm3_vm0, %v93_v13  }
  0x80   :  { %v120_v14 = vpop.permute.xlu1 %119   ;;  %v111_v15 = vpop.permute.xlu0 %110  }
  0x81   :  { %123 = vst.msk [vmem:[#allocation0 + $0x1c1] ss:$8 sm:$0xf] %vm3_vm0, %v120_v14   ;;  %125 = vst.msk [vmem:[#allocation0 + $0x1c1] ss:$8 sm:$0xf0] %vm3_vm0, %v120_v14  }
  0x82   :  { %114 = vst.msk [vmem:[#allocation0 + $0x181] ss:$8 sm:$0xf] %vm3_vm0, %v111_v15   ;;  %116 = vst.msk [vmem:[#allocation0 + $0x181] ss:$8 sm:$0xf0] %vm3_vm0, %v111_v15  }
  0x84   :  { %v137_v16 = vpop.permute.xlu1 %136   ;;  %v128_v17 = vpop.permute.xlu0 %127  }
  0x85   :  { %140 = vst.msk [vmem:[#allocation0 + $0x42] ss:$8 sm:$0xf] %vm3_vm0, %v137_v16   ;;  %142 = vst.msk [vmem:[#allocation0 + $0x42] ss:$8 sm:$0xf0] %vm3_vm0, %v137_v16  }
  0x86   :  { %131 = vst.msk [vmem:[#allocation0 + $0x2] ss:$8 sm:$0xf] %vm3_vm0, %v128_v17   ;;  %133 = vst.msk [vmem:[#allocation0 + $0x2] ss:$8 sm:$0xf0] %vm3_vm0, %v128_v17  }
  0x88   :  { %v155_v18 = vpop.permute.xlu1 %154   ;;  %v146_v19 = vpop.permute.xlu0 %145  }
  0x89   :  { %158 = vst.msk [vmem:[#allocation0 + $0xc2] ss:$8 sm:$0xf] %vm3_vm0, %v155_v18   ;;  %160 = vst.msk [vmem:[#allocation0 + $0xc2] ss:$8 sm:$0xf0] %vm3_vm0, %v155_v18  }
  0x8a   :  { %149 = vst.msk [vmem:[#allocation0 + $0x82] ss:$8 sm:$0xf] %vm3_vm0, %v146_v19   ;;  %151 = vst.msk [vmem:[#allocation0 + $0x82] ss:$8 sm:$0xf0] %vm3_vm0, %v146_v19  }
  0x8c   :  { %v173_v20 = vpop.permute.xlu1 %172   ;;  %v164_v21 = vpop.permute.xlu0 %163  }
  0x8d   :  { %176 = vst.msk [vmem:[#allocation0 + $0x142] ss:$8 sm:$0xf] %vm3_vm0, %v173_v20   ;;  %178 = vst.msk [vmem:[#allocation0 + $0x142] ss:$8 sm:$0xf0] %vm3_vm0, %v173_v20  }
  0x8e   :  { %167 = vst.msk [vmem:[#allocation0 + $0x102] ss:$8 sm:$0xf] %vm3_vm0, %v164_v21   ;;  %169 = vst.msk [vmem:[#allocation0 + $0x102] ss:$8 sm:$0xf0] %vm3_vm0, %v164_v21  }
  0x90   :  { %v191_v22 = vpop.permute.xlu1 %190   ;;  %v182_v23 = vpop.permute.xlu0 %181  }
  0x91   :  { %194 = vst.msk [vmem:[#allocation0 + $0x1c2] ss:$8 sm:$0xf] %vm3_vm0, %v191_v22   ;;  %196 = vst.msk [vmem:[#allocation0 + $0x1c2] ss:$8 sm:$0xf0] %vm3_vm0, %v191_v22  }
  0x92   :  { %185 = vst.msk [vmem:[#allocation0 + $0x182] ss:$8 sm:$0xf] %vm3_vm0, %v182_v23   ;;  %187 = vst.msk [vmem:[#allocation0 + $0x182] ss:$8 sm:$0xf0] %vm3_vm0, %v182_v23  }
  0x94   :  { %v208_v24 = vpop.permute.xlu1 %207   ;;  %v199_v25 = vpop.permute.xlu0 %198  }
  0x95   :  { %211 = vst.msk [vmem:[#allocation0 + $0x43] ss:$8 sm:$0xf] %vm3_vm0, %v208_v24   ;;  %213 = vst.msk [vmem:[#allocation0 + $0x43] ss:$8 sm:$0xf0] %vm3_vm0, %v208_v24  }
  0x96   :  { %202 = vst.msk [vmem:[#allocation0 + $0x3] ss:$8 sm:$0xf] %vm3_vm0, %v199_v25   ;;  %204 = vst.msk [vmem:[#allocation0 + $0x3] ss:$8 sm:$0xf0] %vm3_vm0, %v199_v25  }
  0x98   :  { %v226_v26 = vpop.permute.xlu1 %225   ;;  %v217_v27 = vpop.permute.xlu0 %216  }
  0x99   :  { %229 = vst.msk [vmem:[#allocation0 + $0xc3] ss:$8 sm:$0xf] %vm3_vm0, %v226_v26   ;;  %231 = vst.msk [vmem:[#allocation0 + $0xc3] ss:$8 sm:$0xf0] %vm3_vm0, %v226_v26  }
  0x9a   :  { %220 = vst.msk [vmem:[#allocation0 + $0x83] ss:$8 sm:$0xf] %vm3_vm0, %v217_v27   ;;  %222 = vst.msk [vmem:[#allocation0 + $0x83] ss:$8 sm:$0xf0] %vm3_vm0, %v217_v27  }
  0x9c   :  { %v316_v28 = vld [vmem:[#allocation0 + $0x40] sm:$0xf]  ;;  %v322_v29 = vld [vmem:[#allocation0 + $0x48] sm:$0xf]  ;;  %v328_v30 = vld [vmem:[#allocation0 + $0x50] sm:$0xf]  ;;  %v244_v31 = vpop.permute.xlu1 %243   ;;  %v235_v32 = vpop.permute.xlu0 %234  }
  0x9d   :  { %v334_v33 = vld [vmem:[#allocation0 + $0x58] sm:$0xf]  ;;  %v340_v34 = vld [vmem:[#allocation0 + $0x60] sm:$0xf]  ;;  %v346_v35 = vld [vmem:[#allocation0 + $0x68] sm:$0xf] }
  0x9e   :  { %748 = vst [vmem:[%s1101_s1 + $0x20] sm:$0xf] %v316_v28  ;;  %749 = vst [vmem:[%s1101_s1 + $0x24] sm:$0xf] %v322_v29  ;;  %v352_v36 = vld [vmem:[#allocation0 + $0x70] sm:$0xf] }
  0x9f   :  { %750 = vst [vmem:[%s1101_s1 + $0x28] sm:$0xf] %v328_v30  ;;  %247 = vst.msk [vmem:[#allocation0 + $0x143] ss:$8 sm:$0xf] %vm3_vm0, %v244_v31  }
  0xa0   :  { %249 = vst.msk [vmem:[#allocation0 + $0x143] ss:$8 sm:$0xf0] %vm3_vm0, %v244_v31   ;;  %238 = vst.msk [vmem:[#allocation0 + $0x103] ss:$8 sm:$0xf] %vm3_vm0, %v235_v32   ;;  %v262_v45 = vpop.permute.xlu1 %261   ;;  %v253_v46 = vpop.permute.xlu0 %252  }
  0xa1   :  { %240 = vst.msk [vmem:[#allocation0 + $0x103] ss:$8 sm:$0xf0] %vm3_vm0, %v235_v32   ;;  %v358_v37 = vld [vmem:[#allocation0 + $0x78] sm:$0xf] }
  0xa2   :  { %v271_v38 = vld [vmem:[#allocation0] sm:$0xf]  ;;  %751 = vst [vmem:[%s1101_s1 + $0x2c] sm:$0xf] %v334_v33  ;;  %752 = vst [vmem:[%s1101_s1 + $0x30] sm:$0xf] %v340_v34 }
  0xa3   :  { %753 = vst [vmem:[%s1101_s1 + $0x34] sm:$0xf] %v346_v35  ;;  %v275_v39 = vld [vmem:[#allocation0 + $0x8] sm:$0xf]  ;;  %v280_v40 = vld [vmem:[#allocation0 + $0x10] sm:$0xf] }
  0xa4   :  { %v286_v41 = vld [vmem:[#allocation0 + $0x18] sm:$0xf]  ;;  %754 = vst [vmem:[%s1101_s1 + $0x38] sm:$0xf] %v352_v36  ;;  %755 = vst [vmem:[%s1101_s1 + $0x3c] sm:$0xf] %v358_v37 }
  0xa5   :  { %273 = vst [vmem:[%s1101_s1] sm:$0xf] %v271_v38  ;;  %v292_v42 = vld [vmem:[#allocation0 + $0x20] sm:$0xf]  ;;  %v298_v43 = vld [vmem:[#allocation0 + $0x28] sm:$0xf] }
  0xa6   :  { %v304_v44 = vld [vmem:[#allocation0 + $0x30] sm:$0xf]  ;;  %741 = vst [vmem:[%s1101_s1 + $0x4] sm:$0xf] %v275_v39  ;;  %742 = vst [vmem:[%s1101_s1 + $0x8] sm:$0xf] %v280_v40 }
  0xa7   :  { %743 = vst [vmem:[%s1101_s1 + $0xc] sm:$0xf] %v286_v41  ;;  %v310_v47 = vld [vmem:[#allocation0 + $0x38] sm:$0xf]  ;;  %744 = vst [vmem:[%s1101_s1 + $0x10] sm:$0xf] %v292_v42 }
  0xa8   :  { %745 = vst [vmem:[%s1101_s1 + $0x14] sm:$0xf] %v298_v43  ;;  %746 = vst [vmem:[%s1101_s1 + $0x18] sm:$0xf] %v304_v44  ;;  %v412_v48 = vld [vmem:[#allocation0 + $0xc0] sm:$0xf] }
  0xa9   :  { %v418_v49 = vld [vmem:[#allocation0 + $0xc8] sm:$0xf]  ;;  %265 = vst.msk [vmem:[#allocation0 + $0x1c3] ss:$8 sm:$0xf] %vm3_vm0, %v262_v45  }
  0xaa   :  { %267 = vst.msk [vmem:[#allocation0 + $0x1c3] ss:$8 sm:$0xf0] %vm3_vm0, %v262_v45   ;;  %256 = vst.msk [vmem:[#allocation0 + $0x183] ss:$8 sm:$0xf] %vm3_vm0, %v253_v46  }
  0xab   :  { %258 = vst.msk [vmem:[#allocation0 + $0x183] ss:$8 sm:$0xf0] %vm3_vm0, %v253_v46   ;;  %747 = vst [vmem:[%s1101_s1 + $0x1c] sm:$0xf] %v310_v47 }
  0xac   :  { %v424_v50 = vld [vmem:[#allocation0 + $0xd0] sm:$0xf]  ;;  %v430_v51 = vld [vmem:[#allocation0 + $0xd8] sm:$0xf]  ;;  %v436_v52 = vld [vmem:[#allocation0 + $0xe0] sm:$0xf] }
  0xad   :  { %764 = vst [vmem:[%s1101_s1 + $0x60] sm:$0xf] %v412_v48  ;;  %765 = vst [vmem:[%s1101_s1 + $0x64] sm:$0xf] %v418_v49  ;;  %v442_v53 = vld [vmem:[#allocation0 + $0xe8] sm:$0xf] }
  0xae   :  { %v448_v54 = vld [vmem:[#allocation0 + $0xf0] sm:$0xf]  ;;  %v454_v55 = vld [vmem:[#allocation0 + $0xf8] sm:$0xf]  ;;  %766 = vst [vmem:[%s1101_s1 + $0x68] sm:$0xf] %v424_v50 }
  0xaf   :  { %767 = vst [vmem:[%s1101_s1 + $0x6c] sm:$0xf] %v430_v51  ;;  %768 = vst [vmem:[%s1101_s1 + $0x70] sm:$0xf] %v436_v52  ;;  %v364_v56 = vld [vmem:[#allocation0 + $0x80] sm:$0xf] }
  0xb0   :  { %v370_v57 = vld [vmem:[#allocation0 + $0x88] sm:$0xf]  ;;  %v376_v58 = vld [vmem:[#allocation0 + $0x90] sm:$0xf]  ;;  %769 = vst [vmem:[%s1101_s1 + $0x74] sm:$0xf] %v442_v53 }
  0xb1   :  { %770 = vst [vmem:[%s1101_s1 + $0x78] sm:$0xf] %v448_v54  ;;  %771 = vst [vmem:[%s1101_s1 + $0x7c] sm:$0xf] %v454_v55  ;;  %v382_v59 = vld [vmem:[#allocation0 + $0x98] sm:$0xf] }
  0xb2   :  { %v388_v60 = vld [vmem:[#allocation0 + $0xa0] sm:$0xf]  ;;  %v394_v61 = vld [vmem:[#allocation0 + $0xa8] sm:$0xf]  ;;  %756 = vst [vmem:[%s1101_s1 + $0x40] sm:$0xf] %v364_v56 }
  0xb3   :  { %757 = vst [vmem:[%s1101_s1 + $0x44] sm:$0xf] %v370_v57  ;;  %758 = vst [vmem:[%s1101_s1 + $0x48] sm:$0xf] %v376_v58  ;;  %v400_v62 = vld [vmem:[#allocation0 + $0xb0] sm:$0xf] }
  0xb4   :  { %v406_v63 = vld [vmem:[#allocation0 + $0xb8] sm:$0xf]  ;;  %v508_v0 = vld [vmem:[#allocation0 + $0x140] sm:$0xf]  ;;  %759 = vst [vmem:[%s1101_s1 + $0x4c] sm:$0xf] %v382_v59 }
  0xb5   :  { %760 = vst [vmem:[%s1101_s1 + $0x50] sm:$0xf] %v388_v60  ;;  %761 = vst [vmem:[%s1101_s1 + $0x54] sm:$0xf] %v394_v61  ;;  %v514_v1 = vld [vmem:[#allocation0 + $0x148] sm:$0xf] }
  0xb6   :  { %780 = vst [vmem:[%s1101_s1 + $0xa0] sm:$0xf] %v508_v0  ;;  %v520_v2 = vld [vmem:[#allocation0 + $0x150] sm:$0xf]  ;;  %v526_v3 = vld [vmem:[#allocation0 + $0x158] sm:$0xf] }
  0xb7   :  { %762 = vst [vmem:[%s1101_s1 + $0x58] sm:$0xf] %v400_v62  ;;  %763 = vst [vmem:[%s1101_s1 + $0x5c] sm:$0xf] %v406_v63  ;;  %v532_v4 = vld [vmem:[#allocation0 + $0x160] sm:$0xf] }
  0xb8   :  { %781 = vst [vmem:[%s1101_s1 + $0xa4] sm:$0xf] %v514_v1  ;;  %782 = vst [vmem:[%s1101_s1 + $0xa8] sm:$0xf] %v520_v2  ;;  %v538_v5 = vld [vmem:[#allocation0 + $0x168] sm:$0xf] }
  0xb9   :  { %783 = vst [vmem:[%s1101_s1 + $0xac] sm:$0xf] %v526_v3  ;;  %v544_v6 = vld [vmem:[#allocation0 + $0x170] sm:$0xf]  ;;  %784 = vst [vmem:[%s1101_s1 + $0xb0] sm:$0xf] %v532_v4 }
  0xba   :  { %785 = vst [vmem:[%s1101_s1 + $0xb4] sm:$0xf] %v538_v5  ;;  %786 = vst [vmem:[%s1101_s1 + $0xb8] sm:$0xf] %v544_v6  ;;  %v550_v7 = vld [vmem:[#allocation0 + $0x178] sm:$0xf] }
  0xbb   :  { %v460_v8 = vld [vmem:[#allocation0 + $0x100] sm:$0xf]  ;;  %v466_v9 = vld [vmem:[#allocation0 + $0x108] sm:$0xf]  ;;  %787 = vst [vmem:[%s1101_s1 + $0xbc] sm:$0xf] %v550_v7 }
  0xbc   :  { %772 = vst [vmem:[%s1101_s1 + $0x80] sm:$0xf] %v460_v8  ;;  %773 = vst [vmem:[%s1101_s1 + $0x84] sm:$0xf] %v466_v9  ;;  %v472_v10 = vld [vmem:[#allocation0 + $0x110] sm:$0xf] }
  0xbd   :  { %v478_v11 = vld [vmem:[#allocation0 + $0x118] sm:$0xf]  ;;  %v484_v12 = vld [vmem:[#allocation0 + $0x120] sm:$0xf]  ;;  %774 = vst [vmem:[%s1101_s1 + $0x88] sm:$0xf] %v472_v10 }
  0xbe   :  { %775 = vst [vmem:[%s1101_s1 + $0x8c] sm:$0xf] %v478_v11  ;;  %776 = vst [vmem:[%s1101_s1 + $0x90] sm:$0xf] %v484_v12  ;;  %v490_v13 = vld [vmem:[#allocation0 + $0x128] sm:$0xf] }
  0xbf   :  { %v496_v14 = vld [vmem:[#allocation0 + $0x130] sm:$0xf]  ;;  %v502_v15 = vld [vmem:[#allocation0 + $0x138] sm:$0xf]  ;;  %777 = vst [vmem:[%s1101_s1 + $0x94] sm:$0xf] %v490_v13 }
  0xc0   :  { %778 = vst [vmem:[%s1101_s1 + $0x98] sm:$0xf] %v496_v14  ;;  %779 = vst [vmem:[%s1101_s1 + $0x9c] sm:$0xf] %v502_v15  ;;  %v604_v16 = vld [vmem:[#allocation0 + $0x1c0] sm:$0xf] }
  0xc1   :  { %v610_v17 = vld [vmem:[#allocation0 + $0x1c8] sm:$0xf]  ;;  %v616_v18 = vld [vmem:[#allocation0 + $0x1d0] sm:$0xf]  ;;  %796 = vst [vmem:[%s1101_s1 + $0xe0] sm:$0xf] %v604_v16 }
  0xc2   :  { %797 = vst [vmem:[%s1101_s1 + $0xe4] sm:$0xf] %v610_v17  ;;  %798 = vst [vmem:[%s1101_s1 + $0xe8] sm:$0xf] %v616_v18  ;;  %v622_v19 = vld [vmem:[#allocation0 + $0x1d8] sm:$0xf] }
  0xc3   :  { %v628_v20 = vld [vmem:[#allocation0 + $0x1e0] sm:$0xf]  ;;  %v634_v21 = vld [vmem:[#allocation0 + $0x1e8] sm:$0xf]  ;;  %799 = vst [vmem:[%s1101_s1 + $0xec] sm:$0xf] %v622_v19 }
  0xc4   :  { %800 = vst [vmem:[%s1101_s1 + $0xf0] sm:$0xf] %v628_v20  ;;  %801 = vst [vmem:[%s1101_s1 + $0xf4] sm:$0xf] %v634_v21  ;;  %v640_v22 = vld [vmem:[#allocation0 + $0x1f0] sm:$0xf] }
  0xc5   :  { %v646_v23 = vld [vmem:[#allocation0 + $0x1f8] sm:$0xf]  ;;  %v556_v24 = vld [vmem:[#allocation0 + $0x180] sm:$0xf]  ;;  %802 = vst [vmem:[%s1101_s1 + $0xf8] sm:$0xf] %v640_v22 }
  0xc6   :  { %803 = vst [vmem:[%s1101_s1 + $0xfc] sm:$0xf] %v646_v23  ;;  %788 = vst [vmem:[%s1101_s1 + $0xc0] sm:$0xf] %v556_v24  ;;  %v562_v25 = vld [vmem:[#allocation0 + $0x188] sm:$0xf] }
  0xc7   :  { %v568_v26 = vld [vmem:[#allocation0 + $0x190] sm:$0xf]  ;;  %v574_v27 = vld [vmem:[#allocation0 + $0x198] sm:$0xf]  ;;  %789 = vst [vmem:[%s1101_s1 + $0xc4] sm:$0xf] %v562_v25 }
  0xc8   :  { %790 = vst [vmem:[%s1101_s1 + $0xc8] sm:$0xf] %v568_v26  ;;  %791 = vst [vmem:[%s1101_s1 + $0xcc] sm:$0xf] %v574_v27  ;;  %v580_v28 = vld [vmem:[#allocation0 + $0x1a0] sm:$0xf] }
  0xc9   :  { %v586_v29 = vld [vmem:[#allocation0 + $0x1a8] sm:$0xf]  ;;  %v592_v30 = vld [vmem:[#allocation0 + $0x1b0] sm:$0xf]  ;;  %792 = vst [vmem:[%s1101_s1 + $0xd0] sm:$0xf] %v580_v28 }
  0xca   :  { %793 = vst [vmem:[%s1101_s1 + $0xd4] sm:$0xf] %v586_v29  ;;  %794 = vst [vmem:[%s1101_s1 + $0xd8] sm:$0xf] %v592_v30  ;;  %v598_v31 = vld [vmem:[#allocation0 + $0x1b8] sm:$0xf] }
  0xcb   :  { %795 = vst [vmem:[%s1101_s1 + $0xdc] sm:$0xf] %v598_v31 }

// kernel: squeeze.5
= control target key start
LH: loop header
LB: loop body
LE: loop exit
PB: predicated region body
PF: predicated region fallthrough
CT: control target
= control target key end

     0   :  { %vm245_vm0 = vcmask 1043458   ;;  %s285_s6 = smov 3  ;;  %vm250_vm1 = vcmask 1045508   ;;  %vm255_vm2 = vcmask 1047558   ;;  %s288_s9 = smov 12  ;;  %vm4_vm3 = vcmask 1047556   ;;  %s6338_s0 = inlined_call_operand.vmem [shape: f32[1,8,8,16,16], index: 0, kind: input, shape index: {}]   ;;  %s6339_s1 = inlined_call_operand.vmem [shape: f32[64,256], index: 1, kind: output, shape index: {}]  }
   0x1   :  { %v2910_v0 = vld [vmem:[%s6338_s0 + $0x207] ss:$16 sm:%s285_s6]   ;;  %s293_s10 = smov 48  ;;  %s298_s15 = smov 192  ;;  %vm6_vm4 = vcmask 130048   ;;  %vm626_vm5 = vcmask 917248  }
   0x2   :  { %v2911_v1 = vld [vmem:[%s6338_s0 + $0x207] ss:$16 sm:%s288_s9]   ;;  %s240_s16 = smov 3  ;;  %s243_s21 = smov 12  ;;  %vm259_vm6 = vcmask 1048448   ;;  %vm993_vm7 = vcmask 786048  }
   0x3   :  { %v2912_v2 = vld [vmem:[%s6338_s0 + $0x207] ss:$16 sm:%s293_s10]   ;;  %v291_v3 = vsel %vm245_vm0, %v2911_v1, %v2910_v0  ;;  %s248_s22 = smov 48  ;;  %s253_s27 = smov 192  ;;  %vm1360_vm8 = vcmask 654848   ;;  %vm1727_vm9 = vcmask 523648  }
   0x4   :  { %v2913_v4 = vld [vmem:[%s6338_s0 + $0x207] ss:$16 sm:%s298_s15]   ;;  %v296_v6 = vsel %vm250_vm1, %v2912_v2, %v291_v3  ;;  %s308_s28 = smov 3  ;;  %s311_s4 = smov 12  ;;  %vm2094_vm10 = vcmask 392448   ;;  %vm2461_vm11 = vcmask 261248  }
   0x5   :  { %v2901_v5 = vld [vmem:[%s6338_s0 + $0x7] ss:$16 sm:%s240_s16]   ;;  %v301_v9 = vsel %vm255_vm2, %v2913_v4, %v296_v6  ;;  %s316_s5 = smov 48  ;;  %s3461_s6 = smov 112  }
   0x6   :  { %v2902_v7 = vld [vmem:[%s6338_s0 + $0x7] ss:$16 sm:%s243_s21]   ;;  %302 = vrot.lane.b32.xlu1 %v301_v9, %s3461_s6  ;;  %s321_s9 = smov 192  ;;  %s262_s10 = smov 3 }
   0x7   :  { %v2903_v8 = vld [vmem:[%s6338_s0 + $0x7] ss:$16 sm:%s248_s22]   ;;  %v246_v10 = vsel %vm245_vm0, %v2902_v7, %v2901_v5  ;;  %s265_s15 = smov 12  ;;  %s270_s16 = smov 48 }
   0x8   :  { %v2904_v11 = vld [vmem:[%s6338_s0 + $0x7] ss:$16 sm:%s253_s27]   ;;  %v251_v13 = vsel %vm250_vm1, %v2903_v8, %v246_v10  ;;  %s275_s19 = smov 192  ;;  %s354_s20 = smov 3 }
   0x9   :  { %v2915_v12 = vld [vmem:[%s6338_s0 + $0x307] ss:$16 sm:%s308_s28]   ;;  %v256_v15 = vsel %vm255_vm2, %v2904_v11, %v251_v13  ;;  %s357_s25 = smov 12  ;;  %s362_s26 = smov 48  ;;  %v2925_v27 = vld [vmem:[%s6338_s0 + $0x10f] ss:$16 sm:%s354_s20]  }
   0xa   :  { %v2916_v14 = vld [vmem:[%s6338_s0 + $0x307] ss:$16 sm:%s311_s4]   ;;  %257 = vrot.lane.b32.xlu0 %v256_v15, %s3461_s6  ;;  %s367_s29 = smov 192  ;;  %s331_s30 = smov 3 }
   0xb   :  { %v314_v16 = vsel %vm245_vm0, %v2916_v14, %v2915_v12  ;;  %v2917_v17 = vld [vmem:[%s6338_s0 + $0x307] ss:$16 sm:%s316_s5]   ;;  %v2926_v28 = vld [vmem:[%s6338_s0 + $0x10f] ss:$16 sm:%s357_s25]   ;;  %s334_s7 = smov 12  ;;  %s339_s8 = smov 48 }
   0xc   :  { %v2918_v18 = vld [vmem:[%s6338_s0 + $0x307] ss:$16 sm:%s321_s9]   ;;  %v319_v19 = vsel %vm250_vm1, %v2917_v17, %v314_v16  ;;  %v360_v30 = vsel %vm245_vm0, %v2926_v28, %v2925_v27  ;;  %v2927_v31 = vld [vmem:[%s6338_s0 + $0x10f] ss:$16 sm:%s362_s26]   ;;  %s344_s13 = smov 192  ;;  %s403_s17 = smov 12 }
   0xd   :  { %v2905_v20 = vld [vmem:[%s6338_s0 + $0x107] ss:$16 sm:%s262_s10]   ;;  %v324_v21 = vsel %vm255_vm2, %v2918_v18, %v319_v19  ;;  %v2928_v32 = vld [vmem:[%s6338_s0 + $0x10f] ss:$16 sm:%s367_s29]   ;;  %v365_v33 = vsel %vm250_vm1, %v2927_v31, %v360_v30  ;;  %s408_s22 = smov 48  ;;  %s413_s23 = smov 192 }
   0xe   :  { %v2906_v22 = vld [vmem:[%s6338_s0 + $0x107] ss:$16 sm:%s265_s15]   ;;  %325 = vrot.lane.b32.xlu1 %v324_v21, %s3461_s6  ;;  %v370_v35 = vsel %vm255_vm2, %v2928_v32, %v365_v33  ;;  %s377_s26 = smov 3  ;;  %s380_s2 = smov 12 }
   0xf   :  { %v2907_v23 = vld [vmem:[%s6338_s0 + $0x107] ss:$16 sm:%s270_s16]   ;;  %v268_v24 = vsel %vm245_vm0, %v2906_v22, %v2905_v20  ;;  %v2920_v34 = vld [vmem:[%s6338_s0 + $0xf] ss:$16 sm:%s331_s30]   ;;  %s400_s16 = smov 3  ;;  %s385_s3 = smov 48 }
  0x10   :  { %v2908_v25 = vld [vmem:[%s6338_s0 + $0x107] ss:$16 sm:%s275_s19]   ;;  %v273_v26 = vsel %vm250_vm1, %v2907_v23, %v268_v24  ;;  %v2921_v36 = vld [vmem:[%s6338_s0 + $0xf] ss:$16 sm:%s334_s7]   ;;  %s390_s9 = smov 192  ;;  %s446_s12 = smov 3 }
  0x11   :  { %v278_v29 = vsel %vm255_vm2, %v2908_v25, %v273_v26  ;;  %v2922_v37 = vld [vmem:[%s6338_s0 + $0xf] ss:$16 sm:%s339_s8]   ;;  %v337_v38 = vsel %vm245_vm0, %v2921_v36, %v2920_v34  ;;  %s454_s18 = smov 48  ;;  %s459_s19 = smov 192  ;;  %v2945_v55 = vld [vmem:[%s6338_s0 + $0x187] ss:$16 sm:%s446_s12]  }
  0x12   :  { %279 = vrot.lane.b32.xlu0 %v278_v29, %s3461_s6  ;;  %371 = vrot.lane.b32.xlu1 %v370_v35, %s3461_s6  ;;  %v2923_v39 = vld [vmem:[%s6338_s0 + $0xf] ss:$16 sm:%s344_s13]   ;;  %v342_v40 = vsel %vm250_vm1, %v2922_v37, %v337_v38  ;;  %s449_s13 = smov 12  ;;  %s426_s27 = smov 12 }
  0x13   :  { %v2935_v41 = vld [vmem:[%s6338_s0 + $0x30f] ss:$16 sm:%s400_s16]   ;;  %v347_v43 = vsel %vm255_vm2, %v2923_v39, %v342_v40  ;;  %v2946_v56 = vld [vmem:[%s6338_s0 + $0x187] ss:$16 sm:%s449_s13]   ;;  %s431_s28 = smov 48  ;;  %s436_s4 = smov 192 }
  0x14   :  { %v2936_v42 = vld [vmem:[%s6338_s0 + $0x30f] ss:$16 sm:%s403_s17]   ;;  %v452_v58 = vsel %vm245_vm0, %v2946_v56, %v2945_v55  ;;  %v2947_v59 = vld [vmem:[%s6338_s0 + $0x187] ss:$16 sm:%s454_s18]   ;;  %s492_s8 = smov 3  ;;  %s500_s14 = smov 48 }
  0x15   :  { %v406_v44 = vsel %vm245_vm0, %v2936_v42, %v2935_v41  ;;  %v2937_v45 = vld [vmem:[%s6338_s0 + $0x30f] ss:$16 sm:%s408_s22]   ;;  %s423_s22 = smov 3  ;;  %v2948_v60 = vld [vmem:[%s6338_s0 + $0x187] ss:$16 sm:%s459_s19]   ;;  %v457_v61 = vsel %vm250_vm1, %v2947_v59, %v452_v58  ;;  %s505_s15 = smov 192 }
  0x16   :  { %v2938_v46 = vld [vmem:[%s6338_s0 + $0x30f] ss:$16 sm:%s413_s23]   ;;  %348 = vrot.lane.b32.xlu0 %v347_v43, %s3461_s6  ;;  %v411_v47 = vsel %vm250_vm1, %v2937_v45, %v406_v44  ;;  %v462_v63 = vsel %vm255_vm2, %v2948_v60, %v457_v61  ;;  %s469_s18 = smov 3  ;;  %s472_s23 = smov 12 }
  0x17   :  { %v2930_v48 = vld [vmem:[%s6338_s0 + $0x20f] ss:$16 sm:%s377_s26]   ;;  %v416_v49 = vsel %vm255_vm2, %v2938_v46, %v411_v47  ;;  %v2940_v62 = vld [vmem:[%s6338_s0 + $0x87] ss:$16 sm:%s423_s22]   ;;  %s477_s24 = smov 48  ;;  %s482_s29 = smov 192 }
  0x18   :  { %v2931_v50 = vld [vmem:[%s6338_s0 + $0x20f] ss:$16 sm:%s380_s2]   ;;  %417 = vrot.lane.b32.xlu1 %v416_v49, %s3461_s6  ;;  %s546_s10 = smov 48  ;;  %s551_s11 = smov 192 }
  0x19   :  { %v2932_v51 = vld [vmem:[%s6338_s0 + $0x20f] ss:$16 sm:%s385_s3]   ;;  %v383_v52 = vsel %vm245_vm0, %v2931_v50, %v2930_v48  ;;  %v2941_v0 = vld [vmem:[%s6338_s0 + $0x87] ss:$16 sm:%s426_s27]   ;;  %s538_s3 = smov 3  ;;  %s518_s19 = smov 12 }
  0x1a   :  { %v2933_v53 = vld [vmem:[%s6338_s0 + $0x20f] ss:$16 sm:%s390_s9]   ;;  %v388_v54 = vsel %vm250_vm1, %v2932_v51, %v383_v52  ;;  %s495_s9 = smov 12  ;;  %v2942_v1 = vld [vmem:[%s6338_s0 + $0x87] ss:$16 sm:%s431_s28]   ;;  %v429_v2 = vsel %vm245_vm0, %v2941_v0, %v2940_v62  ;;  %s523_s20 = smov 48 }
  0x1b   :  { %v393_v57 = vsel %vm255_vm2, %v2933_v53, %v388_v54  ;;  %v2943_v3 = vld [vmem:[%s6338_s0 + $0x87] ss:$16 sm:%s436_s4]   ;;  %v434_v4 = vsel %vm250_vm1, %v2942_v1, %v429_v2  ;;  %s541_s4 = smov 12  ;;  %v2965_v19 = vld [vmem:[%s6338_s0 + $0x18f] ss:$16 sm:%s538_s3]   ;;  %s528_s25 = smov 192 }
  0x1c   :  { %394 = vrot.lane.b32.xlu0 %v393_v57, %s3461_s6  ;;  %463 = vrot.lane.b32.xlu1 %v462_v63, %s3461_s6  ;;  %v2955_v5 = vld [vmem:[%s6338_s0 + $0x387] ss:$16 sm:%s492_s8]   ;;  %v439_v7 = vsel %vm255_vm2, %v2943_v3, %v434_v4  ;;  %s584_s28 = smov 3  ;;  %s592_s5 = smov 48 }
  0x1d   :  { %v2956_v6 = vld [vmem:[%s6338_s0 + $0x387] ss:$16 sm:%s495_s9]   ;;  %v2966_v20 = vld [vmem:[%s6338_s0 + $0x18f] ss:$16 sm:%s541_s4]   ;;  %s597_s7 = smov 192  ;;  %s569_s16 = smov 48 }
  0x1e   :  { %v498_v8 = vsel %vm245_vm0, %v2956_v6, %v2955_v5  ;;  %v2957_v9 = vld [vmem:[%s6338_s0 + $0x387] ss:$16 sm:%s500_s14]   ;;  %s515_s14 = smov 3  ;;  %v544_v22 = vsel %vm245_vm0, %v2966_v20, %v2965_v19  ;;  %v2967_v23 = vld [vmem:[%s6338_s0 + $0x18f] ss:$16 sm:%s546_s10]   ;;  %s561_s10 = smov 3 }
  0x1f   :  { %v2958_v10 = vld [vmem:[%s6338_s0 + $0x387] ss:$16 sm:%s505_s15]   ;;  %v503_v11 = vsel %vm250_vm1, %v2957_v9, %v498_v8  ;;  %v2968_v24 = vld [vmem:[%s6338_s0 + $0x18f] ss:$16 sm:%s551_s11]   ;;  %v549_v25 = vsel %vm250_vm1, %v2967_v23, %v544_v22  ;;  %s564_s15 = smov 12  ;;  %s574_s21 = smov 192 }
  0x20   :  { %440 = vrot.lane.b32.xlu0 %v439_v7, %s3461_s6  ;;  %v2950_v12 = vld [vmem:[%s6338_s0 + $0x287] ss:$16 sm:%s469_s18]   ;;  %v508_v13 = vsel %vm255_vm2, %v2958_v10, %v503_v11  ;;  %v554_v27 = vsel %vm255_vm2, %v2968_v24, %v549_v25  ;;  %s637_s30 = smov 48  ;;  %s642_s2 = smov 192 }
  0x21   :  { %v2951_v14 = vld [vmem:[%s6338_s0 + $0x287] ss:$16 sm:%s472_s23]   ;;  %509 = vrot.lane.b32.xlu1 %v508_v13, %s3461_s6  ;;  %s610_s11 = smov 12  ;;  %s615_s12 = smov 48 }
  0x22   :  { %v2952_v15 = vld [vmem:[%s6338_s0 + $0x287] ss:$16 sm:%s477_s24]   ;;  %v475_v16 = vsel %vm245_vm0, %v2951_v14, %v2950_v12  ;;  %v2960_v26 = vld [vmem:[%s6338_s0 + $0x8f] ss:$16 sm:%s515_s14]   ;;  %s629_s24 = smov 3  ;;  %s620_s17 = smov 192 }
  0x23   :  { %v2953_v17 = vld [vmem:[%s6338_s0 + $0x287] ss:$16 sm:%s482_s29]   ;;  %v480_v18 = vsel %vm250_vm1, %v2952_v15, %v475_v16  ;;  %s587_s29 = smov 12  ;;  %v2961_v28 = vld [vmem:[%s6338_s0 + $0x8f] ss:$16 sm:%s518_s19]   ;;  %s675_s19 = smov 3 }
  0x24   :  { %v485_v21 = vsel %vm255_vm2, %v2953_v17, %v480_v18  ;;  %v2962_v29 = vld [vmem:[%s6338_s0 + $0x8f] ss:$16 sm:%s523_s20]   ;;  %v521_v30 = vsel %vm245_vm0, %v2961_v28, %v2960_v26  ;;  %v2984_v47 = vld [vmem:[%s6338_s0 + $0x106] ss:$16 sm:%s629_s24]   ;;  %s678_s20 = smov 12  ;;  %s688_s26 = smov 192 }
  0x25   :  { %486 = vrot.lane.b32.xlu0 %v485_v21, %s3461_s6  ;;  %555 = vrot.lane.b32.xlu1 %v554_v27, %s3461_s6  ;;  %v2963_v31 = vld [vmem:[%s6338_s0 + $0x8f] ss:$16 sm:%s528_s25]   ;;  %v526_v32 = vsel %vm250_vm1, %v2962_v29, %v521_v30  ;;  %s632_s25 = smov 12  ;;  %s3462_s27 = smov 96  }
  0x26   :  { %v2975_v33 = vld [vmem:[%s6338_s0 + $0x38f] ss:$16 sm:%s584_s28]   ;;  %v531_v35 = vsel %vm255_vm2, %v2963_v31, %v526_v32  ;;  %v2985_v48 = vld [vmem:[%s6338_s0 + $0x106] ss:$16 sm:%s632_s25]   ;;  %s683_s25 = smov 48  ;;  %s660_s8 = smov 48 }
  0x27   :  { %v2976_v34 = vld [vmem:[%s6338_s0 + $0x38f] ss:$16 sm:%s587_s29]   ;;  %v635_v50 = vsel %vm245_vm0, %v2985_v48, %v2984_v47  ;;  %v2986_v51 = vld [vmem:[%s6338_s0 + $0x106] ss:$16 sm:%s637_s30]   ;;  %s652_s30 = smov 3  ;;  %s665_s13 = smov 192 }
  0x28   :  { %v590_v36 = vsel %vm245_vm0, %v2976_v34, %v2975_v33  ;;  %v2977_v37 = vld [vmem:[%s6338_s0 + $0x38f] ss:$16 sm:%s592_s5]   ;;  %s607_s5 = smov 3  ;;  %v2987_v52 = vld [vmem:[%s6338_s0 + $0x106] ss:$16 sm:%s642_s2]   ;;  %v640_v53 = vsel %vm250_vm1, %v2986_v51, %v635_v50  ;;  %s734_s22 = smov 192 }
  0x29   :  { %v2978_v38 = vld [vmem:[%s6338_s0 + $0x38f] ss:$16 sm:%s597_s7]   ;;  %532 = vrot.lane.b32.xlu0 %v531_v35, %s3461_s6  ;;  %v595_v39 = vsel %vm250_vm1, %v2977_v37, %v590_v36  ;;  %v645_v55 = vsel %vm255_vm2, %v2987_v52, %v640_v53  ;;  %s655_s7 = smov 12  ;;  %s701_s2 = smov 12 }
  0x2a   :  { %v2970_v40 = vld [vmem:[%s6338_s0 + $0x28f] ss:$16 sm:%s561_s10]   ;;  %v600_v41 = vsel %vm255_vm2, %v2978_v38, %v595_v39  ;;  %v2980_v54 = vld [vmem:[%s6338_s0 + $0x6] ss:$16 sm:%s607_s5]   ;;  %s706_s3 = smov 48  ;;  %s711_s9 = smov 192 }
  0x2b   :  { %v2971_v42 = vld [vmem:[%s6338_s0 + $0x28f] ss:$16 sm:%s564_s15]   ;;  %601 = vrot.lane.b32.xlu1 %v600_v41, %s3461_s6  ;;  %s780_s18 = smov 192  ;;  %s752_s28 = smov 48 }
  0x2c   :  { %v2972_v43 = vld [vmem:[%s6338_s0 + $0x28f] ss:$16 sm:%s569_s16]   ;;  %v567_v44 = vsel %vm245_vm0, %v2971_v42, %v2970_v40  ;;  %v2981_v56 = vld [vmem:[%s6338_s0 + $0x6] ss:$16 sm:%s610_s11]   ;;  %s721_s16 = smov 3  ;;  %s757_s4 = smov 192 }
  0x2d   :  { %v2973_v45 = vld [vmem:[%s6338_s0 + $0x28f] ss:$16 sm:%s574_s21]   ;;  %v572_v46 = vsel %vm250_vm1, %v2972_v43, %v567_v44  ;;  %v2982_v57 = vld [vmem:[%s6338_s0 + $0x6] ss:$16 sm:%s615_s12]   ;;  %v613_v58 = vsel %vm245_vm0, %v2981_v56, %v2980_v54  ;;  %s729_s21 = smov 48  ;;  %s767_s12 = smov 3 }
  0x2e   :  { %v577_v49 = vsel %vm255_vm2, %v2973_v45, %v572_v46  ;;  %v2983_v59 = vld [vmem:[%s6338_s0 + $0x6] ss:$16 sm:%s620_s17]   ;;  %v618_v60 = vsel %vm250_vm1, %v2982_v57, %v613_v58  ;;  %s724_s17 = smov 12  ;;  %v3004_v11 = vld [vmem:[%s6338_s0 + $0x10e] ss:$16 sm:%s721_s16]   ;;  %s821_s14 = smov 48 }
  0x2f   :  { %578 = vrot.lane.b32.xlu0 %v577_v49, %s3461_s6  ;;  %646 = vrot.lane.b32.xlu1 %v645_v55, %s3462_s27  ;;  %v2994_v61 = vld [vmem:[%s6338_s0 + $0x306] ss:$16 sm:%s675_s19]   ;;  %v623_v63 = vsel %vm255_vm2, %v2983_v59, %v618_v60  ;;  %s775_s6 = smov 48  ;;  %s826_s15 = smov 192 }
  0x30   :  { %v2995_v62 = vld [vmem:[%s6338_s0 + $0x306] ss:$16 sm:%s678_s20]   ;;  %v3005_v12 = vld [vmem:[%s6338_s0 + $0x10e] ss:$16 sm:%s724_s17]   ;;  %s798_s23 = smov 48  ;;  %s803_s29 = smov 192 }
  0x31   :  { %v681_v0 = vsel %vm245_vm0, %v2995_v62, %v2994_v61  ;;  %v2996_v1 = vld [vmem:[%s6338_s0 + $0x306] ss:$16 sm:%s683_s25]   ;;  %s698_s25 = smov 3  ;;  %v727_v14 = vsel %vm245_vm0, %v3005_v12, %v3004_v11  ;;  %v3006_v15 = vld [vmem:[%s6338_s0 + $0x10e] ss:$16 sm:%s729_s21]   ;;  %s744_s21 = smov 3 }
  0x32   :  { %v2997_v2 = vld [vmem:[%s6338_s0 + $0x306] ss:$16 sm:%s688_s26]   ;;  %v686_v3 = vsel %vm250_vm1, %v2996_v1, %v681_v0  ;;  %v3007_v16 = vld [vmem:[%s6338_s0 + $0x10e] ss:$16 sm:%s734_s22]   ;;  %v732_v17 = vsel %vm250_vm1, %v3006_v15, %v727_v14  ;;  %s747_s26 = smov 12  ;;  %s793_s22 = smov 12 }
  0x33   :  { %624 = vrot.lane.b32.xlu0 %v623_v63, %s3462_s27  ;;  %v2989_v4 = vld [vmem:[%s6338_s0 + $0x206] ss:$16 sm:%s652_s30]   ;;  %v691_v5 = vsel %vm255_vm2, %v2997_v2, %v686_v3  ;;  %v737_v19 = vsel %vm255_vm2, %v3007_v16, %v732_v17  ;;  %s867_s10 = smov 48  ;;  %s872_s11 = smov 192 }
  0x34   :  { %v2990_v6 = vld [vmem:[%s6338_s0 + $0x206] ss:$16 sm:%s655_s7]   ;;  %692 = vrot.lane.b32.xlu1 %v691_v5, %s3462_s27  ;;  %s844_s19 = smov 48  ;;  %s849_s24 = smov 192 }
  0x35   :  { %v2991_v7 = vld [vmem:[%s6338_s0 + $0x206] ss:$16 sm:%s660_s8]   ;;  %v658_v8 = vsel %vm245_vm0, %v2990_v6, %v2989_v4  ;;  %v2999_v18 = vld [vmem:[%s6338_s0 + $0xe] ss:$16 sm:%s698_s25]   ;;  %s813_s8 = smov 3  ;;  %s913_s5 = smov 48 }
  0x36   :  { %v2992_v9 = vld [vmem:[%s6338_s0 + $0x206] ss:$16 sm:%s665_s13]   ;;  %v663_v10 = vsel %vm250_vm1, %v2991_v7, %v658_v8  ;;  %s770_s13 = smov 12  ;;  %v3000_v20 = vld [vmem:[%s6338_s0 + $0xe] ss:$16 sm:%s701_s2]   ;;  %s918_s7 = smov 192 }
  0x37   :  { %v668_v13 = vsel %vm255_vm2, %v2992_v9, %v663_v10  ;;  %v3001_v21 = vld [vmem:[%s6338_s0 + $0xe] ss:$16 sm:%s706_s3]   ;;  %v704_v22 = vsel %vm245_vm0, %v3000_v20, %v2999_v18  ;;  %v3024_v39 = vld [vmem:[%s6338_s0 + $0x186] ss:$16 sm:%s813_s8]   ;;  %s859_s3 = smov 3  ;;  %s890_s16 = smov 48 }
  0x38   :  { %669 = vrot.lane.b32.xlu0 %v668_v13, %s3462_s27  ;;  %738 = vrot.lane.b32.xlu1 %v737_v19, %s3462_s27  ;;  %v3002_v23 = vld [vmem:[%s6338_s0 + $0xe] ss:$16 sm:%s711_s9]   ;;  %v709_v24 = vsel %vm250_vm1, %v3001_v21, %v704_v22  ;;  %s816_s9 = smov 12  ;;  %s895_s20 = smov 192 }
  0x39   :  { %v3014_v25 = vld [vmem:[%s6338_s0 + $0x30e] ss:$16 sm:%s767_s12]   ;;  %v714_v27 = vsel %vm255_vm2, %v3002_v23, %v709_v24  ;;  %v3025_v40 = vld [vmem:[%s6338_s0 + $0x186] ss:$16 sm:%s816_s9]   ;;  %s959_s30 = smov 48  ;;  %s964_s2 = smov 192 }
  0x3a   :  { %v3015_v26 = vld [vmem:[%s6338_s0 + $0x30e] ss:$16 sm:%s770_s13]   ;;  %v819_v42 = vsel %vm245_vm0, %v3025_v40, %v3024_v39  ;;  %v3026_v43 = vld [vmem:[%s6338_s0 + $0x186] ss:$16 sm:%s821_s14]   ;;  %s836_s14 = smov 3  ;;  %s936_s12 = smov 48 }
  0x3b   :  { %v773_v28 = vsel %vm245_vm0, %v3015_v26, %v3014_v25  ;;  %v3016_v29 = vld [vmem:[%s6338_s0 + $0x30e] ss:$16 sm:%s775_s6]   ;;  %s790_s6 = smov 3  ;;  %v3027_v44 = vld [vmem:[%s6338_s0 + $0x186] ss:$16 sm:%s826_s15]   ;;  %v824_v45 = vsel %vm250_vm1, %v3026_v43, %v819_v42  ;;  %s885_s15 = smov 12 }
  0x3c   :  { %v3017_v30 = vld [vmem:[%s6338_s0 + $0x30e] ss:$16 sm:%s780_s18]   ;;  %715 = vrot.lane.b32.xlu0 %v714_v27, %s3462_s27  ;;  %v778_v31 = vsel %vm250_vm1, %v3016_v29, %v773_v28  ;;  %v829_v47 = vsel %vm255_vm2, %v3027_v44, %v824_v45  ;;  %s839_s18 = smov 12  ;;  %s941_s17 = smov 192 }
  0x3d   :  { %v3009_v32 = vld [vmem:[%s6338_s0 + $0x20e] ss:$16 sm:%s744_s21]   ;;  %v783_v33 = vsel %vm255_vm2, %v3017_v30, %v778_v31  ;;  %v3019_v46 = vld [vmem:[%s6338_s0 + $0x86] ss:$16 sm:%s790_s6]   ;;  %s1004_s25 = smov 48  ;;  %s982_s8 = smov 48 }
  0x3e   :  { %v3010_v34 = vld [vmem:[%s6338_s0 + $0x20e] ss:$16 sm:%s747_s26]   ;;  %784 = vrot.lane.b32.xlu1 %v783_v33, %s3462_s27  ;;  %s1009_s26 = smov 192  ;;  %s987_s13 = smov 192 }
  0x3f   :  { %v3011_v35 = vld [vmem:[%s6338_s0 + $0x20e] ss:$16 sm:%s752_s28]   ;;  %v750_v36 = vsel %vm245_vm0, %v3010_v34, %v3009_v32  ;;  %v3020_v48 = vld [vmem:[%s6338_s0 + $0x86] ss:$16 sm:%s793_s22]   ;;  %s905_s28 = smov 3  ;;  %s1055_s21 = smov 192 }
  0x40   :  { %v3012_v37 = vld [vmem:[%s6338_s0 + $0x20e] ss:$16 sm:%s757_s4]   ;;  %v755_v38 = vsel %vm250_vm1, %v3011_v35, %v750_v36  ;;  %s862_s4 = smov 12  ;;  %v3021_v49 = vld [vmem:[%s6338_s0 + $0x86] ss:$16 sm:%s798_s23]   ;;  %v796_v50 = vsel %vm245_vm0, %v3020_v48, %v3019_v46  ;;  %s951_s23 = smov 3 }
  0x41   :  { %v760_v41 = vsel %vm255_vm2, %v3012_v37, %v755_v38  ;;  %v3022_v51 = vld [vmem:[%s6338_s0 + $0x86] ss:$16 sm:%s803_s29]   ;;  %v801_v52 = vsel %vm250_vm1, %v3021_v49, %v796_v50  ;;  %s908_s29 = smov 12  ;;  %v3044_v3 = vld [vmem:[%s6338_s0 + $0x18e] ss:$16 sm:%s905_s28]   ;;  %s3463_s22 = smov 80  }
  0x42   :  { %761 = vrot.lane.b32.xlu0 %v760_v41, %s3462_s27  ;;  %830 = vrot.lane.b32.xlu1 %v829_v47, %s3462_s27  ;;  %v3034_v53 = vld [vmem:[%s6338_s0 + $0x386] ss:$16 sm:%s859_s3]   ;;  %v806_v55 = vsel %vm255_vm2, %v3022_v51, %v801_v52  ;;  %s1027_s3 = smov 48  ;;  %s1032_s9 = smov 192 }
  0x43   :  { %v3035_v54 = vld [vmem:[%s6338_s0 + $0x386] ss:$16 sm:%s862_s4]   ;;  %v3045_v4 = vld [vmem:[%s6338_s0 + $0x18e] ss:$16 sm:%s908_s29]   ;;  %s1101_s6 = smov 192  ;;  %s1073_s28 = smov 48 }
  0x44   :  { %v865_v56 = vsel %vm245_vm0, %v3035_v54, %v3034_v53  ;;  %v3036_v57 = vld [vmem:[%s6338_s0 + $0x386] ss:$16 sm:%s867_s10]   ;;  %s882_s10 = smov 3  ;;  %v911_v6 = vsel %vm245_vm0, %v3045_v4, %v3044_v3  ;;  %v3046_v7 = vld [vmem:[%s6338_s0 + $0x18e] ss:$16 sm:%s913_s5]   ;;  %s928_s5 = smov 3 }
  0x45   :  { %v3037_v58 = vld [vmem:[%s6338_s0 + $0x386] ss:$16 sm:%s872_s11]   ;;  %v870_v59 = vsel %vm250_vm1, %v3036_v57, %v865_v56  ;;  %v3047_v8 = vld [vmem:[%s6338_s0 + $0x18e] ss:$16 sm:%s918_s7]   ;;  %v916_v9 = vsel %vm250_vm1, %v3046_v7, %v911_v6  ;;  %s931_s11 = smov 12  ;;  %s977_s7 = smov 12 }
  0x46   :  { %807 = vrot.lane.b32.xlu0 %v806_v55, %s3462_s27  ;;  %v3029_v60 = vld [vmem:[%s6338_s0 + $0x286] ss:$16 sm:%s836_s14]   ;;  %v875_v61 = vsel %vm255_vm2, %v3037_v58, %v870_v59  ;;  %v921_v11 = vsel %vm255_vm2, %v3047_v8, %v916_v9  ;;  %s1078_s4 = smov 192  ;;  %s1147_s14 = smov 192 }
  0x47   :  { %v3030_v62 = vld [vmem:[%s6338_s0 + $0x286] ss:$16 sm:%s839_s18]   ;;  %876 = vrot.lane.b32.xlu1 %v875_v61, %s3462_s27  ;;  %s1124_s29 = smov 192  ;;  %s1165_s18 = smov 48 }
  0x48   :  { %v3031_v63 = vld [vmem:[%s6338_s0 + $0x286] ss:$16 sm:%s844_s19]   ;;  %v842_v0 = vsel %vm245_vm0, %v3030_v62, %v3029_v60  ;;  %v3039_v10 = vld [vmem:[%s6338_s0 + $0x8e] ss:$16 sm:%s882_s10]   ;;  %s996_s19 = smov 3  ;;  %s1188_s10 = smov 48 }
  0x49   :  { %v3032_v1 = vld [vmem:[%s6338_s0 + $0x286] ss:$16 sm:%s849_s24]   ;;  %v847_v2 = vsel %vm250_vm1, %v3031_v63, %v842_v0  ;;  %s954_s24 = smov 12  ;;  %v3040_v12 = vld [vmem:[%s6338_s0 + $0x8e] ss:$16 sm:%s885_s15]   ;;  %s1042_s15 = smov 3 }
  0x4a   :  { %v852_v5 = vsel %vm255_vm2, %v3032_v1, %v847_v2  ;;  %v3041_v13 = vld [vmem:[%s6338_s0 + $0x8e] ss:$16 sm:%s890_s16]   ;;  %v888_v14 = vsel %vm245_vm0, %v3040_v12, %v3039_v10  ;;  %v3063_v31 = vld [vmem:[%s6338_s0 + $0x105] ss:$16 sm:%s996_s19]   ;;  %s1045_s16 = smov 12  ;;  %s1216_s19 = smov 192 }
  0x4b   :  { %853 = vrot.lane.b32.xlu0 %v852_v5, %s3462_s27  ;;  %922 = vrot.lane.b32.xlu1 %v921_v11, %s3462_s27  ;;  %v3042_v15 = vld [vmem:[%s6338_s0 + $0x8e] ss:$16 sm:%s895_s20]   ;;  %v893_v16 = vsel %vm250_vm1, %v3041_v13, %v888_v14  ;;  %s999_s20 = smov 12 }
  0x4c   :  { %v3054_v17 = vld [vmem:[%s6338_s0 + $0x38e] ss:$16 sm:%s951_s23]   ;;  %v898_v19 = vsel %vm255_vm2, %v3042_v15, %v893_v16  ;;  %v3064_v32 = vld [vmem:[%s6338_s0 + $0x105] ss:$16 sm:%s999_s20]   ;;  %s1050_s20 = smov 48  ;;  %s1119_s23 = smov 48 }
  0x4d   :  { %v3055_v18 = vld [vmem:[%s6338_s0 + $0x38e] ss:$16 sm:%s954_s24]   ;;  %v1002_v34 = vsel %vm245_vm0, %v3064_v32, %v3063_v31  ;;  %v3065_v35 = vld [vmem:[%s6338_s0 + $0x105] ss:$16 sm:%s1004_s25]   ;;  %s1019_s25 = smov 3  ;;  %s1170_s24 = smov 192 }
  0x4e   :  { %v957_v20 = vsel %vm245_vm0, %v3055_v18, %v3054_v17  ;;  %v3056_v21 = vld [vmem:[%s6338_s0 + $0x38e] ss:$16 sm:%s959_s30]   ;;  %s974_s30 = smov 3  ;;  %v3066_v36 = vld [vmem:[%s6338_s0 + $0x105] ss:$16 sm:%s1009_s26]   ;;  %v1007_v37 = vsel %vm250_vm1, %v3065_v35, %v1002_v34  ;;  %s1068_s26 = smov 12 }
  0x4f   :  { %v3057_v22 = vld [vmem:[%s6338_s0 + $0x38e] ss:$16 sm:%s964_s2]   ;;  %899 = vrot.lane.b32.xlu0 %v898_v19, %s3462_s27  ;;  %v962_v23 = vsel %vm250_vm1, %v3056_v21, %v957_v20  ;;  %v1012_v39 = vsel %vm255_vm2, %v3066_v36, %v1007_v37  ;;  %s1022_s2 = smov 12 }
  0x50   :  { %v3049_v24 = vld [vmem:[%s6338_s0 + $0x28e] ss:$16 sm:%s928_s5]   ;;  %v967_v25 = vsel %vm255_vm2, %v3057_v22, %v962_v23  ;;  %v3059_v38 = vld [vmem:[%s6338_s0 + $0x5] ss:$16 sm:%s974_s30]   ;;  %s1234_s5 = smov 48  ;;  %s1280_s30 = smov 48 }
  0x51   :  { %v3050_v26 = vld [vmem:[%s6338_s0 + $0x28e] ss:$16 sm:%s931_s11]   ;;  %968 = vrot.lane.b32.xlu1 %v967_v25, %s3462_s27  ;;  %s1193_s11 = smov 192 }
  0x52   :  { %v3051_v27 = vld [vmem:[%s6338_s0 + $0x28e] ss:$16 sm:%s936_s12]   ;;  %v934_v28 = vsel %vm245_vm0, %v3050_v26, %v3049_v24  ;;  %v3060_v40 = vld [vmem:[%s6338_s0 + $0x5] ss:$16 sm:%s977_s7]   ;;  %s1088_s12 = smov 3  ;;  %s1239_s7 = smov 192 }
  0x53   :  { %v3052_v29 = vld [vmem:[%s6338_s0 + $0x28e] ss:$16 sm:%s941_s17]   ;;  %v939_v30 = vsel %vm250_vm1, %v3051_v27, %v934_v28  ;;  %v3061_v41 = vld [vmem:[%s6338_s0 + $0x5] ss:$16 sm:%s982_s8]   ;;  %v980_v42 = vsel %vm245_vm0, %v3060_v40, %v3059_v38  ;;  %s1096_s17 = smov 48  ;;  %s1134_s8 = smov 3 }
  0x54   :  { %v944_v33 = vsel %vm255_vm2, %v3052_v29, %v939_v30  ;;  %v3062_v43 = vld [vmem:[%s6338_s0 + $0x5] ss:$16 sm:%s987_s13]   ;;  %v985_v44 = vsel %vm250_vm1, %v3061_v41, %v980_v42  ;;  %s1091_s13 = smov 12  ;;  %v3083_v59 = vld [vmem:[%s6338_s0 + $0x10d] ss:$16 sm:%s1088_s12]   ;;  %s1257_s12 = smov 48 }
  0x55   :  { %945 = vrot.lane.b32.xlu0 %v944_v33, %s3462_s27  ;;  %1013 = vrot.lane.b32.xlu1 %v1012_v39, %s3463_s22  ;;  %v3073_v45 = vld [vmem:[%s6338_s0 + $0x305] ss:$16 sm:%s1042_s15]   ;;  %v990_v47 = vsel %vm255_vm2, %v3062_v43, %v985_v44  ;;  %s1142_s27 = smov 48  ;;  %s1211_s15 = smov 48 }
  0x56   :  { %v3074_v46 = vld [vmem:[%s6338_s0 + $0x305] ss:$16 sm:%s1045_s16]   ;;  %v3084_v60 = vld [vmem:[%s6338_s0 + $0x10d] ss:$16 sm:%s1091_s13]   ;;  %s1262_s16 = smov 192  ;;  %s1308_s13 = smov 192 }
  0x57   :  { %v1048_v48 = vsel %vm245_vm0, %v3074_v46, %v3073_v45  ;;  %v3075_v49 = vld [vmem:[%s6338_s0 + $0x305] ss:$16 sm:%s1050_s20]   ;;  %s1065_s20 = smov 3  ;;  %v1094_v62 = vsel %vm245_vm0, %v3084_v60, %v3083_v59  ;;  %v3085_v63 = vld [vmem:[%s6338_s0 + $0x10d] ss:$16 sm:%s1096_s17]   ;;  %s1111_s17 = smov 3 }
  0x58   :  { %v3076_v50 = vld [vmem:[%s6338_s0 + $0x305] ss:$16 sm:%s1055_s21]   ;;  %v1053_v51 = vsel %vm250_vm1, %v3075_v49, %v1048_v48  ;;  %v3086_v0 = vld [vmem:[%s6338_s0 + $0x10d] ss:$16 sm:%s1101_s6]   ;;  %v1099_v1 = vsel %vm250_vm1, %v3085_v63, %v1094_v62  ;;  %s1114_s21 = smov 12  ;;  %s1160_s6 = smov 12 }
  0x59   :  { %991 = vrot.lane.b32.xlu0 %v990_v47, %s3463_s22  ;;  %v3068_v52 = vld [vmem:[%s6338_s0 + $0x205] ss:$16 sm:%s1019_s25]   ;;  %v1058_v53 = vsel %vm255_vm2, %v3076_v50, %v1053_v51  ;;  %v1104_v3 = vsel %vm255_vm2, %v3086_v0, %v1099_v1  ;;  %s1326_s25 = smov 48 }
  0x5a   :  { %v3069_v54 = vld [vmem:[%s6338_s0 + $0x205] ss:$16 sm:%s1022_s2]   ;;  %1059 = vrot.lane.b32.xlu1 %v1058_v53, %s3463_s22  ;;  %s1285_s2 = smov 192 }
  0x5b   :  { %v3070_v55 = vld [vmem:[%s6338_s0 + $0x205] ss:$16 sm:%s1027_s3]   ;;  %v1025_v56 = vsel %vm245_vm0, %v3069_v54, %v3068_v52  ;;  %v3078_v2 = vld [vmem:[%s6338_s0 + $0xd] ss:$16 sm:%s1065_s20]   ;;  %s1180_s3 = smov 3  ;;  %s1371_s20 = smov 48 }
  0x5c   :  { %v3071_v57 = vld [vmem:[%s6338_s0 + $0x205] ss:$16 sm:%s1032_s9]   ;;  %v1030_v58 = vsel %vm250_vm1, %v3070_v55, %v1025_v56  ;;  %s1137_s9 = smov 12  ;;  %v3079_v4 = vld [vmem:[%s6338_s0 + $0xd] ss:$16 sm:%s1068_s26]   ;;  %s1331_s26 = smov 192 }
  0x5d   :  { %v1035_v61 = vsel %vm255_vm2, %v3071_v57, %v1030_v58  ;;  %v3080_v5 = vld [vmem:[%s6338_s0 + $0xd] ss:$16 sm:%s1073_s28]   ;;  %v1071_v6 = vsel %vm245_vm0, %v3079_v4, %v3078_v2  ;;  %v3103_v23 = vld [vmem:[%s6338_s0 + $0x185] ss:$16 sm:%s1180_s3]   ;;  %s1226_s28 = smov 3  ;;  %s1349_s3 = smov 48 }
  0x5e   :  { %1036 = vrot.lane.b32.xlu0 %v1035_v61, %s3463_s22  ;;  %1105 = vrot.lane.b32.xlu1 %v1104_v3, %s3463_s22  ;;  %v3081_v7 = vld [vmem:[%s6338_s0 + $0xd] ss:$16 sm:%s1078_s4]   ;;  %v1076_v8 = vsel %vm250_vm1, %v3080_v5, %v1071_v6  ;;  %s1183_s4 = smov 12 }
  0x5f   :  { %v3093_v9 = vld [vmem:[%s6338_s0 + $0x30d] ss:$16 sm:%s1134_s8]   ;;  %v1081_v11 = vsel %vm255_vm2, %v3081_v7, %v1076_v8  ;;  %v3104_v24 = vld [vmem:[%s6338_s0 + $0x185] ss:$16 sm:%s1183_s4]   ;;  %s1303_s8 = smov 48  ;;  %s1399_s4 = smov 192 }
  0x60   :  { %v3094_v10 = vld [vmem:[%s6338_s0 + $0x30d] ss:$16 sm:%s1137_s9]   ;;  %v1186_v26 = vsel %vm245_vm0, %v3104_v24, %v3103_v23  ;;  %v3105_v27 = vld [vmem:[%s6338_s0 + $0x185] ss:$16 sm:%s1188_s10]   ;;  %s1203_s10 = smov 3  ;;  %s1354_s9 = smov 192 }
  0x61   :  { %v1140_v12 = vsel %vm245_vm0, %v3094_v10, %v3093_v9  ;;  %v3095_v13 = vld [vmem:[%s6338_s0 + $0x30d] ss:$16 sm:%s1142_s27]   ;;  %s1157_s27 = smov 3  ;;  %v3106_v28 = vld [vmem:[%s6338_s0 + $0x185] ss:$16 sm:%s1193_s11]   ;;  %v1191_v29 = vsel %vm250_vm1, %v3105_v27, %v1186_v26  ;;  %s1252_s11 = smov 12 }
  0x62   :  { %v3096_v14 = vld [vmem:[%s6338_s0 + $0x30d] ss:$16 sm:%s1147_s14]   ;;  %1082 = vrot.lane.b32.xlu0 %v1081_v11, %s3463_s22  ;;  %v1145_v15 = vsel %vm250_vm1, %v3095_v13, %v1140_v12  ;;  %v1196_v31 = vsel %vm255_vm2, %v3106_v28, %v1191_v29  ;;  %s1206_s14 = smov 12 }
  0x63   :  { %v3088_v16 = vld [vmem:[%s6338_s0 + $0x20d] ss:$16 sm:%s1111_s17]   ;;  %v1150_v17 = vsel %vm255_vm2, %v3096_v14, %v1145_v15  ;;  %v3098_v30 = vld [vmem:[%s6338_s0 + $0x85] ss:$16 sm:%s1157_s27]   ;;  %s1422_s17 = smov 192  ;;  %s1468_s27 = smov 192 }
  0x64   :  { %v3089_v18 = vld [vmem:[%s6338_s0 + $0x20d] ss:$16 sm:%s1114_s21]   ;;  %1151 = vrot.lane.b32.xlu1 %v1150_v17, %s3463_s22  ;;  %s1376_s21 = smov 192 }
  0x65   :  { %v3090_v19 = vld [vmem:[%s6338_s0 + $0x20d] ss:$16 sm:%s1119_s23]   ;;  %v1117_v20 = vsel %vm245_vm0, %v3089_v18, %v3088_v16  ;;  %v3099_v32 = vld [vmem:[%s6338_s0 + $0x85] ss:$16 sm:%s1160_s6]   ;;  %s1272_s23 = smov 3  ;;  %s3464_s6 = smov 64  }
  0x66   :  { %v3091_v21 = vld [vmem:[%s6338_s0 + $0x20d] ss:$16 sm:%s1124_s29]   ;;  %v1122_v22 = vsel %vm250_vm1, %v3090_v19, %v1117_v20  ;;  %s1229_s29 = smov 12  ;;  %v3100_v33 = vld [vmem:[%s6338_s0 + $0x85] ss:$16 sm:%s1165_s18]   ;;  %v1163_v34 = vsel %vm245_vm0, %v3099_v32, %v3098_v30  ;;  %s1318_s18 = smov 3 }
  0x67   :  { %v1127_v25 = vsel %vm255_vm2, %v3091_v21, %v1122_v22  ;;  %v3101_v35 = vld [vmem:[%s6338_s0 + $0x85] ss:$16 sm:%s1170_s24]   ;;  %v1168_v36 = vsel %vm250_vm1, %v3100_v33, %v1163_v34  ;;  %s1275_s24 = smov 12  ;;  %v3123_v51 = vld [vmem:[%s6338_s0 + $0x18d] ss:$16 sm:%s1272_s23]   ;;  %s1440_s23 = smov 48 }
  0x68   :  { %1128 = vrot.lane.b32.xlu0 %v1127_v25, %s3463_s22  ;;  %1197 = vrot.lane.b32.xlu1 %v1196_v31, %s3463_s22  ;;  %v3113_v37 = vld [vmem:[%s6338_s0 + $0x385] ss:$16 sm:%s1226_s28]   ;;  %v1173_v39 = vsel %vm255_vm2, %v3101_v35, %v1168_v36  ;;  %s1394_s28 = smov 48 }
  0x69   :  { %v3114_v38 = vld [vmem:[%s6338_s0 + $0x385] ss:$16 sm:%s1229_s29]   ;;  %v3124_v52 = vld [vmem:[%s6338_s0 + $0x18d] ss:$16 sm:%s1275_s24]   ;;  %s1445_s29 = smov 192  ;;  %s1491_s24 = smov 192 }
  0x6a   :  { %v1232_v40 = vsel %vm245_vm0, %v3114_v38, %v3113_v37  ;;  %v3115_v41 = vld [vmem:[%s6338_s0 + $0x385] ss:$16 sm:%s1234_s5]   ;;  %s1249_s5 = smov 3  ;;  %v1278_v54 = vsel %vm245_vm0, %v3124_v52, %v3123_v51  ;;  %v3125_v55 = vld [vmem:[%s6338_s0 + $0x18d] ss:$16 sm:%s1280_s30]   ;;  %s1295_s30 = smov 3 }
  0x6b   :  { %v3116_v42 = vld [vmem:[%s6338_s0 + $0x385] ss:$16 sm:%s1239_s7]   ;;  %v1237_v43 = vsel %vm250_vm1, %v3115_v41, %v1232_v40  ;;  %v3126_v56 = vld [vmem:[%s6338_s0 + $0x18d] ss:$16 sm:%s1285_s2]   ;;  %v1283_v57 = vsel %vm250_vm1, %v3125_v55, %v1278_v54  ;;  %s1298_s7 = smov 12  ;;  %s1344_s2 = smov 12 }
  0x6c   :  { %1174 = vrot.lane.b32.xlu0 %v1173_v39, %s3463_s22  ;;  %v3108_v44 = vld [vmem:[%s6338_s0 + $0x285] ss:$16 sm:%s1203_s10]   ;;  %v1242_v45 = vsel %vm255_vm2, %v3116_v42, %v1237_v43  ;;  %v1288_v59 = vsel %vm255_vm2, %v3126_v56, %v1283_v57  ;;  %s1514_s10 = smov 192 }
  0x6d   :  { %v3109_v46 = vld [vmem:[%s6338_s0 + $0x285] ss:$16 sm:%s1206_s14]   ;;  %1243 = vrot.lane.b32.xlu1 %v1242_v45, %s3463_s22  ;;  %s1532_s14 = smov 48 }
  0x6e   :  { %v3110_v47 = vld [vmem:[%s6338_s0 + $0x285] ss:$16 sm:%s1211_s15]   ;;  %v1209_v48 = vsel %vm245_vm0, %v3109_v46, %v3108_v44  ;;  %v3118_v58 = vld [vmem:[%s6338_s0 + $0x8d] ss:$16 sm:%s1249_s5]   ;;  %s1363_s15 = smov 3  ;;  %s1555_s5 = smov 48 }
  0x6f   :  { %v3111_v49 = vld [vmem:[%s6338_s0 + $0x285] ss:$16 sm:%s1216_s19]   ;;  %v1214_v50 = vsel %vm250_vm1, %v3110_v47, %v1209_v48  ;;  %s1321_s19 = smov 12  ;;  %v3119_v60 = vld [vmem:[%s6338_s0 + $0x8d] ss:$16 sm:%s1252_s11]   ;;  %s1409_s11 = smov 3 }
  0x70   :  { %v1219_v53 = vsel %vm255_vm2, %v3111_v49, %v1214_v50  ;;  %v3120_v61 = vld [vmem:[%s6338_s0 + $0x8d] ss:$16 sm:%s1257_s12]   ;;  %v1255_v62 = vsel %vm245_vm0, %v3119_v60, %v3118_v58  ;;  %v3142_v16 = vld [vmem:[%s6338_s0 + $0x104] ss:$16 sm:%s1363_s15]   ;;  %s1412_s12 = smov 12  ;;  %s4807_s15 = smov 48 }
  0x71   :  { %1220 = vrot.lane.b32.xlu0 %v1219_v53, %s3463_s22  ;;  %1289 = vrot.lane.b32.xlu1 %v1288_v59, %s3463_s22  ;;  %v3121_v63 = vld [vmem:[%s6338_s0 + $0x8d] ss:$16 sm:%s1262_s16]   ;;  %v1260_v0 = vsel %vm250_vm1, %v3120_v61, %v1255_v62  ;;  %s1366_s16 = smov 12 }
  0x72   :  { %v3133_v1 = vld [vmem:[%s6338_s0 + $0x38d] ss:$16 sm:%s1318_s18]   ;;  %v1265_v3 = vsel %vm255_vm2, %v3121_v63, %v1260_v0  ;;  %v3143_v17 = vld [vmem:[%s6338_s0 + $0x104] ss:$16 sm:%s1366_s16]   ;;  %s1417_s16 = smov 48  ;;  %s1486_s18 = smov 48 }
  0x73   :  { %v3134_v2 = vld [vmem:[%s6338_s0 + $0x38d] ss:$16 sm:%s1321_s19]   ;;  %v1369_v19 = vsel %vm245_vm0, %v3143_v17, %v3142_v16  ;;  %v3144_v20 = vld [vmem:[%s6338_s0 + $0x104] ss:$16 sm:%s1371_s20]   ;;  %s1386_s20 = smov 3  ;;  %s1537_s19 = smov 192 }
  0x74   :  { %v1324_v4 = vsel %vm245_vm0, %v3134_v2, %v3133_v1  ;;  %v3135_v5 = vld [vmem:[%s6338_s0 + $0x38d] ss:$16 sm:%s1326_s25]   ;;  %s1341_s25 = smov 3  ;;  %v3145_v21 = vld [vmem:[%s6338_s0 + $0x104] ss:$16 sm:%s1376_s21]   ;;  %v1374_v23 = vsel %vm250_vm1, %v3144_v20, %v1369_v19  ;;  %s1435_s21 = smov 12 }
  0x75   :  { %v3136_v6 = vld [vmem:[%s6338_s0 + $0x38d] ss:$16 sm:%s1331_s26]   ;;  %1266 = vrot.lane.b32.xlu0 %v1265_v3, %s3463_s22  ;;  %v1329_v7 = vsel %vm250_vm1, %v3135_v5, %v1324_v4  ;;  %v1379_v25 = vsel %vm255_vm2, %v3145_v21, %v1374_v23  ;;  %s1389_s26 = smov 12 }
  0x76   :  { %v3128_v8 = vld [vmem:[%s6338_s0 + $0x28d] ss:$16 sm:%s1295_s30]   ;;  %v1334_v9 = vsel %vm255_vm2, %v3136_v6, %v1329_v7  ;;  %v3138_v24 = vld [vmem:[%s6338_s0 + $0x4] ss:$16 sm:%s1341_s25]   ;;  %s1601_s25 = smov 48  ;;  %s1624_s30 = smov 48 }
  0x77   :  { %v3129_v10 = vld [vmem:[%s6338_s0 + $0x28d] ss:$16 sm:%s1298_s7]   ;;  %1335 = vrot.lane.b32.xlu1 %v1334_v9, %s3463_s22  ;;  %s1560_s7 = smov 192 }
  0x78   :  { %v3130_v11 = vld [vmem:[%s6338_s0 + $0x28d] ss:$16 sm:%s1303_s8]   ;;  %v1301_v12 = vsel %vm245_vm0, %v3129_v10, %v3128_v8  ;;  %v4243_v14 = vpop.permute.xlu1 %302   ;;  %v3139_v26 = vld [vmem:[%s6338_s0 + $0x4] ss:$16 sm:%s1344_s2]   ;;  %s1455_s8 = smov 3  ;;  %s1606_s2 = smov 192 }
  0x79   :  { %v3131_v13 = vld [vmem:[%s6338_s0 + $0x28d] ss:$16 sm:%s1308_s13]   ;;  %v1306_v15 = vsel %vm250_vm1, %v3130_v11, %v1301_v12  ;;  %v3140_v27 = vld [vmem:[%s6338_s0 + $0x4] ss:$16 sm:%s1349_s3]   ;;  %v1347_v29 = vsel %vm245_vm0, %v3139_v26, %v3138_v24  ;;  %s1463_s13 = smov 48  ;;  %s1501_s3 = smov 3 }
  0x7a   :  { %v1311_v18 = vsel %vm255_vm2, %v3131_v13, %v1306_v15  ;;  %v3141_v30 = vld [vmem:[%s6338_s0 + $0x4] ss:$16 sm:%s1354_s9]   ;;  %v1352_v31 = vsel %vm250_vm1, %v3140_v27, %v1347_v29  ;;  %s1458_s9 = smov 12  ;;  %v3162_v48 = vld [vmem:[%s6338_s0 + $0x10c] ss:$16 sm:%s1455_s8]   ;;  %s1578_s8 = smov 48 }
  0x7b   :  { %1312 = vrot.lane.b32.xlu0 %v1311_v18, %s3463_s22  ;;  %1380 = vrot.lane.b32.xlu1 %v1379_v25, %s3464_s6  ;;  %v3152_v32 = vld [vmem:[%s6338_s0 + $0x304] ss:$16 sm:%s1409_s11]   ;;  %v1357_v34 = vsel %vm255_vm2, %v3141_v30, %v1352_v31  ;;  %s1509_s22 = smov 48  ;;  %s4475_s11 = smov 3 }
  0x7c   :  { %v4260_v22 = vpop.permute.xlu0 %257   ;;  %v3153_v33 = vld [vmem:[%s6338_s0 + $0x304] ss:$16 sm:%s1412_s12]   ;;  %v3163_v49 = vld [vmem:[%s6338_s0 + $0x10c] ss:$16 sm:%s1458_s9]   ;;  %s1583_s12 = smov 192  ;;  %s2037_s9 = smov 48 }
  0x7d   :  { %v1415_v35 = vsel %vm245_vm0, %v3153_v33, %v3152_v32  ;;  %v3154_v36 = vld [vmem:[%s6338_s0 + $0x304] ss:$16 sm:%s1417_s16]   ;;  %s1432_s16 = smov 3  ;;  %v1461_v51 = vsel %vm245_vm0, %v3163_v49, %v3162_v48  ;;  %v3164_v52 = vld [vmem:[%s6338_s0 + $0x10c] ss:$16 sm:%s1463_s13]   ;;  %s1478_s13 = smov 3 }
  0x7e   :  { %v3155_v37 = vld [vmem:[%s6338_s0 + $0x304] ss:$16 sm:%s1422_s17]   ;;  %v1420_v39 = vsel %vm250_vm1, %v3154_v36, %v1415_v35  ;;  %v3165_v53 = vld [vmem:[%s6338_s0 + $0x10c] ss:$16 sm:%s1468_s27]   ;;  %v1466_v55 = vsel %vm250_vm1, %v3164_v52, %v1461_v51  ;;  %s1481_s17 = smov 12  ;;  %s1527_s27 = smov 12 }
  0x7f   :  { %1358 = vrot.lane.b32.xlu0 %v1357_v34, %s3464_s6  ;;  %v3147_v40 = vld [vmem:[%s6338_s0 + $0x204] ss:$16 sm:%s1386_s20]   ;;  %v1425_v41 = vsel %vm255_vm2, %v3155_v37, %v1420_v39  ;;  %v1471_v57 = vsel %vm255_vm2, %v3165_v53, %v1466_v55  ;;  %s1593_s20 = smov 3  ;;  %v2829_v52 = vld [vmem:[%s6338_s0 + $0x100] ss:$8 sm:$0xf]  }
  0x80   :  { %v4274_v28 = vpop.permute.xlu1 %325   ;;  %v3148_v42 = vld [vmem:[%s6338_s0 + $0x204] ss:$16 sm:%s1389_s26]   ;;  %1426 = vrot.lane.b32.xlu1 %v1425_v41, %s3464_s6  ;;  %s4566_s26 = smov 48 }
  0x81   :  { %v3149_v43 = vld [vmem:[%s6338_s0 + $0x204] ss:$16 sm:%s1394_s28]   ;;  %v1392_v45 = vsel %vm245_vm0, %v3148_v42, %v3147_v40  ;;  %v3157_v56 = vld [vmem:[%s6338_s0 + $0xc] ss:$16 sm:%s1432_s16]   ;;  %s1547_s28 = smov 3  ;;  %s4487_s16 = smov 48 }
  0x82   :  { %v3150_v46 = vld [vmem:[%s6338_s0 + $0x204] ss:$16 sm:%s1399_s4]   ;;  %v1397_v47 = vsel %vm250_vm1, %v3149_v43, %v1392_v45  ;;  %s1504_s4 = smov 12  ;;  %v3158_v58 = vld [vmem:[%s6338_s0 + $0xc] ss:$16 sm:%s1435_s21]   ;;  %s1652_s21 = smov 192 }
  0x83   :  { %v1402_v50 = vsel %vm255_vm2, %v3150_v46, %v1397_v47  ;;  %v3159_v59 = vld [vmem:[%s6338_s0 + $0xc] ss:$16 sm:%s1440_s23]   ;;  %v1438_v61 = vsel %vm245_vm0, %v3158_v58, %v3157_v56  ;;  %v3182_v17 = vld [vmem:[%s6338_s0 + $0x184] ss:$16 sm:%s1547_s28]   ;;  %s4447_s23 = smov 3  ;;  %s2100_s28 = smov 12 }
  0x84   :  { %v4296_v38 = vpop.permute.xlu0 %279   ;;  %v4310_v44 = vpop.permute.xlu1 %371   ;;  %1403 = vrot.lane.b32.xlu0 %v1402_v50, %s3464_s6  ;;  %1472 = vrot.lane.b32.xlu1 %v1471_v57, %s3464_s6  ;;  %v3160_v62 = vld [vmem:[%s6338_s0 + $0xc] ss:$16 sm:%s1445_s29]   ;;  %v1443_v63 = vsel %vm250_vm1, %v3159_v59, %v1438_v61  ;;  %s1550_s29 = smov 12 }
  0x85   :  { %v3172_v0 = vld [vmem:[%s6338_s0 + $0x30c] ss:$16 sm:%s1501_s3]   ;;  %v1448_v2 = vsel %vm255_vm2, %v3160_v62, %v1443_v63  ;;  %v3183_v18 = vld [vmem:[%s6338_s0 + $0x184] ss:$16 sm:%s1550_s29]   ;;  %s1570_s3 = smov 3  ;;  %s1619_s29 = smov 12 }
  0x86   :  { %v3173_v1 = vld [vmem:[%s6338_s0 + $0x30c] ss:$16 sm:%s1504_s4]   ;;  %v1553_v20 = vsel %vm245_vm0, %v3183_v18, %v3182_v17  ;;  %v3184_v21 = vld [vmem:[%s6338_s0 + $0x184] ss:$16 sm:%s1555_s5]   ;;  %s4463_s4 = smov 192  ;;  %s4785_s5 = smov 3 }
  0x87   :  { %v1507_v3 = vsel %vm245_vm0, %v3173_v1, %v3172_v0  ;;  %v3174_v4 = vld [vmem:[%s6338_s0 + $0x30c] ss:$16 sm:%s1509_s22]   ;;  %s1524_s22 = smov 3  ;;  %v3185_v23 = vld [vmem:[%s6338_s0 + $0x184] ss:$16 sm:%s1560_s7]   ;;  %v1558_v25 = vsel %vm250_vm1, %v3184_v21, %v1553_v20  ;;  %s1573_s7 = smov 12 }
  0x88   :  { %v4332_v54 = vpop.permute.xlu0 %348   ;;  %v3175_v5 = vld [vmem:[%s6338_s0 + $0x30c] ss:$16 sm:%s1514_s10]   ;;  %1449 = vrot.lane.b32.xlu0 %v1448_v2, %s3464_s6  ;;  %v1512_v7 = vsel %vm250_vm1, %v3174_v4, %v1507_v3  ;;  %v1563_v27 = vsel %vm255_vm2, %v3185_v23, %v1558_v25  ;;  %v2830_v1 = vld [vmem:[%s6338_s0 + $0x100] ss:$8 sm:$0xf0]   ;;  %s5224_s10 = smov 3 }
  0x89   :  { %v3167_v8 = vld [vmem:[%s6338_s0 + $0x20c] ss:$16 sm:%s1478_s13]   ;;  %v1517_v9 = vsel %vm255_vm2, %v3175_v5, %v1512_v7  ;;  %v3177_v26 = vld [vmem:[%s6338_s0 + $0x84] ss:$16 sm:%s1524_s22]   ;;  %s1639_s13 = smov 3  ;;  %v64_v7 = vsel %vm4_vm3, %v2830_v1, %v2829_v52  ;;  %s4590_s22 = smov 12 }
  0x8a   :  { %v4346_v60 = vpop.permute.xlu1 %417   ;;  %v3168_v10 = vld [vmem:[%s6338_s0 + $0x20c] ss:$16 sm:%s1481_s17]   ;;  %1518 = vrot.lane.b32.xlu1 %v1517_v9, %s3464_s6  ;;  %s1642_s17 = smov 12  ;;  %2831 = vst.msk [vmem:[%s6339_s1 + $0x20] ss:$8 sm:$0x3] %vm6_vm4, %v64_v7  }
  0x8b   :  { %v3169_v11 = vld [vmem:[%s6338_s0 + $0x20c] ss:$16 sm:%s1486_s18]   ;;  %v1484_v13 = vsel %vm245_vm0, %v3168_v10, %v3167_v8  ;;  %v3178_v29 = vld [vmem:[%s6338_s0 + $0x84] ss:$16 sm:%s1527_s27]   ;;  %s1647_s18 = smov 48  ;;  %s4647_s27 = smov 48 }
  0x8c   :  { %v3170_v15 = vld [vmem:[%s6338_s0 + $0x20c] ss:$16 sm:%s1491_s24]   ;;  %v1489_v16 = vsel %vm250_vm1, %v3169_v11, %v1484_v13  ;;  %s1596_s24 = smov 12  ;;  %v3179_v30 = vld [vmem:[%s6338_s0 + $0x84] ss:$16 sm:%s1532_s14]   ;;  %v1530_v32 = vsel %vm245_vm0, %v3178_v29, %v3177_v26 }
  0x8d   :  { %v1494_v19 = vsel %vm255_vm2, %v3170_v15, %v1489_v16  ;;  %v3180_v33 = vld [vmem:[%s6338_s0 + $0x84] ss:$16 sm:%s1537_s19]   ;;  %v1535_v34 = vsel %vm250_vm1, %v3179_v30, %v1530_v32  ;;  %v3202_v55 = vld [vmem:[%s6338_s0 + $0x18c] ss:$16 sm:%s1639_s13]   ;;  %s4709_s19 = smov 3  ;;  %s4904_s13 = smov 12 }
  0x8e   :  { %v4368_v6 = vpop.permute.xlu0 %394   ;;  %v4382_v12 = vpop.permute.xlu1 %463   ;;  %1495 = vrot.lane.b32.xlu0 %v1494_v19, %s3464_s6  ;;  %1564 = vrot.lane.b32.xlu1 %v1563_v27, %s3464_s6  ;;  %v3192_v35 = vld [vmem:[%s6338_s0 + $0x384] ss:$16 sm:%s1593_s20]   ;;  %v1540_v37 = vsel %vm255_vm2, %v3180_v33, %v1535_v34  ;;  %s4499_s20 = smov 3 }
  0x8f   :  { %v3193_v36 = vld [vmem:[%s6338_s0 + $0x384] ss:$16 sm:%s1596_s24]   ;;  %v3203_v56 = vld [vmem:[%s6338_s0 + $0x18c] ss:$16 sm:%s1642_s17]   ;;  %s4489_s17 = smov 192  ;;  %s1991_s24 = smov 48 }
  0x90   :  { %v1599_v39 = vsel %vm245_vm0, %v3193_v36, %v3192_v35  ;;  %v3194_v40 = vld [vmem:[%s6338_s0 + $0x384] ss:$16 sm:%s1601_s25]   ;;  %v1645_v58 = vsel %vm245_vm0, %v3203_v56, %v3202_v55  ;;  %v3204_v59 = vld [vmem:[%s6338_s0 + $0x18c] ss:$16 sm:%s1647_s18]   ;;  %s3465_s25 = smov 48   ;;  %s5232_s18 = smov 12 }
  0x91   :  { %v3195_v41 = vld [vmem:[%s6338_s0 + $0x384] ss:$16 sm:%s1606_s2]   ;;  %v1604_v43 = vsel %vm250_vm1, %v3194_v40, %v1599_v39  ;;  %v3205_v61 = vld [vmem:[%s6338_s0 + $0x18c] ss:$16 sm:%s1652_s21]   ;;  %v1650_v63 = vsel %vm250_vm1, %v3204_v59, %v1645_v58  ;;  %s1761_s2 = smov 48  ;;  %s5289_s21 = smov 12 }
  0x92   :  { %v4404_v24 = vpop.permute.xlu0 %440   ;;  %1541 = vrot.lane.b32.xlu0 %v1540_v37, %s3464_s6  ;;  %v3187_v45 = vld [vmem:[%s6338_s0 + $0x284] ss:$16 sm:%s1570_s3]   ;;  %v1609_v46 = vsel %vm255_vm2, %v3195_v41, %v1604_v43  ;;  %v1655_v2 = vsel %vm255_vm2, %v3205_v61, %v1650_v63  ;;  %2832 = vst.msk [vmem:[%s6339_s1 + $0x11] ss:$8 sm:$0xc] %vm6_vm4, %v64_v7   ;;  %s4626_s3 = smov 3 }
  0x93   :  { %v4418_v31 = vpop.permute.xlu1 %509   ;;  %v3188_v47 = vld [vmem:[%s6338_s0 + $0x284] ss:$16 sm:%s1573_s7]   ;;  %1610 = vrot.lane.b32.xlu1 %v1609_v46, %s3464_s6  ;;  %2833 = vst.msk [vmem:[%s6339_s1 + $0x2] ss:$8 sm:$0x30] %vm6_vm4, %v64_v7   ;;  %s4943_s7 = smov 3 }
  0x94   :  { %v3189_v48 = vld [vmem:[%s6338_s0 + $0x284] ss:$16 sm:%s1578_s8]   ;;  %v1576_v50 = vsel %vm245_vm0, %v3188_v47, %v3187_v45  ;;  %v3197_v0 = vld [vmem:[%s6338_s0 + $0x8c] ss:$16 sm:%s4447_s23]   ;;  %s5032_s23 = smov 3  ;;  %s5057_s8 = smov 192 }
  0x95   :  { %v3190_v51 = vld [vmem:[%s6338_s0 + $0x284] ss:$16 sm:%s1583_s12]   ;;  %v1581_v53 = vsel %vm250_vm1, %v3189_v48, %v1576_v50  ;;  %s4477_s12 = smov 12  ;;  %v3198_v3 = vld [vmem:[%s6338_s0 + $0x8c] ss:$16 sm:%s1619_s29]   ;;  %s4511_s29 = smov 12 }
  0x96   :  { %v1586_v57 = vsel %vm255_vm2, %v3190_v51, %v1581_v53  ;;  %v3199_v4 = vld [vmem:[%s6338_s0 + $0x8c] ss:$16 sm:%s1624_s30]   ;;  %s4513_s30 = smov 48  ;;  %v1622_v8 = vsel %vm245_vm0, %v3198_v3, %v3197_v0  ;;  %2834 = vst.msk [vmem:[%s6339_s1 - $0xd] ss:$8 sm:$0xc0] %vm6_vm4, %v64_v7  }
  0x97   :  { %v4440_v42 = vpop.permute.xlu0 %486   ;;  %v4456_v49 = vpop.permute.xlu1 %555   ;;  %1587 = vrot.lane.b32.xlu0 %v1586_v57, %s3464_s6  ;;  %1656 = vrot.lane.b32.xlu1 %v1655_v2, %s3464_s6  ;;  %v3200_v9 = vld [vmem:[%s6338_s0 + $0x8c] ss:$16 sm:%s4463_s4]   ;;  %s4524_s4 = smov 192  ;;  %v1627_v11 = vsel %vm250_vm1, %v3199_v4, %v1622_v8 }
  0x98   :  { %v2835_v10 = vld [vmem:[%s6338_s0 + $0x140] ss:$8 sm:$0xf]   ;;  %v3212_v13 = vld [vmem:[%s6338_s0 + $0x38c] ss:$16 sm:%s4475_s11]   ;;  %v1632_v16 = vsel %vm255_vm2, %v3200_v9, %v1627_v11  ;;  %s5134_s11 = smov 48 }
  0x99   :  { %v3213_v15 = vld [vmem:[%s6338_s0 + $0x38c] ss:$16 sm:%s4477_s12]   ;;  %s4554_s12 = smov 3  ;;  %v2836_v25 = vld [vmem:[%s6338_s0 + $0x140] ss:$8 sm:$0xf0]  }
  0x9a   :  { %v1691_v17 = vsel %vm245_vm0, %v3213_v15, %v3212_v13  ;;  %v3214_v18 = vld [vmem:[%s6338_s0 + $0x38c] ss:$16 sm:%s4487_s16]   ;;  %v79_v32 = vsel %vm4_vm3, %v2836_v25, %v2835_v10  ;;  %v2_v35 = vld [vmem:[%s6338_s0] ss:$8 sm:$0xf]   ;;  %s4672_s16 = smov 12 }
  0x9b   :  { %v4491_v62 = vpop.permute.xlu0 %532   ;;  %v3215_v19 = vld [vmem:[%s6338_s0 + $0x38c] ss:$16 sm:%s4489_s17]   ;;  %s1733_s17 = smov 12  ;;  %1633 = vrot.lane.b32.xlu0 %v1632_v16, %s3464_s6  ;;  %v1696_v21 = vsel %vm250_vm1, %v3214_v18, %v1691_v17  ;;  %2837 = vst.msk [vmem:[%s6339_s1 + $0x24] ss:$8 sm:$0x3] %vm6_vm4, %v79_v32  }
  0x9c   :  { %v3207_v23 = vld [vmem:[%s6338_s0 + $0x28c] ss:$16 sm:%s4499_s20]   ;;  %s1743_s20 = smov 192  ;;  %v1701_v26 = vsel %vm255_vm2, %v3215_v19, %v1696_v21  ;;  %2838 = vst.msk [vmem:[%s6339_s1 + $0x15] ss:$8 sm:$0xc] %vm6_vm4, %v79_v32  }
  0x9d   :  { %v4515_v5 = vpop.permute.xlu1 %601   ;;  %v3208_v27 = vld [vmem:[%s6338_s0 + $0x28c] ss:$16 sm:%s4511_s29]   ;;  %1702 = vrot.lane.b32.xlu1 %v1701_v26, %s3464_s6  ;;  %2839 = vst.msk [vmem:[%s6339_s1 + $0x6] ss:$8 sm:$0x30] %vm6_vm4, %v79_v32   ;;  %s4744_s29 = smov 12 }
  0x9e   :  { %v3209_v29 = vld [vmem:[%s6338_s0 + $0x28c] ss:$16 sm:%s4513_s30]   ;;  %s4588_s30 = smov 3  ;;  %v1668_v33 = vsel %vm245_vm0, %v3208_v27, %v3207_v23  ;;  %2840 = vst.msk [vmem:[%s6339_s1 - $0x9] ss:$8 sm:$0xc0] %vm6_vm4, %v79_v32  }
  0x9f   :  { %v3210_v34 = vld [vmem:[%s6338_s0 + $0x28c] ss:$16 sm:%s4524_s4]   ;;  %s1716_s4 = smov 48  ;;  %v1673_v36 = vsel %vm250_vm1, %v3209_v29, %v1668_v33  ;;  %v3221_v37 = vld [vmem:[%s6338_s0 + $0x103] ss:$16 sm:%s4554_s12]   ;;  %s5369_s12 = smov 3 }
  0xa0   :  { %v3222_v39 = vld [vmem:[%s6338_s0 + $0x103] ss:$16 sm:%s1733_s17]   ;;  %s1721_s17 = smov 192  ;;  %2909 = vst.msk [vmem:[%s6339_s1 + $0x20] sm:$0xff] %vm259_vm6, %v4296_v38   ;;  %2929 = vst.msk [vmem:[%s6339_s1 + $0x28] sm:$0xff] %vm259_vm6, %v4310_v44   ;;  %v1678_v38 = vsel %vm255_vm2, %v3210_v34, %v1673_v36 }
  0xa1   :  { %v4568_v20 = vpop.permute.xlu0 %578   ;;  %v647_v30 = vpop.permute.xlu1 %646   ;;  %v1736_v44 = vsel %vm245_vm0, %v3222_v39, %v3221_v37  ;;  %v3223_v40 = vld [vmem:[%s6338_s0 + $0x103] ss:$16 sm:%s4566_s26]   ;;  %1679 = vrot.lane.b32.xlu0 %v1678_v38, %s3464_s6  ;;  %v3_v47 = vld [vmem:[%s6338_s0] ss:$8 sm:$0xf0]   ;;  %s4752_s26 = smov 48 }
  0xa2   :  { %v3224_v41 = vld [vmem:[%s6338_s0 + $0x103] ss:$16 sm:%s1743_s20]   ;;  %s1779_s20 = smov 12  ;;  %2988 = vst.msk [vmem:[%s6339_s1 + $0x20] sm:$0xff] %vm626_vm5, %v647_v30   ;;  %v1741_v45 = vsel %vm250_vm1, %v3223_v40, %v1736_v44  ;;  %v5_v52 = vsel %vm4_vm3, %v3_v47, %v2_v35  ;;  %s4914_s6 = smov 48 }
  0xa3   :  { %v3217_v46 = vld [vmem:[%s6338_s0 + $0x3] ss:$16 sm:%s4588_s30]   ;;  %s1789_s30 = smov 192  ;;  %v1746_v48 = vsel %vm255_vm2, %v3224_v41, %v1741_v45  ;;  %7 = vst.msk [vmem:[%s6339_s1] ss:$8 sm:$0x3] %vm6_vm4, %v5_v52  }
  0xa4   :  { %v3218_v50 = vld [vmem:[%s6338_s0 + $0x3] ss:$16 sm:%s4590_s22]   ;;  %1747 = vrot.lane.b32.xlu1 %v1746_v48, %s3465_s25  ;;  %2808 = vst.msk [vmem:[%s6339_s1 - $0xf] ss:$8 sm:$0xc] %vm6_vm4, %v5_v52   ;;  %s4720_s22 = smov 48 }
  0xa5   :  { %v4653_v43 = vpop.permute.xlu0 %624   ;;  %v3219_v51 = vld [vmem:[%s6338_s0 + $0x3] ss:$16 sm:%s1716_s4]   ;;  %s1753_s4 = smov 3  ;;  %v1714_v55 = vsel %vm245_vm0, %v3218_v50, %v3217_v46  ;;  %2809 = vst.msk [vmem:[%s6339_s1 - $0x1e] ss:$8 sm:$0x30] %vm6_vm4, %v5_v52  }
  0xa6   :  { %v4675_v53 = vpop.permute.xlu1 %692   ;;  %v3220_v56 = vld [vmem:[%s6338_s0 + $0x3] ss:$16 sm:%s1721_s17]   ;;  %2810 = vst.msk [vmem:[%s6339_s1 - $0x2d] ss:$8 sm:$0xc0] %vm6_vm4, %v5_v52   ;;  %v1719_v58 = vsel %vm250_vm1, %v3219_v51, %v1714_v55  ;;  %s5160_s17 = smov 12 }
  0xa7   :  { %v2811_v57 = vld [vmem:[%s6338_s0 + $0x40] ss:$8 sm:$0xf]   ;;  %v3231_v59 = vld [vmem:[%s6338_s0 + $0x303] ss:$16 sm:%s4626_s3]   ;;  %v1724_v63 = vsel %vm255_vm2, %v3220_v56, %v1719_v58  ;;  %s4964_s3 = smov 48 }
  0xa8   :  { %v3232_v61 = vld [vmem:[%s6338_s0 + $0x303] ss:$16 sm:%s1779_s20]   ;;  %s1766_s20 = smov 192  ;;  %1725 = vrot.lane.b32.xlu0 %v1724_v63, %s3465_s25  ;;  %v2812_v8 = vld [vmem:[%s6338_s0 + $0x40] ss:$8 sm:$0xf0]  }
  0xa9   :  { %v1782_v0 = vsel %vm245_vm0, %v3232_v61, %v3231_v59  ;;  %v3233_v1 = vld [vmem:[%s6338_s0 + $0x303] ss:$16 sm:%s4647_s27]   ;;  %v19_v13 = vsel %vm4_vm3, %v2812_v8, %v2811_v57  ;;  %v2877_v18 = vld [vmem:[%s6338_s0 + $0x300] ss:$8 sm:$0xf]   ;;  %s4871_s27 = smov 3 }
  0xaa   :  { %v3234_v2 = vld [vmem:[%s6338_s0 + $0x303] ss:$16 sm:%s1789_s30]   ;;  %s1825_s30 = smov 12  ;;  %v4722_v3 = vpop.permute.xlu0 %669   ;;  %v1787_v4 = vsel %vm250_vm1, %v3233_v1, %v1782_v0  ;;  %v739_v15 = vpop.permute.xlu1 %738   ;;  %2813 = vst.msk [vmem:[%s6339_s1 + $0x4] ss:$8 sm:$0x3] %vm6_vm4, %v19_v13  }
  0xab   :  { %v3226_v7 = vld [vmem:[%s6338_s0 + $0x203] ss:$16 sm:%s1753_s4]   ;;  %s4729_s4 = smov 192  ;;  %v1792_v9 = vsel %vm255_vm2, %v3234_v2, %v1787_v4  ;;  %2814 = vst.msk [vmem:[%s6339_s1 - $0xb] ss:$8 sm:$0xc] %vm6_vm4, %v19_v13  }
  0xac   :  { %v3227_v10 = vld [vmem:[%s6338_s0 + $0x203] ss:$16 sm:%s4672_s16]   ;;  %1793 = vrot.lane.b32.xlu1 %v1792_v9, %s3465_s25  ;;  %2815 = vst.msk [vmem:[%s6339_s1 - $0x1a] ss:$8 sm:$0x30] %vm6_vm4, %v19_v13   ;;  %s2088_s16 = smov 192 }
  0xad   :  { %v3228_v11 = vld [vmem:[%s6338_s0 + $0x203] ss:$16 sm:%s1761_s2]   ;;  %s4742_s2 = smov 3  ;;  %v1759_v16 = vsel %vm245_vm0, %v3227_v10, %v3226_v7  ;;  %2816 = vst.msk [vmem:[%s6339_s1 - $0x29] ss:$8 sm:$0xc0] %vm6_vm4, %v19_v13  }
  0xae   :  { %v3229_v17 = vld [vmem:[%s6338_s0 + $0x203] ss:$16 sm:%s1766_s20]   ;;  %3008 = vst.msk [vmem:[%s6339_s1 + $0x28] sm:$0xff] %vm626_vm5, %v739_v15   ;;  %v1764_v19 = vsel %vm250_vm1, %v3228_v11, %v1759_v16  ;;  %v716_v27 = vpop.permute.xlu0 %715   ;;  %v2878_v32 = vld [vmem:[%s6338_s0 + $0x300] ss:$8 sm:$0xf0]  }
  0xaf   :  { %v3241_v21 = vld [vmem:[%s6338_s0 + $0x10b] ss:$16 sm:%s4709_s19]   ;;  %260 = vst.msk [vmem:[%s6339_s1] sm:$0xff] %vm259_vm6, %v4260_v22   ;;  %2924 = vst.msk [vmem:[%s6339_s1 + $0x8] sm:$0xff] %vm259_vm6, %v4332_v54   ;;  %v1769_v22 = vsel %vm255_vm2, %v3229_v17, %v1764_v19  ;;  %s4836_s19 = smov 12  ;;  %v184_v36 = vsel %vm4_vm3, %v2878_v32, %v2877_v18 }
  0xb0   :  { %v3242_v23 = vld [vmem:[%s6338_s0 + $0x10b] ss:$16 sm:%s1825_s30]   ;;  %s1812_s30 = smov 192  ;;  %627 = vst.msk [vmem:[%s6339_s1] sm:$0xff] %vm626_vm5, %v4653_v43   ;;  %1770 = vrot.lane.b32.xlu0 %v1769_v22, %s3465_s25  ;;  %v785_v37 = vpop.permute.xlu1 %784  }
  0xb1   :  { %v1828_v54 = vsel %vm245_vm0, %v3242_v23, %v3241_v21  ;;  %v3243_v25 = vld [vmem:[%s6338_s0 + $0x10b] ss:$16 sm:%s4720_s22]   ;;  %3003 = vst.msk [vmem:[%s6339_s1 + $0x8] sm:$0xff] %vm626_vm5, %v716_v27   ;;  %v2883_v44 = vld [vmem:[%s6338_s0 + $0x340] ss:$8 sm:$0xf]  }
  0xb2   :  { %v3244_v26 = vld [vmem:[%s6338_s0 + $0x10b] ss:$16 sm:%s4729_s4]   ;;  %s1871_s4 = smov 12  ;;  %v1833_v29 = vsel %vm250_vm1, %v3243_v25, %v1828_v54  ;;  %2879 = vst.msk [vmem:[%s6339_s1 + $0x60] ss:$8 sm:$0x3] %vm6_vm4, %v184_v36  }
  0xb3   :  { %v3236_v30 = vld [vmem:[%s6338_s0 + $0xb] ss:$16 sm:%s4742_s2]   ;;  %s1881_s2 = smov 192  ;;  %v1838_v33 = vsel %vm255_vm2, %v3244_v26, %v1833_v29  ;;  %2880 = vst.msk [vmem:[%s6339_s1 + $0x51] ss:$8 sm:$0xc] %vm6_vm4, %v184_v36  }
  0xb4   :  { %v3237_v34 = vld [vmem:[%s6338_s0 + $0xb] ss:$16 sm:%s4744_s29]   ;;  %1839 = vrot.lane.b32.xlu1 %v1838_v33, %s3465_s25  ;;  %2881 = vst.msk [vmem:[%s6339_s1 + $0x42] ss:$8 sm:$0x30] %vm6_vm4, %v184_v36   ;;  %s4882_s29 = smov 48  ;;  %v4884_v50 = vpop.permute.xlu0 %761   ;;  %v4907_v61 = vpop.permute.xlu1 %830  }
  0xb5   :  { %v3238_v35 = vld [vmem:[%s6338_s0 + $0xb] ss:$16 sm:%s4752_s26]   ;;  %s1845_s26 = smov 3  ;;  %v1805_v39 = vsel %vm245_vm0, %v3237_v34, %v3236_v30  ;;  %2882 = vst.msk [vmem:[%s6339_s1 + $0x33] ss:$8 sm:$0xc0] %vm6_vm4, %v184_v36  }
  0xb6   :  { %v3239_v38 = vld [vmem:[%s6338_s0 + $0xb] ss:$16 sm:%s1812_s30]   ;;  %s1853_s30 = smov 48  ;;  %v1810_v40 = vsel %vm250_vm1, %v3238_v35, %v1805_v39  ;;  %v2884_v55 = vld [vmem:[%s6338_s0 + $0x340] ss:$8 sm:$0xf0]  }
  0xb7   :  { %v3251_v41 = vld [vmem:[%s6338_s0 + $0x30b] ss:$16 sm:%s4785_s5]   ;;  %v1815_v45 = vsel %vm255_vm2, %v3239_v38, %v1810_v40  ;;  %v199_v59 = vsel %vm4_vm3, %v2884_v55, %v2883_v44  ;;  %v2853_v1 = vld [vmem:[%s6338_s0 + $0x200] ss:$8 sm:$0xf]   ;;  %s5070_s22 = smov 12 }
  0xb8   :  { %v3252_v43 = vld [vmem:[%s6338_s0 + $0x30b] ss:$16 sm:%s1871_s4]   ;;  %s1858_s4 = smov 192  ;;  %1816 = vrot.lane.b32.xlu0 %v1815_v45, %s3465_s25  ;;  %2885 = vst.msk [vmem:[%s6339_s1 + $0x64] ss:$8 sm:$0x3] %vm6_vm4, %v199_v59  }
  0xb9   :  { %v1874_v46 = vsel %vm245_vm0, %v3252_v43, %v3251_v41  ;;  %v3253_v47 = vld [vmem:[%s6338_s0 + $0x30b] ss:$16 sm:%s4807_s15]   ;;  %2886 = vst.msk [vmem:[%s6339_s1 + $0x55] ss:$8 sm:$0xc] %vm6_vm4, %v199_v59   ;;  %v4998_v19 = vpop.permute.xlu1 %876   ;;  %s5287_s5 = smov 3 }
  0xba   :  { %v3254_v48 = vld [vmem:[%s6338_s0 + $0x30b] ss:$16 sm:%s1881_s2]   ;;  %s1917_s2 = smov 12  ;;  %v1879_v51 = vsel %vm250_vm1, %v3253_v47, %v1874_v46  ;;  %2887 = vst.msk [vmem:[%s6339_s1 + $0x46] ss:$8 sm:$0x30] %vm6_vm4, %v199_v59  }
  0xbb   :  { %v3246_v52 = vld [vmem:[%s6338_s0 + $0x20b] ss:$16 sm:%s1845_s26]   ;;  %s1927_s26 = smov 192  ;;  %v1884_v56 = vsel %vm255_vm2, %v3254_v48, %v1879_v51  ;;  %2888 = vst.msk [vmem:[%s6339_s1 + $0x37] ss:$8 sm:$0xc0] %vm6_vm4, %v199_v59  }
  0xbc   :  { %v3247_v57 = vld [vmem:[%s6338_s0 + $0x20b] ss:$16 sm:%s4836_s19]   ;;  %1885 = vrot.lane.b32.xlu1 %v1884_v56, %s3465_s25  ;;  %2919 = vst.msk [vmem:[%s6339_s1 + $0x60] sm:$0xff] %vm259_vm6, %v4274_v28   ;;  %s2510_s15 = smov 3 }
  0xbd   :  { %v3248_v58 = vld [vmem:[%s6338_s0 + $0x20b] ss:$16 sm:%s1853_s30]   ;;  %s4902_s30 = smov 3  ;;  %v1851_v63 = vsel %vm245_vm0, %v3247_v57, %v3246_v52  ;;  %v3261_v4 = vld [vmem:[%s6338_s0 + $0x183] ss:$16 sm:%s4871_s27]   ;;  %s4995_s27 = smov 12  ;;  %v5072_v40 = vpop.permute.xlu1 %922  }
  0xbe   :  { %v3249_v0 = vld [vmem:[%s6338_s0 + $0x20b] ss:$16 sm:%s1858_s4]   ;;  %v1856_v2 = vsel %vm250_vm1, %v3248_v58, %v1851_v63  ;;  %v3262_v7 = vld [vmem:[%s6338_s0 + $0x183] ss:$16 sm:%s1917_s2]   ;;  %s1904_s2 = smov 192 }
  0xbf   :  { %2939 = vst.msk [vmem:[%s6339_s1 + $0x68] sm:$0xff] %vm259_vm6, %v4346_v60   ;;  %v1861_v28 = vsel %vm255_vm2, %v3249_v0, %v1856_v2  ;;  %v1920_v60 = vsel %vm245_vm0, %v3262_v7, %v3261_v4  ;;  %v3263_v8 = vld [vmem:[%s6338_s0 + $0x183] ss:$16 sm:%s4882_s29]   ;;  %v2854_v13 = vld [vmem:[%s6338_s0 + $0x200] ss:$8 sm:$0xf0]  }
  0xc0   :  { %v3264_v9 = vld [vmem:[%s6338_s0 + $0x183] ss:$16 sm:%s1927_s26]   ;;  %s1963_s26 = smov 12  ;;  %2998 = vst.msk [vmem:[%s6339_s1 + $0x60] sm:$0xff] %vm626_vm5, %v4675_v53   ;;  %3018 = vst.msk [vmem:[%s6339_s1 + $0x68] sm:$0xff] %vm626_vm5, %v785_v37   ;;  %v4975_v53 = vpop.permute.xlu0 %807   ;;  %v1925_v10 = vsel %vm250_vm1, %v3263_v8, %v1920_v60  ;;  %v124_v18 = vsel %vm4_vm3, %v2854_v13, %v2853_v1  ;;  %s5440_s29 = smov 12 }
  0xc1   :  { %1862 = vrot.lane.b32.xlu0 %v1861_v28, %s3465_s25  ;;  %v3256_v11 = vld [vmem:[%s6338_s0 + $0x83] ss:$16 sm:%s4902_s30]   ;;  %s1973_s30 = smov 192  ;;  %v1930_v15 = vsel %vm255_vm2, %v3264_v9, %v1925_v10  ;;  %2855 = vst.msk [vmem:[%s6339_s1 + $0x40] ss:$8 sm:$0x3] %vm6_vm4, %v124_v18  }
  0xc2   :  { %v3257_v16 = vld [vmem:[%s6338_s0 + $0x83] ss:$16 sm:%s4904_s13]   ;;  %1931 = vrot.lane.b32.xlu1 %v1930_v15, %s3465_s25  ;;  %2856 = vst.msk [vmem:[%s6339_s1 + $0x31] ss:$8 sm:$0xc] %vm6_vm4, %v124_v18   ;;  %s5045_s13 = smov 48 }
  0xc3   :  { %v3258_v17 = vld [vmem:[%s6338_s0 + $0x83] ss:$16 sm:%s4914_s6]   ;;  %s1937_s6 = smov 3  ;;  %v1897_v21 = vsel %vm245_vm0, %v3257_v16, %v3256_v11  ;;  %2857 = vst.msk [vmem:[%s6339_s1 + $0x22] ss:$8 sm:$0x30] %vm6_vm4, %v124_v18   ;;  %v5163_v0 = vpop.permute.xlu1 %968  }
  0xc4   :  { %v3259_v23 = vld [vmem:[%s6338_s0 + $0x83] ss:$16 sm:%s1904_s2]   ;;  %s1945_s2 = smov 48  ;;  %2858 = vst.msk [vmem:[%s6339_s1 + $0x13] ss:$8 sm:$0xc0] %vm6_vm4, %v124_v18   ;;  %v1902_v54 = vsel %vm250_vm1, %v3258_v17, %v1897_v21  ;;  %v5047_v33 = vpop.permute.xlu0 %853  }
  0xc5   :  { %v2859_v22 = vld [vmem:[%s6338_s0 + $0x240] ss:$8 sm:$0xf]   ;;  %v3271_v25 = vld [vmem:[%s6338_s0 + $0x383] ss:$16 sm:%s4943_s7]   ;;  %v1907_v27 = vsel %vm255_vm2, %v3259_v23, %v1902_v54  ;;  %s5396_s7 = smov 12 }
  0xc6   :  { %v3272_v26 = vld [vmem:[%s6338_s0 + $0x383] ss:$16 sm:%s1963_s26]   ;;  %s1950_s26 = smov 192  ;;  %1908 = vrot.lane.b32.xlu0 %v1907_v27, %s3465_s25  ;;  %v2860_v36 = vld [vmem:[%s6338_s0 + $0x240] ss:$8 sm:$0xf0]  }
  0xc7   :  { %v1966_v29 = vsel %vm245_vm0, %v3272_v26, %v3271_v25  ;;  %v3273_v30 = vld [vmem:[%s6338_s0 + $0x383] ss:$16 sm:%s4964_s3]   ;;  %v139_v44 = vsel %vm4_vm3, %v2860_v36, %v2859_v22  ;;  %v2841_v45 = vld [vmem:[%s6338_s0 + $0x180] ss:$8 sm:$0xf]   ;;  %v1014_v54 = vpop.permute.xlu1 %1013   ;;  %s2248_s3 = smov 192 }
  0xc8   :  { %v3274_v32 = vld [vmem:[%s6338_s0 + $0x383] ss:$16 sm:%s1973_s30]   ;;  %s5043_s30 = smov 12  ;;  %v1971_v34 = vsel %vm250_vm1, %v3273_v30, %v1966_v29  ;;  %2861 = vst.msk [vmem:[%s6339_s1 + $0x44] ss:$8 sm:$0x3] %vm6_vm4, %v139_v44  }
  0xc9   :  { %v3266_v35 = vld [vmem:[%s6338_s0 + $0x283] ss:$16 sm:%s1937_s6]   ;;  %v1976_v37 = vsel %vm255_vm2, %v3274_v32, %v1971_v34  ;;  %2862 = vst.msk [vmem:[%s6339_s1 + $0x35] ss:$8 sm:$0xc] %vm6_vm4, %v139_v44   ;;  %s5320_s6 = smov 3 }
  0xca   :  { %v3267_v39 = vld [vmem:[%s6338_s0 + $0x283] ss:$16 sm:%s4995_s27]   ;;  %1977 = vrot.lane.b32.xlu1 %v1976_v37, %s3465_s25  ;;  %2863 = vst.msk [vmem:[%s6339_s1 + $0x26] ss:$8 sm:$0x30] %vm6_vm4, %v139_v44   ;;  %s5117_s27 = smov 3 }
  0xcb   :  { %v3268_v38 = vld [vmem:[%s6338_s0 + $0x283] ss:$16 sm:%s1945_s2]   ;;  %s5068_s2 = smov 3  ;;  %v1943_v41 = vsel %vm245_vm0, %v3267_v39, %v3266_v35  ;;  %2864 = vst.msk [vmem:[%s6339_s1 + $0x17] ss:$8 sm:$0xc0] %vm6_vm4, %v139_v44  }
  0xcc   :  { %v3269_v43 = vld [vmem:[%s6338_s0 + $0x283] ss:$16 sm:%s1950_s26]   ;;  %v1948_v46 = vsel %vm250_vm1, %v3268_v38, %v1943_v41  ;;  %2914 = vst.msk [vmem:[%s6339_s1 + $0x40] sm:$0xff] %vm259_vm6, %v4243_v14   ;;  %2934 = vst.msk [vmem:[%s6339_s1 + $0x48] sm:$0xff] %vm259_vm6, %v4368_v6   ;;  %s2151_s26 = smov 48 }
  0xcd   :  { %v3281_v14 = vld [vmem:[%s6338_s0 + $0x18b] ss:$16 sm:%s5032_s23]   ;;  %v1953_v47 = vsel %vm255_vm2, %v3269_v43, %v1948_v46  ;;  %2993 = vst.msk [vmem:[%s6339_s1 + $0x40] sm:$0xff] %vm626_vm5, %v4722_v3   ;;  %3013 = vst.msk [vmem:[%s6339_s1 + $0x48] sm:$0xff] %vm626_vm5, %v4884_v50   ;;  %v5141_v50 = vpop.permute.xlu0 %899   ;;  %v1060_v43 = vpop.permute.xlu1 %1059   ;;  %s2294_s23 = smov 192 }
  0xce   :  { %v3282_v6 = vld [vmem:[%s6338_s0 + $0x18b] ss:$16 sm:%s5043_s30]   ;;  %s1996_s30 = smov 192  ;;  %1954 = vrot.lane.b32.xlu0 %v1953_v47, %s3465_s25  ;;  %v2842_v56 = vld [vmem:[%s6338_s0 + $0x180] ss:$8 sm:$0xf0]  }
  0xcf   :  { %v2012_v3 = vsel %vm245_vm0, %v3282_v6, %v3281_v14  ;;  %v3283_v48 = vld [vmem:[%s6338_s0 + $0x18b] ss:$16 sm:%s5045_s13]   ;;  %v94_v63 = vsel %vm4_vm3, %v2842_v56, %v2841_v45  ;;  %v2847_v4 = vld [vmem:[%s6338_s0 + $0x1c0] ss:$8 sm:$0xf]   ;;  %3067 = vst.msk [vmem:[%s6339_s1 + $0x20] sm:$0xff] %vm993_vm7, %v1014_v54  }
  0xd0   :  { %v3284_v51 = vld [vmem:[%s6338_s0 + $0x18b] ss:$16 sm:%s5057_s8]   ;;  %s2055_s8 = smov 12  ;;  %v2017_v52 = vsel %vm250_vm1, %v3283_v48, %v2012_v3  ;;  %2843 = vst.msk [vmem:[%s6339_s1 + $0x30] ss:$8 sm:$0x3] %vm6_vm4, %v94_v63  }
  0xd1   :  { %v3276_v55 = vld [vmem:[%s6338_s0 + $0x8b] ss:$16 sm:%s5068_s2]   ;;  %s2065_s2 = smov 192  ;;  %v2022_v57 = vsel %vm255_vm2, %v3284_v51, %v2017_v52  ;;  %2844 = vst.msk [vmem:[%s6339_s1 + $0x21] ss:$8 sm:$0xc] %vm6_vm4, %v94_v63   ;;  %v5206_v13 = vpop.permute.xlu0 %945  }
  0xd2   :  { %v3277_v58 = vld [vmem:[%s6338_s0 + $0x8b] ss:$16 sm:%s5070_s22]   ;;  %2023 = vrot.lane.b32.xlu1 %v2022_v57, %s3465_s25  ;;  %2845 = vst.msk [vmem:[%s6339_s1 + $0x12] ss:$8 sm:$0x30] %vm6_vm4, %v94_v63   ;;  %s2220_s13 = smov 48 }
  0xd3   :  { %v3278_v59 = vld [vmem:[%s6338_s0 + $0x8b] ss:$16 sm:%s1991_s24]   ;;  %s2029_s24 = smov 3  ;;  %v1989_v1 = vsel %vm245_vm0, %v3277_v58, %v3276_v55  ;;  %2846 = vst.msk [vmem:[%s6339_s1 + $0x3] ss:$8 sm:$0xc0] %vm6_vm4, %v94_v63  }
  0xd4   :  { %v3279_v2 = vld [vmem:[%s6338_s0 + $0x8b] ss:$16 sm:%s1996_s30]   ;;  %v1994_v7 = vsel %vm250_vm1, %v3278_v59, %v1989_v1  ;;  %v2848_v17 = vld [vmem:[%s6338_s0 + $0x1c0] ss:$8 sm:$0xf0]   ;;  %3077 = vst.msk [vmem:[%s6339_s1 + $0x60] sm:$0xff] %vm993_vm7, %v1060_v43   ;;  %v1106_v1 = vpop.permute.xlu1 %1105  }
  0xd5   :  { %v3291_v28 = vld [vmem:[%s6338_s0 + $0x38b] ss:$16 sm:%s5117_s27]   ;;  %v1999_v8 = vsel %vm255_vm2, %v3279_v2, %v1994_v7  ;;  %v109_v22 = vsel %vm4_vm3, %v2848_v17, %v2847_v4  ;;  %v2817_v27 = vld [vmem:[%s6338_s0 + $0x80] ss:$8 sm:$0xf]   ;;  %s2123_s27 = smov 12 }
  0xd6   :  { %v3292_v60 = vld [vmem:[%s6338_s0 + $0x38b] ss:$16 sm:%s2055_s8]   ;;  %s2042_s8 = smov 192  ;;  %2000 = vrot.lane.b32.xlu0 %v1999_v8, %s3465_s25  ;;  %2849 = vst.msk [vmem:[%s6339_s1 + $0x34] ss:$8 sm:$0x3] %vm6_vm4, %v109_v22  }
  0xd7   :  { %v2058_v9 = vsel %vm245_vm0, %v3292_v60, %v3291_v28  ;;  %v3293_v10 = vld [vmem:[%s6338_s0 + $0x38b] ss:$16 sm:%s5134_s11]   ;;  %2850 = vst.msk [vmem:[%s6339_s1 + $0x25] ss:$8 sm:$0xc] %vm6_vm4, %v109_v22   ;;  %s2284_s11 = smov 12 }
  0xd8   :  { %v3294_v11 = vld [vmem:[%s6338_s0 + $0x38b] ss:$16 sm:%s2065_s2]   ;;  %s2097_s2 = smov 3  ;;  %v2063_v15 = vsel %vm250_vm1, %v3293_v10, %v2058_v9  ;;  %2851 = vst.msk [vmem:[%s6339_s1 + $0x16] ss:$8 sm:$0x30] %vm6_vm4, %v109_v22   ;;  %v1152_v54 = vpop.permute.xlu1 %1151  }
  0xd9   :  { %v3286_v16 = vld [vmem:[%s6338_s0 + $0x28b] ss:$16 sm:%s2029_s24]   ;;  %s2105_s24 = smov 48  ;;  %v2068_v18 = vsel %vm255_vm2, %v3294_v11, %v2063_v15  ;;  %2852 = vst.msk [vmem:[%s6339_s1 + $0x7] ss:$8 sm:$0xc0] %vm6_vm4, %v109_v22  }
  0xda   :  { %v3287_v21 = vld [vmem:[%s6338_s0 + $0x28b] ss:$16 sm:%s5160_s17]   ;;  %2069 = vrot.lane.b32.xlu1 %v2068_v18, %s3465_s25  ;;  %2949 = vst.msk [vmem:[%s6339_s1 + $0x30] sm:$0xff] %vm259_vm6, %v4382_v12  }
  0xdb   :  { %v3288_v23 = vld [vmem:[%s6338_s0 + $0x28b] ss:$16 sm:%s2037_s9]   ;;  %s2110_s9 = smov 192  ;;  %v2035_v25 = vsel %vm245_vm0, %v3287_v21, %v3286_v16  ;;  %v3300_v30 = vld [vmem:[%s6338_s0 + $0x102] ss:$16 sm:%s2097_s2]   ;;  %s5318_s2 = smov 192 }
  0xdc   :  { %v3289_v26 = vld [vmem:[%s6338_s0 + $0x28b] ss:$16 sm:%s2042_s8]   ;;  %v2040_v29 = vsel %vm250_vm1, %v3288_v23, %v2035_v25  ;;  %v3301_v32 = vld [vmem:[%s6338_s0 + $0x102] ss:$16 sm:%s2100_s28]   ;;  %s2083_s28 = smov 48  ;;  %s2235_s8 = smov 3 }
  0xdd   :  { %2969 = vst.msk [vmem:[%s6339_s1 + $0x38] sm:$0xff] %vm259_vm6, %v4456_v49   ;;  %v2045_v12 = vsel %vm255_vm2, %v3289_v26, %v2040_v29  ;;  %v2103_v49 = vsel %vm245_vm0, %v3301_v32, %v3300_v30  ;;  %v3302_v34 = vld [vmem:[%s6338_s0 + $0x102] ss:$16 sm:%s2105_s24]   ;;  %v2818_v39 = vld [vmem:[%s6338_s0 + $0x80] ss:$8 sm:$0xf0]  }
  0xde   :  { %v3303_v35 = vld [vmem:[%s6338_s0 + $0x102] ss:$16 sm:%s2110_s9]   ;;  %3028 = vst.msk [vmem:[%s6339_s1 + $0x30] sm:$0xff] %vm626_vm5, %v4907_v61   ;;  %3048 = vst.msk [vmem:[%s6339_s1 + $0x38] sm:$0xff] %vm626_vm5, %v5072_v40   ;;  %v992_v61 = vpop.permute.xlu0 %991   ;;  %v2108_v36 = vsel %vm250_vm1, %v3302_v34, %v2103_v49  ;;  %v34_v41 = vsel %vm4_vm3, %v2818_v39, %v2817_v27  ;;  %v1198_v34 = vpop.permute.xlu1 %1197  }
  0xdf   :  { %2046 = vrot.lane.b32.xlu0 %v2045_v12, %s3465_s25  ;;  %v3296_v37 = vld [vmem:[%s6338_s0 + $0x2] ss:$16 sm:%s5224_s10]   ;;  %994 = vst.msk [vmem:[%s6339_s1] sm:$0xff] %vm993_vm7, %v992_v61   ;;  %v2113_v38 = vsel %vm255_vm2, %v3303_v35, %v2108_v36  ;;  %s2225_s25 = smov 192 }
  0xe0   :  { %v3297_v44 = vld [vmem:[%s6338_s0 + $0x2] ss:$16 sm:%s5232_s18]   ;;  %2819 = vst.msk [vmem:[%s6339_s1 + $0x10] ss:$8 sm:$0x3] %vm6_vm4, %v34_v41   ;;  %s5422_s18 = smov 192 }
  0xe1   :  { %v3298_v40 = vld [vmem:[%s6338_s0 + $0x2] ss:$16 sm:%s2083_s28]   ;;  %s3466_s28 = smov 32   ;;  %v2081_v45 = vsel %vm245_vm0, %v3297_v44, %v3296_v37  ;;  %2820 = vst.msk [vmem:[%s6339_s1 + $0x1] ss:$8 sm:$0xc] %vm6_vm4, %v34_v41  }
  0xe2   :  { %2114 = vrot.lane.b32.xlu1 %v2113_v38, %s3466_s28  ;;  %v3299_v46 = vld [vmem:[%s6338_s0 + $0x2] ss:$16 sm:%s2088_s16]   ;;  %2821 = vst.msk [vmem:[%s6339_s1 - $0xe] ss:$8 sm:$0x30] %vm6_vm4, %v34_v41   ;;  %v2086_v6 = vsel %vm250_vm1, %v3298_v40, %v2081_v45  ;;  %v1037_v56 = vpop.permute.xlu0 %1036  }
  0xe3   :  { %2822 = vst.msk [vmem:[%s6339_s1 - $0x1d] ss:$8 sm:$0xc0] %vm6_vm4, %v34_v41   ;;  %v2823_v14 = vld [vmem:[%s6338_s0 + $0xc0] ss:$8 sm:$0xf]   ;;  %v2091_v48 = vsel %vm255_vm2, %v3299_v46, %v2086_v6 }
  0xe4   :  { %v2824_v47 = vld [vmem:[%s6338_s0 + $0xc0] ss:$8 sm:$0xf0]   ;;  %v3310_v3 = vld [vmem:[%s6338_s0 + $0x302] ss:$16 sm:%s5287_s5]   ;;  %s5358_s5 = smov 48  ;;  %2092 = vrot.lane.b32.xlu0 %v2091_v48, %s3466_s28 }
  0xe5   :  { %v49_v51 = vsel %vm4_vm3, %v2824_v47, %v2823_v14  ;;  %v3311_v52 = vld [vmem:[%s6338_s0 + $0x302] ss:$16 sm:%s5289_s21]   ;;  %v2889_v59 = vld [vmem:[%s6338_s0 + $0x380] ss:$8 sm:$0xf]   ;;  %3072 = vst.msk [vmem:[%s6339_s1 + $0x40] sm:$0xff] %vm993_vm7, %v1037_v56  }
  0xe6   :  { %v3312_v55 = vld [vmem:[%s6338_s0 + $0x302] ss:$16 sm:%s2151_s26]   ;;  %s2133_s26 = smov 192  ;;  %2825 = vst.msk [vmem:[%s6339_s1 + $0x14] ss:$8 sm:$0x3] %vm6_vm4, %v49_v51   ;;  %v2149_v57 = vsel %vm245_vm0, %v3311_v52, %v3310_v3  ;;  %v1083_v15 = vpop.permute.xlu0 %1082   ;;  %v1244_v3 = vpop.permute.xlu1 %1243  }
  0xe7   :  { %2826 = vst.msk [vmem:[%s6339_s1 + $0x5] ss:$8 sm:$0xc] %vm6_vm4, %v49_v51   ;;  %2827 = vst.msk [vmem:[%s6339_s1 - $0xa] ss:$8 sm:$0x30] %vm6_vm4, %v49_v51  }
  0xe8   :  { %2828 = vst.msk [vmem:[%s6339_s1 - $0x19] ss:$8 sm:$0xc0] %vm6_vm4, %v49_v51   ;;  %v3313_v58 = vld [vmem:[%s6338_s0 + $0x302] ss:$16 sm:%s5318_s2]   ;;  %s2289_s21 = smov 48 }
  0xe9   :  { %2944 = vst.msk [vmem:[%s6339_s1 + $0x10] sm:$0xff] %vm259_vm6, %v4404_v24   ;;  %2964 = vst.msk [vmem:[%s6339_s1 + $0x18] sm:$0xff] %vm259_vm6, %v4491_v62   ;;  %v2154_v24 = vsel %vm250_vm1, %v3312_v55, %v2149_v57  ;;  %v3305_v62 = vld [vmem:[%s6338_s0 + $0x202] ss:$16 sm:%s5320_s6]   ;;  %s2518_s6 = smov 48 }
  0xea   :  { %v3306_v63 = vld [vmem:[%s6338_s0 + $0x202] ss:$16 sm:%s2123_s27]   ;;  %s5420_s27 = smov 48  ;;  %3023 = vst.msk [vmem:[%s6339_s1 + $0x10] sm:$0xff] %vm626_vm5, %v4975_v53   ;;  %v2159_v53 = vsel %vm255_vm2, %v3313_v58, %v2154_v24  ;;  %3043 = vst.msk [vmem:[%s6339_s1 + $0x18] sm:$0xff] %vm626_vm5, %v5141_v50   ;;  %v1129_v29 = vpop.permute.xlu0 %1128  }
  0xeb   :  { %v2126_v2 = vsel %vm245_vm0, %v3306_v63, %v3305_v62  ;;  %v3307_v4 = vld [vmem:[%s6338_s0 + $0x202] ss:$16 sm:%s5358_s5]   ;;  %3087 = vst.msk [vmem:[%s6339_s1 + $0x28] sm:$0xff] %vm993_vm7, %v1106_v1   ;;  %2160 = vrot.lane.b32.xlu1 %v2159_v53, %s3466_s28 }
  0xec   :  { %v3308_v7 = vld [vmem:[%s6338_s0 + $0x202] ss:$16 sm:%s2133_s26]   ;;  %s5438_s26 = smov 3  ;;  %v2131_v50 = vsel %vm250_vm1, %v3307_v4, %v2126_v2  ;;  %v2890_v28 = vld [vmem:[%s6338_s0 + $0x380] ss:$8 sm:$0xf0]  }
  0xed   :  { %v2895_v60 = vld [vmem:[%s6338_s0 + $0x3c0] ss:$8 sm:$0xf]   ;;  %v2136_v8 = vsel %vm255_vm2, %v3308_v7, %v2131_v50  ;;  %v214_v9 = vsel %vm4_vm3, %v2890_v28, %v2889_v59  ;;  %3082 = vst.msk [vmem:[%s6339_s1 + $0x8] sm:$0xff] %vm993_vm7, %v1083_v15   ;;  %v3320_v22 = vld [vmem:[%s6338_s0 + $0x10a] ss:$16 sm:%s5369_s12]   ;;  %v1290_v7 = vpop.permute.xlu1 %1289  }
  0xee   :  { %v2896_v10 = vld [vmem:[%s6338_s0 + $0x3c0] ss:$8 sm:$0xf0]   ;;  %2137 = vrot.lane.b32.xlu0 %v2136_v8, %s3466_s28  ;;  %2891 = vst.msk [vmem:[%s6339_s1 + $0x70] ss:$8 sm:$0x3] %vm6_vm4, %v214_v9   ;;  %v1175_v43 = vpop.permute.xlu0 %1174  }
  0xef   :  { %v2865_v11 = vld [vmem:[%s6338_s0 + $0x280] ss:$8 sm:$0xf]   ;;  %2892 = vst.msk [vmem:[%s6339_s1 + $0x61] ss:$8 sm:$0xc] %vm6_vm4, %v214_v9   ;;  %v229_v16 = vsel %vm4_vm3, %v2896_v10, %v2895_v60 }
  0xf0   :  { %2893 = vst.msk [vmem:[%s6339_s1 + $0x52] ss:$8 sm:$0x30] %vm6_vm4, %v214_v9   ;;  %2894 = vst.msk [vmem:[%s6339_s1 + $0x43] ss:$8 sm:$0xc0] %vm6_vm4, %v214_v9  }
  0xf1   :  { %v2866_v17 = vld [vmem:[%s6338_s0 + $0x280] ss:$8 sm:$0xf0]   ;;  %2897 = vst.msk [vmem:[%s6339_s1 + $0x74] ss:$8 sm:$0x3] %vm6_vm4, %v229_v16  }
  0xf2   :  { %v2871_v18 = vld [vmem:[%s6338_s0 + $0x2c0] ss:$8 sm:$0xf]   ;;  %2898 = vst.msk [vmem:[%s6339_s1 + $0x65] ss:$8 sm:$0xc] %vm6_vm4, %v229_v16   ;;  %v154_v21 = vsel %vm4_vm3, %v2866_v17, %v2865_v11  ;;  %v1221_v62 = vpop.permute.xlu0 %1220  }
  0xf3   :  { %2899 = vst.msk [vmem:[%s6339_s1 + $0x56] ss:$8 sm:$0x30] %vm6_vm4, %v229_v16   ;;  %2900 = vst.msk [vmem:[%s6339_s1 + $0x47] ss:$8 sm:$0xc0] %vm6_vm4, %v229_v16  }
  0xf4   :  { %v2872_v23 = vld [vmem:[%s6338_s0 + $0x2c0] ss:$8 sm:$0xf0]   ;;  %s2174_s12 = smov 48  ;;  %2959 = vst.msk [vmem:[%s6339_s1 + $0x70] sm:$0xff] %vm259_vm6, %v4418_v31   ;;  %2979 = vst.msk [vmem:[%s6339_s1 + $0x78] sm:$0xff] %vm259_vm6, %v4515_v5  }
  0xf5   :  { %2867 = vst.msk [vmem:[%s6339_s1 + $0x50] ss:$8 sm:$0x3] %vm6_vm4, %v154_v21   ;;  %2868 = vst.msk [vmem:[%s6339_s1 + $0x41] ss:$8 sm:$0xc] %vm6_vm4, %v154_v21   ;;  %v169_v31 = vsel %vm4_vm3, %v2872_v23, %v2871_v18 }
  0xf6   :  { %2869 = vst.msk [vmem:[%s6339_s1 + $0x32] ss:$8 sm:$0x30] %vm6_vm4, %v154_v21   ;;  %2870 = vst.msk [vmem:[%s6339_s1 + $0x23] ss:$8 sm:$0xc0] %vm6_vm4, %v154_v21   ;;  %v1267_v17 = vpop.permute.xlu0 %1266  }
  0xf7   :  { %v3321_v5 = vld [vmem:[%s6338_s0 + $0x10a] ss:$16 sm:%s5396_s7]   ;;  %3097 = vst.msk [vmem:[%s6339_s1 + $0x68] sm:$0xff] %vm993_vm7, %v1152_v54   ;;  %3092 = vst.msk [vmem:[%s6339_s1 + $0x48] sm:$0xff] %vm993_vm7, %v1129_v29  }
  0xf8   :  { %v3322_v25 = vld [vmem:[%s6338_s0 + $0x10a] ss:$16 sm:%s5420_s27]   ;;  %s2179_s27 = smov 192  ;;  %3038 = vst.msk [vmem:[%s6339_s1 + $0x70] sm:$0xff] %vm626_vm5, %v4998_v19   ;;  %v2195_v19 = vsel %vm245_vm0, %v3321_v5, %v3320_v22  ;;  %3058 = vst.msk [vmem:[%s6339_s1 + $0x78] sm:$0xff] %vm626_vm5, %v5163_v0  }
  0xf9   :  { %2873 = vst.msk [vmem:[%s6339_s1 + $0x54] ss:$8 sm:$0x3] %vm6_vm4, %v169_v31   ;;  %2874 = vst.msk [vmem:[%s6339_s1 + $0x45] ss:$8 sm:$0xc] %vm6_vm4, %v169_v31  }
  0xfa   :  { %2875 = vst.msk [vmem:[%s6339_s1 + $0x36] ss:$8 sm:$0x30] %vm6_vm4, %v169_v31   ;;  %2876 = vst.msk [vmem:[%s6339_s1 + $0x27] ss:$8 sm:$0xc0] %vm6_vm4, %v169_v31   ;;  %v1336_v31 = vpop.permute.xlu1 %1335  }
  0xfb   :  { %v3323_v26 = vld [vmem:[%s6338_s0 + $0x10a] ss:$16 sm:%s5422_s18]   ;;  %2954 = vst.msk [vmem:[%s6339_s1 + $0x50] sm:$0xff] %vm259_vm6, %v4440_v42   ;;  %2974 = vst.msk [vmem:[%s6339_s1 + $0x58] sm:$0xff] %vm259_vm6, %v4568_v20   ;;  %v2200_v42 = vsel %vm250_vm1, %v3322_v25, %v2195_v19  ;;  %s2215_s18 = smov 12 }
  0xfc   :  { %v3315_v27 = vld [vmem:[%s6338_s0 + $0xa] ss:$16 sm:%s5438_s26]   ;;  %s2238_s26 = smov 12  ;;  %3033 = vst.msk [vmem:[%s6339_s1 + $0x50] sm:$0xff] %vm626_vm5, %v5047_v33   ;;  %v2205_v33 = vsel %vm255_vm2, %v3323_v26, %v2200_v42  ;;  %3053 = vst.msk [vmem:[%s6339_s1 + $0x58] sm:$0xff] %vm626_vm5, %v5206_v13  }
  0xfd   :  { %v3316_v20 = vld [vmem:[%s6338_s0 + $0xa] ss:$16 sm:%s5440_s29]   ;;  %2206 = vrot.lane.b32.xlu1 %v2205_v33, %s3466_s28  ;;  %3107 = vst.msk [vmem:[%s6339_s1 + $0x30] sm:$0xff] %vm993_vm7, %v1198_v34   ;;  %s2281_s29 = smov 3  ;;  %v1313_v33 = vpop.permute.xlu0 %1312  }
  0xfe   :  { %v3317_v0 = vld [vmem:[%s6338_s0 + $0xa] ss:$16 sm:%s2174_s12]   ;;  %s2243_s12 = smov 48  ;;  %v2172_v30 = vsel %vm245_vm0, %v3316_v20, %v3315_v27  ;;  %3102 = vst.msk [vmem:[%s6339_s1 + $0x10] sm:$0xff] %vm993_vm7, %v1175_v43   ;;  %3117 = vst.msk [vmem:[%s6339_s1 + $0x70] sm:$0xff] %vm993_vm7, %v1244_v3   ;;  %v1381_v34 = vpop.permute.xlu1 %1380  }
  0xff   :  { %v3318_v32 = vld [vmem:[%s6338_s0 + $0xa] ss:$16 sm:%s2179_s27]   ;;  %v2177_v13 = vsel %vm250_vm1, %v3317_v0, %v2172_v30  ;;  %v3340_v6 = vld [vmem:[%s6338_s0 + $0x182] ss:$16 sm:%s2281_s29]   ;;  %s2327_s29 = smov 3 }
 0x100   :  { %v3330_v12 = vld [vmem:[%s6338_s0 + $0x30a] ss:$16 sm:%s2235_s8]   ;;  %s2212_s8 = smov 3  ;;  %v2182_v35 = vsel %vm255_vm2, %v3318_v32, %v2177_v13  ;;  %v3341_v47 = vld [vmem:[%s6338_s0 + $0x182] ss:$16 sm:%s2284_s11]   ;;  %s2330_s11 = smov 12 }
 0x101   :  { %v3331_v49 = vld [vmem:[%s6338_s0 + $0x30a] ss:$16 sm:%s2238_s26]   ;;  %2183 = vrot.lane.b32.xlu0 %v2182_v35, %s3466_s28  ;;  %v2287_v51 = vsel %vm245_vm0, %v3341_v47, %v3340_v6  ;;  %3112 = vst.msk [vmem:[%s6339_s1 + $0x50] sm:$0xff] %vm993_vm7, %v1221_v62   ;;  %v1359_v43 = vpop.permute.xlu0 %1358  }
 0x102   :  { %v2241_v61 = vsel %vm245_vm0, %v3331_v49, %v3330_v12  ;;  %v3332_v36 = vld [vmem:[%s6338_s0 + $0x30a] ss:$16 sm:%s2243_s12]   ;;  %v3342_v52 = vld [vmem:[%s6338_s0 + $0x182] ss:$16 sm:%s2289_s21]   ;;  %s2335_s21 = smov 48  ;;  %v1427_v3 = vpop.permute.xlu1 %1426  }
 0x103   :  { %v3333_v37 = vld [vmem:[%s6338_s0 + $0x30a] ss:$16 sm:%s2248_s3]   ;;  %v2246_v39 = vsel %vm250_vm1, %v3332_v36, %v2241_v61  ;;  %v3343_v55 = vld [vmem:[%s6338_s0 + $0x182] ss:$16 sm:%s2294_s23]   ;;  %v2292_v56 = vsel %vm250_vm1, %v3342_v52, %v2287_v51  ;;  %s2340_s23 = smov 192 }
 0x104   :  { %v3325_v38 = vld [vmem:[%s6338_s0 + $0x20a] ss:$16 sm:%s2212_s8]   ;;  %v2251_v44 = vsel %vm255_vm2, %v3333_v37, %v2246_v39  ;;  %s2258_s8 = smov 3  ;;  %v2297_v58 = vsel %vm255_vm2, %v3343_v55, %v2292_v56  ;;  %v3350_v2 = vld [vmem:[%s6338_s0 + $0x382] ss:$16 sm:%s2327_s29]   ;;  %s2373_s29 = smov 3 }
 0x105   :  { %v3326_v40 = vld [vmem:[%s6338_s0 + $0x20a] ss:$16 sm:%s2215_s18]   ;;  %2252 = vrot.lane.b32.xlu1 %v2251_v44, %s3466_s28  ;;  %s2261_s18 = smov 12  ;;  %3127 = vst.msk [vmem:[%s6339_s1 + $0x38] sm:$0xff] %vm993_vm7, %v1290_v7   ;;  %v1404_v62 = vpop.permute.xlu0 %1403  }
 0x106   :  { %v3327_v41 = vld [vmem:[%s6338_s0 + $0x20a] ss:$16 sm:%s2220_s13]   ;;  %v2218_v45 = vsel %vm245_vm0, %v3326_v40, %v3325_v38  ;;  %s2266_s13 = smov 48  ;;  %v3335_v57 = vld [vmem:[%s6338_s0 + $0x82] ss:$16 sm:%s2258_s8]   ;;  %s2304_s8 = smov 3  ;;  %v1473_v7 = vpop.permute.xlu1 %1472  }
 0x107   :  { %v3328_v46 = vld [vmem:[%s6338_s0 + $0x20a] ss:$16 sm:%s2225_s25]   ;;  %v2223_v14 = vsel %vm250_vm1, %v3327_v41, %v2218_v45  ;;  %s2271_s25 = smov 192  ;;  %v3336_v59 = vld [vmem:[%s6338_s0 + $0x82] ss:$16 sm:%s2261_s18]   ;;  %s2307_s18 = smov 12 }
 0x108   :  { %v2228_v48 = vsel %vm255_vm2, %v3328_v46, %v2223_v14  ;;  %v3337_v24 = vld [vmem:[%s6338_s0 + $0x82] ss:$16 sm:%s2266_s13]   ;;  %v2264_v63 = vsel %vm245_vm0, %v3336_v59, %v3335_v57  ;;  %s2312_s13 = smov 48  ;;  %3122 = vst.msk [vmem:[%s6339_s1 + $0x18] sm:$0xff] %vm993_vm7, %v1267_v17   ;;  %3137 = vst.msk [vmem:[%s6339_s1 + $0x78] sm:$0xff] %vm993_vm7, %v1336_v31  }
 0x109   :  { %2229 = vrot.lane.b32.xlu0 %v2228_v48, %s3466_s28  ;;  %2298 = vrot.lane.b32.xlu1 %v2297_v58, %s3466_s28  ;;  %v3338_v1 = vld [vmem:[%s6338_s0 + $0x82] ss:$16 sm:%s2271_s25]   ;;  %v2269_v53 = vsel %vm250_vm1, %v3337_v24, %v2264_v63  ;;  %s2317_s25 = smov 192  ;;  %v1450_v17 = vpop.permute.xlu0 %1449  }
 0x10a   :  { %v3351_v4 = vld [vmem:[%s6338_s0 + $0x382] ss:$16 sm:%s2330_s11]   ;;  %v2274_v50 = vsel %vm255_vm2, %v3338_v1, %v2269_v53  ;;  %s2376_s11 = smov 12  ;;  %v3360_v22 = vld [vmem:[%s6338_s0 + $0x18a] ss:$16 sm:%s2373_s29]   ;;  %s2419_s29 = smov 3  ;;  %v1519_v31 = vpop.permute.xlu1 %1518  }
 0x10b   :  { %v2333_v28 = vsel %vm245_vm0, %v3351_v4, %v3350_v2  ;;  %v3352_v60 = vld [vmem:[%s6338_s0 + $0x382] ss:$16 sm:%s2335_s21]   ;;  %s2381_s21 = smov 48  ;;  %v3361_v54 = vld [vmem:[%s6338_s0 + $0x18a] ss:$16 sm:%s2376_s11]   ;;  %s2422_s11 = smov 12 }
 0x10c   :  { %v3353_v8 = vld [vmem:[%s6338_s0 + $0x382] ss:$16 sm:%s2340_s23]   ;;  %v2338_v9 = vsel %vm250_vm1, %v3352_v60, %v2333_v28  ;;  %s2386_s23 = smov 192  ;;  %v2379_v25 = vsel %vm245_vm0, %v3361_v54, %v3360_v22  ;;  %v3362_v19 = vld [vmem:[%s6338_s0 + $0x18a] ss:$16 sm:%s2381_s21]   ;;  %s2427_s21 = smov 48 }
 0x10d   :  { %2275 = vrot.lane.b32.xlu0 %v2274_v50, %s3466_s28  ;;  %v3345_v10 = vld [vmem:[%s6338_s0 + $0x282] ss:$16 sm:%s2304_s8]   ;;  %v2343_v11 = vsel %vm255_vm2, %v3353_v8, %v2338_v9  ;;  %s2350_s8 = smov 3  ;;  %v2384_v27 = vsel %vm250_vm1, %v3362_v19, %v2379_v25  ;;  %3132 = vst.msk [vmem:[%s6339_s1 + $0x58] sm:$0xff] %vm993_vm7, %v1313_v33   ;;  %v1496_v33 = vpop.permute.xlu0 %1495  }
 0x10e   :  { %v3346_v15 = vld [vmem:[%s6338_s0 + $0x282] ss:$16 sm:%s2307_s18]   ;;  %2344 = vrot.lane.b32.xlu1 %v2343_v11, %s3466_s28  ;;  %s2353_s18 = smov 12  ;;  %3146 = vst.msk [vmem:[%s6339_s1 + $0x20] sm:$0xff] %vm1360_vm8, %v1381_v34   ;;  %v1565_v34 = vpop.permute.xlu1 %1564  }
 0x10f   :  { %v3347_v16 = vld [vmem:[%s6338_s0 + $0x282] ss:$16 sm:%s2312_s13]   ;;  %v2310_v18 = vsel %vm245_vm0, %v3346_v15, %v3345_v10  ;;  %s2358_s13 = smov 48  ;;  %v3363_v26 = vld [vmem:[%s6338_s0 + $0x18a] ss:$16 sm:%s2386_s23]   ;;  %s2432_s23 = smov 192 }
 0x110   :  { %v3348_v21 = vld [vmem:[%s6338_s0 + $0x282] ss:$16 sm:%s2317_s25]   ;;  %v2315_v23 = vsel %vm250_vm1, %v3347_v16, %v2310_v18  ;;  %s2363_s25 = smov 192  ;;  %v3355_v42 = vld [vmem:[%s6338_s0 + $0x8a] ss:$16 sm:%s2350_s8]   ;;  %v2389_v20 = vsel %vm255_vm2, %v3363_v26, %v2384_v27  ;;  %s2396_s8 = smov 3 }
 0x111   :  { %v2320_v5 = vsel %vm255_vm2, %v3348_v21, %v2315_v23  ;;  %v3356_v0 = vld [vmem:[%s6338_s0 + $0x8a] ss:$16 sm:%s2353_s18]   ;;  %s2399_s18 = smov 12  ;;  %1361 = vst.msk [vmem:[%s6339_s1] sm:$0xff] %vm1360_vm8, %v1359_v43   ;;  %3156 = vst.msk [vmem:[%s6339_s1 + $0x60] sm:$0xff] %vm1360_vm8, %v1427_v3   ;;  %v1542_v43 = vpop.permute.xlu0 %1541  }
 0x112   :  { %2321 = vrot.lane.b32.xlu0 %v2320_v5, %s3466_s28  ;;  %v3357_v29 = vld [vmem:[%s6338_s0 + $0x8a] ss:$16 sm:%s2358_s13]   ;;  %2390 = vrot.lane.b32.xlu1 %v2389_v20, %s3466_s28  ;;  %v2356_v30 = vsel %vm245_vm0, %v3356_v0, %v3355_v42  ;;  %s2404_s13 = smov 48  ;;  %v1611_v3 = vpop.permute.xlu1 %1610  }
 0x113   :  { %v3358_v32 = vld [vmem:[%s6338_s0 + $0x8a] ss:$16 sm:%s2363_s25]   ;;  %v2361_v12 = vsel %vm250_vm1, %v3357_v29, %v2356_v30  ;;  %s2409_s25 = smov 192  ;;  %3151 = vst.msk [vmem:[%s6339_s1 + $0x40] sm:$0xff] %vm1360_vm8, %v1404_v62   ;;  %3166 = vst.msk [vmem:[%s6339_s1 + $0x28] sm:$0xff] %vm1360_vm8, %v1473_v7  }
 0x114   :  { %v3370_v13 = vld [vmem:[%s6338_s0 + $0x38a] ss:$16 sm:%s2419_s29]   ;;  %v2366_v35 = vsel %vm255_vm2, %v3358_v32, %v2361_v12  ;;  %s2464_s29 = smov 3  ;;  %v3389_v2 = vld [vmem:[%s6338_s0 + $0x301] ss:$16 sm:%s2510_s15]   ;;  %s2556_s15 = smov 3 }
 0x115   :  { %v3371_v49 = vld [vmem:[%s6338_s0 + $0x38a] ss:$16 sm:%s2422_s11]   ;;  %s2467_s11 = smov 12  ;;  %v3379_v6 = vld [vmem:[%s6338_s0 + $0x101] ss:$16 sm:%s2464_s29]   ;;  %s2513_s29 = smov 12  ;;  %v1588_v62 = vpop.permute.xlu0 %1587  }
 0x116   :  { %v2425_v61 = vsel %vm245_vm0, %v3371_v49, %v3370_v13  ;;  %v3372_v36 = vld [vmem:[%s6338_s0 + $0x38a] ss:$16 sm:%s2427_s21]   ;;  %2367 = vrot.lane.b32.xlu0 %v2366_v35, %s3466_s28  ;;  %s2472_s21 = smov 48  ;;  %3161 = vst.msk [vmem:[%s6339_s1 + $0x8] sm:$0xff] %vm1360_vm8, %v1450_v17   ;;  %v1657_v7 = vpop.permute.xlu1 %1656  }
 0x117   :  { %v3373_v37 = vld [vmem:[%s6338_s0 + $0x38a] ss:$16 sm:%s2432_s23]   ;;  %v2430_v39 = vsel %vm250_vm1, %v3372_v36, %v2425_v61  ;;  %s2477_s23 = smov 192  ;;  %v3380_v47 = vld [vmem:[%s6338_s0 + $0x101] ss:$16 sm:%s2467_s11]  }
 0x118   :  { %v3365_v38 = vld [vmem:[%s6338_s0 + $0x28a] ss:$16 sm:%s2396_s8]   ;;  %v2435_v44 = vsel %vm255_vm2, %v3373_v37, %v2430_v39  ;;  %s2442_s8 = smov 3  ;;  %v2470_v51 = vsel %vm245_vm0, %v3380_v47, %v3379_v6  ;;  %v3381_v52 = vld [vmem:[%s6338_s0 + $0x101] ss:$16 sm:%s2472_s21]   ;;  %s2523_s21 = smov 192 }
 0x119   :  { %v3366_v40 = vld [vmem:[%s6338_s0 + $0x28a] ss:$16 sm:%s2399_s18]   ;;  %2436 = vrot.lane.b32.xlu1 %v2435_v44, %s3466_s28  ;;  %s2445_s18 = smov 12  ;;  %v2475_v56 = vsel %vm250_vm1, %v3381_v52, %v2470_v51  ;;  %3176 = vst.msk [vmem:[%s6339_s1 + $0x68] sm:$0xff] %vm1360_vm8, %v1519_v31   ;;  %v1634_v17 = vpop.permute.xlu0 %1633  }
 0x11a   :  { %v3367_v41 = vld [vmem:[%s6338_s0 + $0x28a] ss:$16 sm:%s2404_s13]   ;;  %v2402_v45 = vsel %vm245_vm0, %v3366_v40, %v3365_v38  ;;  %s2450_s13 = smov 48  ;;  %v3382_v55 = vld [vmem:[%s6338_s0 + $0x101] ss:$16 sm:%s2477_s23]   ;;  %s3467_s23 = smov 16   ;;  %v1703_v31 = vpop.permute.xlu1 %1702  }
 0x11b   :  { %v3368_v46 = vld [vmem:[%s6338_s0 + $0x28a] ss:$16 sm:%s2409_s25]   ;;  %v2407_v14 = vsel %vm250_vm1, %v3367_v41, %v2402_v45  ;;  %s2455_s25 = smov 192  ;;  %v3375_v57 = vld [vmem:[%s6338_s0 + $0x1] ss:$16 sm:%s2442_s8]   ;;  %v2480_v58 = vsel %vm255_vm2, %v3382_v55, %v2475_v56  ;;  %s2487_s8 = smov 3 }
 0x11c   :  { %v2412_v48 = vsel %vm255_vm2, %v3368_v46, %v2407_v14  ;;  %v3376_v59 = vld [vmem:[%s6338_s0 + $0x1] ss:$16 sm:%s2445_s18]   ;;  %s2490_s18 = smov 12  ;;  %v3399_v22 = vld [vmem:[%s6338_s0 + $0x109] ss:$16 sm:%s2556_s15]   ;;  %s2602_s15 = smov 3 }
 0x11d   :  { %2413 = vrot.lane.b32.xlu0 %v2412_v48, %s3466_s28  ;;  %v3377_v24 = vld [vmem:[%s6338_s0 + $0x1] ss:$16 sm:%s2450_s13]   ;;  %2481 = vrot.lane.b32.xlu1 %v2480_v58, %s3467_s23  ;;  %v2448_v63 = vsel %vm245_vm0, %v3376_v59, %v3375_v57  ;;  %s2495_s13 = smov 48 }
 0x11e   :  { %v3378_v1 = vld [vmem:[%s6338_s0 + $0x1] ss:$16 sm:%s2455_s25]   ;;  %v2453_v53 = vsel %vm250_vm1, %v3377_v24, %v2448_v63  ;;  %s2500_s25 = smov 192  ;;  %3171 = vst.msk [vmem:[%s6339_s1 + $0x48] sm:$0xff] %vm1360_vm8, %v1496_v33   ;;  %3186 = vst.msk [vmem:[%s6339_s1 + $0x30] sm:$0xff] %vm1360_vm8, %v1565_v34   ;;  %v1680_v33 = vpop.permute.xlu0 %1679   ;;  %v1748_v34 = vpop.permute.xlu1 %1747  }
 0x11f   :  { %v3390_v4 = vld [vmem:[%s6338_s0 + $0x301] ss:$16 sm:%s2513_s29]   ;;  %v2458_v50 = vsel %vm255_vm2, %v3378_v1, %v2453_v53  ;;  %s2559_s29 = smov 12  ;;  %v3409_v13 = vld [vmem:[%s6338_s0 + $0x309] ss:$16 sm:%s2602_s15]   ;;  %s2648_s15 = smov 3 }
 0x120   :  { %v2516_v28 = vsel %vm245_vm0, %v3390_v4, %v3389_v2  ;;  %v3391_v60 = vld [vmem:[%s6338_s0 + $0x301] ss:$16 sm:%s2518_s6]   ;;  %s2564_s6 = smov 48  ;;  %v3400_v54 = vld [vmem:[%s6338_s0 + $0x109] ss:$16 sm:%s2559_s29]   ;;  %s2605_s29 = smov 12 }
 0x121   :  { %v3392_v8 = vld [vmem:[%s6338_s0 + $0x301] ss:$16 sm:%s2523_s21]   ;;  %2459 = vrot.lane.b32.xlu0 %v2458_v50, %s3467_s23  ;;  %v2521_v9 = vsel %vm250_vm1, %v3391_v60, %v2516_v28  ;;  %s2569_s21 = smov 192  ;;  %v2562_v25 = vsel %vm245_vm0, %v3400_v54, %v3399_v22  ;;  %3181 = vst.msk [vmem:[%s6339_s1 + $0x10] sm:$0xff] %vm1360_vm8, %v1542_v43  }
 0x122   :  { %v3384_v10 = vld [vmem:[%s6338_s0 + $0x201] ss:$16 sm:%s2487_s8]   ;;  %v2526_v11 = vsel %vm255_vm2, %v3392_v8, %v2521_v9  ;;  %s2533_s8 = smov 3  ;;  %v3401_v19 = vld [vmem:[%s6338_s0 + $0x109] ss:$16 sm:%s2564_s6]   ;;  %s2610_s6 = smov 48  ;;  %v1726_v43 = vpop.permute.xlu0 %1725  }
 0x123   :  { %v3385_v15 = vld [vmem:[%s6338_s0 + $0x201] ss:$16 sm:%s2490_s18]   ;;  %2527 = vrot.lane.b32.xlu1 %v2526_v11, %s3467_s23  ;;  %s2536_s18 = smov 12  ;;  %v2567_v27 = vsel %vm250_vm1, %v3401_v19, %v2562_v25  ;;  %3196 = vst.msk [vmem:[%s6339_s1 + $0x70] sm:$0xff] %vm1360_vm8, %v1611_v3  }
 0x124   :  { %v3386_v16 = vld [vmem:[%s6338_s0 + $0x201] ss:$16 sm:%s2495_s13]   ;;  %v2493_v18 = vsel %vm245_vm0, %v3385_v15, %v3384_v10  ;;  %s2541_s13 = smov 48  ;;  %v3402_v26 = vld [vmem:[%s6338_s0 + $0x109] ss:$16 sm:%s2569_s21]   ;;  %s2615_s21 = smov 192 }
 0x125   :  { %v3387_v21 = vld [vmem:[%s6338_s0 + $0x201] ss:$16 sm:%s2500_s25]   ;;  %v2498_v23 = vsel %vm250_vm1, %v3386_v16, %v2493_v18  ;;  %s2546_s25 = smov 192  ;;  %v3394_v42 = vld [vmem:[%s6338_s0 + $0x9] ss:$16 sm:%s2533_s8]   ;;  %v2572_v20 = vsel %vm255_vm2, %v3402_v26, %v2567_v27  ;;  %s2579_s8 = smov 3 }
 0x126   :  { %v2503_v5 = vsel %vm255_vm2, %v3387_v21, %v2498_v23  ;;  %v3395_v0 = vld [vmem:[%s6338_s0 + $0x9] ss:$16 sm:%s2536_s18]   ;;  %s2582_s18 = smov 12  ;;  %v3419_v6 = vld [vmem:[%s6338_s0 + $0x181] ss:$16 sm:%s2648_s15]   ;;  %s2694_s15 = smov 3  ;;  %v1771_v3 = vpop.permute.xlu0 %1770  }
 0x127   :  { %2504 = vrot.lane.b32.xlu0 %v2503_v5, %s3467_s23  ;;  %v3396_v29 = vld [vmem:[%s6338_s0 + $0x9] ss:$16 sm:%s2541_s13]   ;;  %2573 = vrot.lane.b32.xlu1 %v2572_v20, %s3467_s23  ;;  %v2539_v30 = vsel %vm245_vm0, %v3395_v0, %v3394_v42  ;;  %s2587_s13 = smov 48 }
 0x128   :  { %v3397_v32 = vld [vmem:[%s6338_s0 + $0x9] ss:$16 sm:%s2546_s25]   ;;  %v2544_v12 = vsel %vm250_vm1, %v3396_v29, %v2539_v30  ;;  %s2592_s25 = smov 192  ;;  %3191 = vst.msk [vmem:[%s6339_s1 + $0x50] sm:$0xff] %vm1360_vm8, %v1588_v62   ;;  %3206 = vst.msk [vmem:[%s6339_s1 + $0x38] sm:$0xff] %vm1360_vm8, %v1657_v7  }
 0x129   :  { %v3410_v49 = vld [vmem:[%s6338_s0 + $0x309] ss:$16 sm:%s2605_s29]   ;;  %v2549_v35 = vsel %vm255_vm2, %v3397_v32, %v2544_v12  ;;  %s2651_s29 = smov 12  ;;  %v3429_v2 = vld [vmem:[%s6338_s0 + $0x381] ss:$16 sm:%s2694_s15]   ;;  %s2740_s15 = smov 3 }
 0x12a   :  { %v2608_v61 = vsel %vm245_vm0, %v3410_v49, %v3409_v13  ;;  %v3411_v36 = vld [vmem:[%s6338_s0 + $0x309] ss:$16 sm:%s2610_s6]   ;;  %s2656_s6 = smov 48  ;;  %v3420_v47 = vld [vmem:[%s6338_s0 + $0x181] ss:$16 sm:%s2651_s29]   ;;  %s2697_s29 = smov 12 }
 0x12b   :  { %v3412_v37 = vld [vmem:[%s6338_s0 + $0x309] ss:$16 sm:%s2615_s21]   ;;  %2550 = vrot.lane.b32.xlu0 %v2549_v35, %s3467_s23  ;;  %v2613_v39 = vsel %vm250_vm1, %v3411_v36, %v2608_v61  ;;  %s2661_s21 = smov 192  ;;  %v2654_v51 = vsel %vm245_vm0, %v3420_v47, %v3419_v6  ;;  %3201 = vst.msk [vmem:[%s6339_s1 + $0x18] sm:$0xff] %vm1360_vm8, %v1634_v17   ;;  %v1794_v6 = vpop.permute.xlu1 %1793  }
 0x12c   :  { %v3404_v38 = vld [vmem:[%s6338_s0 + $0x209] ss:$16 sm:%s2579_s8]   ;;  %v2618_v44 = vsel %vm255_vm2, %v3412_v37, %v2613_v39  ;;  %s2625_s8 = smov 3  ;;  %v3421_v52 = vld [vmem:[%s6338_s0 + $0x181] ss:$16 sm:%s2656_s6]   ;;  %s2702_s6 = smov 48 }
 0x12d   :  { %v3405_v40 = vld [vmem:[%s6338_s0 + $0x209] ss:$16 sm:%s2582_s18]   ;;  %2619 = vrot.lane.b32.xlu1 %v2618_v44, %s3467_s23  ;;  %s2628_s18 = smov 12  ;;  %v2659_v56 = vsel %vm250_vm1, %v3421_v52, %v2654_v51  ;;  %3216 = vst.msk [vmem:[%s6339_s1 + $0x78] sm:$0xff] %vm1360_vm8, %v1703_v31   ;;  %v1817_v51 = vpop.permute.xlu0 %1816  }
 0x12e   :  { %v3406_v41 = vld [vmem:[%s6338_s0 + $0x209] ss:$16 sm:%s2587_s13]   ;;  %v2585_v45 = vsel %vm245_vm0, %v3405_v40, %v3404_v38  ;;  %s2633_s13 = smov 48  ;;  %v3422_v55 = vld [vmem:[%s6338_s0 + $0x181] ss:$16 sm:%s2661_s21]   ;;  %s2707_s21 = smov 192 }
 0x12f   :  { %v3407_v46 = vld [vmem:[%s6338_s0 + $0x209] ss:$16 sm:%s2592_s25]   ;;  %v2590_v14 = vsel %vm250_vm1, %v3406_v41, %v2585_v45  ;;  %s2638_s25 = smov 192  ;;  %v3414_v57 = vld [vmem:[%s6338_s0 + $0x81] ss:$16 sm:%s2625_s8]   ;;  %v2664_v58 = vsel %vm255_vm2, %v3422_v55, %v2659_v56  ;;  %s2671_s8 = smov 3 }
 0x130   :  { %v2595_v48 = vsel %vm255_vm2, %v3407_v46, %v2590_v14  ;;  %v3415_v59 = vld [vmem:[%s6338_s0 + $0x81] ss:$16 sm:%s2628_s18]   ;;  %s2674_s18 = smov 12  ;;  %v3439_v22 = vld [vmem:[%s6338_s0 + $0x189] ss:$16 sm:%s2740_s15]   ;;  %s2786_s15 = smov 3 }
 0x131   :  { %2596 = vrot.lane.b32.xlu0 %v2595_v48, %s3467_s23  ;;  %v3416_v24 = vld [vmem:[%s6338_s0 + $0x81] ss:$16 sm:%s2633_s13]   ;;  %2665 = vrot.lane.b32.xlu1 %v2664_v58, %s3467_s23  ;;  %v2631_v63 = vsel %vm245_vm0, %v3415_v59, %v3414_v57  ;;  %s2679_s13 = smov 48  ;;  %v1840_v48 = vpop.permute.xlu1 %1839  }
 0x132   :  { %v3417_v1 = vld [vmem:[%s6338_s0 + $0x81] ss:$16 sm:%s2638_s25]   ;;  %v2636_v53 = vsel %vm250_vm1, %v3416_v24, %v2631_v63  ;;  %s2684_s25 = smov 192  ;;  %3211 = vst.msk [vmem:[%s6339_s1 + $0x58] sm:$0xff] %vm1360_vm8, %v1680_v33  }
 0x133   :  { %v3430_v4 = vld [vmem:[%s6338_s0 + $0x381] ss:$16 sm:%s2697_s29]   ;;  %v2641_v50 = vsel %vm255_vm2, %v3417_v1, %v2636_v53  ;;  %s2743_s29 = smov 12  ;;  %v3449_v13 = vld [vmem:[%s6338_s0 + $0x389] ss:$16 sm:%s2786_s15]   ;;  %v1863_v55 = vpop.permute.xlu0 %1862  }
 0x134   :  { %v2700_v28 = vsel %vm245_vm0, %v3430_v4, %v3429_v2  ;;  %v3431_v60 = vld [vmem:[%s6338_s0 + $0x381] ss:$16 sm:%s2702_s6]   ;;  %s2748_s6 = smov 48  ;;  %v3440_v54 = vld [vmem:[%s6338_s0 + $0x189] ss:$16 sm:%s2743_s29]   ;;  %s2789_s29 = smov 12 }
 0x135   :  { %v3432_v8 = vld [vmem:[%s6338_s0 + $0x381] ss:$16 sm:%s2707_s21]   ;;  %2642 = vrot.lane.b32.xlu0 %v2641_v50, %s3467_s23  ;;  %v2705_v9 = vsel %vm250_vm1, %v3431_v60, %v2700_v28  ;;  %s2753_s21 = smov 192  ;;  %v2746_v25 = vsel %vm245_vm0, %v3440_v54, %v3439_v22  ;;  %3225 = vst.msk [vmem:[%s6339_s1 + $0x20] sm:$0xff] %vm1727_vm9, %v1748_v34   ;;  %v1886_v52 = vpop.permute.xlu1 %1885  }
 0x136   :  { %v3424_v10 = vld [vmem:[%s6338_s0 + $0x281] ss:$16 sm:%s2671_s8]   ;;  %v2710_v11 = vsel %vm255_vm2, %v3432_v8, %v2705_v9  ;;  %s2717_s8 = smov 3  ;;  %v3441_v19 = vld [vmem:[%s6338_s0 + $0x189] ss:$16 sm:%s2748_s6]   ;;  %s2794_s6 = smov 48 }
 0x137   :  { %v3425_v15 = vld [vmem:[%s6338_s0 + $0x281] ss:$16 sm:%s2674_s18]   ;;  %2711 = vrot.lane.b32.xlu1 %v2710_v11, %s3467_s23  ;;  %s2720_s18 = smov 12  ;;  %v2751_v27 = vsel %vm250_vm1, %v3441_v19, %v2746_v25  ;;  %1728 = vst.msk [vmem:[%s6339_s1] sm:$0xff] %vm1727_vm9, %v1726_v43  }
 0x138   :  { %v3426_v16 = vld [vmem:[%s6338_s0 + $0x281] ss:$16 sm:%s2679_s13]   ;;  %v2677_v18 = vsel %vm245_vm0, %v3425_v15, %v3424_v10  ;;  %s2725_s13 = smov 48  ;;  %v3442_v26 = vld [vmem:[%s6338_s0 + $0x189] ss:$16 sm:%s2753_s21]   ;;  %s2799_s21 = smov 192  ;;  %v1909_v57 = vpop.permute.xlu0 %1908  }
 0x139   :  { %v3427_v21 = vld [vmem:[%s6338_s0 + $0x281] ss:$16 sm:%s2684_s25]   ;;  %v2682_v23 = vsel %vm250_vm1, %v3426_v16, %v2677_v18  ;;  %s2730_s25 = smov 192  ;;  %v3434_v42 = vld [vmem:[%s6338_s0 + $0x89] ss:$16 sm:%s2717_s8]   ;;  %v2756_v20 = vsel %vm255_vm2, %v3442_v26, %v2751_v27  ;;  %s2763_s8 = smov 3  ;;  %v1932_v56 = vpop.permute.xlu1 %1931  }
 0x13a   :  { %v2687_v5 = vsel %vm255_vm2, %v3427_v21, %v2682_v23  ;;  %v3435_v0 = vld [vmem:[%s6338_s0 + $0x89] ss:$16 sm:%s2720_s18]   ;;  %s2766_s18 = smov 12  ;;  %3235 = vst.msk [vmem:[%s6339_s1 + $0x60] sm:$0xff] %vm1727_vm9, %v1794_v6   ;;  %3230 = vst.msk [vmem:[%s6339_s1 + $0x40] sm:$0xff] %vm1727_vm9, %v1771_v3  }
 0x13b   :  { %2688 = vrot.lane.b32.xlu0 %v2687_v5, %s3467_s23  ;;  %v3436_v29 = vld [vmem:[%s6338_s0 + $0x89] ss:$16 sm:%s2725_s13]   ;;  %2757 = vrot.lane.b32.xlu1 %v2756_v20, %s3467_s23  ;;  %v2723_v30 = vsel %vm245_vm0, %v3435_v0, %v3434_v42  ;;  %s2771_s13 = smov 48 }
 0x13c   :  { %v3437_v32 = vld [vmem:[%s6338_s0 + $0x89] ss:$16 sm:%s2730_s25]   ;;  %v2728_v12 = vsel %vm250_vm1, %v3436_v29, %v2723_v30  ;;  %s2776_s25 = smov 192  ;;  %3245 = vst.msk [vmem:[%s6339_s1 + $0x28] sm:$0xff] %vm1727_vm9, %v1840_v48   ;;  %3240 = vst.msk [vmem:[%s6339_s1 + $0x8] sm:$0xff] %vm1727_vm9, %v1817_v51  }
 0x13d   :  { %v3450_v49 = vld [vmem:[%s6338_s0 + $0x389] ss:$16 sm:%s2789_s29]   ;;  %v2733_v35 = vsel %vm255_vm2, %v3437_v32, %v2728_v12  ;;  %3255 = vst.msk [vmem:[%s6339_s1 + $0x68] sm:$0xff] %vm1727_vm9, %v1886_v52   ;;  %3250 = vst.msk [vmem:[%s6339_s1 + $0x48] sm:$0xff] %vm1727_vm9, %v1863_v55   ;;  %v1978_v58 = vpop.permute.xlu1 %1977  }
 0x13e   :  { %v2792_v61 = vsel %vm245_vm0, %v3450_v49, %v3449_v13  ;;  %v3451_v36 = vld [vmem:[%s6338_s0 + $0x389] ss:$16 sm:%s2794_s6]   ;;  %3265 = vst.msk [vmem:[%s6339_s1 + $0x30] sm:$0xff] %vm1727_vm9, %v1932_v56   ;;  %3260 = vst.msk [vmem:[%s6339_s1 + $0x10] sm:$0xff] %vm1727_vm9, %v1909_v57  }
 0x13f   :  { %v3452_v37 = vld [vmem:[%s6338_s0 + $0x389] ss:$16 sm:%s2799_s21]   ;;  %2734 = vrot.lane.b32.xlu0 %v2733_v35, %s3467_s23  ;;  %v2797_v39 = vsel %vm250_vm1, %v3451_v36, %v2792_v61  ;;  %3275 = vst.msk [vmem:[%s6339_s1 + $0x70] sm:$0xff] %vm1727_vm9, %v1978_v58  }
 0x140   :  { %v3444_v38 = vld [vmem:[%s6338_s0 + $0x289] ss:$16 sm:%s2763_s8]   ;;  %v2802_v44 = vsel %vm255_vm2, %v3452_v37, %v2797_v39  ;;  %v1955_v59 = vpop.permute.xlu0 %1954  }
 0x141   :  { %v3445_v40 = vld [vmem:[%s6338_s0 + $0x289] ss:$16 sm:%s2766_s18]   ;;  %2803 = vrot.lane.b32.xlu1 %v2802_v44, %s3467_s23  ;;  %3270 = vst.msk [vmem:[%s6339_s1 + $0x50] sm:$0xff] %vm1727_vm9, %v1955_v59  }
 0x142   :  { %v3446_v41 = vld [vmem:[%s6338_s0 + $0x289] ss:$16 sm:%s2771_s13]   ;;  %v2769_v45 = vsel %vm245_vm0, %v3445_v40, %v3444_v38 }
 0x143   :  { %v3447_v46 = vld [vmem:[%s6338_s0 + $0x289] ss:$16 sm:%s2776_s25]   ;;  %v2774_v14 = vsel %vm250_vm1, %v3446_v41, %v2769_v45 }
 0x144   :  { %v2779_v47 = vsel %vm255_vm2, %v3447_v46, %v2774_v14  ;;  %v2024_v24 = vpop.permute.xlu1 %2023  }
 0x145   :  { %2780 = vrot.lane.b32.xlu0 %v2779_v47, %s3467_s23  ;;  %3285 = vst.msk [vmem:[%s6339_s1 + $0x38] sm:$0xff] %vm1727_vm9, %v2024_v24  }
 0x148   :  { %v2001_v62 = vpop.permute.xlu0 %2000  }
 0x149   :  { %3280 = vst.msk [vmem:[%s6339_s1 + $0x18] sm:$0xff] %vm1727_vm9, %v2001_v62  }
 0x14c   :  { %v2070_v63 = vpop.permute.xlu1 %2069  }
 0x14d   :  { %3295 = vst.msk [vmem:[%s6339_s1 + $0x78] sm:$0xff] %vm1727_vm9, %v2070_v63  }
 0x151   :  { %v2047_v1 = vpop.permute.xlu0 %2046  }
 0x152   :  { %3290 = vst.msk [vmem:[%s6339_s1 + $0x58] sm:$0xff] %vm1727_vm9, %v2047_v1  }
 0x154   :  { %v2115_v53 = vpop.permute.xlu1 %2114  }
 0x155   :  { %3304 = vst.msk [vmem:[%s6339_s1 + $0x20] sm:$0xff] %vm2094_vm10, %v2115_v53  }
 0x156   :  { %v2093_v2 = vpop.permute.xlu0 %2092  }
 0x157   :  { %2095 = vst.msk [vmem:[%s6339_s1] sm:$0xff] %vm2094_vm10, %v2093_v2  }
 0x15d   :  { %v2161_v4 = vpop.permute.xlu1 %2160  }
 0x15e   :  { %3314 = vst.msk [vmem:[%s6339_s1 + $0x60] sm:$0xff] %vm2094_vm10, %v2161_v4  }
 0x160   :  { %v2138_v7 = vpop.permute.xlu0 %2137  }
 0x161   :  { %3309 = vst.msk [vmem:[%s6339_s1 + $0x40] sm:$0xff] %vm2094_vm10, %v2138_v7  }
 0x16f   :  { %v2207_v50 = vpop.permute.xlu1 %2206  }
 0x170   :  { %3324 = vst.msk [vmem:[%s6339_s1 + $0x28] sm:$0xff] %vm2094_vm10, %v2207_v50  }
 0x173   :  { %v2184_v28 = vpop.permute.xlu0 %2183  }
 0x174   :  { %3319 = vst.msk [vmem:[%s6339_s1 + $0x8] sm:$0xff] %vm2094_vm10, %v2184_v28  }
 0x177   :  { %v2253_v60 = vpop.permute.xlu1 %2252  }
 0x178   :  { %3334 = vst.msk [vmem:[%s6339_s1 + $0x68] sm:$0xff] %vm2094_vm10, %v2253_v60  }
 0x17b   :  { %v2230_v8 = vpop.permute.xlu0 %2229   ;;  %v2299_v9 = vpop.permute.xlu1 %2298  }
 0x17c   :  { %3329 = vst.msk [vmem:[%s6339_s1 + $0x48] sm:$0xff] %vm2094_vm10, %v2230_v8   ;;  %3344 = vst.msk [vmem:[%s6339_s1 + $0x30] sm:$0xff] %vm2094_vm10, %v2299_v9  }
 0x17f   :  { %v2276_v10 = vpop.permute.xlu0 %2275  }
 0x180   :  { %3339 = vst.msk [vmem:[%s6339_s1 + $0x10] sm:$0xff] %vm2094_vm10, %v2276_v10   ;;  %v2345_v11 = vpop.permute.xlu1 %2344  }
 0x181   :  { %3354 = vst.msk [vmem:[%s6339_s1 + $0x70] sm:$0xff] %vm2094_vm10, %v2345_v11  }
 0x184   :  { %v2322_v15 = vpop.permute.xlu0 %2321   ;;  %v2391_v16 = vpop.permute.xlu1 %2390  }
 0x185   :  { %3349 = vst.msk [vmem:[%s6339_s1 + $0x50] sm:$0xff] %vm2094_vm10, %v2322_v15   ;;  %3364 = vst.msk [vmem:[%s6339_s1 + $0x38] sm:$0xff] %vm2094_vm10, %v2391_v16  }
 0x188   :  { %v2368_v17 = vpop.permute.xlu0 %2367  }
 0x189   :  { %3359 = vst.msk [vmem:[%s6339_s1 + $0x18] sm:$0xff] %vm2094_vm10, %v2368_v17  }
 0x18b   :  { %v2437_v18 = vpop.permute.xlu1 %2436  }
 0x18c   :  { %3374 = vst.msk [vmem:[%s6339_s1 + $0x78] sm:$0xff] %vm2094_vm10, %v2437_v18  }
 0x18f   :  { %v2414_v21 = vpop.permute.xlu0 %2413   ;;  %v2482_v23 = vpop.permute.xlu1 %2481  }
 0x190   :  { %3369 = vst.msk [vmem:[%s6339_s1 + $0x58] sm:$0xff] %vm2094_vm10, %v2414_v21  }
 0x191   :  { %3383 = vst.msk [vmem:[%s6339_s1 + $0x20] sm:$0xff] %vm2461_vm11, %v2482_v23  }
 0x193   :  { %v2460_v22 = vpop.permute.xlu0 %2459  }
 0x194   :  { %2462 = vst.msk [vmem:[%s6339_s1] sm:$0xff] %vm2461_vm11, %v2460_v22  }
 0x195   :  { %v2528_v54 = vpop.permute.xlu1 %2527  }
 0x196   :  { %3393 = vst.msk [vmem:[%s6339_s1 + $0x60] sm:$0xff] %vm2461_vm11, %v2528_v54  }
 0x199   :  { %v2505_v31 = vpop.permute.xlu0 %2504   ;;  %v2574_v5 = vpop.permute.xlu1 %2573  }
 0x19a   :  { %3388 = vst.msk [vmem:[%s6339_s1 + $0x40] sm:$0xff] %vm2461_vm11, %v2505_v31   ;;  %3403 = vst.msk [vmem:[%s6339_s1 + $0x28] sm:$0xff] %vm2461_vm11, %v2574_v5  }
 0x19d   :  { %v2551_v25 = vpop.permute.xlu0 %2550  }
 0x19e   :  { %3398 = vst.msk [vmem:[%s6339_s1 + $0x8] sm:$0xff] %vm2461_vm11, %v2551_v25  }
 0x19f   :  { %v2620_v19 = vpop.permute.xlu1 %2619  }
 0x1a0   :  { %3413 = vst.msk [vmem:[%s6339_s1 + $0x68] sm:$0xff] %vm2461_vm11, %v2620_v19  }
 0x1a3   :  { %v2597_v26 = vpop.permute.xlu0 %2596   ;;  %v2666_v27 = vpop.permute.xlu1 %2665  }
 0x1a4   :  { %3408 = vst.msk [vmem:[%s6339_s1 + $0x48] sm:$0xff] %vm2461_vm11, %v2597_v26   ;;  %3423 = vst.msk [vmem:[%s6339_s1 + $0x30] sm:$0xff] %vm2461_vm11, %v2666_v27  }
 0x1a7   :  { %v2643_v42 = vpop.permute.xlu0 %2642  }
 0x1a8   :  { %3418 = vst.msk [vmem:[%s6339_s1 + $0x10] sm:$0xff] %vm2461_vm11, %v2643_v42  }
 0x1a9   :  { %v2712_v20 = vpop.permute.xlu1 %2711  }
 0x1aa   :  { %3433 = vst.msk [vmem:[%s6339_s1 + $0x70] sm:$0xff] %vm2461_vm11, %v2712_v20  }
 0x1ad   :  { %v2689_v0 = vpop.permute.xlu0 %2688   ;;  %v2758_v29 = vpop.permute.xlu1 %2757  }
 0x1ae   :  { %3428 = vst.msk [vmem:[%s6339_s1 + $0x50] sm:$0xff] %vm2461_vm11, %v2689_v0   ;;  %3443 = vst.msk [vmem:[%s6339_s1 + $0x38] sm:$0xff] %vm2461_vm11, %v2758_v29  }
 0x1b1   :  { %v2735_v33 = vpop.permute.xlu0 %2734  }
 0x1b2   :  { %3438 = vst.msk [vmem:[%s6339_s1 + $0x18] sm:$0xff] %vm2461_vm11, %v2735_v33  }
 0x1b3   :  { %v2804_v30 = vpop.permute.xlu1 %2803  }
 0x1b4   :  { %3453 = vst.msk [vmem:[%s6339_s1 + $0x78] sm:$0xff] %vm2461_vm11, %v2804_v30  }
 0x1b7   :  { %v2781_v32 = vpop.permute.xlu0 %2780  }
 0x1b8   :  { %3448 = vst.msk [vmem:[%s6339_s1 + $0x58] sm:$0xff] %vm2461_vm11, %v2781_v32  }

// kernel: multi_head_attention_forward.1
= control target key start
LH: loop header
LB: loop body
LE: loop exit
PB: predicated region body
PF: predicated region fallthrough
CT: control target
= control target key end

     0   :  { %vm162_vm0 = vcmask 1043456   ;;  %vm65_vm1 = vcmask 31744   ;;  %v5380_v9 = vmov 0.0   ;;  %vm584_vm2 = vcmask 523264   ;;  %s10224_s0 = inlined_call_operand.vmem [shape: f32[256,4], index: 0, kind: input, shape index: {}]   ;;  %s10225_s1 = inlined_call_operand.vmem [shape: f32[256,64], index: 1, kind: input, shape index: {}]   ;;  %s10226_s2 = inlined_call_operand.vmem [shape: f32[64,256], index: 2, kind: input, shape index: {}]   ;;  %s10227_s3 = inlined_call_operand.vmem [shape: f32[4,32], index: 3, kind: input, shape index: {}]   ;;  %s10228_s4 = inlined_call_operand.vmem [shape: f32[64,256], index: 4, kind: input, shape index: {}]   ;;  %s10229_s5 = inlined_call_operand.vmem [shape: f32[8,16], index: 5, kind: input, shape index: {}]   ;;  %s10230_s6 = inlined_call_operand.vmem [shape: f32[8,1], index: 6, kind: input, shape index: {}]   ;;  %s10231_s7 = inlined_call_operand.vmem [shape: f32[8,1], index: 7, kind: input, shape index: {}]   ;;  %s10232_s8 = inlined_call_operand.vmem [shape: f32[8,256], index: 8, kind: output, shape index: {0}]   ;;  %s10233_s9 = inlined_call_operand.hbm [shape: f32[2,8], index: 9, kind: output, shape index: {1}]  }
   0x1   :  { %v64_v0 = vld [vmem:[%s10227_s3] sm:$0xf]  ;;  %v33_v2 = vld [vmem:[%s10224_s0 + $0x8] sm:$0xff]  ;;  %v571_v4 = vld [vmem:[%s10228_s4 + $0x18] sm:$0xff]  ;;  %799 = vmatprep.mubr.f32.mxu1 %v5380_v9 }
   0x2   :  { %v32_v1 = vld [vmem:[%s10224_s0] sm:$0xff]  ;;  %5246 = vmatprep.subr.msk.mxu0 %vm162_vm0, %v64_v0  ;;  %v569_v3 = vld [vmem:[%s10228_s4 + $0x8] sm:$0xff]  ;;  %v570_v7 = vld [vmem:[%s10228_s4 + $0x10] sm:$0xff] }
   0x3   :  { %5248 = vmatprep.mubr.msk.f32.mxu0 %vm65_vm1, %v32_v1  ;;  %v568_v5 = vld [vmem:[%s10228_s4] sm:$0xff]  ;;  %5247 = vmatpush3.msk.msra.mxu0 %vm162_vm0, %v64_v0  ;;  %v5296_v6 = vpack.c.bf16 %v571_v4, %v569_v3  ;;  %v34_v8 = vld [vmem:[%s10224_s0 + $0x10] sm:$0xff]  ;;  %v573_v11 = vld [vmem:[%s10228_s4 + $0x28] sm:$0xff] }
   0x4   :  { %5249 = vmatmul.mubr.msk.f32.vlgmr.msra.gmra.mrb[0].mxu0 %vm65_vm1, %v33_v2  ;;  %v5298_v10 = vpack.c.bf16 %v570_v7, %v568_v5  ;;  %v575_v12 = vld [vmem:[%s10228_s4 + $0x38] sm:$0xff]  ;;  %v572_v13 = vld [vmem:[%s10228_s4 + $0x20] sm:$0xff]  ;;  %v574_v16 = vld [vmem:[%s10228_s4 + $0x30] sm:$0xff] }
   0x5   :  { %5316 = vmatprep.subr.bf16.mxu1 %v5296_v6  ;;  %5251 = vmatprep.mubr.msk.f32.mxu0 %vm65_vm1, %v34_v8  ;;  %v35_v14 = vld [vmem:[%s10224_s0 + $0x18] sm:$0xff]  ;;  %v5300_v15 = vpack.c.bf16 %v575_v12, %v573_v11  ;;  %v5302_v17 = vpack.c.bf16 %v574_v16, %v572_v13  ;;  %v36_v18 = vld [vmem:[%s10224_s0 + $0x20] sm:$0xff]  ;;  %v577_v19 = vld [vmem:[%s10228_s4 + $0x48] sm:$0xff] }
   0x6   :  { %5320 = vmatpush1.bf16.msra.mxu1 %v5298_v10  ;;  %v579_v20 = vld [vmem:[%s10228_s4 + $0x58] sm:$0xff]  ;;  %5297 = vmatprep.subr.bf16.mxu0 %v5296_v6  ;;  %v576_v22 = vld [vmem:[%s10228_s4 + $0x40] sm:$0xff]  ;;  %v578_v23 = vld [vmem:[%s10228_s4 + $0x50] sm:$0xff] }
   0x7   :  { %5317 = vmatprep.subr.bf16.mxu1 %v5300_v15  ;;  %v5304_v21 = vpack.c.bf16 %v579_v20, %v577_v19  ;;  %5299 = vmatpush1.bf16.msra.mxu0 %v5298_v10  ;;  %v581_v24 = vld [vmem:[%s10228_s4 + $0x68] sm:$0xff]  ;;  %v583_v25 = vld [vmem:[%s10228_s4 + $0x78] sm:$0xff]  ;;  %v5306_v27 = vpack.c.bf16 %v578_v23, %v576_v22  ;;  %v38_v28 = vld [vmem:[%s10224_s0 + $0x30] sm:$0xff] }
   0x8   :  { %5252 = vmatmul.mubr.msk.f32.gmra.mrb[2].mxu0 %vm65_vm1, %v35_v14  ;;  %5301 = vmatprep.subr.bf16.mxu0 %v5300_v15  ;;  %v37_v26 = vld [vmem:[%s10224_s0 + $0x28] sm:$0xff]  ;;  %v5308_v29 = vpack.c.bf16 %v583_v25, %v581_v24  ;;  %v580_v30 = vld [vmem:[%s10228_s4 + $0x60] sm:$0xff]  ;;  %v582_v31 = vld [vmem:[%s10228_s4 + $0x70] sm:$0xff] }
   0x9   :  { %5254 = vmatprep.mubr.msk.f32.mxu0 %vm65_vm1, %v36_v18  ;;  %v39_v32 = vld [vmem:[%s10224_s0 + $0x38] sm:$0xff]  ;;  %v5310_v33 = vpack.c.bf16 %v582_v31, %v580_v30  ;;  %v40_v34 = vld [vmem:[%s10224_s0 + $0x40] sm:$0xff]  ;;  %v41_v35 = vld [vmem:[%s10224_s0 + $0x48] sm:$0xff] }
   0xa   :  { %5321 = vmatpush1.bf16.msra.mxu1 %v5302_v17  ;;  %v545_v36 = vld [vmem:[%s10225_s1 + $0x48] sm:$0xff]  ;;  %v42_v37 = vld [vmem:[%s10224_s0 + $0x50] sm:$0xff]  ;;  %v43_v38 = vld [vmem:[%s10224_s0 + $0x58] sm:$0xff] }
   0xb   :  { %5318 = vmatprep.subr.bf16.mxu1 %v5304_v21  ;;  %5303 = vmatpush1.bf16.msra.mxu0 %v5302_v17  ;;  %v546_v39 = vld [vmem:[%s10225_s1 + $0x50] sm:$0xff]  ;;  %v44_v40 = vld [vmem:[%s10224_s0 + $0x60] sm:$0xff]  ;;  %v45_v41 = vld [vmem:[%s10224_s0 + $0x68] sm:$0xff] }
   0xc   :  { %5255 = vmatmul.mubr.msk.f32.gmra.mrb[4].mxu0 %vm65_vm1, %v37_v26  ;;  %5305 = vmatprep.subr.bf16.mxu0 %v5304_v21  ;;  %v547_v42 = vld [vmem:[%s10225_s1 + $0x58] sm:$0xff]  ;;  %v46_v43 = vld [vmem:[%s10224_s0 + $0x70] sm:$0xff] }
   0xd   :  { %5257 = vmatprep.mubr.msk.f32.mxu0 %vm65_vm1, %v38_v28 }
   0xe   :  { %5322 = vmatpush1.bf16.msra.mxu1 %v5306_v27 }
   0xf   :  { %5319 = vmatprep.subr.bf16.mxu1 %v5308_v29  ;;  %5307 = vmatpush1.bf16.msra.mxu0 %v5306_v27 }
  0x10   :  { %5258 = vmatmul.mubr.msk.f32.gmra.mrb[6].mxu0 %vm65_vm1, %v39_v32  ;;  %5309 = vmatprep.subr.bf16.mxu0 %v5308_v29 }
  0x11   :  { %5260 = vmatprep.mubr.msk.f32.mxu0 %vm65_vm1, %v40_v34 }
  0x12   :  { %5323 = vmatpush1.bf16.msra.mxu1 %v5310_v33 }
  0x13   :  { %5311 = vmatpush1.bf16.msra.mxu0 %v5310_v33 }
  0x14   :  { %5261 = vmatmul.mubr.msk.f32.gmra.mrb[8].mxu0 %vm65_vm1, %v41_v35 }
  0x15   :  { %5189 = vmatmul.mubr.msk.f32.vlgmr.msra.gmra.mrb[0].mxu1 %vm584_vm2, %v545_v36  ;;  %5263 = vmatprep.mubr.msk.f32.mxu0 %vm65_vm1, %v42_v37 }
  0x16   :  { %805 = vmatprep.mubr.f32.mxu1 %v5380_v9 }
  0x18   :  { %5264 = vmatmul.mubr.msk.f32.gmra.mrb[10].mxu0 %vm65_vm1, %v43_v38 }
  0x19   :  { %5190 = vmatmul.mubr.msk.f32.gmra.mrb[2].mxu1 %vm584_vm2, %v546_v39  ;;  %5266 = vmatprep.mubr.msk.f32.mxu0 %vm65_vm1, %v44_v40 }
  0x1a   :  { %811 = vmatprep.mubr.f32.mxu1 %v5380_v9 }
  0x1c   :  { %5267 = vmatmul.mubr.msk.f32.gmra.mrb[12].mxu0 %vm65_vm1, %v45_v41 }
  0x1d   :  { %15 = vsyncpa [#allocation3], 0  ;;  %5191 = vmatmul.mubr.msk.f32.gmra.mrb[4].mxu1 %vm584_vm2, %v547_v42  ;;  %5269 = vmatprep.mubr.msk.f32.mxu0 %vm65_vm1, %v46_v43  ;;  %v47_v44 = vld [vmem:[%s10224_s0 + $0x78] sm:$0xff]  ;;  %v548_v45 = vld [vmem:[%s10225_s1 + $0x60] sm:$0xff]  ;;  %vm391_vm3 = vcmask 261120   ;;  %s5382_s10 = smov 112  }
  0x1e   :  { %817 = vmatprep.mubr.f32.mxu1 %v5380_v9  ;;  %v48_v46 = vld [vmem:[%s10224_s0 + $0x80] sm:$0xff]  ;;  %v49_v47 = vld [vmem:[%s10224_s0 + $0x88] sm:$0xff]  ;;  %v50_v49 = vld [vmem:[%s10224_s0 + $0x90] sm:$0xff]  ;;  %s5383_s11 = smov 104   ;;  %s5384_s12 = smov 96   ;;  %vm2155_vm4 = vcmask 1041409  }
  0x1f   :  { %v549_v48 = vld [vmem:[%s10225_s1 + $0x68] sm:$0xff]  ;;  %v51_v50 = vld [vmem:[%s10224_s0 + $0x98] sm:$0xff]  ;;  %v550_v51 = vld [vmem:[%s10225_s1 + $0x70] sm:$0xff]  ;;  %s5385_s13 = smov 88   ;;  %s5386_s14 = smov 80   ;;  %vm2158_vm5 = vcmask 1042434  }
  0x20   :  { %5270 = vmatmul.mubr.msk.f32.gmra.mrb[14].mxu0 %vm65_vm1, %v47_v44  ;;  %v52_v52 = vld [vmem:[%s10224_s0 + $0xa0] sm:$0xff]  ;;  %v53_v53 = vld [vmem:[%s10224_s0 + $0xa8] sm:$0xff]  ;;  %v551_v54 = vld [vmem:[%s10225_s1 + $0x78] sm:$0xff]  ;;  %s5387_s15 = smov 72   ;;  %s5388_s16 = smov 64   ;;  %vm2161_vm6 = vcmask 1043459  }
  0x21   :  { %5192 = vmatmul.mubr.msk.f32.gmra.mrb[6].mxu1 %vm584_vm2, %v548_v45  ;;  %5272 = vmatprep.mubr.msk.f32.mxu0 %vm65_vm1, %v48_v46  ;;  %v54_v55 = vld [vmem:[%s10224_s0 + $0xb0] sm:$0xff]  ;;  %v55_v56 = vld [vmem:[%s10224_s0 + $0xb8] sm:$0xff]  ;;  %v552_v57 = vld [vmem:[%s10225_s1 + $0x80] sm:$0xff]  ;;  %s5389_s4 = smov 56   ;;  %s5390_s17 = smov 48   ;;  %vm2164_vm7 = vcmask 1044484  }
  0x22   :  { %823 = vmatprep.mubr.f32.mxu1 %v5380_v9  ;;  %v56_v58 = vld [vmem:[%s10224_s0 + $0xc0] sm:$0xff]  ;;  %v57_v59 = vld [vmem:[%s10224_s0 + $0xc8] sm:$0xff]  ;;  %v58_v61 = vld [vmem:[%s10224_s0 + $0xd0] sm:$0xff]  ;;  %s5391_s18 = smov 40   ;;  %s5392_s3 = smov 32   ;;  %vm2167_vm8 = vcmask 1045509  }
  0x23   :  { %v553_v60 = vld [vmem:[%s10225_s1 + $0x88] sm:$0xff]  ;;  %v59_v62 = vld [vmem:[%s10224_s0 + $0xd8] sm:$0xff]  ;;  %v554_v63 = vld [vmem:[%s10225_s1 + $0x90] sm:$0xff]  ;;  %s5394_s19 = smov 8   ;;  %s5395_s20 = smov 16   ;;  %vm2170_vm9 = vcmask 1046534  }
  0x24   :  { %5273 = vmatmul.mubr.msk.f32.gmra.mrb[16].mxu0 %vm65_vm1, %v49_v47  ;;  %v60_v0 = vld [vmem:[%s10224_s0 + $0xe0] sm:$0xff]  ;;  %v61_v1 = vld [vmem:[%s10224_s0 + $0xe8] sm:$0xff]  ;;  %v555_v2 = vld [vmem:[%s10225_s1 + $0x98] sm:$0xff]  ;;  %vm2173_vm10 = vcmask 1047559   ;;  %vm4513_vm11 = vcmask 64512   ;;  %vm4662_vm12 = vcmask 58368  }
  0x25   :  { %5193 = vmatmul.mubr.msk.f32.gmra.mrb[8].mxu1 %vm584_vm2, %v549_v48  ;;  %5275 = vmatprep.mubr.msk.f32.mxu0 %vm65_vm1, %v50_v49  ;;  %v62_v3 = vld [vmem:[%s10224_s0 + $0xf0] sm:$0xff]  ;;  %v63_v4 = vld [vmem:[%s10224_s0 + $0xf8] sm:$0xff]  ;;  %v556_v5 = vld [vmem:[%s10225_s1 + $0xa0] sm:$0xff]  ;;  %s5393_s0 = smov 24   ;;  %vm5017_vm13 = vcmask 130048  }
  0x26   :  { %829 = vmatprep.mubr.f32.mxu1 %v5380_v9  ;;  %v536_v6 = vld [vmem:[%s10225_s1] sm:$0xff]  ;;  %v557_v7 = vld [vmem:[%s10225_s1 + $0xa8] sm:$0xff]  ;;  %v558_v10 = vld [vmem:[%s10225_s1 + $0xb0] sm:$0xff] }
  0x27   :  { %v537_v8 = vld [vmem:[%s10225_s1 + $0x8] sm:$0xff]  ;;  %v538_v11 = vld [vmem:[%s10225_s1 + $0x10] sm:$0xff]  ;;  %v559_v12 = vld [vmem:[%s10225_s1 + $0xb8] sm:$0xff] }
  0x28   :  { %5276 = vmatmul.mubr.msk.f32.gmra.mrb[18].mxu0 %vm65_vm1, %v51_v50  ;;  %v539_v13 = vld [vmem:[%s10225_s1 + $0x18] sm:$0xff]  ;;  %v560_v14 = vld [vmem:[%s10225_s1 + $0xc0] sm:$0xff]  ;;  %v561_v16 = vld [vmem:[%s10225_s1 + $0xc8] sm:$0xff] }
  0x29   :  { %5194 = vmatmul.mubr.msk.f32.gmra.mrb[10].mxu1 %vm584_vm2, %v550_v51  ;;  %5278 = vmatprep.mubr.msk.f32.mxu0 %vm65_vm1, %v52_v52  ;;  %v540_v15 = vld [vmem:[%s10225_s1 + $0x20] sm:$0xff]  ;;  %v541_v17 = vld [vmem:[%s10225_s1 + $0x28] sm:$0xff]  ;;  %v562_v18 = vld [vmem:[%s10225_s1 + $0xd0] sm:$0xff] }
  0x2a   :  { %835 = vmatprep.mubr.f32.mxu1 %v5380_v9  ;;  %v542_v19 = vld [vmem:[%s10225_s1 + $0x30] sm:$0xff]  ;;  %v563_v20 = vld [vmem:[%s10225_s1 + $0xd8] sm:$0xff]  ;;  %v564_v22 = vld [vmem:[%s10225_s1 + $0xe0] sm:$0xff] }
  0x2b   :  { %v543_v21 = vld [vmem:[%s10225_s1 + $0x38] sm:$0xff]  ;;  %v544_v23 = vld [vmem:[%s10225_s1 + $0x40] sm:$0xff]  ;;  %v565_v24 = vld [vmem:[%s10225_s1 + $0xe8] sm:$0xff] }
  0x2c   :  { %5279 = vmatmul.mubr.msk.f32.gmra.mrb[20].mxu0 %vm65_vm1, %v53_v53  ;;  %v566_v25 = vld [vmem:[%s10225_s1 + $0xf0] sm:$0xff]  ;;  %v567_v26 = vld [vmem:[%s10225_s1 + $0xf8] sm:$0xff]  ;;  %s5381_s1 = smov 120  }
  0x2d   :  { %5195 = vmatmul.mubr.msk.f32.gmra.mrb[12].mxu1 %vm584_vm2, %v551_v54  ;;  %5281 = vmatprep.mubr.msk.f32.mxu0 %vm65_vm1, %v54_v55 }
  0x2e   :  { %841 = vmatprep.mubr.f32.mxu1 %v5380_v9 }
  0x30   :  { %5282 = vmatmul.mubr.msk.f32.gmra.mrb[22].mxu0 %vm65_vm1, %v55_v56 }
  0x31   :  { %5196 = vmatmul.mubr.msk.f32.gmra.mrb[14].mxu1 %vm584_vm2, %v552_v57  ;;  %5284 = vmatprep.mubr.msk.f32.mxu0 %vm65_vm1, %v56_v58 }
  0x32   :  { %847 = vmatprep.mubr.f32.mxu1 %v5380_v9 }
  0x34   :  { %5285 = vmatmul.mubr.msk.f32.gmra.mrb[24].mxu0 %vm65_vm1, %v57_v59 }
  0x35   :  { %5197 = vmatmul.mubr.msk.f32.gmra.mrb[16].mxu1 %vm584_vm2, %v553_v60  ;;  %5287 = vmatprep.mubr.msk.f32.mxu0 %vm65_vm1, %v58_v61 }
  0x36   :  { %853 = vmatprep.mubr.f32.mxu1 %v5380_v9 }
  0x38   :  { %5288 = vmatmul.mubr.msk.f32.gmra.mrb[26].mxu0 %vm65_vm1, %v59_v62 }
  0x39   :  { %5198 = vmatmul.mubr.msk.f32.gmra.mrb[18].mxu1 %vm584_vm2, %v554_v63  ;;  %5290 = vmatprep.mubr.msk.f32.mxu0 %vm65_vm1, %v60_v0 }
  0x3a   :  { %859 = vmatprep.mubr.f32.mxu1 %v5380_v9 }
  0x3c   :  { %5291 = vmatmul.mubr.msk.f32.gmra.mrb[28].mxu0 %vm65_vm1, %v61_v1 }
  0x3d   :  { %5199 = vmatmul.mubr.msk.f32.gmra.mrb[20].mxu1 %vm584_vm2, %v555_v2  ;;  %5293 = vmatprep.mubr.msk.f32.mxu0 %vm65_vm1, %v62_v3 }
  0x3e   :  { %865 = vmatprep.mubr.f32.mxu1 %v5380_v9 }
  0x40   :  { %5294 = vmatmul.mubr.msk.f32.gmra.mrb[30].mxu0 %vm65_vm1, %v63_v4 }
  0x41   :  { %5200 = vmatmul.mubr.msk.f32.gmra.mrb[22].mxu1 %vm584_vm2, %v556_v5  ;;  %745 = vmatprep.mubr.f32.mxu0 %v5380_v9 }
  0x42   :  { %871 = vmatprep.mubr.f32.mxu1 %v5380_v9 }
  0x44   :  { %5180 = vmatmul.mubr.msk.f32.vlgmr.msra.gmra.mrb[32].mxu0 %vm584_vm2, %v536_v6 }
  0x45   :  { %5201 = vmatmul.mubr.msk.f32.gmra.mrb[24].mxu1 %vm584_vm2, %v557_v7  ;;  %751 = vmatprep.mubr.f32.mxu0 %v5380_v9 }
  0x46   :  { %877 = vmatprep.mubr.f32.mxu1 %v5380_v9 }
  0x48   :  { %5181 = vmatmul.mubr.msk.f32.gmra.mrb[34].mxu0 %vm584_vm2, %v537_v8 }
  0x49   :  { %5202 = vmatmul.mubr.msk.f32.gmra.mrb[26].mxu1 %vm584_vm2, %v558_v10  ;;  %757 = vmatprep.mubr.f32.mxu0 %v5380_v9 }
  0x4a   :  { %883 = vmatprep.mubr.f32.mxu1 %v5380_v9 }
  0x4c   :  { %5182 = vmatmul.mubr.msk.f32.gmra.mrb[36].mxu0 %vm584_vm2, %v538_v11 }
  0x4d   :  { %5203 = vmatmul.mubr.msk.f32.gmra.mrb[28].mxu1 %vm584_vm2, %v559_v12  ;;  %763 = vmatprep.mubr.f32.mxu0 %v5380_v9 }
  0x4e   :  { %889 = vmatprep.mubr.f32.mxu1 %v5380_v9 }
  0x50   :  { %5183 = vmatmul.mubr.msk.f32.gmra.mrb[38].mxu0 %vm584_vm2, %v539_v13 }
  0x51   :  { %5204 = vmatmul.mubr.msk.f32.gmra.mrb[30].mxu1 %vm584_vm2, %v560_v14  ;;  %769 = vmatprep.mubr.f32.mxu0 %v5380_v9 }
  0x52   :  { %895 = vmatprep.mubr.f32.mxu1 %v5380_v9 }
  0x54   :  { %5184 = vmatmul.mubr.msk.f32.gmra.mrb[40].mxu0 %vm584_vm2, %v540_v15 }
  0x55   :  { %5205 = vmatmul.mubr.msk.f32.gmra.mrb[32].mxu1 %vm584_vm2, %v561_v16  ;;  %775 = vmatprep.mubr.f32.mxu0 %v5380_v9 }
  0x56   :  { %901 = vmatprep.mubr.f32.mxu1 %v5380_v9 }
  0x58   :  { %5185 = vmatmul.mubr.msk.f32.gmra.mrb[42].mxu0 %vm584_vm2, %v541_v17 }
  0x59   :  { %5206 = vmatmul.mubr.msk.f32.gmra.mrb[34].mxu1 %vm584_vm2, %v562_v18  ;;  %781 = vmatprep.mubr.f32.mxu0 %v5380_v9 }
  0x5a   :  { %907 = vmatprep.mubr.f32.mxu1 %v5380_v9 }
  0x5c   :  { %5186 = vmatmul.mubr.msk.f32.gmra.mrb[44].mxu0 %vm584_vm2, %v542_v19 }
  0x5d   :  { %5207 = vmatmul.mubr.msk.f32.gmra.mrb[36].mxu1 %vm584_vm2, %v563_v20  ;;  %787 = vmatprep.mubr.f32.mxu0 %v5380_v9 }
  0x5e   :  { %913 = vmatprep.mubr.f32.mxu1 %v5380_v9 }
  0x60   :  { %5187 = vmatmul.mubr.msk.f32.gmra.mrb[46].mxu0 %vm584_vm2, %v543_v21 }
  0x61   :  { %5208 = vmatmul.mubr.msk.f32.gmra.mrb[38].mxu1 %vm584_vm2, %v564_v22  ;;  %793 = vmatprep.mubr.f32.mxu0 %v5380_v9 }
  0x62   :  { %919 = vmatprep.mubr.f32.mxu1 %v5380_v9 }
  0x64   :  { %5188 = vmatmul.mubr.msk.f32.gmra.mrb[48].mxu0 %vm584_vm2, %v544_v23 }
  0x65   :  { %5209 = vmatmul.mubr.msk.f32.gmra.mrb[40].mxu1 %vm584_vm2, %v565_v24  ;;  %5085 = vmatprep.mubr.f32.mxu0 %v5380_v9 }
  0x66   :  { %925 = vmatprep.mubr.f32.mxu1 %v5380_v9 }
  0x69   :  { %5210 = vmatmul.mubr.msk.f32.gmra.mrb[42].mxu1 %vm584_vm2, %v566_v25 }
  0x6a   :  { %931 = vmatprep.mubr.f32.mxu1 %v5380_v9 }
  0x6d   :  { %5211 = vmatmul.mubr.msk.f32.gmra.mrb[44].mxu1 %vm584_vm2, %v567_v26 }
  0xd7   :  { %v5250_v27 = vpop.f32.mrb[0].mxu0 }
  0xd8   :  { %v393_v28 = vsel %vm391_vm3, %v5250_v27, -inf  ;;  %v232_v29 = vpop.f32.mrb[1].mxu0 }
  0xd9   :  { %v392_v30 = vsel %vm391_vm3, %v232_v29, -inf }
  0xda   :  { %v5792_v31 = vmax.f32 %v392_v30, %v393_v28 }
  0xdb   :  { %v5253_v32 = vpop.f32.mrb[2].mxu0 }
  0xdc   :  { %v402_v33 = vsel %vm391_vm3, %v5253_v32, -inf  ;;  %v242_v34 = vpop.f32.mrb[3].mxu0 }
  0xdd   :  { %v401_v9 = vsel %vm391_vm3, %v242_v34, -inf }
  0xde   :  { %v5796_v35 = vmax.f32 %v401_v9, %v402_v33 }
  0xdf   :  { %v5256_v36 = vpop.f32.mrb[4].mxu0 }
  0xe0   :  { %v411_v37 = vsel %vm391_vm3, %v5256_v36, -inf  ;;  %v252_v38 = vpop.f32.mrb[5].mxu0 }
  0xe1   :  { %v410_v39 = vsel %vm391_vm3, %v252_v38, -inf }
  0xe2   :  { %v5800_v40 = vmax.f32 %v410_v39, %v411_v37 }
  0xe3   :  { %v5259_v41 = vpop.f32.mrb[6].mxu0 }
  0xe4   :  { %v420_v42 = vsel %vm391_vm3, %v5259_v41, -inf  ;;  %v262_v43 = vpop.f32.mrb[7].mxu0 }
  0xe5   :  { %v419_v44 = vsel %vm391_vm3, %v262_v43, -inf }
  0xe6   :  { %v5804_v45 = vmax.f32 %v419_v44, %v420_v42 }
  0xe7   :  { %v5262_v46 = vpop.f32.mrb[8].mxu0 }
  0xe8   :  { %v5806_v47 = vpop.f32.mrb[0].mxu1  ;;  %v429_v48 = vsel %vm391_vm3, %v5262_v46, -inf  ;;  %v272_v49 = vpop.f32.mrb[9].mxu0 }
  0xe9   :  { %v5809_v50 = vpop.f32.mrb[1].mxu1  ;;  %v428_v51 = vsel %vm391_vm3, %v272_v49, -inf }
  0xea   :  { %v5812_v52 = vmax.f32 %v428_v51, %v429_v48 }
  0xeb   :  { %v5265_v53 = vpop.f32.mrb[10].mxu0 }
  0xec   :  { %v807_v54 = vpop.f32.mrb[2].mxu1  ;;  %v438_v55 = vsel %vm391_vm3, %v5265_v53, -inf  ;;  %v282_v56 = vpop.f32.mrb[11].mxu0 }
  0xed   :  { %v809_v57 = vpop.f32.mrb[3].mxu1  ;;  %v437_v58 = vsel %vm391_vm3, %v282_v56, -inf }
  0xee   :  { %v5816_v59 = vmax.f32 %v437_v58, %v438_v55 }
  0xef   :  { %v5268_v60 = vpop.f32.mrb[12].mxu0 }
  0xf0   :  { %v813_v61 = vpop.f32.mrb[4].mxu1  ;;  %v447_v62 = vsel %vm391_vm3, %v5268_v60, -inf  ;;  %v292_v63 = vpop.f32.mrb[13].mxu0 }
  0xf1   :  { %v1008_v0 = vmax.f32 %v807_v54, %v813_v61  ;;  %v815_v1 = vpop.f32.mrb[5].mxu1  ;;  %v446_v2 = vsel %vm391_vm3, %v292_v63, -inf }
  0xf2   :  { %v5820_v3 = vmax.f32 %v809_v57, %v815_v1  ;;  %v5822_v4 = vmax.f32 %v446_v2, %v447_v62 }
  0xf3   :  { %v1009_v5 = vrot.slane %v1008_v0, 4  ;;  %v5271_v6 = vpop.f32.mrb[14].mxu0 }
  0xf4   :  { %v819_v7 = vpop.f32.mrb[6].mxu1  ;;  %v302_v8 = vpop.f32.mrb[15].mxu0  ;;  %v456_v12 = vsel %vm391_vm3, %v5271_v6, -inf }
  0xf5   :  { %v1010_v10 = vmax.f32 %v1008_v0, %v1009_v5  ;;  %v821_v11 = vpop.f32.mrb[7].mxu1  ;;  %v455_v13 = vsel %vm391_vm3, %v302_v8, -inf }
  0xf6   :  { %v5826_v14 = vmax.f32 %v455_v13, %v456_v12 }
  0xf7   :  { %v1011_v15 = vrot.slane %v1010_v10, 2  ;;  %v5274_v16 = vpop.f32.mrb[16].mxu0 }
  0xf8   :  { %v825_v17 = vpop.f32.mrb[8].mxu1  ;;  %v312_v18 = vpop.f32.mrb[17].mxu0  ;;  %v465_v22 = vsel %vm391_vm3, %v5274_v16, -inf }
  0xf9   :  { %v1012_v19 = vmax.f32 %v1010_v10, %v1011_v15  ;;  %v1022_v20 = vmax.f32 %v819_v7, %v825_v17  ;;  %v827_v21 = vpop.f32.mrb[9].mxu1  ;;  %v464_v23 = vsel %vm391_vm3, %v312_v18, -inf }
  0xfa   :  { %v5830_v24 = vmax.f32 %v821_v11, %v827_v21  ;;  %v5832_v27 = vmax.f32 %v464_v23, %v465_v22 }
  0xfb   :  { %v1013_v25 = vrot.slane %v1012_v19, 1  ;;  %v1023_v26 = vrot.slane %v1022_v20, 4  ;;  %v5277_v28 = vpop.f32.mrb[18].mxu0 }
  0xfc   :  { %v831_v29 = vpop.f32.mrb[10].mxu1  ;;  %v322_v30 = vpop.f32.mrb[19].mxu0  ;;  %v474_v9 = vsel %vm391_vm3, %v5277_v28, -inf }
  0xfd   :  { %v5834_v32 = vmax.f32 %v1012_v19, %v1013_v25  ;;  %v1024_v33 = vmax.f32 %v1022_v20, %v1023_v26  ;;  %v833_v34 = vpop.f32.mrb[11].mxu1  ;;  %v473_v36 = vsel %vm391_vm3, %v322_v30, -inf }
  0xfe   :  { %v5840_v38 = vmax.f32 %v473_v36, %v474_v9 }
  0xff   :  { %v1025_v37 = vrot.slane %v1024_v33, 2  ;;  %1188 = vrot.lane.b32.xlu1 %v5834_v32, %s5381_s1  ;;  %v5280_v39 = vpop.f32.mrb[20].mxu0 }
 0x100   :  { %v837_v41 = vpop.f32.mrb[12].mxu1  ;;  %v483_v42 = vsel %vm391_vm3, %v5280_v39, -inf  ;;  %v332_v43 = vpop.f32.mrb[21].mxu0 }
 0x101   :  { %v1026_v44 = vmax.f32 %v1024_v33, %v1025_v37  ;;  %v1036_v46 = vmax.f32 %v831_v29, %v837_v41  ;;  %v839_v48 = vpop.f32.mrb[13].mxu1  ;;  %v482_v51 = vsel %vm391_vm3, %v332_v43, -inf }
 0x102   :  { %v5843_v49 = vmax.f32 %v833_v34, %v839_v48  ;;  %v5848_v56 = vmax.f32 %v482_v51, %v483_v42 }
 0x103   :  { %v1027_v53 = vrot.slane %v1026_v44, 1  ;;  %1220 = vrot.lane.b32.xlu1 %v5834_v32, %s5382_s10  ;;  %v5283_v54 = vpop.f32.mrb[22].mxu0  ;;  %v1037_v25 = vrot.slane %v1036_v46, 4 }
 0x104   :  { %v843_v55 = vpop.f32.mrb[14].mxu1  ;;  %v492_v57 = vsel %vm391_vm3, %v5283_v54, -inf  ;;  %v342_v58 = vpop.f32.mrb[23].mxu0 }
 0x105   :  { %v5851_v60 = vmax.f32 %v1026_v44, %v1027_v53  ;;  %v845_v61 = vpop.f32.mrb[15].mxu1  ;;  %v491_v62 = vsel %vm391_vm3, %v342_v58, -inf  ;;  %v1038_v39 = vmax.f32 %v1036_v46, %v1037_v25 }
 0x106   :  { %v5858_v63 = vmax.f32 %v491_v62, %v492_v57 }
 0x107   :  { %1252 = vrot.lane.b32.xlu1 %v5834_v32, %s5383_s11  ;;  %1190 = vrot.lane.b32.xlu0 %v5851_v60, %s5381_s1  ;;  %v5286_v0 = vpop.f32.mrb[24].mxu0  ;;  %v1039_v53 = vrot.slane %v1038_v39, 2 }
 0x108   :  { %v849_v1 = vpop.f32.mrb[16].mxu1  ;;  %v501_v2 = vsel %vm391_vm3, %v5286_v0, -inf  ;;  %v352_v5 = vpop.f32.mrb[25].mxu0 }
 0x109   :  { %v1050_v6 = vmax.f32 %v843_v55, %v849_v1  ;;  %v851_v7 = vpop.f32.mrb[17].mxu1  ;;  %v500_v10 = vsel %vm391_vm3, %v352_v5, -inf  ;;  %v1040_v1 = vmax.f32 %v1038_v39, %v1039_v53 }
 0x10a   :  { %v5861_v8 = vmax.f32 %v845_v61, %v851_v7  ;;  %v5868_v11 = vmax.f32 %v500_v10, %v501_v2 }
 0x10b   :  { %1284 = vrot.lane.b32.xlu1 %v5834_v32, %s5384_s12  ;;  %1222 = vrot.lane.b32.xlu0 %v5851_v60, %s5382_s10  ;;  %v5289_v12 = vpop.f32.mrb[26].mxu0  ;;  %v1051_v54 = vrot.slane %v1050_v6, 4 }
 0x10c   :  { %v855_v13 = vpop.f32.mrb[18].mxu1  ;;  %v510_v15 = vsel %vm391_vm3, %v5289_v12, -inf  ;;  %v362_v16 = vpop.f32.mrb[27].mxu0 }
 0x10d   :  { %v857_v17 = vpop.f32.mrb[19].mxu1  ;;  %v509_v18 = vsel %vm391_vm3, %v362_v16, -inf  ;;  %v1052_v2 = vmax.f32 %v1050_v6, %v1051_v54 }
 0x10e   :  { %v5876_v19 = vmax.f32 %v509_v18, %v510_v15  ;;  %v1041_v15 = vrot.slane %v1040_v1, 1 }
 0x10f   :  { %1316 = vrot.lane.b32.xlu1 %v5834_v32, %s5385_s13  ;;  %1254 = vrot.lane.b32.xlu0 %v5851_v60, %s5383_s11  ;;  %v5292_v20 = vpop.f32.mrb[28].mxu0  ;;  %v1053_v16 = vrot.slane %v1052_v2, 2 }
 0x110   :  { %v861_v21 = vpop.f32.mrb[20].mxu1  ;;  %v519_v22 = vsel %vm391_vm3, %v5292_v20, -inf  ;;  %v372_v23 = vpop.f32.mrb[29].mxu0 }
 0x111   :  { %v5879_v26 = vmax.f32 %v855_v13, %v861_v21  ;;  %v863_v28 = vpop.f32.mrb[21].mxu1  ;;  %v518_v30 = vsel %vm391_vm3, %v372_v23, -inf  ;;  %v5922_v23 = vmax.f32 %v1040_v1, %v1041_v15  ;;  %v1054_v25 = vmax.f32 %v1052_v2, %v1053_v16 }
 0x112   :  { %v5881_v29 = vmax.f32 %v857_v17, %v863_v28  ;;  %v5888_v33 = vmax.f32 %v518_v30, %v519_v22 }
 0x113   :  { %1348 = vrot.lane.b32.xlu1 %v5834_v32, %s5386_s14  ;;  %1286 = vrot.lane.b32.xlu0 %v5851_v60, %s5384_s12  ;;  %v5295_v34 = vpop.f32.mrb[30].mxu0  ;;  %10407 = vst [vmem:[#allocation5_spill] sm:$0xff] %v5922_v23  ;;  %v1055_v39 = vrot.slane %v1054_v25, 1 }
 0x114   :  { %v867_v9 = vpop.f32.mrb[22].mxu1  ;;  %v528_v36 = vsel %vm391_vm3, %v5295_v34, -inf  ;;  %v382_v37 = vpop.f32.mrb[31].mxu0 }
 0x115   :  { %v869_v41 = vpop.f32.mrb[23].mxu1  ;;  %v527_v42 = vsel %vm391_vm3, %v382_v37, -inf }
 0x116   :  { %v5896_v43 = vmax.f32 %v527_v42, %v528_v36 }
 0x117   :  { %1380 = vrot.lane.b32.xlu1 %v5834_v32, %s5387_s15  ;;  %1318 = vrot.lane.b32.xlu0 %v5851_v60, %s5385_s13  ;;  %v747_v44 = vpop.f32.mrb[32].mxu0 }
 0x118   :  { %v873_v48 = vpop.f32.mrb[24].mxu1  ;;  %v749_v51 = vpop.f32.mrb[33].mxu0 }
 0x119   :  { %v5898_v55 = vmax.f32 %v867_v9, %v873_v48  ;;  %v875_v46 = vpop.f32.mrb[25].mxu1 }
 0x11a   :  { %v5900_v57 = vmax.f32 %v869_v41, %v875_v46  ;;  %v5942_v46 = vmax.f32 %v1054_v25, %v1055_v39 }
 0x11b   :  { %1412 = vrot.lane.b32.xlu1 %v5834_v32, %s5388_s16  ;;  %1350 = vrot.lane.b32.xlu0 %v5851_v60, %s5386_s14  ;;  %v753_v58 = vpop.f32.mrb[34].mxu0 }
 0x11c   :  { %v879_v61 = vpop.f32.mrb[26].mxu1  ;;  %v5906_v62 = vmax.f32 %v747_v44, %v753_v58  ;;  %v755_v0 = vpop.f32.mrb[35].mxu0 }
 0x11d   :  { %v881_v5 = vpop.f32.mrb[27].mxu1  ;;  %v5908_v7 = vmax.f32 %v749_v51, %v755_v0 }
 0x11f   :  { %1444 = vrot.lane.b32.xlu1 %v5834_v32, %s5389_s4  ;;  %1382 = vrot.lane.b32.xlu0 %v5851_v60, %s5387_s15  ;;  %v759_v10 = vpop.f32.mrb[36].mxu0 }
 0x120   :  { %v885_v12 = vpop.f32.mrb[28].mxu1  ;;  %v761_v13 = vpop.f32.mrb[37].mxu0 }
 0x121   :  { %v5914_v17 = vmax.f32 %v879_v61, %v885_v12  ;;  %v887_v18 = vpop.f32.mrb[29].mxu1 }
 0x122   :  { %v5916_v20 = vmax.f32 %v881_v5, %v887_v18 }
 0x123   :  { %1476 = vrot.lane.b32.xlu1 %v5834_v32, %s5390_s17  ;;  %1414 = vrot.lane.b32.xlu0 %v5851_v60, %s5388_s16  ;;  %v765_v6 = vpop.f32.mrb[38].mxu0 }
 0x124   :  { %v891_v21 = vpop.f32.mrb[30].mxu1  ;;  %v767_v22 = vpop.f32.mrb[39].mxu0  ;;  %v5924_v30 = vmax.f32 %v759_v10, %v765_v6 }
 0x125   :  { %v893_v28 = vpop.f32.mrb[31].mxu1  ;;  %v5926_v34 = vmax.f32 %v761_v13, %v767_v22 }
 0x127   :  { %1446 = vrot.lane.b32.xlu0 %v5851_v60, %s5389_s4  ;;  %1192 = vrot.lane.b32.xlu1 %v5922_v23, %s5381_s1  ;;  %v771_v9 = vpop.f32.mrb[40].mxu0 }
 0x128   :  { %v897_v36 = vpop.f32.mrb[32].mxu1  ;;  %v773_v37 = vpop.f32.mrb[41].mxu0 }
 0x129   :  { %v5932_v41 = vmax.f32 %v891_v21, %v897_v36  ;;  %v899_v42 = vpop.f32.mrb[33].mxu1  ;;  %v1065_v36 = vrot.slane %v5879_v26, 4 }
 0x12a   :  { %v5934_v44 = vmax.f32 %v893_v28, %v899_v42 }
 0x12b   :  { %1478 = vrot.lane.b32.xlu0 %v5851_v60, %s5390_s17  ;;  %1224 = vrot.lane.b32.xlu1 %v5922_v23, %s5382_s10  ;;  %v777_v48 = vpop.f32.mrb[42].mxu0 }
 0x12c   :  { %v903_v51 = vpop.f32.mrb[34].mxu1  ;;  %v5940_v53 = vmax.f32 %v771_v9, %v777_v48  ;;  %v779_v54 = vpop.f32.mrb[43].mxu0 }
 0x12d   :  { %v905_v58 = vpop.f32.mrb[35].mxu1  ;;  %v5944_v61 = vmax.f32 %v773_v37, %v779_v54 }
 0x12f   :  { %1256 = vrot.lane.b32.xlu1 %v5922_v23, %s5383_s11  ;;  %1194 = vrot.lane.b32.xlu0 %v5942_v46, %s5381_s1  ;;  %v783_v0 = vpop.f32.mrb[44].mxu0 }
 0x130   :  { %v909_v1 = vpop.f32.mrb[36].mxu1  ;;  %v785_v2 = vpop.f32.mrb[45].mxu0 }
 0x131   :  { %v5950_v5 = vmax.f32 %v903_v51, %v909_v1  ;;  %v911_v10 = vpop.f32.mrb[37].mxu1  ;;  %v1066_v51 = vmax.f32 %v5879_v26, %v1065_v36 }
 0x132   :  { %v5952_v12 = vmax.f32 %v905_v58, %v911_v10 }
 0x133   :  { %1288 = vrot.lane.b32.xlu1 %v5922_v23, %s5384_s12  ;;  %1226 = vrot.lane.b32.xlu0 %v5942_v46, %s5382_s10  ;;  %v789_v13 = vpop.f32.mrb[46].mxu0  ;;  %v1067_v58 = vrot.slane %v1066_v51, 2 }
 0x134   :  { %v915_v15 = vpop.f32.mrb[38].mxu1  ;;  %v791_v16 = vpop.f32.mrb[47].mxu0  ;;  %v5958_v18 = vmax.f32 %v783_v0, %v789_v13  ;;  %v1079_v0 = vrot.slane %v5898_v55, 4 }
 0x135   :  { %v5960_v6 = vmax.f32 %v785_v2, %v791_v16  ;;  %v917_v21 = vpop.f32.mrb[39].mxu1  ;;  %v1068_v26 = vmax.f32 %v1066_v51, %v1067_v58 }
 0x136   :  { %v1080_v13 = vmax.f32 %v5898_v55, %v1079_v0 }
 0x137   :  { %1320 = vrot.lane.b32.xlu1 %v5922_v23, %s5385_s13  ;;  %1258 = vrot.lane.b32.xlu0 %v5942_v46, %s5383_s11  ;;  %v795_v22 = vpop.f32.mrb[48].mxu0 }
 0x138   :  { %v5967_v25 = vmax.f32 %v795_v22, %v5806_v47  ;;  %v921_v28 = vpop.f32.mrb[40].mxu1  ;;  %v797_v9 = vpop.f32.mrb[49].mxu0  ;;  %v1081_v16 = vrot.slane %v1080_v13, 2 }
 0x139   :  { %v5970_v37 = vmax.f32 %v915_v15, %v921_v28  ;;  %v923_v39 = vpop.f32.mrb[41].mxu1  ;;  %v5973_v42 = vmax.f32 %v797_v9, %v5809_v50  ;;  %v1069_v15 = vrot.slane %v1068_v26, 1  ;;  %v1093_v9 = vrot.slane %v5914_v17, 4 }
 0x13a   :  { %v5979_v48 = vmax.f32 %v917_v21, %v923_v39  ;;  %v1082_v22 = vmax.f32 %v1080_v13, %v1081_v16 }
 0x13b   :  { %1352 = vrot.lane.b32.xlu1 %v5922_v23, %s5386_s14  ;;  %1290 = vrot.lane.b32.xlu0 %v5942_v46, %s5384_s12  ;;  %v6004_v21 = vmax.f32 %v1068_v26, %v1069_v15  ;;  %v1094_v36 = vmax.f32 %v5914_v17, %v1093_v9 }
 0x13c   :  { %v927_v47 = vpop.f32.mrb[42].mxu1  ;;  %v1083_v55 = vrot.slane %v1082_v22, 1 }
 0x13d   :  { %v929_v54 = vpop.f32.mrb[43].mxu1  ;;  %v1095_v39 = vrot.slane %v1094_v36, 2 }
 0x13e   :  { %v6014_v28 = vmax.f32 %v1082_v22, %v1083_v55 }
 0x13f   :  { %1384 = vrot.lane.b32.xlu1 %v5922_v23, %s5387_s15  ;;  %1322 = vrot.lane.b32.xlu0 %v5942_v46, %s5385_s13  ;;  %v1096_v51 = vmax.f32 %v1094_v36, %v1095_v39 }
 0x140   :  { %v933_v50 = vpop.f32.mrb[44].mxu1 }
 0x141   :  { %v5987_v1 = vmax.f32 %v927_v47, %v933_v50  ;;  %v935_v2 = vpop.f32.mrb[45].mxu1  ;;  %v939_v47 = vrot.slane %v5906_v62, 4  ;;  %v1097_v17 = vrot.slane %v1096_v51, 1 }
 0x142   :  { %v5989_v10 = vmax.f32 %v929_v54, %v935_v2 }
 0x143   :  { %1416 = vrot.lane.b32.xlu1 %v5922_v23, %s5388_s16  ;;  %1354 = vrot.lane.b32.xlu0 %v5942_v46, %s5386_s14  ;;  %v940_v54 = vmax.f32 %v5906_v62, %v939_v47  ;;  %v6054_v0 = vmax.f32 %v1096_v51, %v1097_v17  ;;  %v953_v51 = vrot.slane %v5924_v30, 4 }
 0x145   :  { %v941_v50 = vrot.slane %v940_v54, 2 }
 0x147   :  { %1448 = vrot.lane.b32.xlu1 %v5922_v23, %s5389_s4  ;;  %1386 = vrot.lane.b32.xlu0 %v5942_v46, %s5387_s15  ;;  %v942_v2 = vmax.f32 %v940_v54, %v941_v50  ;;  %v954_v50 = vmax.f32 %v5924_v30, %v953_v51 }
 0x149   :  { %v943_v26 = vrot.slane %v942_v2, 1 }
 0x14b   :  { %1480 = vrot.lane.b32.xlu1 %v5922_v23, %s5390_s17  ;;  %1418 = vrot.lane.b32.xlu0 %v5942_v46, %s5388_s16  ;;  %v6070_v16 = vmax.f32 %v942_v2, %v943_v26 }
 0x14f   :  { %1450 = vrot.lane.b32.xlu0 %v5942_v46, %s5389_s4  ;;  %1196 = vrot.lane.b32.xlu1 %v6004_v21, %s5381_s1 }
 0x153   :  { %1482 = vrot.lane.b32.xlu0 %v5942_v46, %s5390_s17  ;;  %1228 = vrot.lane.b32.xlu1 %v6004_v21, %s5382_s10 }
 0x157   :  { %1260 = vrot.lane.b32.xlu1 %v6004_v21, %s5383_s11  ;;  %1198 = vrot.lane.b32.xlu0 %v6014_v28, %s5381_s1 }
 0x15b   :  { %1292 = vrot.lane.b32.xlu1 %v6004_v21, %s5384_s12  ;;  %1230 = vrot.lane.b32.xlu0 %v6014_v28, %s5382_s10 }
 0x15f   :  { %1324 = vrot.lane.b32.xlu1 %v6004_v21, %s5385_s13  ;;  %1262 = vrot.lane.b32.xlu0 %v6014_v28, %s5383_s11 }
 0x163   :  { %1356 = vrot.lane.b32.xlu1 %v6004_v21, %s5386_s14  ;;  %1294 = vrot.lane.b32.xlu0 %v6014_v28, %s5384_s12 }
 0x167   :  { %1388 = vrot.lane.b32.xlu1 %v6004_v21, %s5387_s15  ;;  %1326 = vrot.lane.b32.xlu0 %v6014_v28, %s5385_s13 }
 0x16b   :  { %1420 = vrot.lane.b32.xlu1 %v6004_v21, %s5388_s16  ;;  %1358 = vrot.lane.b32.xlu0 %v6014_v28, %s5386_s14 }
 0x16f   :  { %1452 = vrot.lane.b32.xlu1 %v6004_v21, %s5389_s4  ;;  %1390 = vrot.lane.b32.xlu0 %v6014_v28, %s5387_s15 }
 0x171   :  { %v6048_v58 = vpop.permute.xlu1 %1188 }
 0x172   :  { %10408 = vst [vmem:[#allocation6_spill] sm:$0xff] %v6048_v58 }
 0x173   :  { %1484 = vrot.lane.b32.xlu1 %v6004_v21, %s5390_s17  ;;  %1422 = vrot.lane.b32.xlu0 %v6014_v28, %s5388_s16 }
 0x175   :  { %v6056_v62 = vpop.permute.xlu1 %1220 }
 0x176   :  { %10409 = vst [vmem:[#allocation7_spill] sm:$0xff] %v6056_v62 }
 0x177   :  { %1454 = vrot.lane.b32.xlu0 %v6014_v28, %s5389_s4  ;;  %1200 = vrot.lane.b32.xlu1 %v6054_v0, %s5381_s1 }
 0x179   :  { %v6062_v13 = vpop.permute.xlu1 %1252  ;;  %v6064_v15 = vpop.permute.xlu0 %1190 }
 0x17a   :  { %10410 = vst [vmem:[#allocation8_spill] sm:$0xff] %v6062_v13  ;;  %10411 = vst [vmem:[#allocation9_spill] sm:$0xff] %v6064_v15 }
 0x17b   :  { %1486 = vrot.lane.b32.xlu0 %v6014_v28, %s5390_s17  ;;  %1232 = vrot.lane.b32.xlu1 %v6054_v0, %s5382_s10 }
 0x17d   :  { %v6072_v22 = vpop.permute.xlu1 %1284  ;;  %v6074_v55 = vpop.permute.xlu0 %1222 }
 0x17e   :  { %10412 = vst [vmem:[#allocation10_spill] sm:$0xff] %v6072_v22  ;;  %10413 = vst [vmem:[#allocation11_spill] sm:$0xff] %v6074_v55 }
 0x17f   :  { %1264 = vrot.lane.b32.xlu1 %v6054_v0, %s5383_s11  ;;  %1178 = vrot.lane.b32.xlu0 %v6070_v16, %s5381_s1 }
 0x181   :  { %v6080_v9 = vpop.permute.xlu1 %1316  ;;  %v6082_v36 = vpop.permute.xlu0 %1254 }
 0x182   :  { %10414 = vst [vmem:[#allocation12_spill] sm:$0xff] %v6080_v9  ;;  %10415 = vst [vmem:[#allocation13_spill] sm:$0xff] %v6082_v36 }
 0x183   :  { %1296 = vrot.lane.b32.xlu1 %v6054_v0, %s5384_s12  ;;  %1210 = vrot.lane.b32.xlu0 %v6070_v16, %s5382_s10 }
 0x185   :  { %v6088_v39 = vpop.permute.xlu1 %1348  ;;  %v6090_v47 = vpop.permute.xlu0 %1286 }
 0x186   :  { %10416 = vst [vmem:[#allocation14_spill] sm:$0xff] %v6088_v39  ;;  %10417 = vst [vmem:[#allocation15_spill] sm:$0xff] %v6090_v47 }
 0x187   :  { %1328 = vrot.lane.b32.xlu1 %v6054_v0, %s5385_s13  ;;  %1242 = vrot.lane.b32.xlu0 %v6070_v16, %s5383_s11 }
 0x189   :  { %v6097_v54 = vpop.permute.xlu1 %1380  ;;  %v6099_v17 = vpop.permute.xlu0 %1318 }
 0x18a   :  { %10418 = vst [vmem:[#allocation16_spill] sm:$0xff] %v6097_v54  ;;  %10419 = vst [vmem:[#allocation17_spill] sm:$0xff] %v6099_v17  ;;  %v955_v54 = vrot.slane %v954_v50, 2 }
 0x18b   :  { %1360 = vrot.lane.b32.xlu1 %v6054_v0, %s5386_s14  ;;  %1274 = vrot.lane.b32.xlu0 %v6070_v16, %s5384_s12 }
 0x18c   :  { %v956_v30 = vmax.f32 %v954_v50, %v955_v54 }
 0x18d   :  { %v6106_v2 = vpop.permute.xlu1 %1412  ;;  %v6108_v26 = vpop.permute.xlu0 %1350 }
 0x18e   :  { %10420 = vst [vmem:[#allocation18_spill] sm:$0xff] %v6106_v2  ;;  %10421 = vst [vmem:[#allocation19_spill] sm:$0xff] %v6108_v26 }
 0x18f   :  { %1392 = vrot.lane.b32.xlu1 %v6054_v0, %s5387_s15  ;;  %1306 = vrot.lane.b32.xlu0 %v6070_v16, %s5385_s13 }
 0x191   :  { %v6114_v17 = vpop.permute.xlu1 %1444  ;;  %v6116_v47 = vpop.permute.xlu0 %1382 }
 0x192   :  { %10422 = vst [vmem:[#allocation20_spill] sm:$0xff] %v6114_v17  ;;  %10423 = vst [vmem:[#allocation21_spill] sm:$0xff] %v6116_v47  ;;  %v1107_v17 = vrot.slane %v5932_v41, 4  ;;  %v957_v47 = vrot.slane %v956_v30, 1 }
 0x193   :  { %1424 = vrot.lane.b32.xlu1 %v6054_v0, %s5388_s16  ;;  %1338 = vrot.lane.b32.xlu0 %v6070_v16, %s5386_s14 }
 0x194   :  { %v1108_v54 = vmax.f32 %v5932_v41, %v1107_v17  ;;  %v6140_v50 = vmax.f32 %v956_v30, %v957_v47 }
 0x195   :  { %v6122_v51 = vpop.permute.xlu1 %1476  ;;  %v6124_v26 = vpop.permute.xlu0 %1414 }
 0x196   :  { %10424 = vst [vmem:[#allocation22_spill] sm:$0xff] %v6122_v51  ;;  %10425 = vst [vmem:[#allocation23_spill] sm:$0xff] %v6124_v26 }
 0x197   :  { %1456 = vrot.lane.b32.xlu1 %v6054_v0, %s5389_s4  ;;  %1370 = vrot.lane.b32.xlu0 %v6070_v16, %s5387_s15 }
 0x199   :  { %v6131_v2 = vpop.permute.xlu0 %1446  ;;  %v6133_v39 = vpop.permute.xlu1 %1192 }
 0x19a   :  { %10426 = vst [vmem:[#allocation24_spill] sm:$0xff] %v6131_v2  ;;  %10427 = vst [vmem:[#allocation25_spill] sm:$0xff] %v6133_v39  ;;  %v1109_v39 = vrot.slane %v1108_v54, 2 }
 0x19b   :  { %1488 = vrot.lane.b32.xlu1 %v6054_v0, %s5390_s17  ;;  %1402 = vrot.lane.b32.xlu0 %v6070_v16, %s5388_s16 }
 0x19c   :  { %v1110_v41 = vmax.f32 %v1108_v54, %v1109_v39 }
 0x19d   :  { %v6142_v26 = vpop.permute.xlu0 %1478  ;;  %v6144_v51 = vpop.permute.xlu1 %1224 }
 0x19e   :  { %10428 = vst [vmem:[#allocation26_spill] sm:$0xff] %v6142_v26  ;;  %10429 = vst [vmem:[#allocation27_spill] sm:$0xff] %v6144_v51  ;;  %v1111_v30 = vrot.slane %v1110_v41, 1 }
 0x19f   :  { %1434 = vrot.lane.b32.xlu0 %v6070_v16, %s5389_s4  ;;  %1212 = vrot.lane.b32.xlu1 %v6140_v50, %s5382_s10 }
 0x1a0   :  { %v6174_v39 = vmax.f32 %v1110_v41, %v1111_v30  ;;  %v1121_v41 = vrot.slane %v5950_v5, 4 }
 0x1a1   :  { %v6150_v2 = vpop.permute.xlu1 %1256  ;;  %v6152_v36 = vpop.permute.xlu0 %1194 }
 0x1a2   :  { %10430 = vst [vmem:[#allocation28_spill] sm:$0xff] %v6150_v2  ;;  %10431 = vst [vmem:[#allocation29_spill] sm:$0xff] %v6152_v36 }
 0x1a3   :  { %1466 = vrot.lane.b32.xlu0 %v6070_v16, %s5390_s17  ;;  %1244 = vrot.lane.b32.xlu1 %v6140_v50, %s5383_s11 }
 0x1a5   :  { %v6158_v47 = vpop.permute.xlu1 %1288  ;;  %v6160_v17 = vpop.permute.xlu0 %1226 }
 0x1a6   :  { %10432 = vst [vmem:[#allocation30_spill] sm:$0xff] %v6158_v47  ;;  %10433 = vst [vmem:[#allocation31_spill] sm:$0xff] %v6160_v17 }
 0x1a7   :  { %1498 = vrot.lane.b32.xlu0 %v6070_v16, %s5391_s18  ;;  %1276 = vrot.lane.b32.xlu1 %v6140_v50, %s5384_s12 }
 0x1a9   :  { %v6166_v36 = vpop.permute.xlu1 %1320  ;;  %v6168_v2 = vpop.permute.xlu0 %1258 }
 0x1aa   :  { %10434 = vst [vmem:[#allocation32_spill] sm:$0xff] %v6166_v36  ;;  %10435 = vst [vmem:[#allocation33_spill] sm:$0xff] %v6168_v2  ;;  %v967_v2 = vrot.slane %v5940_v53, 4 }
 0x1ab   :  { %1308 = vrot.lane.b32.xlu1 %v6140_v50, %s5385_s13  ;;  %1180 = vrot.lane.b32.xlu0 %v6140_v50, %s5381_s1 }
 0x1ac   :  { %v968_v30 = vmax.f32 %v5940_v53, %v967_v2 }
 0x1ad   :  { %v6176_v54 = vpop.permute.xlu1 %1352  ;;  %v6178_v17 = vpop.permute.xlu0 %1290 }
 0x1ae   :  { %10436 = vst [vmem:[#allocation34_spill] sm:$0xff] %v6176_v54  ;;  %10437 = vst [vmem:[#allocation35_spill] sm:$0xff] %v6178_v17 }
 0x1af   :  { %1340 = vrot.lane.b32.xlu1 %v6140_v50, %s5386_s14  ;;  %1202 = vrot.lane.b32.xlu0 %v6174_v39, %s5381_s1 }
 0x1b1   :  { %v6185_v36 = vpop.permute.xlu1 %1384  ;;  %v6187_v47 = vpop.permute.xlu0 %1322 }
 0x1b2   :  { %10438 = vst [vmem:[#allocation36_spill] sm:$0xff] %v6185_v36  ;;  %10439 = vst [vmem:[#allocation37_spill] sm:$0xff] %v6187_v47  ;;  %v1122_v47 = vmax.f32 %v5950_v5, %v1121_v41  ;;  %v969_v36 = vrot.slane %v968_v30, 2 }
 0x1b3   :  { %1372 = vrot.lane.b32.xlu1 %v6140_v50, %s5387_s15  ;;  %1234 = vrot.lane.b32.xlu0 %v6174_v39, %s5382_s10 }
 0x1b4   :  { %v1123_v53 = vrot.slane %v1122_v47, 2  ;;  %v970_v2 = vmax.f32 %v968_v30, %v969_v36 }
 0x1b5   :  { %v6195_v17 = vpop.permute.xlu1 %1416  ;;  %v6197_v54 = vpop.permute.xlu0 %1354 }
 0x1b6   :  { %10440 = vst [vmem:[#allocation38_spill] sm:$0xff] %v6195_v17  ;;  %10441 = vst [vmem:[#allocation39_spill] sm:$0xff] %v6197_v54  ;;  %v1124_v5 = vmax.f32 %v1122_v47, %v1123_v53  ;;  %v971_v41 = vrot.slane %v970_v2, 1 }
 0x1b7   :  { %1404 = vrot.lane.b32.xlu1 %v6140_v50, %s5388_s16  ;;  %1266 = vrot.lane.b32.xlu0 %v6174_v39, %s5383_s11 }
 0x1b8   :  { %v1125_v36 = vrot.slane %v1124_v5, 1  ;;  %v6228_v30 = vmax.f32 %v970_v2, %v971_v41 }
 0x1b9   :  { %v6204_v51 = vpop.permute.xlu1 %1448  ;;  %v6206_v26 = vpop.permute.xlu0 %1386 }
 0x1ba   :  { %10442 = vst [vmem:[#allocation40_spill] sm:$0xff] %v6204_v51  ;;  %10443 = vst [vmem:[#allocation41_spill] sm:$0xff] %v6206_v26  ;;  %v6238_v47 = vmax.f32 %v1124_v5, %v1125_v36 }
 0x1bb   :  { %1436 = vrot.lane.b32.xlu1 %v6140_v50, %s5389_s4  ;;  %1298 = vrot.lane.b32.xlu0 %v6174_v39, %s5384_s12 }
 0x1bc   :  { %10450 = vst [vmem:[#allocation48_spill] sm:$0xff] %v6238_v47 }
 0x1bd   :  { %v6212_v54 = vpop.permute.xlu1 %1480  ;;  %v6214_v17 = vpop.permute.xlu0 %1418 }
 0x1be   :  { %10444 = vst [vmem:[#allocation42_spill] sm:$0xff] %v6212_v54  ;;  %10445 = vst [vmem:[#allocation43_spill] sm:$0xff] %v6214_v17 }
 0x1bf   :  { %1468 = vrot.lane.b32.xlu1 %v6140_v50, %s5390_s17  ;;  %1330 = vrot.lane.b32.xlu0 %v6174_v39, %s5385_s13 }
 0x1c1   :  { %v6220_v26 = vpop.permute.xlu0 %1450  ;;  %v6222_v51 = vpop.permute.xlu1 %1196 }
 0x1c2   :  { %10446 = vst [vmem:[#allocation44_spill] sm:$0xff] %v6220_v26  ;;  %10447 = vst [vmem:[#allocation45_spill] sm:$0xff] %v6222_v51 }
 0x1c3   :  { %1500 = vrot.lane.b32.xlu1 %v6140_v50, %s5391_s18  ;;  %1362 = vrot.lane.b32.xlu0 %v6174_v39, %s5386_s14 }
 0x1c5   :  { %v6230_v54 = vpop.permute.xlu0 %1482  ;;  %v6232_v17 = vpop.permute.xlu1 %1228 }
 0x1c6   :  { %10448 = vst [vmem:[#allocation46_spill] sm:$0xff] %v6230_v54  ;;  %10449 = vst [vmem:[#allocation47_spill] sm:$0xff] %v6232_v17  ;;  %v1135_v17 = vrot.slane %v5970_v37, 4 }
 0x1c7   :  { %1394 = vrot.lane.b32.xlu0 %v6174_v39, %s5387_s15  ;;  %1182 = vrot.lane.b32.xlu1 %v6228_v30, %s5381_s1 }
 0x1c9   :  { %v6240_v53 = vpop.permute.xlu1 %1260  ;;  %v6242_v26 = vpop.permute.xlu0 %1198 }
 0x1ca   :  { %10451 = vst [vmem:[#allocation49_spill] sm:$0xff] %v6240_v53  ;;  %10452 = vst [vmem:[#allocation50_spill] sm:$0xff] %v6242_v26 }
 0x1cb   :  { %1426 = vrot.lane.b32.xlu0 %v6174_v39, %s5388_s16  ;;  %1204 = vrot.lane.b32.xlu1 %v6238_v47, %s5381_s1 }
 0x1cd   :  { %v6248_v2 = vpop.permute.xlu1 %1292  ;;  %v6250_v41 = vpop.permute.xlu0 %1230 }
 0x1ce   :  { %10453 = vst [vmem:[#allocation51_spill] sm:$0xff] %v6248_v2  ;;  %10454 = vst [vmem:[#allocation52_spill] sm:$0xff] %v6250_v41 }
 0x1cf   :  { %1458 = vrot.lane.b32.xlu0 %v6174_v39, %s5389_s4  ;;  %1236 = vrot.lane.b32.xlu1 %v6238_v47, %s5382_s10 }
 0x1d1   :  { %v6256_v5 = vpop.permute.xlu1 %1324  ;;  %v6258_v36 = vpop.permute.xlu0 %1262 }
 0x1d2   :  { %10455 = vst [vmem:[#allocation53_spill] sm:$0xff] %v6256_v5  ;;  %10456 = vst [vmem:[#allocation54_spill] sm:$0xff] %v6258_v36 }
 0x1d3   :  { %1490 = vrot.lane.b32.xlu0 %v6174_v39, %s5390_s17  ;;  %1268 = vrot.lane.b32.xlu1 %v6238_v47, %s5383_s11 }
 0x1d5   :  { %v6264_v54 = vpop.permute.xlu1 %1356  ;;  %v6266_v2 = vpop.permute.xlu0 %1294 }
 0x1d6   :  { %10457 = vst [vmem:[#allocation55_spill] sm:$0xff] %v6264_v54  ;;  %10458 = vst [vmem:[#allocation56_spill] sm:$0xff] %v6266_v2  ;;  %v981_v54 = vrot.slane %v5958_v18, 4 }
 0x1d7   :  { %1214 = vrot.lane.b32.xlu0 %v6228_v30, %s5382_s10  ;;  %1300 = vrot.lane.b32.xlu1 %v6238_v47, %s5384_s12 }
 0x1d9   :  { %v6272_v41 = vpop.permute.xlu1 %1388  ;;  %v6274_v5 = vpop.permute.xlu0 %1326 }
 0x1da   :  { %10459 = vst [vmem:[#allocation57_spill] sm:$0xff] %v6272_v41  ;;  %10460 = vst [vmem:[#allocation58_spill] sm:$0xff] %v6274_v5  ;;  %v982_v5 = vmax.f32 %v5958_v18, %v981_v54  ;;  %v995_v54 = vrot.slane %v5967_v25, 4 }
 0x1db   :  { %1246 = vrot.lane.b32.xlu0 %v6228_v30, %s5383_s11  ;;  %1332 = vrot.lane.b32.xlu1 %v6238_v47, %s5385_s13 }
 0x1dd   :  { %v6281_v36 = vpop.permute.xlu1 %1420  ;;  %v6283_v2 = vpop.permute.xlu0 %1358 }
 0x1de   :  { %10461 = vst [vmem:[#allocation59_spill] sm:$0xff] %v6281_v36  ;;  %10462 = vst [vmem:[#allocation60_spill] sm:$0xff] %v6283_v2  ;;  %v983_v36 = vrot.slane %v982_v5, 2 }
 0x1df   :  { %1278 = vrot.lane.b32.xlu0 %v6228_v30, %s5384_s12  ;;  %1364 = vrot.lane.b32.xlu1 %v6238_v47, %s5386_s14 }
 0x1e0   :  { %v984_v18 = vmax.f32 %v982_v5, %v983_v36 }
 0x1e1   :  { %v6290_v41 = vpop.permute.xlu1 %1452  ;;  %v6292_v26 = vpop.permute.xlu0 %1390 }
 0x1e2   :  { %10463 = vst [vmem:[#allocation61_spill] sm:$0xff] %v6290_v41  ;;  %10464 = vst [vmem:[#allocation62_spill] sm:$0xff] %v6292_v26 }
 0x1e3   :  { %1310 = vrot.lane.b32.xlu0 %v6228_v30, %s5385_s13  ;;  %1396 = vrot.lane.b32.xlu1 %v6238_v47, %s5387_s15 }
 0x1e5   :  { %v6298_v2 = vpop.permute.xlu1 %1484  ;;  %v6300_v53 = vpop.permute.xlu0 %1422 }
 0x1e6   :  { %10465 = vst [vmem:[#allocation63_spill] sm:$0xff] %v6298_v2  ;;  %10466 = vst [vmem:[#allocation64_spill] sm:$0xff] %v6300_v53  ;;  %v985_v53 = vrot.slane %v984_v18, 1  ;;  %v996_v2 = vmax.f32 %v5967_v25, %v995_v54 }
 0x1e7   :  { %1342 = vrot.lane.b32.xlu0 %v6228_v30, %s5386_s14  ;;  %1428 = vrot.lane.b32.xlu1 %v6238_v47, %s5388_s16 }
 0x1e8   :  { %v6325_v36 = vmax.f32 %v984_v18, %v985_v53 }
 0x1e9   :  { %v6307_v26 = vpop.permute.xlu0 %1454  ;;  %v6309_v41 = vpop.permute.xlu1 %1200 }
 0x1ea   :  { %10467 = vst [vmem:[#allocation65_spill] sm:$0xff] %v6307_v26  ;;  %10468 = vst [vmem:[#allocation66_spill] sm:$0xff] %v6309_v41  ;;  %v997_v41 = vrot.slane %v996_v2, 2  ;;  %v1136_v26 = vmax.f32 %v5970_v37, %v1135_v17 }
 0x1eb   :  { %1374 = vrot.lane.b32.xlu0 %v6228_v30, %s5387_s15  ;;  %1460 = vrot.lane.b32.xlu1 %v6238_v47, %s5389_s4 }
 0x1ec   :  { %v998_v54 = vmax.f32 %v996_v2, %v997_v41 }
 0x1ed   :  { %v6317_v51 = vpop.permute.xlu0 %1486  ;;  %v6319_v5 = vpop.permute.xlu1 %1232 }
 0x1ee   :  { %10469 = vst [vmem:[#allocation67_spill] sm:$0xff] %v6317_v51  ;;  %10470 = vst [vmem:[#allocation68_spill] sm:$0xff] %v6319_v5  ;;  %v1137_v5 = vrot.slane %v1136_v26, 2  ;;  %v999_v37 = vrot.slane %v998_v54, 1 }
 0x1ef   :  { %1406 = vrot.lane.b32.xlu0 %v6228_v30, %s5388_s16  ;;  %1492 = vrot.lane.b32.xlu1 %v6238_v47, %s5390_s17 }
 0x1f0   :  { %v1138_v17 = vmax.f32 %v1136_v26, %v1137_v5  ;;  %v6352_v2 = vmax.f32 %v998_v54, %v999_v37 }
 0x1f1   :  { %v6328_v9 = vpop.permute.xlu1 %1264  ;;  %v6330_v25 = vpop.permute.xlu0 %1178 }
 0x1f2   :  { %10471 = vst [vmem:[#allocation69_spill] sm:$0xff] %v6328_v9  ;;  %10472 = vst [vmem:[#allocation70_spill] sm:$0xff] %v6330_v25  ;;  %v1139_v41 = vrot.slane %v1138_v17, 1 }
 0x1f3   :  { %1438 = vrot.lane.b32.xlu0 %v6228_v30, %s5389_s4  ;;  %1184 = vrot.lane.b32.xlu1 %v6325_v36, %s5381_s1 }
 0x1f4   :  { %v6362_v26 = vmax.f32 %v1138_v17, %v1139_v41 }
 0x1f5   :  { %v6336_v51 = vpop.permute.xlu1 %1296  ;;  %v6338_v55 = vpop.permute.xlu0 %1210 }
 0x1f6   :  { %10473 = vst [vmem:[#allocation71_spill] sm:$0xff] %v6336_v51  ;;  %10474 = vst [vmem:[#allocation72_spill] sm:$0xff] %v6338_v55 }
 0x1f7   :  { %1470 = vrot.lane.b32.xlu0 %v6228_v30, %s5390_s17  ;;  %1216 = vrot.lane.b32.xlu1 %v6325_v36, %s5382_s10  ;;  %10479 = vst [vmem:[#allocation77_spill] sm:$0xff] %v6362_v26 }
 0x1f9   :  { %v6344_v53 = vpop.permute.xlu1 %1328  ;;  %v6346_v18 = vpop.permute.xlu0 %1242 }
 0x1fa   :  { %10475 = vst [vmem:[#allocation73_spill] sm:$0xff] %v6344_v53  ;;  %10476 = vst [vmem:[#allocation74_spill] sm:$0xff] %v6346_v18 }
 0x1fb   :  { %1502 = vrot.lane.b32.xlu0 %v6228_v30, %s5391_s18  ;;  %1248 = vrot.lane.b32.xlu1 %v6325_v36, %s5383_s11 }
 0x1fd   :  { %v6354_v51 = vpop.permute.xlu1 %1360  ;;  %v6356_v9 = vpop.permute.xlu0 %1274 }
 0x1fe   :  { %10477 = vst [vmem:[#allocation75_spill] sm:$0xff] %v6354_v51  ;;  %10478 = vst [vmem:[#allocation76_spill] sm:$0xff] %v6356_v9 }
 0x1ff   :  { %1280 = vrot.lane.b32.xlu1 %v6325_v36, %s5384_s12  ;;  %1186 = vrot.lane.b32.xlu0 %v6352_v2, %s5381_s1 }
 0x201   :  { %v6364_v5 = vpop.permute.xlu1 %1392  ;;  %v6366_v53 = vpop.permute.xlu0 %1306 }
 0x202   :  { %10480 = vst [vmem:[#allocation78_spill] sm:$0xff] %v6364_v5  ;;  %10481 = vst [vmem:[#allocation79_spill] sm:$0xff] %v6366_v53 }
 0x203   :  { %1312 = vrot.lane.b32.xlu1 %v6325_v36, %s5385_s13  ;;  %1206 = vrot.lane.b32.xlu0 %v6362_v26, %s5381_s1 }
 0x205   :  { %v6372_v54 = vpop.permute.xlu1 %1424  ;;  %v6374_v37 = vpop.permute.xlu0 %1338 }
 0x206   :  { %10482 = vst [vmem:[#allocation80_spill] sm:$0xff] %v6372_v54  ;;  %10483 = vst [vmem:[#allocation81_spill] sm:$0xff] %v6374_v37  ;;  %v1149_v37 = vrot.slane %v5987_v1, 4 }
 0x207   :  { %1344 = vrot.lane.b32.xlu1 %v6325_v36, %s5386_s14  ;;  %1218 = vrot.lane.b32.xlu0 %v6352_v2, %s5382_s10 }
 0x209   :  { %v6380_v17 = vpop.permute.xlu1 %1456  ;;  %v6382_v41 = vpop.permute.xlu0 %1370 }
 0x20a   :  { %10484 = vst [vmem:[#allocation82_spill] sm:$0xff] %v6380_v17  ;;  %10485 = vst [vmem:[#allocation83_spill] sm:$0xff] %v6382_v41  ;;  %v440_v17 = vrot.slane %v5816_v59, 4 }
 0x20b   :  { %1376 = vrot.lane.b32.xlu1 %v6325_v36, %s5387_s15  ;;  %1238 = vrot.lane.b32.xlu0 %v6362_v26, %s5382_s10 }
 0x20c   :  { %v441_v13 = vmax.f32 %v5816_v59, %v440_v17 }
 0x20d   :  { %v6388_v5 = vpop.permute.xlu1 %1488  ;;  %v6390_v51 = vpop.permute.xlu0 %1402 }
 0x20e   :  { %10486 = vst [vmem:[#allocation84_spill] sm:$0xff] %v6388_v5  ;;  %10487 = vst [vmem:[#allocation85_spill] sm:$0xff] %v6390_v51  ;;  %v1150_v51 = vmax.f32 %v5987_v1, %v1149_v37 }
 0x20f   :  { %1408 = vrot.lane.b32.xlu1 %v6325_v36, %s5388_s16  ;;  %1250 = vrot.lane.b32.xlu0 %v6352_v2, %s5383_s11 }
 0x211   :  { %v6397_v25 = vpop.permute.xlu0 %1434  ;;  %v6399_v41 = vpop.permute.xlu1 %1212 }
 0x212   :  { %10488 = vst [vmem:[#allocation86_spill] sm:$0xff] %v6397_v25  ;;  %10489 = vst [vmem:[#allocation87_spill] sm:$0xff] %v6399_v41  ;;  %v1151_v25 = vrot.slane %v1150_v51, 2 }
 0x213   :  { %1440 = vrot.lane.b32.xlu1 %v6325_v36, %s5389_s4  ;;  %1270 = vrot.lane.b32.xlu0 %v6362_v26, %s5383_s11 }
 0x214   :  { %v1152_v1 = vmax.f32 %v1150_v51, %v1151_v25 }
 0x215   :  { %v6406_v53 = vpop.permute.xlu0 %1466  ;;  %v6408_v9 = vpop.permute.xlu1 %1244 }
 0x216   :  { %10490 = vst [vmem:[#allocation88_spill] sm:$0xff] %v6406_v53  ;;  %10491 = vst [vmem:[#allocation89_spill] sm:$0xff] %v6408_v9 }
 0x217   :  { %1472 = vrot.lane.b32.xlu1 %v6325_v36, %s5390_s17  ;;  %1282 = vrot.lane.b32.xlu0 %v6352_v2, %s5384_s12 }
 0x219   :  { %v6414_v18 = vpop.permute.xlu0 %1498  ;;  %v6416_v55 = vpop.permute.xlu1 %1276 }
 0x21a   :  { %10492 = vst [vmem:[#allocation90_spill] sm:$0xff] %v6414_v18  ;;  %10493 = vst [vmem:[#allocation91_spill] sm:$0xff] %v6416_v55  ;;  %v1153_v18 = vrot.slane %v1152_v1, 1 }
 0x21b   :  { %1504 = vrot.lane.b32.xlu1 %v6325_v36, %s5391_s18  ;;  %1302 = vrot.lane.b32.xlu0 %v6362_v26, %s5384_s12 }
 0x21c   :  { %v6438_v51 = vmax.f32 %v1152_v1, %v1153_v18 }
 0x21d   :  { %v6422_v37 = vpop.permute.xlu1 %1308  ;;  %v6424_v53 = vpop.permute.xlu0 %1180 }
 0x21e   :  { %10494 = vst [vmem:[#allocation92_spill] sm:$0xff] %v6422_v37  ;;  %10495 = vst [vmem:[#allocation93_spill] sm:$0xff] %v6424_v53 }
 0x21f   :  { %1508 = vrot.lane.b32.xlu1 %v5834_v32, %s5391_s18  ;;  %1314 = vrot.lane.b32.xlu0 %v6352_v2, %s5385_s13  ;;  %10498 = vst [vmem:[#allocation96_spill] sm:$0xff] %v6438_v51 }
 0x221   :  { %v6430_v9 = vpop.permute.xlu1 %1340  ;;  %v6432_v55 = vpop.permute.xlu0 %1202 }
 0x222   :  { %10496 = vst [vmem:[#allocation94_spill] sm:$0xff] %v6430_v9  ;;  %10497 = vst [vmem:[#allocation95_spill] sm:$0xff] %v6432_v55 }
 0x223   :  { %1512 = vrot.lane.b32.xlu1 %v5922_v23, %s5391_s18  ;;  %1334 = vrot.lane.b32.xlu0 %v6362_v26, %s5385_s13 }
 0x225   :  { %v6440_v25 = vpop.permute.xlu1 %1372  ;;  %v6442_v53 = vpop.permute.xlu0 %1234 }
 0x226   :  { %10499 = vst [vmem:[#allocation97_spill] sm:$0xff] %v6440_v25  ;;  %10500 = vst [vmem:[#allocation98_spill] sm:$0xff] %v6442_v53 }
 0x227   :  { %1208 = vrot.lane.b32.xlu1 %v6438_v51, %s5381_s1  ;;  %1346 = vrot.lane.b32.xlu0 %v6352_v2, %s5386_s14 }
 0x229   :  { %v6448_v9 = vpop.permute.xlu1 %1404  ;;  %v6450_v55 = vpop.permute.xlu0 %1266 }
 0x22a   :  { %10501 = vst [vmem:[#allocation99_spill] sm:$0xff] %v6448_v9  ;;  %10502 = vst [vmem:[#allocation100_spill] sm:$0xff] %v6450_v55 }
 0x22b   :  { %1240 = vrot.lane.b32.xlu1 %v6438_v51, %s5382_s10  ;;  %1366 = vrot.lane.b32.xlu0 %v6362_v26, %s5386_s14 }
 0x22d   :  { %v6456_v18 = vpop.permute.xlu1 %1436  ;;  %v6458_v1 = vpop.permute.xlu0 %1298 }
 0x22e   :  { %10503 = vst [vmem:[#allocation101_spill] sm:$0xff] %v6456_v18  ;;  %10504 = vst [vmem:[#allocation102_spill] sm:$0xff] %v6458_v1 }
 0x22f   :  { %1272 = vrot.lane.b32.xlu1 %v6438_v51, %s5383_s11  ;;  %1378 = vrot.lane.b32.xlu0 %v6352_v2, %s5387_s15 }
 0x231   :  { %v6464_v53 = vpop.permute.xlu1 %1468  ;;  %v6466_v9 = vpop.permute.xlu0 %1330 }
 0x232   :  { %10505 = vst [vmem:[#allocation103_spill] sm:$0xff] %v6464_v53  ;;  %10506 = vst [vmem:[#allocation104_spill] sm:$0xff] %v6466_v9 }
 0x233   :  { %1304 = vrot.lane.b32.xlu1 %v6438_v51, %s5384_s12  ;;  %1398 = vrot.lane.b32.xlu0 %v6362_v26, %s5387_s15 }
 0x235   :  { %v6472_v55 = vpop.permute.xlu1 %1500  ;;  %v6474_v18 = vpop.permute.xlu0 %1362 }
 0x236   :  { %10507 = vst [vmem:[#allocation105_spill] sm:$0xff] %v6472_v55  ;;  %10508 = vst [vmem:[#allocation106_spill] sm:$0xff] %v6474_v18 }
 0x237   :  { %1336 = vrot.lane.b32.xlu1 %v6438_v51, %s5385_s13  ;;  %1410 = vrot.lane.b32.xlu0 %v6352_v2, %s5388_s16 }
 0x239   :  { %v6480_v1 = vpop.permute.xlu0 %1394  ;;  %v6482_v53 = vpop.permute.xlu1 %1182 }
 0x23a   :  { %10509 = vst [vmem:[#allocation107_spill] sm:$0xff] %v6480_v1  ;;  %10510 = vst [vmem:[#allocation108_spill] sm:$0xff] %v6482_v53 }
 0x23b   :  { %1368 = vrot.lane.b32.xlu1 %v6438_v51, %s5386_s14  ;;  %1430 = vrot.lane.b32.xlu0 %v6362_v26, %s5388_s16 }
 0x23d   :  { %v6488_v9 = vpop.permute.xlu0 %1426  ;;  %v6490_v55 = vpop.permute.xlu1 %1204 }
 0x23e   :  { %10511 = vst [vmem:[#allocation109_spill] sm:$0xff] %v6488_v9  ;;  %10512 = vst [vmem:[#allocation110_spill] sm:$0xff] %v6490_v55 }
 0x23f   :  { %1400 = vrot.lane.b32.xlu1 %v6438_v51, %s5387_s15  ;;  %1442 = vrot.lane.b32.xlu0 %v6352_v2, %s5389_s4 }
 0x241   :  { %v6496_v18 = vpop.permute.xlu0 %1458  ;;  %v6498_v1 = vpop.permute.xlu1 %1236 }
 0x242   :  { %10513 = vst [vmem:[#allocation111_spill] sm:$0xff] %v6496_v18  ;;  %10514 = vst [vmem:[#allocation112_spill] sm:$0xff] %v6498_v1 }
 0x243   :  { %1432 = vrot.lane.b32.xlu1 %v6438_v51, %s5388_s16  ;;  %1462 = vrot.lane.b32.xlu0 %v6362_v26, %s5389_s4 }
 0x245   :  { %v6504_v53 = vpop.permute.xlu0 %1490  ;;  %v6506_v9 = vpop.permute.xlu1 %1268 }
 0x246   :  { %10515 = vst [vmem:[#allocation113_spill] sm:$0xff] %v6504_v53  ;;  %10516 = vst [vmem:[#allocation114_spill] sm:$0xff] %v6506_v9 }
 0x247   :  { %1464 = vrot.lane.b32.xlu1 %v6438_v51, %s5389_s4  ;;  %1474 = vrot.lane.b32.xlu0 %v6352_v2, %s5390_s17 }
 0x249   :  { %v6512_v55 = vpop.permute.xlu0 %1214  ;;  %v6514_v18 = vpop.permute.xlu1 %1300 }
 0x24a   :  { %10517 = vst [vmem:[#allocation115_spill] sm:$0xff] %v6512_v55  ;;  %10518 = vst [vmem:[#allocation116_spill] sm:$0xff] %v6514_v18 }
 0x24b   :  { %1496 = vrot.lane.b32.xlu1 %v6438_v51, %s5390_s17  ;;  %1494 = vrot.lane.b32.xlu0 %v6362_v26, %s5390_s17 }
 0x24d   :  { %v6520_v1 = vpop.permute.xlu0 %1246  ;;  %v6522_v53 = vpop.permute.xlu1 %1332 }
 0x24e   :  { %10519 = vst [vmem:[#allocation117_spill] sm:$0xff] %v6520_v1  ;;  %10520 = vst [vmem:[#allocation118_spill] sm:$0xff] %v6522_v53 }
 0x24f   :  { %1516 = vrot.lane.b32.xlu1 %v6004_v21, %s5391_s18  ;;  %1506 = vrot.lane.b32.xlu0 %v6352_v2, %s5391_s18 }
 0x251   :  { %v6528_v9 = vpop.permute.xlu0 %1278  ;;  %v6530_v55 = vpop.permute.xlu1 %1364 }
 0x252   :  { %10521 = vst [vmem:[#allocation119_spill] sm:$0xff] %v6528_v9  ;;  %10522 = vst [vmem:[#allocation120_spill] sm:$0xff] %v6530_v55 }
 0x253   :  { %1520 = vrot.lane.b32.xlu1 %v6054_v0, %s5391_s18  ;;  %1510 = vrot.lane.b32.xlu0 %v5851_v60, %s5391_s18 }
 0x255   :  { %v6536_v18 = vpop.permute.xlu0 %1310  ;;  %v6538_v1 = vpop.permute.xlu1 %1396 }
 0x256   :  { %10523 = vst [vmem:[#allocation121_spill] sm:$0xff] %v6536_v18  ;;  %10524 = vst [vmem:[#allocation122_spill] sm:$0xff] %v6538_v1 }
 0x257   :  { %1524 = vrot.lane.b32.xlu1 %v6238_v47, %s5391_s18  ;;  %1514 = vrot.lane.b32.xlu0 %v5942_v46, %s5391_s18 }
 0x259   :  { %v6544_v53 = vpop.permute.xlu0 %1342  ;;  %v6546_v9 = vpop.permute.xlu1 %1428 }
 0x25a   :  { %10525 = vst [vmem:[#allocation123_spill] sm:$0xff] %v6544_v53  ;;  %10526 = vst [vmem:[#allocation124_spill] sm:$0xff] %v6546_v9 }
 0x25b   :  { %1528 = vrot.lane.b32.xlu1 %v6438_v51, %s5391_s18  ;;  %1518 = vrot.lane.b32.xlu0 %v6014_v28, %s5391_s18 }
 0x25d   :  { %v6552_v55 = vpop.permute.xlu0 %1374  ;;  %v6554_v18 = vpop.permute.xlu1 %1460 }
 0x25e   :  { %10527 = vst [vmem:[#allocation125_spill] sm:$0xff] %v6552_v55  ;;  %10528 = vst [vmem:[#allocation126_spill] sm:$0xff] %v6554_v18 }
 0x25f   :  { %1532 = vrot.lane.b32.xlu1 %v6140_v50, %s5392_s3  ;;  %1522 = vrot.lane.b32.xlu0 %v6174_v39, %s5391_s18 }
 0x261   :  { %v6560_v1 = vpop.permute.xlu0 %1406  ;;  %v6562_v9 = vpop.permute.xlu1 %1492 }
 0x262   :  { %10529 = vst [vmem:[#allocation127_spill] sm:$0xff] %v6560_v1  ;;  %10530 = vst [vmem:[#allocation128_spill] sm:$0xff] %v6562_v9 }
 0x263   :  { %1536 = vrot.lane.b32.xlu1 %v6325_v36, %s5392_s3  ;;  %1526 = vrot.lane.b32.xlu0 %v6362_v26, %s5391_s18 }
 0x265   :  { %v6568_v55 = vpop.permute.xlu0 %1438  ;;  %v6570_v18 = vpop.permute.xlu1 %1184 }
 0x266   :  { %10531 = vst [vmem:[#allocation129_spill] sm:$0xff] %v6568_v55  ;;  %10532 = vst [vmem:[#allocation130_spill] sm:$0xff] %v6570_v18 }
 0x267   :  { %1540 = vrot.lane.b32.xlu1 %v5834_v32, %s5392_s3  ;;  %1530 = vrot.lane.b32.xlu0 %v6070_v16, %s5392_s3 }
 0x269   :  { %v6576_v53 = vpop.permute.xlu0 %1470  ;;  %v6578_v1 = vpop.permute.xlu1 %1216 }
 0x26a   :  { %10533 = vst [vmem:[#allocation131_spill] sm:$0xff] %v6576_v53  ;;  %10534 = vst [vmem:[#allocation132_spill] sm:$0xff] %v6578_v1  ;;  %v960_v53 = vrot.slane %v5926_v34, 4 }
 0x26b   :  { %1544 = vrot.lane.b32.xlu1 %v5922_v23, %s5392_s3  ;;  %1534 = vrot.lane.b32.xlu0 %v6228_v30, %s5392_s3 }
 0x26d   :  { %v6584_v9 = vpop.permute.xlu0 %1502  ;;  %v6586_v55 = vpop.permute.xlu1 %1248 }
 0x26e   :  { %10535 = vst [vmem:[#allocation133_spill] sm:$0xff] %v6584_v9  ;;  %10536 = vst [vmem:[#allocation134_spill] sm:$0xff] %v6586_v55  ;;  %v961_v9 = vmax.f32 %v5926_v34, %v960_v53 }
 0x26f   :  { %1548 = vrot.lane.b32.xlu1 %v6004_v21, %s5392_s3  ;;  %1538 = vrot.lane.b32.xlu0 %v6352_v2, %s5392_s3 }
 0x271   :  { %v6593_v18 = vpop.permute.xlu1 %1280  ;;  %v6595_v1 = vpop.permute.xlu0 %1186 }
 0x272   :  { %10537 = vst [vmem:[#allocation135_spill] sm:$0xff] %v6593_v18  ;;  %10538 = vst [vmem:[#allocation136_spill] sm:$0xff] %v6595_v1  ;;  %v962_v18 = vrot.slane %v961_v9, 2 }
 0x273   :  { %1552 = vrot.lane.b32.xlu1 %v6054_v0, %s5392_s3  ;;  %1542 = vrot.lane.b32.xlu0 %v5851_v60, %s5392_s3 }
 0x274   :  { %v963_v34 = vmax.f32 %v961_v9, %v962_v18 }
 0x275   :  { %v6602_v55 = vpop.permute.xlu1 %1312  ;;  %v6604_v25 = vpop.permute.xlu0 %1206 }
 0x276   :  { %10539 = vst [vmem:[#allocation137_spill] sm:$0xff] %v6602_v55  ;;  %10540 = vst [vmem:[#allocation138_spill] sm:$0xff] %v6604_v25  ;;  %v964_v55 = vrot.slane %v963_v34, 1 }
 0x277   :  { %1556 = vrot.lane.b32.xlu1 %v6238_v47, %s5392_s3  ;;  %1546 = vrot.lane.b32.xlu0 %v5942_v46, %s5392_s3 }
 0x278   :  { %v6634_v9 = vmax.f32 %v963_v34, %v964_v55 }
 0x279   :  { %v6610_v1 = vpop.permute.xlu1 %1344  ;;  %v6612_v37 = vpop.permute.xlu0 %1218 }
 0x27a   :  { %10541 = vst [vmem:[#allocation139_spill] sm:$0xff] %v6610_v1  ;;  %10542 = vst [vmem:[#allocation140_spill] sm:$0xff] %v6612_v37 }
 0x27b   :  { %1560 = vrot.lane.b32.xlu1 %v6438_v51, %s5392_s3  ;;  %1550 = vrot.lane.b32.xlu0 %v6014_v28, %s5392_s3 }
 0x27d   :  { %v6618_v53 = vpop.permute.xlu1 %1376  ;;  %v6620_v25 = vpop.permute.xlu0 %1238 }
 0x27e   :  { %10543 = vst [vmem:[#allocation141_spill] sm:$0xff] %v6618_v53  ;;  %10544 = vst [vmem:[#allocation142_spill] sm:$0xff] %v6620_v25 }
 0x27f   :  { %1564 = vrot.lane.b32.xlu1 %v6140_v50, %s5393_s0  ;;  %1554 = vrot.lane.b32.xlu0 %v6174_v39, %s5392_s3 }
 0x281   :  { %v6626_v1 = vpop.permute.xlu1 %1408  ;;  %v6628_v37 = vpop.permute.xlu0 %1250 }
 0x282   :  { %10545 = vst [vmem:[#allocation143_spill] sm:$0xff] %v6626_v1  ;;  %10546 = vst [vmem:[#allocation144_spill] sm:$0xff] %v6628_v37 }
 0x283   :  { %1628 = vrot.lane.b32.xlu1 %v6140_v50, %s5394_s19  ;;  %1558 = vrot.lane.b32.xlu0 %v6362_v26, %s5392_s3 }
 0x285   :  { %v6636_v18 = vpop.permute.xlu1 %1440  ;;  %v6638_v25 = vpop.permute.xlu0 %1270 }
 0x286   :  { %10547 = vst [vmem:[#allocation145_spill] sm:$0xff] %v6636_v18  ;;  %10548 = vst [vmem:[#allocation146_spill] sm:$0xff] %v6638_v25 }
 0x287   :  { %1708 = vrot.lane.b32.xlu1 %v6634_v9, %s5382_s10  ;;  %1562 = vrot.lane.b32.xlu0 %v6070_v16, %s5393_s0 }
 0x289   :  { %v6644_v51 = vpop.permute.xlu1 %1472  ;;  %v6646_v1 = vpop.permute.xlu0 %1282 }
 0x28a   :  { %10549 = vst [vmem:[#allocation147_spill] sm:$0xff] %v6644_v51  ;;  %10550 = vst [vmem:[#allocation148_spill] sm:$0xff] %v6646_v1 }
 0x28b   :  { %1772 = vrot.lane.b32.xlu1 %v6634_v9, %s5384_s12  ;;  %1596 = vrot.lane.b32.xlu0 %v6140_v50, %s5395_s20 }
 0x28d   :  { %v6652_v55 = vpop.permute.xlu1 %1504  ;;  %v6654_v34 = vpop.permute.xlu0 %1302 }
 0x28e   :  { %10551 = vst [vmem:[#allocation149_spill] sm:$0xff] %v6652_v55  ;;  %10552 = vst [vmem:[#allocation150_spill] sm:$0xff] %v6654_v34  ;;  %v974_v55 = vrot.slane %v5944_v61, 4 }
 0x28f   :  { %1836 = vrot.lane.b32.xlu1 %v6634_v9, %s5386_s14  ;;  %1676 = vrot.lane.b32.xlu0 %v6634_v9, %s5381_s1 }
 0x291   :  { %v6660_v25 = vpop.permute.xlu1 %1508  ;;  %v6662_v51 = vpop.permute.xlu0 %1314 }
 0x292   :  { %10553 = vst [vmem:[#allocation151_spill] sm:$0xff] %v6660_v25  ;;  %10554 = vst [vmem:[#allocation152_spill] sm:$0xff] %v6662_v51  ;;  %v975_v25 = vmax.f32 %v5944_v61, %v974_v55 }
 0x293   :  { %1900 = vrot.lane.b32.xlu1 %v6634_v9, %s5388_s16  ;;  %1740 = vrot.lane.b32.xlu0 %v6634_v9, %s5383_s11 }
 0x295   :  { %v6669_v18 = vpop.permute.xlu1 %1512  ;;  %v6671_v34 = vpop.permute.xlu0 %1334 }
 0x296   :  { %10555 = vst [vmem:[#allocation153_spill] sm:$0xff] %v6669_v18  ;;  %10556 = vst [vmem:[#allocation154_spill] sm:$0xff] %v6671_v34  ;;  %v976_v18 = vrot.slane %v975_v25, 2 }
 0x297   :  { %1964 = vrot.lane.b32.xlu1 %v6634_v9, %s5390_s17  ;;  %1804 = vrot.lane.b32.xlu0 %v6634_v9, %s5385_s13 }
 0x298   :  { %v977_v61 = vmax.f32 %v975_v25, %v976_v18 }
 0x299   :  { %v6678_v51 = vpop.permute.xlu1 %1208  ;;  %v6680_v1 = vpop.permute.xlu0 %1346 }
 0x29a   :  { %10557 = vst [vmem:[#allocation155_spill] sm:$0xff] %v6678_v51  ;;  %10558 = vst [vmem:[#allocation156_spill] sm:$0xff] %v6680_v1 }
 0x29b   :  { %2028 = vrot.lane.b32.xlu1 %v6634_v9, %s5392_s3  ;;  %1868 = vrot.lane.b32.xlu0 %v6634_v9, %s5387_s15 }
 0x29d   :  { %v6686_v34 = vpop.permute.xlu1 %1240  ;;  %v6688_v53 = vpop.permute.xlu0 %1366 }
 0x29e   :  { %10559 = vst [vmem:[#allocation157_spill] sm:$0xff] %v6686_v34  ;;  %10560 = vst [vmem:[#allocation158_spill] sm:$0xff] %v6688_v53  ;;  %v978_v34 = vrot.slane %v977_v61, 1 }
 0x29f   :  { %2092 = vrot.lane.b32.xlu1 %v6634_v9, %s5395_s20  ;;  %1932 = vrot.lane.b32.xlu0 %v6634_v9, %s5389_s4 }
 0x2a0   :  { %v6710_v25 = vmax.f32 %v977_v61, %v978_v34 }
 0x2a1   :  { %v6694_v55 = vpop.permute.xlu1 %1272  ;;  %v6696_v51 = vpop.permute.xlu0 %1378 }
 0x2a2   :  { %10561 = vst [vmem:[#allocation159_spill] sm:$0xff] %v6694_v55  ;;  %10562 = vst [vmem:[#allocation160_spill] sm:$0xff] %v6696_v51 }
 0x2a3   :  { %1566 = vrot.lane.b32.xlu1 %v6228_v30, %s5393_s0  ;;  %1996 = vrot.lane.b32.xlu0 %v6634_v9, %s5391_s18 }
 0x2a5   :  { %v6702_v1 = vpop.permute.xlu1 %1304  ;;  %v6704_v53 = vpop.permute.xlu0 %1398 }
 0x2a6   :  { %10563 = vst [vmem:[#allocation161_spill] sm:$0xff] %v6702_v1  ;;  %10564 = vst [vmem:[#allocation162_spill] sm:$0xff] %v6704_v53 }
 0x2a7   :  { %1630 = vrot.lane.b32.xlu1 %v6228_v30, %s5394_s19  ;;  %2060 = vrot.lane.b32.xlu0 %v6634_v9, %s5393_s0 }
 0x2a9   :  { %v6712_v18 = vpop.permute.xlu1 %1336  ;;  %v6714_v55 = vpop.permute.xlu0 %1410 }
 0x2aa   :  { %10565 = vst [vmem:[#allocation163_spill] sm:$0xff] %v6712_v18  ;;  %10566 = vst [vmem:[#allocation164_spill] sm:$0xff] %v6714_v55 }
 0x2ab   :  { %1710 = vrot.lane.b32.xlu1 %v6710_v25, %s5382_s10  ;;  %2124 = vrot.lane.b32.xlu0 %v6634_v9, %s5394_s19 }
 0x2ad   :  { %v6720_v1 = vpop.permute.xlu1 %1368  ;;  %v6722_v53 = vpop.permute.xlu0 %1430 }
 0x2ae   :  { %10567 = vst [vmem:[#allocation165_spill] sm:$0xff] %v6720_v1  ;;  %10568 = vst [vmem:[#allocation166_spill] sm:$0xff] %v6722_v53 }
 0x2af   :  { %1774 = vrot.lane.b32.xlu1 %v6710_v25, %s5384_s12  ;;  %1598 = vrot.lane.b32.xlu0 %v6228_v30, %s5395_s20 }
 0x2b1   :  { %v6728_v34 = vpop.permute.xlu1 %1400  ;;  %v6730_v61 = vpop.permute.xlu0 %1442 }
 0x2b2   :  { %10569 = vst [vmem:[#allocation167_spill] sm:$0xff] %v6728_v34  ;;  %10570 = vst [vmem:[#allocation168_spill] sm:$0xff] %v6730_v61 }
 0x2b3   :  { %1838 = vrot.lane.b32.xlu1 %v6710_v25, %s5386_s14  ;;  %1678 = vrot.lane.b32.xlu0 %v6710_v25, %s5381_s1 }
 0x2b5   :  { %v6736_v18 = vpop.permute.xlu1 %1432  ;;  %v6738_v1 = vpop.permute.xlu0 %1462 }
 0x2b6   :  { %10571 = vst [vmem:[#allocation169_spill] sm:$0xff] %v6736_v18  ;;  %10572 = vst [vmem:[#allocation170_spill] sm:$0xff] %v6738_v1  ;;  %v988_v18 = vrot.slane %v5960_v6, 4 }
 0x2b7   :  { %1902 = vrot.lane.b32.xlu1 %v6710_v25, %s5388_s16  ;;  %1742 = vrot.lane.b32.xlu0 %v6710_v25, %s5383_s11 }
 0x2b9   :  { %v6744_v53 = vpop.permute.xlu1 %1464  ;;  %v6746_v34 = vpop.permute.xlu0 %1474 }
 0x2ba   :  { %10573 = vst [vmem:[#allocation171_spill] sm:$0xff] %v6744_v53  ;;  %10574 = vst [vmem:[#allocation172_spill] sm:$0xff] %v6746_v34  ;;  %v989_v53 = vmax.f32 %v5960_v6, %v988_v18 }
 0x2bb   :  { %1966 = vrot.lane.b32.xlu1 %v6710_v25, %s5390_s17  ;;  %1806 = vrot.lane.b32.xlu0 %v6710_v25, %s5385_s13 }
 0x2bd   :  { %v6753_v55 = vpop.permute.xlu1 %1496  ;;  %v6755_v1 = vpop.permute.xlu0 %1494 }
 0x2be   :  { %10575 = vst [vmem:[#allocation173_spill] sm:$0xff] %v6753_v55  ;;  %10576 = vst [vmem:[#allocation174_spill] sm:$0xff] %v6755_v1  ;;  %v946_v55 = vrot.slane %v5908_v7, 4  ;;  %v990_v1 = vrot.slane %v989_v53, 2 }
 0x2bf   :  { %2030 = vrot.lane.b32.xlu1 %v6710_v25, %s5392_s3  ;;  %1870 = vrot.lane.b32.xlu0 %v6710_v25, %s5387_s15 }
 0x2c0   :  { %v947_v6 = vmax.f32 %v5908_v7, %v946_v55  ;;  %v991_v18 = vmax.f32 %v989_v53, %v990_v1 }
 0x2c1   :  { %v6762_v34 = vpop.permute.xlu1 %1516  ;;  %v6764_v61 = vpop.permute.xlu0 %1506 }
 0x2c2   :  { %10577 = vst [vmem:[#allocation175_spill] sm:$0xff] %v6762_v34  ;;  %10578 = vst [vmem:[#allocation176_spill] sm:$0xff] %v6764_v61 }
 0x2c3   :  { %2094 = vrot.lane.b32.xlu1 %v6710_v25, %s5395_s20  ;;  %1934 = vrot.lane.b32.xlu0 %v6710_v25, %s5389_s4 }
 0x2c5   :  { %v6771_v51 = vpop.permute.xlu1 %1520  ;;  %v6773_v37 = vpop.permute.xlu0 %1510 }
 0x2c6   :  { %10579 = vst [vmem:[#allocation177_spill] sm:$0xff] %v6771_v51  ;;  %10580 = vst [vmem:[#allocation178_spill] sm:$0xff] %v6773_v37  ;;  %v948_v51 = vrot.slane %v947_v6, 2  ;;  %v992_v37 = vrot.slane %v991_v18, 1 }
 0x2c7   :  { %1568 = vrot.lane.b32.xlu1 %v6325_v36, %s5393_s0  ;;  %1998 = vrot.lane.b32.xlu0 %v6710_v25, %s5391_s18 }
 0x2c8   :  { %v949_v7 = vmax.f32 %v947_v6, %v948_v51  ;;  %v6796_v1 = vmax.f32 %v991_v18, %v992_v37 }
 0x2c9   :  { %v6780_v34 = vpop.permute.xlu1 %1524  ;;  %v6782_v61 = vpop.permute.xlu0 %1514 }
 0x2ca   :  { %10581 = vst [vmem:[#allocation179_spill] sm:$0xff] %v6780_v34  ;;  %10582 = vst [vmem:[#allocation180_spill] sm:$0xff] %v6782_v61 }
 0x2cb   :  { %1600 = vrot.lane.b32.xlu1 %v6325_v36, %s5395_s20  ;;  %2062 = vrot.lane.b32.xlu0 %v6710_v25, %s5393_s0 }
 0x2cd   :  { %v6788_v41 = vpop.permute.xlu1 %1528  ;;  %v6790_v5 = vpop.permute.xlu0 %1518 }
 0x2ce   :  { %10583 = vst [vmem:[#allocation181_spill] sm:$0xff] %v6788_v41  ;;  %10584 = vst [vmem:[#allocation182_spill] sm:$0xff] %v6790_v5  ;;  %v950_v41 = vrot.slane %v949_v7, 1 }
 0x2cf   :  { %1632 = vrot.lane.b32.xlu1 %v6325_v36, %s5394_s19  ;;  %2126 = vrot.lane.b32.xlu0 %v6710_v25, %s5394_s19 }
 0x2d0   :  { %v6814_v37 = vmax.f32 %v949_v7, %v950_v41 }
 0x2d1   :  { %v6798_v53 = vpop.permute.xlu1 %1532  ;;  %v6800_v55 = vpop.permute.xlu0 %1522 }
 0x2d2   :  { %10585 = vst [vmem:[#allocation183_spill] sm:$0xff] %v6798_v53  ;;  %10586 = vst [vmem:[#allocation184_spill] sm:$0xff] %v6800_v55 }
 0x2d3   :  { %1680 = vrot.lane.b32.xlu1 %v6796_v1, %s5381_s1  ;;  %1594 = vrot.lane.b32.xlu0 %v6070_v16, %s5395_s20 }
 0x2d5   :  { %v6806_v34 = vpop.permute.xlu1 %1536  ;;  %v6808_v61 = vpop.permute.xlu0 %1526 }
 0x2d6   :  { %10587 = vst [vmem:[#allocation185_spill] sm:$0xff] %v6806_v34  ;;  %10588 = vst [vmem:[#allocation186_spill] sm:$0xff] %v6808_v61 }
 0x2d7   :  { %1712 = vrot.lane.b32.xlu1 %v6796_v1, %s5382_s10  ;;  %1626 = vrot.lane.b32.xlu0 %v6070_v16, %s5394_s19 }
 0x2d9   :  { %v6816_v51 = vpop.permute.xlu1 %1540  ;;  %v6818_v6 = vpop.permute.xlu0 %1530 }
 0x2da   :  { %10589 = vst [vmem:[#allocation187_spill] sm:$0xff] %v6816_v51  ;;  %10590 = vst [vmem:[#allocation188_spill] sm:$0xff] %v6818_v6 }
 0x2db   :  { %1744 = vrot.lane.b32.xlu1 %v6796_v1, %s5383_s11  ;;  %1674 = vrot.lane.b32.xlu0 %v6814_v37, %s5381_s1 }
 0x2dd   :  { %v6824_v18 = vpop.permute.xlu1 %1544  ;;  %v6826_v61 = vpop.permute.xlu0 %1534 }
 0x2de   :  { %10591 = vst [vmem:[#allocation189_spill] sm:$0xff] %v6824_v18  ;;  %10592 = vst [vmem:[#allocation190_spill] sm:$0xff] %v6826_v61 }
 0x2df   :  { %1776 = vrot.lane.b32.xlu1 %v6796_v1, %s5384_s12  ;;  %1706 = vrot.lane.b32.xlu0 %v6814_v37, %s5382_s10 }
 0x2e1   :  { %v6832_v41 = vpop.permute.xlu1 %1548  ;;  %v6834_v7 = vpop.permute.xlu0 %1538 }
 0x2e2   :  { %10593 = vst [vmem:[#allocation191_spill] sm:$0xff] %v6832_v41  ;;  %10594 = vst [vmem:[#allocation192_spill] sm:$0xff] %v6834_v7 }
 0x2e3   :  { %1808 = vrot.lane.b32.xlu1 %v6796_v1, %s5385_s13  ;;  %1738 = vrot.lane.b32.xlu0 %v6814_v37, %s5383_s11 }
 0x2e5   :  { %v6840_v55 = vpop.permute.xlu1 %1552  ;;  %v6842_v18 = vpop.permute.xlu0 %1542 }
 0x2e6   :  { %10595 = vst [vmem:[#allocation193_spill] sm:$0xff] %v6840_v55  ;;  %10596 = vst [vmem:[#allocation194_spill] sm:$0xff] %v6842_v18 }
 0x2e7   :  { %1840 = vrot.lane.b32.xlu1 %v6796_v1, %s5386_s14  ;;  %1770 = vrot.lane.b32.xlu0 %v6814_v37, %s5384_s12 }
 0x2e9   :  { %v6848_v5 = vpop.permute.xlu1 %1556  ;;  %v6850_v51 = vpop.permute.xlu0 %1546 }
 0x2ea   :  { %10597 = vst [vmem:[#allocation195_spill] sm:$0xff] %v6848_v5  ;;  %10598 = vst [vmem:[#allocation196_spill] sm:$0xff] %v6850_v51 }
 0x2eb   :  { %1872 = vrot.lane.b32.xlu1 %v6796_v1, %s5387_s15  ;;  %1802 = vrot.lane.b32.xlu0 %v6814_v37, %s5385_s13 }
 0x2ed   :  { %v6856_v34 = vpop.permute.xlu1 %1560  ;;  %v6858_v55 = vpop.permute.xlu0 %1550 }
 0x2ee   :  { %10599 = vst [vmem:[#allocation197_spill] sm:$0xff] %v6856_v34  ;;  %10600 = vst [vmem:[#allocation198_spill] sm:$0xff] %v6858_v55 }
 0x2ef   :  { %1904 = vrot.lane.b32.xlu1 %v6796_v1, %s5388_s16  ;;  %1834 = vrot.lane.b32.xlu0 %v6814_v37, %s5386_s14 }
 0x2f1   :  { %v6864_v18 = vpop.permute.xlu1 %1564  ;;  %v6866_v5 = vpop.permute.xlu0 %1554 }
 0x2f2   :  { %10601 = vst [vmem:[#allocation199_spill] sm:$0xff] %v6864_v18  ;;  %10602 = vst [vmem:[#allocation200_spill] sm:$0xff] %v6866_v5 }
 0x2f3   :  { %1936 = vrot.lane.b32.xlu1 %v6796_v1, %s5389_s4  ;;  %1866 = vrot.lane.b32.xlu0 %v6814_v37, %s5387_s15 }
 0x2f5   :  { %v6872_v51 = vpop.permute.xlu1 %1628  ;;  %v6874_v34 = vpop.permute.xlu0 %1558 }
 0x2f6   :  { %10603 = vst [vmem:[#allocation201_spill] sm:$0xff] %v6872_v51  ;;  %10604 = vst [vmem:[#allocation202_spill] sm:$0xff] %v6874_v34  ;;  %v1002_v51 = vrot.slane %v5973_v42, 4 }
 0x2f7   :  { %1968 = vrot.lane.b32.xlu1 %v6796_v1, %s5390_s17  ;;  %1898 = vrot.lane.b32.xlu0 %v6814_v37, %s5388_s16 }
 0x2f9   :  { %v6880_v7 = vpop.permute.xlu1 %1708  ;;  %v6882_v18 = vpop.permute.xlu0 %1562 }
 0x2fa   :  { %10605 = vst [vmem:[#allocation203_spill] sm:$0xff] %v6880_v7  ;;  %10606 = vst [vmem:[#allocation204_spill] sm:$0xff] %v6882_v18  ;;  %v1003_v18 = vmax.f32 %v5973_v42, %v1002_v51 }
 0x2fb   :  { %2000 = vrot.lane.b32.xlu1 %v6796_v1, %s5391_s18  ;;  %1930 = vrot.lane.b32.xlu0 %v6814_v37, %s5389_s4 }
 0x2fd   :  { %v6889_v5 = vpop.permute.xlu1 %1772  ;;  %v6891_v34 = vpop.permute.xlu0 %1596 }
 0x2fe   :  { %10607 = vst [vmem:[#allocation205_spill] sm:$0xff] %v6889_v5  ;;  %10608 = vst [vmem:[#allocation206_spill] sm:$0xff] %v6891_v34  ;;  %v1004_v5 = vrot.slane %v1003_v18, 2 }
 0x2ff   :  { %2032 = vrot.lane.b32.xlu1 %v6796_v1, %s5392_s3  ;;  %1962 = vrot.lane.b32.xlu0 %v6814_v37, %s5390_s17 }
 0x300   :  { %v1005_v42 = vmax.f32 %v1003_v18, %v1004_v5 }
 0x301   :  { %v6898_v7 = vpop.permute.xlu1 %1836  ;;  %v6900_v6 = vpop.permute.xlu0 %1676 }
 0x302   :  { %10609 = vst [vmem:[#allocation207_spill] sm:$0xff] %v6898_v7  ;;  %10610 = vst [vmem:[#allocation208_spill] sm:$0xff] %v6900_v6 }
 0x303   :  { %2064 = vrot.lane.b32.xlu1 %v6796_v1, %s5393_s0  ;;  %1994 = vrot.lane.b32.xlu0 %v6814_v37, %s5391_s18 }
 0x305   :  { %v6906_v34 = vpop.permute.xlu1 %1900  ;;  %v6908_v41 = vpop.permute.xlu0 %1740 }
 0x306   :  { %10611 = vst [vmem:[#allocation209_spill] sm:$0xff] %v6906_v34  ;;  %10612 = vst [vmem:[#allocation210_spill] sm:$0xff] %v6908_v41  ;;  %v1006_v34 = vrot.slane %v1005_v42, 1 }
 0x307   :  { %2096 = vrot.lane.b32.xlu1 %v6796_v1, %s5395_s20  ;;  %2026 = vrot.lane.b32.xlu0 %v6814_v37, %s5392_s3 }
 0x308   :  { %v6930_v5 = vmax.f32 %v1005_v42, %v1006_v34 }
 0x309   :  { %v6914_v51 = vpop.permute.xlu1 %1964  ;;  %v6916_v6 = vpop.permute.xlu0 %1804 }
 0x30a   :  { %10613 = vst [vmem:[#allocation211_spill] sm:$0xff] %v6914_v51  ;;  %10614 = vst [vmem:[#allocation212_spill] sm:$0xff] %v6916_v6 }
 0x30b   :  { %2128 = vrot.lane.b32.xlu1 %v6796_v1, %s5394_s19  ;;  %2058 = vrot.lane.b32.xlu0 %v6814_v37, %s5393_s0 }
 0x30d   :  { %v6922_v7 = vpop.permute.xlu1 %2028  ;;  %v6924_v41 = vpop.permute.xlu0 %1868 }
 0x30e   :  { %10615 = vst [vmem:[#allocation213_spill] sm:$0xff] %v6922_v7  ;;  %10616 = vst [vmem:[#allocation214_spill] sm:$0xff] %v6924_v41 }
 0x30f   :  { %1602 = vrot.lane.b32.xlu1 %v6352_v2, %s5395_s20  ;;  %2090 = vrot.lane.b32.xlu0 %v6814_v37, %s5395_s20 }
 0x311   :  { %v6932_v18 = vpop.permute.xlu1 %2092  ;;  %v6934_v6 = vpop.permute.xlu0 %1932 }
 0x312   :  { %10617 = vst [vmem:[#allocation215_spill] sm:$0xff] %v6932_v18  ;;  %10618 = vst [vmem:[#allocation216_spill] sm:$0xff] %v6934_v6 }
 0x313   :  { %2122 = vrot.lane.b32.xlu0 %v6814_v37, %s5394_s19  ;;  %1682 = vrot.lane.b32.xlu1 %v6930_v5, %s5381_s1 }
 0x315   :  { %v6940_v7 = vpop.permute.xlu1 %1566  ;;  %v6942_v41 = vpop.permute.xlu0 %1996 }
 0x316   :  { %10619 = vst [vmem:[#allocation217_spill] sm:$0xff] %v6940_v7  ;;  %10620 = vst [vmem:[#allocation218_spill] sm:$0xff] %v6942_v41 }
 0x317   :  { %1570 = vrot.lane.b32.xlu0 %v6352_v2, %s5393_s0  ;;  %1746 = vrot.lane.b32.xlu1 %v6930_v5, %s5383_s11 }
 0x319   :  { %v6948_v34 = vpop.permute.xlu1 %1630  ;;  %v6950_v42 = vpop.permute.xlu0 %2060 }
 0x31a   :  { %10621 = vst [vmem:[#allocation219_spill] sm:$0xff] %v6948_v34  ;;  %10622 = vst [vmem:[#allocation220_spill] sm:$0xff] %v6950_v42  ;;  %v1016_v34 = vrot.slane %v5820_v3, 4 }
 0x31b   :  { %1634 = vrot.lane.b32.xlu0 %v6352_v2, %s5394_s19  ;;  %1810 = vrot.lane.b32.xlu1 %v6930_v5, %s5385_s13 }
 0x31d   :  { %v6956_v6 = vpop.permute.xlu1 %1710  ;;  %v6958_v18 = vpop.permute.xlu0 %2124 }
 0x31e   :  { %10623 = vst [vmem:[#allocation221_spill] sm:$0xff] %v6956_v6  ;;  %10624 = vst [vmem:[#allocation222_spill] sm:$0xff] %v6958_v18  ;;  %v1017_v18 = vmax.f32 %v5820_v3, %v1016_v34 }
 0x31f   :  { %1714 = vrot.lane.b32.xlu0 %v6930_v5, %s5382_s10  ;;  %1874 = vrot.lane.b32.xlu1 %v6930_v5, %s5387_s15 }
 0x321   :  { %v6965_v41 = vpop.permute.xlu1 %1774  ;;  %v6967_v42 = vpop.permute.xlu0 %1598 }
 0x322   :  { %10625 = vst [vmem:[#allocation223_spill] sm:$0xff] %v6965_v41  ;;  %10626 = vst [vmem:[#allocation224_spill] sm:$0xff] %v6967_v42  ;;  %v1018_v41 = vrot.slane %v1017_v18, 2 }
 0x323   :  { %1778 = vrot.lane.b32.xlu0 %v6930_v5, %s5384_s12  ;;  %1938 = vrot.lane.b32.xlu1 %v6930_v5, %s5389_s4 }
 0x324   :  { %v1019_v3 = vmax.f32 %v1017_v18, %v1018_v41 }
 0x325   :  { %v6974_v6 = vpop.permute.xlu1 %1838  ;;  %v6976_v51 = vpop.permute.xlu0 %1678 }
 0x326   :  { %10627 = vst [vmem:[#allocation225_spill] sm:$0xff] %v6974_v6  ;;  %10628 = vst [vmem:[#allocation226_spill] sm:$0xff] %v6976_v51 }
 0x327   :  { %1842 = vrot.lane.b32.xlu0 %v6930_v5, %s5386_s14  ;;  %2002 = vrot.lane.b32.xlu1 %v6930_v5, %s5391_s18 }
 0x329   :  { %v6982_v42 = vpop.permute.xlu1 %1902  ;;  %v6984_v7 = vpop.permute.xlu0 %1742 }
 0x32a   :  { %10629 = vst [vmem:[#allocation227_spill] sm:$0xff] %v6982_v42  ;;  %10630 = vst [vmem:[#allocation228_spill] sm:$0xff] %v6984_v7  ;;  %v1020_v42 = vrot.slane %v1019_v3, 1 }
 0x32b   :  { %1906 = vrot.lane.b32.xlu0 %v6930_v5, %s5388_s16  ;;  %2066 = vrot.lane.b32.xlu1 %v6930_v5, %s5393_s0 }
 0x32c   :  { %v7006_v41 = vmax.f32 %v1019_v3, %v1020_v42 }
 0x32d   :  { %v6990_v34 = vpop.permute.xlu1 %1966  ;;  %v6992_v51 = vpop.permute.xlu0 %1806 }
 0x32e   :  { %10631 = vst [vmem:[#allocation229_spill] sm:$0xff] %v6990_v34  ;;  %10632 = vst [vmem:[#allocation230_spill] sm:$0xff] %v6992_v51 }
 0x32f   :  { %1970 = vrot.lane.b32.xlu0 %v6930_v5, %s5390_s17  ;;  %2130 = vrot.lane.b32.xlu1 %v6930_v5, %s5394_s19 }
 0x331   :  { %v6998_v6 = vpop.permute.xlu1 %2030  ;;  %v7000_v7 = vpop.permute.xlu0 %1870 }
 0x332   :  { %10633 = vst [vmem:[#allocation231_spill] sm:$0xff] %v6998_v6  ;;  %10634 = vst [vmem:[#allocation232_spill] sm:$0xff] %v7000_v7 }
 0x333   :  { %2034 = vrot.lane.b32.xlu0 %v6930_v5, %s5392_s3  ;;  %1604 = vrot.lane.b32.xlu1 %v5834_v32, %s5395_s20 }
 0x335   :  { %v7008_v18 = vpop.permute.xlu1 %2094  ;;  %v7010_v51 = vpop.permute.xlu0 %1934 }
 0x336   :  { %10635 = vst [vmem:[#allocation233_spill] sm:$0xff] %v7008_v18  ;;  %10636 = vst [vmem:[#allocation234_spill] sm:$0xff] %v7010_v51 }
 0x337   :  { %2098 = vrot.lane.b32.xlu0 %v6930_v5, %s5395_s20  ;;  %1684 = vrot.lane.b32.xlu1 %v7006_v41, %s5381_s1 }
 0x339   :  { %v7016_v6 = vpop.permute.xlu1 %1568  ;;  %v7018_v7 = vpop.permute.xlu0 %1998 }
 0x33a   :  { %10637 = vst [vmem:[#allocation235_spill] sm:$0xff] %v7016_v6  ;;  %10638 = vst [vmem:[#allocation236_spill] sm:$0xff] %v7018_v7 }
 0x33b   :  { %1572 = vrot.lane.b32.xlu0 %v5834_v32, %s5393_s0  ;;  %1748 = vrot.lane.b32.xlu1 %v7006_v41, %s5383_s11 }
 0x33d   :  { %v7024_v42 = vpop.permute.xlu1 %1600  ;;  %v7026_v3 = vpop.permute.xlu0 %2062 }
 0x33e   :  { %10639 = vst [vmem:[#allocation237_spill] sm:$0xff] %v7024_v42  ;;  %10640 = vst [vmem:[#allocation238_spill] sm:$0xff] %v7026_v3  ;;  %v1030_v42 = vrot.slane %v5830_v24, 4 }
 0x33f   :  { %1636 = vrot.lane.b32.xlu0 %v5834_v32, %s5394_s19  ;;  %1812 = vrot.lane.b32.xlu1 %v7006_v41, %s5385_s13 }
 0x341   :  { %v7032_v51 = vpop.permute.xlu1 %1632  ;;  %v7034_v18 = vpop.permute.xlu0 %2126 }
 0x342   :  { %10641 = vst [vmem:[#allocation239_spill] sm:$0xff] %v7032_v51  ;;  %10642 = vst [vmem:[#allocation240_spill] sm:$0xff] %v7034_v18  ;;  %v1031_v18 = vmax.f32 %v5830_v24, %v1030_v42 }
 0x343   :  { %1716 = vrot.lane.b32.xlu0 %v7006_v41, %s5382_s10  ;;  %1876 = vrot.lane.b32.xlu1 %v7006_v41, %s5387_s15 }
 0x345   :  { %v7041_v7 = vpop.permute.xlu1 %1680  ;;  %v7043_v3 = vpop.permute.xlu0 %1594 }
 0x346   :  { %10643 = vst [vmem:[#allocation241_spill] sm:$0xff] %v7041_v7  ;;  %10644 = vst [vmem:[#allocation242_spill] sm:$0xff] %v7043_v3  ;;  %v1032_v7 = vrot.slane %v1031_v18, 2 }
 0x347   :  { %1780 = vrot.lane.b32.xlu0 %v7006_v41, %s5384_s12  ;;  %1940 = vrot.lane.b32.xlu1 %v7006_v41, %s5389_s4 }
 0x348   :  { %v1033_v24 = vmax.f32 %v1031_v18, %v1032_v7 }
 0x349   :  { %v7050_v51 = vpop.permute.xlu1 %1712  ;;  %v7052_v34 = vpop.permute.xlu0 %1626 }
 0x34a   :  { %10645 = vst [vmem:[#allocation243_spill] sm:$0xff] %v7050_v51  ;;  %10646 = vst [vmem:[#allocation244_spill] sm:$0xff] %v7052_v34 }
 0x34b   :  { %1844 = vrot.lane.b32.xlu0 %v7006_v41, %s5386_s14  ;;  %2004 = vrot.lane.b32.xlu1 %v7006_v41, %s5391_s18 }
 0x34d   :  { %v7058_v3 = vpop.permute.xlu1 %1744  ;;  %v7060_v6 = vpop.permute.xlu0 %1674 }
 0x34e   :  { %10647 = vst [vmem:[#allocation245_spill] sm:$0xff] %v7058_v3  ;;  %10648 = vst [vmem:[#allocation246_spill] sm:$0xff] %v7060_v6  ;;  %v1034_v3 = vrot.slane %v1033_v24, 1 }
 0x34f   :  { %1908 = vrot.lane.b32.xlu0 %v7006_v41, %s5388_s16  ;;  %2068 = vrot.lane.b32.xlu1 %v7006_v41, %s5393_s0 }
 0x350   :  { %v7082_v7 = vmax.f32 %v1033_v24, %v1034_v3 }
 0x351   :  { %v7066_v42 = vpop.permute.xlu1 %1776  ;;  %v7068_v51 = vpop.permute.xlu0 %1706 }
 0x352   :  { %10649 = vst [vmem:[#allocation247_spill] sm:$0xff] %v7066_v42  ;;  %10650 = vst [vmem:[#allocation248_spill] sm:$0xff] %v7068_v51 }
 0x353   :  { %1972 = vrot.lane.b32.xlu0 %v7006_v41, %s5390_s17  ;;  %2132 = vrot.lane.b32.xlu1 %v7006_v41, %s5394_s19 }
 0x355   :  { %v7074_v34 = vpop.permute.xlu1 %1808  ;;  %v7076_v6 = vpop.permute.xlu0 %1738 }
 0x356   :  { %10651 = vst [vmem:[#allocation249_spill] sm:$0xff] %v7074_v34  ;;  %10652 = vst [vmem:[#allocation250_spill] sm:$0xff] %v7076_v6 }
 0x357   :  { %2036 = vrot.lane.b32.xlu0 %v7006_v41, %s5392_s3  ;;  %1606 = vrot.lane.b32.xlu1 %v5851_v60, %s5395_s20 }
 0x359   :  { %v7084_v18 = vpop.permute.xlu1 %1840  ;;  %v7086_v42 = vpop.permute.xlu0 %1770 }
 0x35a   :  { %10653 = vst [vmem:[#allocation251_spill] sm:$0xff] %v7084_v18  ;;  %10654 = vst [vmem:[#allocation252_spill] sm:$0xff] %v7086_v42 }
 0x35b   :  { %2100 = vrot.lane.b32.xlu0 %v7006_v41, %s5395_s20  ;;  %1686 = vrot.lane.b32.xlu1 %v7082_v7, %s5381_s1 }
 0x35d   :  { %v7092_v34 = vpop.permute.xlu1 %1872  ;;  %v7094_v6 = vpop.permute.xlu0 %1802 }
 0x35e   :  { %10655 = vst [vmem:[#allocation253_spill] sm:$0xff] %v7092_v34  ;;  %10656 = vst [vmem:[#allocation254_spill] sm:$0xff] %v7094_v6 }
 0x35f   :  { %1574 = vrot.lane.b32.xlu0 %v5851_v60, %s5393_s0  ;;  %1750 = vrot.lane.b32.xlu1 %v7082_v7, %s5383_s11 }
 0x361   :  { %v7100_v3 = vpop.permute.xlu1 %1904  ;;  %v7102_v24 = vpop.permute.xlu0 %1834 }
 0x362   :  { %10657 = vst [vmem:[#allocation255_spill] sm:$0xff] %v7100_v3  ;;  %10658 = vst [vmem:[#allocation256_spill] sm:$0xff] %v7102_v24  ;;  %v1044_v3 = vrot.slane %v5843_v49, 4 }
 0x363   :  { %1638 = vrot.lane.b32.xlu0 %v5851_v60, %s5394_s19  ;;  %1814 = vrot.lane.b32.xlu1 %v7082_v7, %s5385_s13 }
 0x365   :  { %v7108_v18 = vpop.permute.xlu1 %1936  ;;  %v7110_v34 = vpop.permute.xlu0 %1866 }
 0x366   :  { %10659 = vst [vmem:[#allocation257_spill] sm:$0xff] %v7108_v18  ;;  %10660 = vst [vmem:[#allocation258_spill] sm:$0xff] %v7110_v34  ;;  %v1045_v18 = vmax.f32 %v5843_v49, %v1044_v3 }
 0x367   :  { %1718 = vrot.lane.b32.xlu0 %v7082_v7, %s5382_s10  ;;  %1878 = vrot.lane.b32.xlu1 %v7082_v7, %s5387_s15 }
 0x369   :  { %v7117_v6 = vpop.permute.xlu1 %1968  ;;  %v7119_v24 = vpop.permute.xlu0 %1898 }
 0x36a   :  { %10661 = vst [vmem:[#allocation259_spill] sm:$0xff] %v7117_v6  ;;  %10662 = vst [vmem:[#allocation260_spill] sm:$0xff] %v7119_v24  ;;  %v1046_v6 = vrot.slane %v1045_v18, 2 }
 0x36b   :  { %1782 = vrot.lane.b32.xlu0 %v7082_v7, %s5384_s12  ;;  %1942 = vrot.lane.b32.xlu1 %v7082_v7, %s5389_s4 }
 0x36c   :  { %v1047_v49 = vmax.f32 %v1045_v18, %v1046_v6 }
 0x36d   :  { %v7126_v34 = vpop.permute.xlu1 %2000  ;;  %v7128_v42 = vpop.permute.xlu0 %1930 }
 0x36e   :  { %10663 = vst [vmem:[#allocation261_spill] sm:$0xff] %v7126_v34  ;;  %10664 = vst [vmem:[#allocation262_spill] sm:$0xff] %v7128_v42 }
 0x36f   :  { %1846 = vrot.lane.b32.xlu0 %v7082_v7, %s5386_s14  ;;  %2006 = vrot.lane.b32.xlu1 %v7082_v7, %s5391_s18 }
 0x371   :  { %v7134_v24 = vpop.permute.xlu1 %2032  ;;  %v7136_v51 = vpop.permute.xlu0 %1962 }
 0x372   :  { %10665 = vst [vmem:[#allocation263_spill] sm:$0xff] %v7134_v24  ;;  %10666 = vst [vmem:[#allocation264_spill] sm:$0xff] %v7136_v51  ;;  %v1048_v24 = vrot.slane %v1047_v49, 1 }
 0x373   :  { %1910 = vrot.lane.b32.xlu0 %v7082_v7, %s5388_s16  ;;  %2070 = vrot.lane.b32.xlu1 %v7082_v7, %s5393_s0 }
 0x374   :  { %v7158_v6 = vmax.f32 %v1047_v49, %v1048_v24 }
 0x375   :  { %v7142_v3 = vpop.permute.xlu1 %2064  ;;  %v7144_v34 = vpop.permute.xlu0 %1994 }
 0x376   :  { %10667 = vst [vmem:[#allocation265_spill] sm:$0xff] %v7142_v3  ;;  %10668 = vst [vmem:[#allocation266_spill] sm:$0xff] %v7144_v34 }
 0x377   :  { %1974 = vrot.lane.b32.xlu0 %v7082_v7, %s5390_s17  ;;  %2134 = vrot.lane.b32.xlu1 %v7082_v7, %s5394_s19 }
 0x379   :  { %v7150_v42 = vpop.permute.xlu1 %2096  ;;  %v7152_v51 = vpop.permute.xlu0 %2026 }
 0x37a   :  { %10669 = vst [vmem:[#allocation267_spill] sm:$0xff] %v7150_v42  ;;  %10670 = vst [vmem:[#allocation268_spill] sm:$0xff] %v7152_v51 }
 0x37b   :  { %2038 = vrot.lane.b32.xlu0 %v7082_v7, %s5392_s3  ;;  %1608 = vrot.lane.b32.xlu1 %v5922_v23, %s5395_s20 }
 0x37d   :  { %v7160_v18 = vpop.permute.xlu1 %2128  ;;  %v7162_v3 = vpop.permute.xlu0 %2058 }
 0x37e   :  { %10671 = vst [vmem:[#allocation269_spill] sm:$0xff] %v7160_v18  ;;  %10672 = vst [vmem:[#allocation270_spill] sm:$0xff] %v7162_v3 }
 0x37f   :  { %2102 = vrot.lane.b32.xlu0 %v7082_v7, %s5395_s20  ;;  %1688 = vrot.lane.b32.xlu1 %v7158_v6, %s5381_s1 }
 0x381   :  { %v7168_v42 = vpop.permute.xlu1 %1602  ;;  %v7170_v51 = vpop.permute.xlu0 %2090 }
 0x382   :  { %10673 = vst [vmem:[#allocation271_spill] sm:$0xff] %v7168_v42  ;;  %10674 = vst [vmem:[#allocation272_spill] sm:$0xff] %v7170_v51 }
 0x383   :  { %1576 = vrot.lane.b32.xlu0 %v5922_v23, %s5393_s0  ;;  %1752 = vrot.lane.b32.xlu1 %v7158_v6, %s5383_s11 }
 0x385   :  { %v7176_v24 = vpop.permute.xlu0 %2122  ;;  %v7178_v49 = vpop.permute.xlu1 %1682 }
 0x386   :  { %10675 = vst [vmem:[#allocation273_spill] sm:$0xff] %v7176_v24  ;;  %10676 = vst [vmem:[#allocation274_spill] sm:$0xff] %v7178_v49  ;;  %v1072_v24 = vrot.slane %v5881_v29, 4 }
 0x387   :  { %1640 = vrot.lane.b32.xlu0 %v5922_v23, %s5394_s19  ;;  %1816 = vrot.lane.b32.xlu1 %v7158_v6, %s5385_s13 }
 0x389   :  { %v7184_v18 = vpop.permute.xlu0 %1570  ;;  %v7186_v42 = vpop.permute.xlu1 %1746 }
 0x38a   :  { %10677 = vst [vmem:[#allocation275_spill] sm:$0xff] %v7184_v18  ;;  %10678 = vst [vmem:[#allocation276_spill] sm:$0xff] %v7186_v42  ;;  %v1073_v42 = vmax.f32 %v5881_v29, %v1072_v24 }
 0x38b   :  { %1720 = vrot.lane.b32.xlu0 %v7158_v6, %s5382_s10  ;;  %1880 = vrot.lane.b32.xlu1 %v7158_v6, %s5387_s15 }
 0x38d   :  { %v7193_v51 = vpop.permute.xlu0 %1634  ;;  %v7195_v49 = vpop.permute.xlu1 %1810 }
 0x38e   :  { %10679 = vst [vmem:[#allocation277_spill] sm:$0xff] %v7193_v51  ;;  %10680 = vst [vmem:[#allocation278_spill] sm:$0xff] %v7195_v49  ;;  %v1074_v51 = vrot.slane %v1073_v42, 2 }
 0x38f   :  { %1784 = vrot.lane.b32.xlu0 %v7158_v6, %s5384_s12  ;;  %1944 = vrot.lane.b32.xlu1 %v7158_v6, %s5389_s4 }
 0x390   :  { %v1075_v29 = vmax.f32 %v1073_v42, %v1074_v51 }
 0x391   :  { %v7202_v18 = vpop.permute.xlu0 %1714  ;;  %v7204_v3 = vpop.permute.xlu1 %1874 }
 0x392   :  { %10681 = vst [vmem:[#allocation279_spill] sm:$0xff] %v7202_v18  ;;  %10682 = vst [vmem:[#allocation280_spill] sm:$0xff] %v7204_v3 }
 0x393   :  { %1848 = vrot.lane.b32.xlu0 %v7158_v6, %s5386_s14  ;;  %2008 = vrot.lane.b32.xlu1 %v7158_v6, %s5391_s18 }
 0x395   :  { %v7210_v49 = vpop.permute.xlu0 %1778  ;;  %v7212_v34 = vpop.permute.xlu1 %1938 }
 0x396   :  { %10683 = vst [vmem:[#allocation281_spill] sm:$0xff] %v7210_v49  ;;  %10684 = vst [vmem:[#allocation282_spill] sm:$0xff] %v7212_v34  ;;  %v1076_v49 = vrot.slane %v1075_v29, 1 }
 0x397   :  { %1912 = vrot.lane.b32.xlu0 %v7158_v6, %s5388_s16  ;;  %2072 = vrot.lane.b32.xlu1 %v7158_v6, %s5393_s0 }
 0x398   :  { %v7234_v51 = vmax.f32 %v1075_v29, %v1076_v49 }
 0x399   :  { %v7218_v24 = vpop.permute.xlu0 %1842  ;;  %v7220_v3 = vpop.permute.xlu1 %2002 }
 0x39a   :  { %10685 = vst [vmem:[#allocation283_spill] sm:$0xff] %v7218_v24  ;;  %10686 = vst [vmem:[#allocation284_spill] sm:$0xff] %v7220_v3 }
 0x39b   :  { %1976 = vrot.lane.b32.xlu0 %v7158_v6, %s5390_s17  ;;  %2136 = vrot.lane.b32.xlu1 %v7158_v6, %s5394_s19 }
 0x39d   :  { %v7226_v18 = vpop.permute.xlu0 %1906  ;;  %v7228_v34 = vpop.permute.xlu1 %2066 }
 0x39e   :  { %10687 = vst [vmem:[#allocation285_spill] sm:$0xff] %v7226_v18  ;;  %10688 = vst [vmem:[#allocation286_spill] sm:$0xff] %v7228_v34 }
 0x39f   :  { %2040 = vrot.lane.b32.xlu0 %v7158_v6, %s5392_s3  ;;  %1612 = vrot.lane.b32.xlu1 %v6004_v21, %s5395_s20 }
 0x3a1   :  { %v7236_v42 = vpop.permute.xlu0 %1970  ;;  %v7238_v3 = vpop.permute.xlu1 %2130 }
 0x3a2   :  { %10689 = vst [vmem:[#allocation287_spill] sm:$0xff] %v7236_v42  ;;  %10690 = vst [vmem:[#allocation288_spill] sm:$0xff] %v7238_v3 }
 0x3a3   :  { %2104 = vrot.lane.b32.xlu0 %v7158_v6, %s5395_s20  ;;  %1692 = vrot.lane.b32.xlu1 %v7234_v51, %s5381_s1 }
 0x3a5   :  { %v7244_v18 = vpop.permute.xlu0 %2034  ;;  %v7246_v34 = vpop.permute.xlu1 %1604 }
 0x3a6   :  { %10691 = vst [vmem:[#allocation289_spill] sm:$0xff] %v7244_v18  ;;  %10692 = vst [vmem:[#allocation290_spill] sm:$0xff] %v7246_v34 }
 0x3a7   :  { %1580 = vrot.lane.b32.xlu0 %v6004_v21, %s5393_s0  ;;  %1756 = vrot.lane.b32.xlu1 %v7234_v51, %s5383_s11 }
 0x3a9   :  { %v7252_v49 = vpop.permute.xlu0 %2098  ;;  %v7254_v29 = vpop.permute.xlu1 %1684 }
 0x3aa   :  { %10693 = vst [vmem:[#allocation291_spill] sm:$0xff] %v7252_v49  ;;  %10694 = vst [vmem:[#allocation292_spill] sm:$0xff] %v7254_v29  ;;  %v1086_v49 = vrot.slane %v5900_v57, 4 }
 0x3ab   :  { %1644 = vrot.lane.b32.xlu0 %v6004_v21, %s5394_s19  ;;  %1820 = vrot.lane.b32.xlu1 %v7234_v51, %s5385_s13 }
 0x3ad   :  { %v7260_v3 = vpop.permute.xlu0 %1572  ;;  %v7262_v18 = vpop.permute.xlu1 %1748 }
 0x3ae   :  { %10695 = vst [vmem:[#allocation293_spill] sm:$0xff] %v7260_v3  ;;  %10696 = vst [vmem:[#allocation294_spill] sm:$0xff] %v7262_v18  ;;  %v1087_v18 = vmax.f32 %v5900_v57, %v1086_v49 }
 0x3af   :  { %1724 = vrot.lane.b32.xlu0 %v7234_v51, %s5382_s10  ;;  %1884 = vrot.lane.b32.xlu1 %v7234_v51, %s5387_s15 }
 0x3b1   :  { %v7269_v34 = vpop.permute.xlu0 %1636  ;;  %v7271_v29 = vpop.permute.xlu1 %1812 }
 0x3b2   :  { %10697 = vst [vmem:[#allocation295_spill] sm:$0xff] %v7269_v34  ;;  %10698 = vst [vmem:[#allocation296_spill] sm:$0xff] %v7271_v29  ;;  %v1088_v34 = vrot.slane %v1087_v18, 2 }
 0x3b3   :  { %1788 = vrot.lane.b32.xlu0 %v7234_v51, %s5384_s12  ;;  %1948 = vrot.lane.b32.xlu1 %v7234_v51, %s5389_s4 }
 0x3b4   :  { %v1089_v57 = vmax.f32 %v1087_v18, %v1088_v34 }
 0x3b5   :  { %v7278_v3 = vpop.permute.xlu0 %1716  ;;  %v7280_v42 = vpop.permute.xlu1 %1876 }
 0x3b6   :  { %10699 = vst [vmem:[#allocation297_spill] sm:$0xff] %v7278_v3  ;;  %10700 = vst [vmem:[#allocation298_spill] sm:$0xff] %v7280_v42 }
 0x3b7   :  { %1852 = vrot.lane.b32.xlu0 %v7234_v51, %s5386_s14  ;;  %2012 = vrot.lane.b32.xlu1 %v7234_v51, %s5391_s18 }
 0x3b9   :  { %v7286_v29 = vpop.permute.xlu0 %1780  ;;  %v7288_v24 = vpop.permute.xlu1 %1940 }
 0x3ba   :  { %10701 = vst [vmem:[#allocation299_spill] sm:$0xff] %v7286_v29  ;;  %10702 = vst [vmem:[#allocation300_spill] sm:$0xff] %v7288_v24  ;;  %v1090_v29 = vrot.slane %v1089_v57, 1 }
 0x3bb   :  { %1916 = vrot.lane.b32.xlu0 %v7234_v51, %s5388_s16  ;;  %2076 = vrot.lane.b32.xlu1 %v7234_v51, %s5393_s0 }
 0x3bc   :  { %v7310_v34 = vmax.f32 %v1089_v57, %v1090_v29 }
 0x3bd   :  { %v7294_v49 = vpop.permute.xlu0 %1844  ;;  %v7296_v42 = vpop.permute.xlu1 %2004 }
 0x3be   :  { %10703 = vst [vmem:[#allocation301_spill] sm:$0xff] %v7294_v49  ;;  %10704 = vst [vmem:[#allocation302_spill] sm:$0xff] %v7296_v42 }
 0x3bf   :  { %1980 = vrot.lane.b32.xlu0 %v7234_v51, %s5390_s17  ;;  %2140 = vrot.lane.b32.xlu1 %v7234_v51, %s5394_s19 }
 0x3c1   :  { %v7302_v3 = vpop.permute.xlu0 %1908  ;;  %v7304_v24 = vpop.permute.xlu1 %2068 }
 0x3c2   :  { %10705 = vst [vmem:[#allocation303_spill] sm:$0xff] %v7302_v3  ;;  %10706 = vst [vmem:[#allocation304_spill] sm:$0xff] %v7304_v24 }
 0x3c3   :  { %2044 = vrot.lane.b32.xlu0 %v7234_v51, %s5392_s3  ;;  %1614 = vrot.lane.b32.xlu1 %v6014_v28, %s5395_s20 }
 0x3c5   :  { %v7312_v18 = vpop.permute.xlu0 %1972  ;;  %v7314_v42 = vpop.permute.xlu1 %2132 }
 0x3c6   :  { %10707 = vst [vmem:[#allocation305_spill] sm:$0xff] %v7312_v18  ;;  %10708 = vst [vmem:[#allocation306_spill] sm:$0xff] %v7314_v42 }
 0x3c7   :  { %2108 = vrot.lane.b32.xlu0 %v7234_v51, %s5395_s20  ;;  %1694 = vrot.lane.b32.xlu1 %v7310_v34, %s5381_s1 }
 0x3c9   :  { %v7320_v3 = vpop.permute.xlu0 %2036  ;;  %v7322_v24 = vpop.permute.xlu1 %1606 }
 0x3ca   :  { %10709 = vst [vmem:[#allocation307_spill] sm:$0xff] %v7320_v3  ;;  %10710 = vst [vmem:[#allocation308_spill] sm:$0xff] %v7322_v24 }
 0x3cb   :  { %1582 = vrot.lane.b32.xlu0 %v6014_v28, %s5393_s0  ;;  %1758 = vrot.lane.b32.xlu1 %v7310_v34, %s5383_s11 }
 0x3cd   :  { %v7328_v29 = vpop.permute.xlu0 %2100  ;;  %v7330_v57 = vpop.permute.xlu1 %1686 }
 0x3ce   :  { %10711 = vst [vmem:[#allocation309_spill] sm:$0xff] %v7328_v29  ;;  %10712 = vst [vmem:[#allocation310_spill] sm:$0xff] %v7330_v57 }
 0x3cf   :  { %1646 = vrot.lane.b32.xlu0 %v6014_v28, %s5394_s19  ;;  %1822 = vrot.lane.b32.xlu1 %v7310_v34, %s5385_s13 }
 0x3d1   :  { %v7336_v42 = vpop.permute.xlu0 %1574  ;;  %v7338_v3 = vpop.permute.xlu1 %1750 }
 0x3d2   :  { %10713 = vst [vmem:[#allocation311_spill] sm:$0xff] %v7336_v42  ;;  %10714 = vst [vmem:[#allocation312_spill] sm:$0xff] %v7338_v3 }
 0x3d3   :  { %1726 = vrot.lane.b32.xlu0 %v7310_v34, %s5382_s10  ;;  %1886 = vrot.lane.b32.xlu1 %v7310_v34, %s5387_s15 }
 0x3d5   :  { %v7344_v24 = vpop.permute.xlu0 %1638  ;;  %v7346_v29 = vpop.permute.xlu1 %1814 }
 0x3d6   :  { %10715 = vst [vmem:[#allocation313_spill] sm:$0xff] %v7344_v24  ;;  %10716 = vst [vmem:[#allocation314_spill] sm:$0xff] %v7346_v29  ;;  %v1100_v24 = vrot.slane %v5916_v20, 4 }
 0x3d7   :  { %1790 = vrot.lane.b32.xlu0 %v7310_v34, %s5384_s12  ;;  %1950 = vrot.lane.b32.xlu1 %v7310_v34, %s5389_s4 }
 0x3d9   :  { %v7352_v57 = vpop.permute.xlu0 %1718  ;;  %v7354_v42 = vpop.permute.xlu1 %1878 }
 0x3da   :  { %10717 = vst [vmem:[#allocation315_spill] sm:$0xff] %v7352_v57  ;;  %10718 = vst [vmem:[#allocation316_spill] sm:$0xff] %v7354_v42  ;;  %v1101_v42 = vmax.f32 %v5916_v20, %v1100_v24 }
 0x3db   :  { %1854 = vrot.lane.b32.xlu0 %v7310_v34, %s5386_s14  ;;  %2014 = vrot.lane.b32.xlu1 %v7310_v34, %s5391_s18 }
 0x3dd   :  { %v7361_v3 = vpop.permute.xlu0 %1782  ;;  %v7363_v29 = vpop.permute.xlu1 %1942 }
 0x3de   :  { %10719 = vst [vmem:[#allocation317_spill] sm:$0xff] %v7361_v3  ;;  %10720 = vst [vmem:[#allocation318_spill] sm:$0xff] %v7363_v29  ;;  %v1058_v29 = vrot.slane %v5861_v8, 4  ;;  %v1102_v3 = vrot.slane %v1101_v42, 2 }
 0x3df   :  { %1918 = vrot.lane.b32.xlu0 %v7310_v34, %s5388_s16  ;;  %2078 = vrot.lane.b32.xlu1 %v7310_v34, %s5393_s0 }
 0x3e0   :  { %v1059_v20 = vmax.f32 %v5861_v8, %v1058_v29  ;;  %v1103_v24 = vmax.f32 %v1101_v42, %v1102_v3 }
 0x3e1   :  { %v7370_v57 = vpop.permute.xlu0 %1846  ;;  %v7372_v18 = vpop.permute.xlu1 %2006 }
 0x3e2   :  { %10721 = vst [vmem:[#allocation319_spill] sm:$0xff] %v7370_v57  ;;  %10722 = vst [vmem:[#allocation320_spill] sm:$0xff] %v7372_v18 }
 0x3e3   :  { %1982 = vrot.lane.b32.xlu0 %v7310_v34, %s5390_s17  ;;  %2142 = vrot.lane.b32.xlu1 %v7310_v34, %s5394_s19 }
 0x3e5   :  { %v7379_v49 = vpop.permute.xlu0 %1910  ;;  %v7381_v55 = vpop.permute.xlu1 %2070 }
 0x3e6   :  { %10723 = vst [vmem:[#allocation321_spill] sm:$0xff] %v7379_v49  ;;  %10724 = vst [vmem:[#allocation322_spill] sm:$0xff] %v7381_v55  ;;  %v1060_v55 = vrot.slane %v1059_v20, 2  ;;  %v1104_v49 = vrot.slane %v1103_v24, 1 }
 0x3e7   :  { %2046 = vrot.lane.b32.xlu0 %v7310_v34, %s5392_s3  ;;  %1584 = vrot.lane.b32.xlu1 %v6054_v0, %s5393_s0 }
 0x3e8   :  { %v1061_v8 = vmax.f32 %v1059_v20, %v1060_v55  ;;  %v7404_v3 = vmax.f32 %v1103_v24, %v1104_v49 }
 0x3e9   :  { %v7388_v18 = vpop.permute.xlu0 %1974  ;;  %v7390_v57 = vpop.permute.xlu1 %2134 }
 0x3ea   :  { %10725 = vst [vmem:[#allocation323_spill] sm:$0xff] %v7388_v18  ;;  %10726 = vst [vmem:[#allocation324_spill] sm:$0xff] %v7390_v57 }
 0x3eb   :  { %2110 = vrot.lane.b32.xlu0 %v7310_v34, %s5395_s20  ;;  %1616 = vrot.lane.b32.xlu1 %v6054_v0, %s5395_s20  ;;  %10729 = vst [vmem:[#allocation327_spill] sm:$0xff] %v7404_v3 }
 0x3ed   :  { %v7396_v53 = vpop.permute.xlu0 %2038  ;;  %v7398_v61 = vpop.permute.xlu1 %1608 }
 0x3ee   :  { %10727 = vst [vmem:[#allocation325_spill] sm:$0xff] %v7396_v53  ;;  %10728 = vst [vmem:[#allocation326_spill] sm:$0xff] %v7398_v61  ;;  %v1062_v53 = vrot.slane %v1061_v8, 1  ;;  %v431_v61 = vrot.slane %v5812_v52, 4 }
 0x3ef   :  { %1578 = vrot.lane.b32.xlu0 %v5942_v46, %s5393_s0  ;;  %1648 = vrot.lane.b32.xlu1 %v6054_v0, %s5394_s19 }
 0x3f0   :  { %v7422_v55 = vmax.f32 %v1061_v8, %v1062_v53  ;;  %v432_v15 = vmax.f32 %v5812_v52, %v431_v61 }
 0x3f1   :  { %v7406_v42 = vpop.permute.xlu0 %2102  ;;  %v7408_v29 = vpop.permute.xlu1 %1688 }
 0x3f2   :  { %10730 = vst [vmem:[#allocation328_spill] sm:$0xff] %v7406_v42  ;;  %10731 = vst [vmem:[#allocation329_spill] sm:$0xff] %v7408_v29 }
 0x3f3   :  { %1610 = vrot.lane.b32.xlu0 %v5942_v46, %s5395_s20  ;;  %1696 = vrot.lane.b32.xlu1 %v7404_v3, %s5381_s1  ;;  %10734 = vst [vmem:[#allocation332_spill] sm:$0xff] %v7422_v55 }
 0x3f5   :  { %v7414_v57 = vpop.permute.xlu0 %1576  ;;  %v7416_v18 = vpop.permute.xlu1 %1752 }
 0x3f6   :  { %10732 = vst [vmem:[#allocation330_spill] sm:$0xff] %v7414_v57  ;;  %10733 = vst [vmem:[#allocation331_spill] sm:$0xff] %v7416_v18  ;;  %v395_v18 = vrot.slane %v5792_v31, 4 }
 0x3f7   :  { %1642 = vrot.lane.b32.xlu0 %v5942_v46, %s5394_s19  ;;  %1728 = vrot.lane.b32.xlu1 %v7404_v3, %s5382_s10 }
 0x3f9   :  { %v7424_v49 = vpop.permute.xlu0 %1640  ;;  %v7426_v20 = vpop.permute.xlu1 %1816 }
 0x3fa   :  { %10735 = vst [vmem:[#allocation333_spill] sm:$0xff] %v7424_v49  ;;  %10736 = vst [vmem:[#allocation334_spill] sm:$0xff] %v7426_v20  ;;  %v413_v49 = vrot.slane %v5800_v40, 4 }
 0x3fb   :  { %1690 = vrot.lane.b32.xlu0 %v7422_v55, %s5381_s1  ;;  %1760 = vrot.lane.b32.xlu1 %v7404_v3, %s5383_s11 }
 0x3fd   :  { %v7432_v24 = vpop.permute.xlu0 %1720  ;;  %v7434_v42 = vpop.permute.xlu1 %1880 }
 0x3fe   :  { %10737 = vst [vmem:[#allocation335_spill] sm:$0xff] %v7432_v24  ;;  %10738 = vst [vmem:[#allocation336_spill] sm:$0xff] %v7434_v42 }
 0x3ff   :  { %1722 = vrot.lane.b32.xlu0 %v7422_v55, %s5382_s10  ;;  %1792 = vrot.lane.b32.xlu1 %v7404_v3, %s5384_s12 }
 0x401   :  { %v7440_v53 = vpop.permute.xlu0 %1784  ;;  %v7442_v8 = vpop.permute.xlu1 %1944 }
 0x402   :  { %10739 = vst [vmem:[#allocation337_spill] sm:$0xff] %v7440_v53  ;;  %10740 = vst [vmem:[#allocation338_spill] sm:$0xff] %v7442_v8 }
 0x403   :  { %1754 = vrot.lane.b32.xlu0 %v7422_v55, %s5383_s11  ;;  %1824 = vrot.lane.b32.xlu1 %v7404_v3, %s5385_s13 }
 0x405   :  { %v7448_v20 = vpop.permute.xlu0 %1848  ;;  %v7450_v24 = vpop.permute.xlu1 %2008 }
 0x406   :  { %10741 = vst [vmem:[#allocation339_spill] sm:$0xff] %v7448_v20  ;;  %10742 = vst [vmem:[#allocation340_spill] sm:$0xff] %v7450_v24 }
 0x407   :  { %1786 = vrot.lane.b32.xlu0 %v7422_v55, %s5384_s12  ;;  %1856 = vrot.lane.b32.xlu1 %v7404_v3, %s5386_s14 }
 0x409   :  { %v7456_v42 = vpop.permute.xlu0 %1912  ;;  %v7458_v53 = vpop.permute.xlu1 %2072 }
 0x40a   :  { %10743 = vst [vmem:[#allocation341_spill] sm:$0xff] %v7456_v42  ;;  %10744 = vst [vmem:[#allocation342_spill] sm:$0xff] %v7458_v53 }
 0x40b   :  { %1818 = vrot.lane.b32.xlu0 %v7422_v55, %s5385_s13  ;;  %1888 = vrot.lane.b32.xlu1 %v7404_v3, %s5387_s15 }
 0x40d   :  { %v7464_v8 = vpop.permute.xlu0 %1976  ;;  %v7466_v20 = vpop.permute.xlu1 %2136 }
 0x40e   :  { %10745 = vst [vmem:[#allocation343_spill] sm:$0xff] %v7464_v8  ;;  %10746 = vst [vmem:[#allocation344_spill] sm:$0xff] %v7466_v20 }
 0x40f   :  { %1850 = vrot.lane.b32.xlu0 %v7422_v55, %s5386_s14  ;;  %1920 = vrot.lane.b32.xlu1 %v7404_v3, %s5388_s16 }
 0x411   :  { %v7472_v24 = vpop.permute.xlu0 %2040  ;;  %v7474_v42 = vpop.permute.xlu1 %1612 }
 0x412   :  { %10747 = vst [vmem:[#allocation345_spill] sm:$0xff] %v7472_v24  ;;  %10748 = vst [vmem:[#allocation346_spill] sm:$0xff] %v7474_v42  ;;  %v1114_v42 = vrot.slane %v5934_v44, 4 }
 0x413   :  { %1882 = vrot.lane.b32.xlu0 %v7422_v55, %s5387_s15  ;;  %1952 = vrot.lane.b32.xlu1 %v7404_v3, %s5389_s4 }
 0x415   :  { %v7480_v53 = vpop.permute.xlu0 %2104  ;;  %v7482_v8 = vpop.permute.xlu1 %1692 }
 0x416   :  { %10749 = vst [vmem:[#allocation347_spill] sm:$0xff] %v7480_v53  ;;  %10750 = vst [vmem:[#allocation348_spill] sm:$0xff] %v7482_v8 }
 0x417   :  { %1914 = vrot.lane.b32.xlu0 %v7422_v55, %s5388_s16  ;;  %1984 = vrot.lane.b32.xlu1 %v7404_v3, %s5390_s17 }
 0x419   :  { %v7488_v20 = vpop.permute.xlu0 %1580  ;;  %v7490_v24 = vpop.permute.xlu1 %1756 }
 0x41a   :  { %10751 = vst [vmem:[#allocation349_spill] sm:$0xff] %v7488_v20  ;;  %10752 = vst [vmem:[#allocation350_spill] sm:$0xff] %v7490_v24  ;;  %v1115_v24 = vmax.f32 %v5934_v44, %v1114_v42 }
 0x41b   :  { %1946 = vrot.lane.b32.xlu0 %v7422_v55, %s5389_s4  ;;  %2016 = vrot.lane.b32.xlu1 %v7404_v3, %s5391_s18 }
 0x41d   :  { %v7497_v53 = vpop.permute.xlu0 %1644  ;;  %v7499_v8 = vpop.permute.xlu1 %1820 }
 0x41e   :  { %10753 = vst [vmem:[#allocation351_spill] sm:$0xff] %v7497_v53  ;;  %10754 = vst [vmem:[#allocation352_spill] sm:$0xff] %v7499_v8  ;;  %v1116_v53 = vrot.slane %v1115_v24, 2 }
 0x41f   :  { %1978 = vrot.lane.b32.xlu0 %v7422_v55, %s5390_s17  ;;  %2048 = vrot.lane.b32.xlu1 %v7404_v3, %s5392_s3 }
 0x420   :  { %v1117_v44 = vmax.f32 %v1115_v24, %v1116_v53 }
 0x421   :  { %v7506_v20 = vpop.permute.xlu0 %1724  ;;  %v7508_v29 = vpop.permute.xlu1 %1884 }
 0x422   :  { %10755 = vst [vmem:[#allocation353_spill] sm:$0xff] %v7506_v20  ;;  %10756 = vst [vmem:[#allocation354_spill] sm:$0xff] %v7508_v29  ;;  %v404_v20 = vrot.slane %v5796_v35, 4  ;;  %v1118_v24 = vrot.slane %v1117_v44, 1 }
 0x423   :  { %2010 = vrot.lane.b32.xlu0 %v7422_v55, %s5391_s18  ;;  %2080 = vrot.lane.b32.xlu1 %v7404_v3, %s5393_s0 }
 0x425   :  { %v7514_v8 = vpop.permute.xlu0 %1788  ;;  %v7516_v57 = vpop.permute.xlu1 %1948 }
 0x426   :  { %10757 = vst [vmem:[#allocation355_spill] sm:$0xff] %v7514_v8  ;;  %10758 = vst [vmem:[#allocation356_spill] sm:$0xff] %v7516_v57  ;;  %v396_v8 = vmax.f32 %v5792_v31, %v395_v18  ;;  %v422_v57 = vrot.slane %v5804_v45, 4  ;;  %v414_v31 = vmax.f32 %v5800_v40, %v413_v49  ;;  %v449_v18 = vrot.slane %v5822_v4, 4 }
 0x427   :  { %2042 = vrot.lane.b32.xlu0 %v7422_v55, %s5392_s3  ;;  %2112 = vrot.lane.b32.xlu1 %v7404_v3, %s5395_s20  ;;  %v7553_v40 = vmax.f32 %v1117_v44, %v1118_v24 }
 0x428   :  { %v397_v54 = vrot.slane %v396_v8, 2  ;;  %v423_v22 = vmax.f32 %v5804_v45, %v422_v57  ;;  %v415_v52 = vrot.slane %v414_v31, 2  ;;  %v450_v59 = vmax.f32 %v5822_v4, %v449_v18 }
 0x429   :  { %v7523_v42 = vpop.permute.xlu0 %1852  ;;  %v7525_v29 = vpop.permute.xlu1 %2012  ;;  %v433_v57 = vrot.slane %v432_v15, 2 }
 0x42a   :  { %10759 = vst [vmem:[#allocation357_spill] sm:$0xff] %v7523_v42  ;;  %10760 = vst [vmem:[#allocation358_spill] sm:$0xff] %v7525_v29  ;;  %v405_v42 = vmax.f32 %v5796_v35, %v404_v20  ;;  %v467_v35 = vrot.slane %v5832_v27, 4  ;;  %v398_v17 = vmax.f32 %v396_v8, %v397_v54  ;;  %v424_v61 = vrot.slane %v423_v22, 2 }
 0x42b   :  { %2074 = vrot.lane.b32.xlu0 %v7422_v55, %s5393_s0  ;;  %2144 = vrot.lane.b32.xlu1 %v7404_v3, %s5394_s19  ;;  %v416_v8 = vmax.f32 %v414_v31, %v415_v52  ;;  %v451_v18 = vrot.slane %v450_v59, 2  ;;  %v503_v31 = vrot.slane %v5868_v11, 4 }
 0x42c   :  { %v406_v45 = vrot.slane %v405_v42, 2  ;;  %v468_v24 = vmax.f32 %v5832_v27, %v467_v35  ;;  %v399_v58 = vrot.slane %v398_v17, 1  ;;  %v425_v23 = vmax.f32 %v423_v22, %v424_v61 }
 0x42d   :  { %v7537_v53 = vpop.permute.xlu0 %1916  ;;  %v7539_v29 = vpop.permute.xlu1 %2076  ;;  %v417_v22 = vrot.slane %v416_v8, 1 }
 0x42e   :  { %10761 = vst [vmem:[#allocation359_spill] sm:$0xff] %v7537_v53  ;;  %10762 = vst [vmem:[#allocation360_spill] sm:$0xff] %v7539_v29  ;;  %v458_v29 = vrot.slane %v5826_v14, 4  ;;  %v442_v53 = vrot.slane %v441_v13, 2  ;;  %v407_v54 = vmax.f32 %v405_v42, %v406_v45  ;;  %v469_v27 = vrot.slane %v468_v24, 2 }
 0x42f   :  { %2106 = vrot.lane.b32.xlu0 %v7422_v55, %s5395_s20  ;;  %1618 = vrot.lane.b32.xlu1 %v6174_v39, %s5395_s20  ;;  %v494_v42 = vrot.slane %v5858_v63, 4  ;;  %v426_v52 = vrot.slane %v425_v23, 1 }
 0x430   :  { %v459_v44 = vmax.f32 %v5826_v14, %v458_v29  ;;  %v443_v26 = vmax.f32 %v441_v13, %v442_v53  ;;  %v408_v13 = vrot.slane %v407_v54, 1  ;;  %v452_v53 = vmax.f32 %v450_v59, %v451_v18 }
 0x431   :  { %v7555_v49 = vpop.permute.xlu0 %1980  ;;  %v7557_v20 = vpop.permute.xlu1 %2140  ;;  %v504_v59 = vmax.f32 %v5868_v11, %v503_v31  ;;  %v1142_v18 = vrot.slane %v5979_v48, 4 }
 0x432   :  { %10763 = vst [vmem:[#allocation361_spill] sm:$0xff] %v7555_v49  ;;  %10764 = vst [vmem:[#allocation362_spill] sm:$0xff] %v7557_v20  ;;  %v476_v20 = vrot.slane %v5840_v38, 4  ;;  %v485_v49 = vrot.slane %v5848_v56, 4  ;;  %v460_v14 = vrot.slane %v459_v44, 2  ;;  %v453_v3 = vrot.slane %v452_v53, 1 }
 0x433   :  { %2138 = vrot.lane.b32.xlu0 %v7422_v55, %s5394_s19  ;;  %1698 = vrot.lane.b32.xlu1 %v7553_v40, %s5381_s1  ;;  %v434_v55 = vmax.f32 %v432_v15, %v433_v57  ;;  %v444_v57 = vrot.slane %v443_v26, 1 }
 0x434   :  { %v477_v29 = vmax.f32 %v5840_v38, %v476_v20  ;;  %v486_v35 = vmax.f32 %v5848_v56, %v485_v49  ;;  %v7588_v38 = vmax.f32 %v398_v17, %v399_v58  ;;  %v461_v56 = vmax.f32 %v459_v44, %v460_v14 }
 0x435   :  { %v7568_v62 = vpop.permute.xlu0 %2044  ;;  %v7570_v4 = vpop.permute.xlu1 %1614  ;;  %v435_v61 = vrot.slane %v434_v55, 1  ;;  %v470_v49 = vmax.f32 %v468_v24, %v469_v27  ;;  %v1156_v58 = vrot.slane %v5989_v10, 4  ;;  %v7599_v17 = vmax.f32 %v407_v54, %v408_v13 }
 0x436   :  { %10765 = vst [vmem:[#allocation363_spill] sm:$0xff] %v7568_v62  ;;  %10766 = vst [vmem:[#allocation364_spill] sm:$0xff] %v7570_v4  ;;  %v478_v20 = vrot.slane %v477_v29, 2  ;;  %v495_v4 = vmax.f32 %v5858_v63, %v494_v42  ;;  %v7601_v44 = vmax.f32 %v416_v8, %v417_v22  ;;  %v512_v24 = vrot.slane %v5876_v19, 4 }
 0x437   :  { %1586 = vrot.lane.b32.xlu0 %v6174_v39, %s5393_s0  ;;  %1762 = vrot.lane.b32.xlu1 %v7553_v40, %s5383_s11  ;;  %10769 = vst [vmem:[#allocation367_spill] sm:$0xff] %v7588_v38  ;;  %10772 = vst [vmem:[#allocation370_spill] sm:$0xff] %v7599_v17  ;;  %v7608_v63 = vmax.f32 %v425_v23, %v426_v52  ;;  %v7610_v11 = vmax.f32 %v434_v55, %v435_v61  ;;  %v462_v27 = vrot.slane %v461_v56, 1 }
 0x438   :  { %10773 = vst [vmem:[#allocation371_spill] sm:$0xff] %v7601_v44  ;;  %v7612_v14 = vmax.f32 %v443_v26, %v444_v57  ;;  %v471_v42 = vrot.slane %v470_v49, 1  ;;  %v479_v54 = vmax.f32 %v477_v29, %v478_v20  ;;  %v496_v13 = vrot.slane %v495_v4, 2 }
 0x439   :  { %v7580_v45 = vpop.permute.xlu0 %2108  ;;  %v7582_v15 = vpop.permute.xlu1 %1694  ;;  %10774 = vst [vmem:[#allocation372_spill] sm:$0xff] %v7608_v63  ;;  %10775 = vst [vmem:[#allocation373_spill] sm:$0xff] %v7610_v11  ;;  %v505_v22 = vrot.slane %v504_v59, 2  ;;  %v521_v23 = vrot.slane %v5888_v33, 4  ;;  %v1157_v26 = vmax.f32 %v5989_v10, %v1156_v58  ;;  %v2617_v55 = vrot.slane %v7006_v41, 3  ;;  %v10892_v63 = vld [vmem:[#allocation70_spill] sm:$0xff] }
 0x43a   :  { %10767 = vst [vmem:[#allocation365_spill] sm:$0xff] %v7580_v45  ;;  %10768 = vst [vmem:[#allocation366_spill] sm:$0xff] %v7582_v15  ;;  %v1128_v45 = vrot.slane %v5952_v12, 4  ;;  %v487_v15 = vrot.slane %v486_v35, 2  ;;  %v7623_v52 = vmax.f32 %v452_v53, %v453_v3  ;;  %v530_v29 = vrot.slane %v5896_v43, 4 }
 0x43b   :  { %1650 = vrot.lane.b32.xlu0 %v6174_v39, %s5394_s19  ;;  %1826 = vrot.lane.b32.xlu1 %v7553_v40, %s5385_s13  ;;  %10776 = vst [vmem:[#allocation374_spill] sm:$0xff] %v7612_v14  ;;  %v7635_v3 = vmax.f32 %v470_v49, %v471_v42  ;;  %v497_v53 = vmax.f32 %v495_v4, %v496_v13  ;;  %v1158_v58 = vrot.slane %v1157_v26, 2 }
 0x43c   :  { %v1129_v8 = vmax.f32 %v5952_v12, %v1128_v45  ;;  %v488_v31 = vmax.f32 %v486_v35, %v487_v15  ;;  %10779 = vst [vmem:[#allocation377_spill] sm:$0xff] %v7623_v52  ;;  %v513_v12 = vmax.f32 %v5876_v19, %v512_v24  ;;  %v2609_v35 = vrot.slane %v6634_v9, 7 }
 0x43d   :  { %v7594_v62 = vpop.permute.xlu0 %1582  ;;  %v7596_v47 = vpop.permute.xlu1 %1758  ;;  %v480_v45 = vrot.slane %v479_v54, 1  ;;  %v7633_v15 = vmax.f32 %v461_v56, %v462_v27  ;;  %10781 = vst [vmem:[#allocation379_spill] sm:$0xff] %v7635_v3  ;;  %v7637_v61 = vmax.f32 %v504_v59, %v505_v22  ;;  %v2157_v24 = vrot.slane %v6228_v30, 6  ;;  %v10838_v3 = vld [vmem:[#allocation49_spill] sm:$0xff] }
 0x43e   :  { %10770 = vst [vmem:[#allocation368_spill] sm:$0xff] %v7594_v62  ;;  %10771 = vst [vmem:[#allocation369_spill] sm:$0xff] %v7596_v47  ;;  %v1143_v47 = vmax.f32 %v5979_v48, %v1142_v18  ;;  %v2154_v48 = vrot.slane %v6140_v50, 7  ;;  %v1130_v10 = vrot.slane %v1129_v8, 2  ;;  %v489_v19 = vrot.slane %v488_v31, 1 }
 0x43f   :  { %1730 = vrot.lane.b32.xlu0 %v7553_v40, %s5382_s10  ;;  %1890 = vrot.lane.b32.xlu1 %v7553_v40, %s5387_s15  ;;  %10780 = vst [vmem:[#allocation378_spill] sm:$0xff] %v7633_v15  ;;  %v522_v18 = vmax.f32 %v5888_v33, %v521_v23  ;;  %v2611_v50 = vrot.slane %v6710_v25, 6  ;;  %v514_v56 = vrot.slane %v513_v12, 2  ;;  %v531_v49 = vmax.f32 %v5896_v43, %v530_v29 }
 0x440   :  { %v1144_v9 = vrot.slane %v1143_v47, 2  ;;  %v2610_v4 = vsel %vm2155_vm4, %v2609_v35, %v6814_v37  ;;  %v2156_v33 = vsel %vm2155_vm4, %v2154_v48, %v6070_v16  ;;  %v1131_v59 = vmax.f32 %v1129_v8, %v1130_v10 }
 0x441   :  { %v7616_v62 = vpop.permute.xlu0 %1646  ;;  %v7618_v44 = vpop.permute.xlu1 %1822  ;;  %v2619_v25 = vrot.slane %v7082_v7, 2  ;;  %v2621_v30 = vrot.slane %v7158_v6, 1  ;;  %v7657_v27 = vmax.f32 %v479_v54, %v480_v45  ;;  %v498_v43 = vrot.slane %v497_v53, 1 }
 0x442   :  { %10777 = vst [vmem:[#allocation375_spill] sm:$0xff] %v7616_v62  ;;  %10778 = vst [vmem:[#allocation376_spill] sm:$0xff] %v7618_v44  ;;  %v1145_v42 = vmax.f32 %v1143_v47, %v1144_v9  ;;  %v2613_v37 = vrot.slane %v6796_v1, 5  ;;  %v2160_v23 = vrot.slane %v6325_v36, 5  ;;  %v523_v29 = vrot.slane %v522_v18, 2  ;;  %v10857_v62 = vld [vmem:[#allocation64_spill] sm:$0xff] }
 0x443   :  { %1794 = vrot.lane.b32.xlu0 %v7553_v40, %s5384_s12  ;;  %1954 = vrot.lane.b32.xlu1 %v7553_v40, %s5389_s4  ;;  %10784 = vst [vmem:[#allocation382_spill] sm:$0xff] %v7657_v27  ;;  %v1159_v35 = vmax.f32 %v1157_v26, %v1158_v58  ;;  %v2612_v16 = vsel %vm2158_vm5, %v2611_v50, %v2610_v4  ;;  %v507_v54 = vrot.slane %v7637_v61, 1  ;;  %v532_v47 = vrot.slane %v531_v49, 2  ;;  %v10837_v27 = vld [vmem:[#allocation47_spill] sm:$0xff] }
 0x444   :  { %v2159_v8 = vsel %vm2158_vm5, %v2157_v24, %v2156_v33  ;;  %v7668_v48 = vmax.f32 %v513_v12, %v514_v56  ;;  %v7674_v1 = vmax.f32 %v488_v31, %v489_v19  ;;  %v1132_v36 = vrot.slane %v1131_v59, 1 }
 0x445   :  { %v7639_v57 = vpop.permute.xlu0 %1726  ;;  %v7641_v20 = vpop.permute.xlu1 %1886  ;;  %v2615_v26 = vrot.slane %v6930_v5, 4  ;;  %v2163_v45 = vrot.slane %v6352_v2, 4  ;;  %v2166_v10 = vrot.slane %v5834_v32, 3  ;;  %v1146_v9 = vrot.slane %v1145_v42, 1 }
 0x446   :  { %10782 = vst [vmem:[#allocation380_spill] sm:$0xff] %v7639_v57  ;;  %10783 = vst [vmem:[#allocation381_spill] sm:$0xff] %v7641_v20  ;;  %v2175_v12 = vrot.slane %v6004_v21, 7  ;;  %v2614_v58 = vsel %vm2161_vm6, %v2613_v37, %v2612_v16  ;;  %v2162_v31 = vsel %vm2161_vm6, %v2160_v23, %v2159_v8  ;;  %v524_v19 = vmax.f32 %v522_v18, %v523_v29  ;;  %v10794_v8 = vld [vmem:[#allocation327_spill] sm:$0xff]  ;;  %v10852_v20 = vld [vmem:[#allocation33_spill] sm:$0xff] }
 0x447   :  { %1858 = vrot.lane.b32.xlu0 %v7553_v40, %s5386_s14  ;;  %2018 = vrot.lane.b32.xlu1 %v7553_v40, %s5391_s18  ;;  %10787 = vst [vmem:[#allocation385_spill] sm:$0xff] %v7674_v1  ;;  %v1160_v56 = vrot.slane %v1159_v35, 1  ;;  %v2177_v5 = vrot.slane %v6014_v28, 6  ;;  %v2169_v2 = vrot.slane %v5851_v60, 2  ;;  %v516_v32 = vrot.slane %v7668_v48, 1  ;;  %v10836_v1 = vld [vmem:[#allocation45_spill] sm:$0xff] }
 0x448   :  { %v533_v4 = vmax.f32 %v531_v49, %v532_v47  ;;  %v7693_v21 = vmax.f32 %v497_v53, %v498_v43  ;;  %v2623_v33 = vrot.slane %v7234_v51, 7  ;;  %v7696_v18 = vmax.f32 %v1131_v59, %v1132_v36  ;;  %v10855_v57 = vld [vmem:[#allocation35_spill] sm:$0xff] }
 0x449   :  { %v7660_v13 = vpop.permute.xlu0 %1790  ;;  %v7662_v22 = vpop.permute.xlu1 %1950  ;;  %v2179_v37 = vrot.slane %v6054_v0, 5  ;;  %v2616_v28 = vsel %vm2164_vm7, %v2615_v26, %v2614_v58  ;;  %v2165_v60 = vsel %vm2164_vm7, %v2163_v45, %v2162_v31  ;;  %v7701_v23 = vmax.f32 %v1145_v42, %v1146_v9  ;;  %v10795_v42 = vld [vmem:[#allocation48_spill] sm:$0xff]  ;;  %v10796_v26 = vld [vmem:[#allocation77_spill] sm:$0xff] }
 0x44a   :  { %10785 = vst [vmem:[#allocation383_spill] sm:$0xff] %v7660_v13  ;;  %10786 = vst [vmem:[#allocation384_spill] sm:$0xff] %v7662_v22  ;;  %v2176_v49 = vsel %vm2155_vm4, %v2175_v12, %v5942_v46  ;;  %v2181_v29 = vrot.slane %v6174_v39, 4  ;;  %v2625_v51 = vrot.slane %v7310_v34, 6  ;;  %v525_v59 = vrot.slane %v524_v19, 1  ;;  %v10797_v9 = vld [vmem:[#allocation332_spill] sm:$0xff] }
 0x44b   :  { %1922 = vrot.lane.b32.xlu0 %v7553_v40, %s5388_s16  ;;  %2082 = vrot.lane.b32.xlu1 %v7553_v40, %s5393_s0  ;;  %10790 = vst [vmem:[#allocation388_spill] sm:$0xff] %v7693_v21  ;;  %v7711_v43 = vmax.f32 %v1159_v35, %v1160_v56  ;;  %v2178_v0 = vsel %vm2158_vm5, %v2177_v5, %v2176_v49  ;;  %v2627_v47 = vrot.slane %v10794_v8, 5  ;;  %v2183_v36 = vrot.slane %v10795_v42, 3  ;;  %v10835_v21 = vld [vmem:[#allocation30_spill] sm:$0xff] }
 0x44c   :  { %v2618_v46 = vsel %vm2167_vm8, %v2617_v55, %v2616_v28  ;;  %v2168_v39 = vsel %vm2167_vm8, %v2166_v10, %v2165_v60  ;;  %v2629_v34 = vrot.slane %v7553_v40, 4  ;;  %v2180_v35 = vsel %vm2161_vm6, %v2179_v37, %v2178_v0 }
 0x44d   :  { %v7681_v50 = vpop.permute.xlu0 %1854  ;;  %v7683_v24 = vpop.permute.xlu1 %2014  ;;  %10793 = vst [vmem:[#allocation391_spill] sm:$0xff] %v7711_v43  ;;  %v2185_v45 = vrot.slane %v10796_v26, 2  ;;  %v2624_v12 = vsel %vm2155_vm4, %v2623_v33, %v10797_v9  ;;  %v2631_v41 = vrot.slane %v7696_v18, 3  ;;  %v534_v55 = vrot.slane %v533_v4, 1  ;;  %v10814_v9 = vld [vmem:[#allocation10_spill] sm:$0xff] }
 0x44e   :  { %10788 = vst [vmem:[#allocation386_spill] sm:$0xff] %v7681_v50  ;;  %10789 = vst [vmem:[#allocation387_spill] sm:$0xff] %v7683_v24  ;;  %v2182_v58 = vsel %vm2164_vm7, %v2181_v29, %v2180_v35  ;;  %v2626_v10 = vsel %vm2158_vm5, %v2625_v51, %v2624_v12  ;;  %v2633_v5 = vrot.slane %v7701_v23, 2  ;;  %v2620_v37 = vsel %vm2170_vm9, %v2619_v25, %v2618_v46  ;;  %v10800_v29 = vld [vmem:[#allocation5_spill] sm:$0xff]  ;;  %v10823_v12 = vld [vmem:[#allocation19_spill] sm:$0xff] }
 0x44f   :  { %1986 = vrot.lane.b32.xlu0 %v7553_v40, %s5390_s17  ;;  %2146 = vrot.lane.b32.xlu1 %v7553_v40, %s5394_s19  ;;  %v2171_v28 = vsel %vm2170_vm9, %v2169_v2, %v2168_v39  ;;  %v2628_v33 = vsel %vm2161_vm6, %v2627_v47, %v2626_v10  ;;  %v2635_v60 = vrot.slane %v7711_v43, 1  ;;  %v2184_v49 = vsel %vm2167_vm8, %v2183_v36, %v2182_v58  ;;  %v10813_v35 = vld [vmem:[#allocation9_spill] sm:$0xff]  ;;  %v10816_v10 = vld [vmem:[#allocation12_spill] sm:$0xff]  ;;  %v10900_v43 = vld [vmem:[#allocation130_spill] sm:$0xff] }
 0x450   :  { %v2172_v51 = vrot.slane %v10800_v29, 1  ;;  %v7752_v7 = vmax.f32 %v7637_v61, %v507_v54  ;;  %v2630_v25 = vsel %vm2164_vm7, %v2629_v34, %v2628_v33  ;;  %v7756_v2 = vsel %vm2170_vm9, %v2185_v45, %v2184_v49  ;;  %v10811_v34 = vld [vmem:[#allocation8_spill] sm:$0xff]  ;;  %v10819_v33 = vld [vmem:[#allocation15_spill] sm:$0xff] }
 0x451   :  { %v7706_v16 = vpop.permute.xlu0 %1918  ;;  %v7708_v53 = vpop.permute.xlu1 %2078  ;;  %10802 = vst [vmem:[#allocation332_spill] sm:$0xff] %v7756_v2  ;;  %v7759_v0 = vmax.f32 %v7668_v48, %v516_v32  ;;  %v7762_v8 = vmax.f32 %v524_v19, %v525_v59  ;;  %v7767_v47 = vsel %vm2173_vm10, %v2621_v30, %v2620_v37  ;;  %v7777_v48 = vmax.f32 %v533_v4, %v534_v55  ;;  %v10809_v32 = vld [vmem:[#allocation6_spill] sm:$0xff]  ;;  %v10810_v19 = vld [vmem:[#allocation7_spill] sm:$0xff]  ;;  %v10817_v4 = vld [vmem:[#allocation13_spill] sm:$0xff] }
 0x452   :  { %10791 = vst [vmem:[#allocation389_spill] sm:$0xff] %v7706_v16  ;;  %10792 = vst [vmem:[#allocation390_spill] sm:$0xff] %v7708_v53  ;;  %v7774_v54 = vsel %vm2173_vm10, %v2172_v51, %v2171_v28  ;;  %v10820_v49 = vld [vmem:[#allocation16_spill] sm:$0xff]  ;;  %v10821_v51 = vld [vmem:[#allocation17_spill] sm:$0xff]  ;;  %v2231_v29 = vrot.slane %v10837_v27, 7  ;;  %v3126_v16 = vlaneseq }
 0x453   :  { %2050 = vrot.lane.b32.xlu0 %v7553_v40, %s5392_s3  ;;  %1620 = vrot.lane.b32.xlu1 %v10795_v42, %s5395_s20  ;;  %10801 = vst [vmem:[#allocation77_spill] sm:$0xff] %v7752_v7  ;;  %10803 = vst [vmem:[#allocation5_spill] sm:$0xff] %v7759_v0  ;;  %v10824_v45 = vld [vmem:[#allocation20_spill] sm:$0xff]  ;;  %v10827_v59 = vld [vmem:[#allocation21_spill] sm:$0xff]  ;;  %v5396_v53 = vmov 1983009808  }
 0x454   :  { %10804 = vst [vmem:[#allocation392_spill] sm:$0xff] %v7762_v8  ;;  %10805 = vst [vmem:[#allocation393_spill] sm:$0xff] %v7767_v47  ;;  %v10828_v2 = vld [vmem:[#allocation22_spill] sm:$0xff]  ;;  %v10831_v8 = vld [vmem:[#allocation25_spill] sm:$0xff]  ;;  %v3124_v28 = vunpack.c.l.s4 %v5396_v53 }
 0x455   :  { %v7731_v31 = vpop.permute.xlu0 %1982  ;;  %v7733_v56 = vpop.permute.xlu1 %2142  ;;  %10808 = vst [vmem:[#allocation396_spill] sm:$0xff] %v7777_v48  ;;  %v10833_v7 = vld [vmem:[#allocation27_spill] sm:$0xff]  ;;  %v10834_v39 = vld [vmem:[#allocation28_spill] sm:$0xff]  ;;  %v10907_v0 = vld [vmem:[#allocation109_spill] sm:$0xff] }
 0x456   :  { %10798 = vst [vmem:[#allocation327_spill] sm:$0xff] %v7731_v31  ;;  %10799 = vst [vmem:[#allocation48_spill] sm:$0xff] %v7733_v56  ;;  %v10844_v31 = vld [vmem:[#allocation34_spill] sm:$0xff]  ;;  %v10846_v27 = vld [vmem:[#allocation52_spill] sm:$0xff]  ;;  %v3125_v52 = vunpack.c.0.s8 %v3124_v28 }
 0x457   :  { %2114 = vrot.lane.b32.xlu0 %v7553_v40, %s5395_s20  ;;  %1700 = vrot.lane.b32.xlu1 %v7696_v18, %s5381_s1  ;;  %v2632_v40 = vsel %vm2167_vm8, %v2631_v41, %v2630_v25  ;;  %v10815_v41 = vld [vmem:[#allocation11_spill] sm:$0xff]  ;;  %v2259_v25 = vrot.slane %v10838_v3, 7  ;;  %v2233_v50 = vrot.slane %v10846_v27, 6  ;;  %v10867_v28 = vld [vmem:[#allocation46_spill] sm:$0xff] }
 0x458   :  { %v2634_v46 = vsel %vm2170_vm9, %v2633_v5, %v2632_v40  ;;  %v10818_v5 = vld [vmem:[#allocation14_spill] sm:$0xff]  ;;  %v10847_v3 = vld [vmem:[#allocation59_spill] sm:$0xff] }
 0x459   :  { %v7769_v36 = vpop.permute.xlu0 %2046  ;;  %v7771_v61 = vpop.permute.xlu1 %1584  ;;  %v7783_v30 = vsel %vm2173_vm10, %v2635_v60, %v2634_v46  ;;  %v10822_v40 = vld [vmem:[#allocation18_spill] sm:$0xff]  ;;  %v2203_v60 = vrot.slane %v10836_v1, 7  ;;  %v10845_v1 = vld [vmem:[#allocation36_spill] sm:$0xff]  ;;  %v2399_v22 = vrot.slane %v10847_v3, 7  ;;  %v10850_v55 = vld [vmem:[#allocation31_spill] sm:$0xff]  ;;  %v7844_v3 = vsel %vm2155_vm4, %v2259_v25, %v10852_v20 }
 0x45a   :  { %10806 = vst [vmem:[#allocation394_spill] sm:$0xff] %v7769_v36  ;;  %10807 = vst [vmem:[#allocation395_spill] sm:$0xff] %v7771_v61  ;;  %v10843_v36 = vld [vmem:[#allocation32_spill] sm:$0xff]  ;;  %v2232_v53 = vsel %vm2155_vm4, %v2231_v29, %v10850_v55  ;;  %v10860_v29 = vld [vmem:[#allocation65_spill] sm:$0xff]  ;;  %v7860_v20 = vshrl.u32 %v3126_v16, 7 }
 0x45b   :  { %10812 = vst [vmem:[#allocation6_spill] sm:$0xff] %v7783_v30  ;;  %1588 = vrot.lane.b32.xlu0 %v10795_v42, %s5393_s0  ;;  %1764 = vrot.lane.b32.xlu1 %v7696_v18, %s5383_s11  ;;  %10853 = vst [vmem:[#allocation11_spill] sm:$0xff] %v7844_v3  ;;  %v10864_v25 = vld [vmem:[#allocation43_spill] sm:$0xff]  ;;  %v10909_v30 = vld [vmem:[#allocation121_spill] sm:$0xff] }
 0x45c   :  { %10862 = vst [vmem:[#allocation16_spill] sm:$0xff] %v7860_v20 }
 0x45d   :  { %v7801_v6 = vpop.permute.xlu0 %2110  ;;  %v7803_v58 = vpop.permute.xlu1 %1616 }
 0x45e   :  { %10825 = vst [vmem:[#allocation7_spill] sm:$0xff] %v7801_v6  ;;  %10826 = vst [vmem:[#allocation8_spill] sm:$0xff] %v7803_v58  ;;  %v10839_v58 = vld [vmem:[#allocation50_spill] sm:$0xff]  ;;  %v10840_v6 = vld [vmem:[#allocation51_spill] sm:$0xff] }
 0x45f   :  { %1652 = vrot.lane.b32.xlu0 %v10795_v42, %s5394_s19  ;;  %1828 = vrot.lane.b32.xlu1 %v7696_v18, %s5385_s13  ;;  %v2205_v46 = vrot.slane %v10839_v58, 6  ;;  %v2287_v37 = vrot.slane %v10840_v6, 7  ;;  %v10848_v58 = vld [vmem:[#allocation61_spill] sm:$0xff] }
 0x460   :  { %v2427_v13 = vrot.slane %v10848_v58, 7  ;;  %v10849_v6 = vld [vmem:[#allocation29_spill] sm:$0xff] }
 0x461   :  { %v7823_v61 = vpop.permute.xlu0 %1578  ;;  %v7825_v42 = vpop.permute.xlu1 %1648  ;;  %v2204_v56 = vsel %vm2155_vm4, %v2203_v60, %v10849_v6  ;;  %v7851_v44 = vsel %vm2155_vm4, %v2287_v37, %v10855_v57  ;;  %v2401_v60 = vrot.slane %v10857_v62, 6  ;;  %v2400_v57 = vsel %vm2155_vm4, %v2399_v22, %v10864_v25  ;;  %v10865_v37 = vld [vmem:[#allocation44_spill] sm:$0xff]  ;;  %v10870_v25 = vld [vmem:[#allocation87_spill] sm:$0xff] }
 0x462   :  { %10841 = vst [vmem:[#allocation9_spill] sm:$0xff] %v7823_v61  ;;  %10842 = vst [vmem:[#allocation10_spill] sm:$0xff] %v7825_v42  ;;  %v10851_v42 = vld [vmem:[#allocation63_spill] sm:$0xff]  ;;  %v5397_v61 = vmov 1934713408   ;;  %v7847_v58 = vsel %vm2158_vm5, %v2205_v46, %v2204_v56  ;;  %v7863_v56 = vsel %vm2158_vm5, %v2233_v50, %v2232_v53  ;;  %v2428_v62 = vsel %vm2155_vm4, %v2427_v13, %v10865_v37  ;;  %v10866_v46 = vld [vmem:[#allocation80_spill] sm:$0xff] }
 0x463   :  { %1732 = vrot.lane.b32.xlu0 %v7696_v18, %s5382_s10  ;;  %1892 = vrot.lane.b32.xlu1 %v7696_v18, %s5387_s15  ;;  %v2455_v24 = vrot.slane %v10851_v42, 7  ;;  %v3188_v27 = vunpack.c.l.s4 %v5397_v61  ;;  %10854 = vst [vmem:[#allocation12_spill] sm:$0xff] %v7847_v58  ;;  %10856 = vst [vmem:[#allocation13_spill] sm:$0xff] %v7851_v44  ;;  %v2429_v42 = vrot.slane %v10860_v29, 6  ;;  %v10861_v61 = vld [vmem:[#allocation67_spill] sm:$0xff]  ;;  %v2403_v58 = vrot.slane %v10866_v46, 5 }
 0x464   :  { %v2457_v15 = vrot.slane %v10861_v61, 6  ;;  %10863 = vst [vmem:[#allocation17_spill] sm:$0xff] %v7863_v56  ;;  %v10868_v29 = vld [vmem:[#allocation82_spill] sm:$0xff]  ;;  %v10869_v53 = vld [vmem:[#allocation84_spill] sm:$0xff]  ;;  %v2402_v22 = vsel %vm2158_vm5, %v2401_v60, %v2400_v57  ;;  %v2217_v13 = vrot.slane %v10870_v25, 7  ;;  %v10871_v37 = vld [vmem:[#allocation89_spill] sm:$0xff] }
 0x465   :  { %v7854_v6 = vpop.permute.xlu0 %1610  ;;  %v7856_v55 = vpop.permute.xlu1 %1696  ;;  %v2456_v16 = vsel %vm2155_vm4, %v2455_v24, %v10867_v28  ;;  %v2431_v50 = vrot.slane %v10868_v29, 5  ;;  %v2459_v61 = vrot.slane %v10869_v53, 5  ;;  %v3189_v56 = vunpack.c.0.s8 %v3188_v27  ;;  %v10872_v44 = vld [vmem:[#allocation91_spill] sm:$0xff]  ;;  %v10875_v28 = vld [vmem:[#allocation92_spill] sm:$0xff]  ;;  %v10877_v57 = vld [vmem:[#allocation93_spill] sm:$0xff] }
 0x466   :  { %10858 = vst [vmem:[#allocation14_spill] sm:$0xff] %v7854_v6  ;;  %10859 = vst [vmem:[#allocation15_spill] sm:$0xff] %v7856_v55  ;;  %v2245_v46 = vrot.slane %v10871_v37, 7  ;;  %v2273_v3 = vrot.slane %v10872_v44, 7  ;;  %v2430_v14 = vsel %vm2158_vm5, %v2429_v42, %v2428_v62  ;;  %v2458_v24 = vsel %vm2158_vm5, %v2457_v15, %v2456_v16  ;;  %v10878_v25 = vld [vmem:[#allocation94_spill] sm:$0xff]  ;;  %v10879_v44 = vld [vmem:[#allocation97_spill] sm:$0xff] }
 0x467   :  { %1796 = vrot.lane.b32.xlu0 %v7696_v18, %s5384_s12  ;;  %1956 = vrot.lane.b32.xlu1 %v7696_v18, %s5389_s4  ;;  %v2301_v29 = vrot.slane %v10875_v28, 7  ;;  %v7890_v27 = vsub.s32 %v3125_v52, %v7860_v20  ;;  %v2404_v60 = vsel %vm2161_vm6, %v2403_v58, %v2402_v22  ;;  %v2189_v53 = vrot.slane %v10877_v57, 7  ;;  %v10880_v42 = vld [vmem:[#allocation115_spill] sm:$0xff]  ;;  %v10882_v16 = vld [vmem:[#allocation72_spill] sm:$0xff]  ;;  %v10883_v28 = vld [vmem:[#allocation74_spill] sm:$0xff] }
 0x468   :  { %v2329_v37 = vrot.slane %v10878_v25, 7  ;;  %v2357_v11 = vrot.slane %v10879_v44, 7  ;;  %v7901_v15 = vsel %vm2161_vm6, %v2431_v50, %v2430_v14  ;;  %v7904_v52 = vsel %vm2161_vm6, %v2459_v61, %v2458_v24  ;;  %v10884_v25 = vld [vmem:[#allocation76_spill] sm:$0xff]  ;;  %v10888_v24 = vld [vmem:[#allocation79_spill] sm:$0xff] }
 0x469   :  { %v7882_v55 = vpop.permute.xlu0 %1642  ;;  %v7884_v6 = vpop.permute.xlu1 %1728  ;;  %10876 = vst [vmem:[#allocation20_spill] sm:$0xff] %v7890_v27  ;;  %v2219_v58 = vrot.slane %v10880_v42, 6  ;;  %v7908_v62 = vsub.s32 %v3189_v56, %v7860_v20  ;;  %v2218_v22 = vsel %vm2155_vm4, %v2217_v13, %v10882_v16  ;;  %v2246_v57 = vsel %vm2155_vm4, %v2245_v46, %v10883_v28  ;;  %v10889_v56 = vld [vmem:[#allocation99_spill] sm:$0xff]  ;;  %v10891_v13 = vld [vmem:[#allocation140_spill] sm:$0xff]  ;;  %v10893_v28 = vld [vmem:[#allocation81_spill] sm:$0xff] }
 0x46a   :  { %10873 = vst [vmem:[#allocation18_spill] sm:$0xff] %v7882_v55  ;;  %10874 = vst [vmem:[#allocation19_spill] sm:$0xff] %v7884_v6  ;;  %v2274_v44 = vsel %vm2155_vm4, %v2273_v3, %v10884_v25  ;;  %v10885_v6 = vld [vmem:[#allocation132_spill] sm:$0xff]  ;;  %v2302_v42 = vsel %vm2155_vm4, %v2301_v29, %v10888_v24  ;;  %v2385_v20 = vrot.slane %v10889_v56, 7  ;;  %v10890_v55 = vld [vmem:[#allocation101_spill] sm:$0xff]  ;;  %v2223_v16 = vrot.slane %v10891_v13, 4 }
 0x46b   :  { %1860 = vrot.lane.b32.xlu0 %v7696_v18, %s5386_s14  ;;  %2020 = vrot.lane.b32.xlu1 %v7696_v18, %s5391_s18  ;;  %10881 = vst [vmem:[#allocation21_spill] sm:$0xff] %v7908_v62  ;;  %v2221_v14 = vrot.slane %v10885_v6, 5  ;;  %v2413_v47 = vrot.slane %v10890_v55, 7  ;;  %v2190_v46 = vsel %vm2155_vm4, %v2189_v53, %v10892_v63  ;;  %v2330_v3 = vsel %vm2155_vm4, %v2329_v37, %v10893_v28  ;;  %v10894_v6 = vld [vmem:[#allocation83_spill] sm:$0xff]  ;;  %v10897_v24 = vld [vmem:[#allocation108_spill] sm:$0xff]  ;;  %v10898_v53 = vld [vmem:[#allocation134_spill] sm:$0xff] }
 0x46c   :  { %v2358_v25 = vsel %vm2155_vm4, %v2357_v11, %v10894_v6  ;;  %v10896_v55 = vld [vmem:[#allocation103_spill] sm:$0xff]  ;;  %v2191_v56 = vrot.slane %v10897_v24, 6  ;;  %v2220_v63 = vsel %vm2158_vm5, %v2219_v58, %v2218_v22  ;;  %v2249_v13 = vrot.slane %v10898_v53, 5  ;;  %v10899_v37 = vld [vmem:[#allocation105_spill] sm:$0xff]  ;;  %v10901_v6 = vld [vmem:[#allocation144_spill] sm:$0xff] }
 0x46d   :  { %v7917_v50 = vpop.permute.xlu0 %1690  ;;  %v7919_v61 = vpop.permute.xlu1 %1760  ;;  %v2441_v29 = vrot.slane %v10896_v55, 7  ;;  %v2469_v28 = vrot.slane %v10899_v37, 7  ;;  %v2193_v11 = vrot.slane %v10900_v43, 5  ;;  %v2251_v17 = vrot.slane %v10901_v6, 4  ;;  %v10904_v62 = vld [vmem:[#allocation85_spill] sm:$0xff]  ;;  %v10905_v24 = vld [vmem:[#allocation86_spill] sm:$0xff] }
 0x46e   :  { %10886 = vst [vmem:[#allocation22_spill] sm:$0xff] %v7917_v50  ;;  %10887 = vst [vmem:[#allocation25_spill] sm:$0xff] %v7919_v61  ;;  %v10895_v50 = vld [vmem:[#allocation117_spill] sm:$0xff]  ;;  %v2386_v55 = vsel %vm2155_vm4, %v2385_v20, %v10904_v62  ;;  %v2414_v58 = vsel %vm2155_vm4, %v2413_v47, %v10905_v24  ;;  %v10906_v22 = vld [vmem:[#allocation136_spill] sm:$0xff]  ;;  %v2405_v43 = vrot.slane %v10907_v0, 4  ;;  %v2192_v62 = vsel %vm2158_vm5, %v2191_v56, %v2190_v46 }
 0x46f   :  { %v2247_v61 = vrot.slane %v10895_v50, 6  ;;  %1924 = vrot.lane.b32.xlu0 %v7696_v18, %s5388_s16  ;;  %2084 = vrot.lane.b32.xlu1 %v7696_v18, %s5393_s0  ;;  %v2222_v50 = vsel %vm2161_vm6, %v2221_v14, %v2220_v63  ;;  %v2195_v53 = vrot.slane %v10906_v22, 4  ;;  %v10908_v63 = vld [vmem:[#allocation119_spill] sm:$0xff]  ;;  %v10910_v20 = vld [vmem:[#allocation88_spill] sm:$0xff]  ;;  %v10913_v24 = vrot.slane %v10810_v19, 3  ;;  %v10914_v46 = vld [vmem:[#allocation125_spill] sm:$0xff] }
 0x470   :  { %v2224_v37 = vsel %vm2164_vm7, %v2223_v16, %v2222_v50  ;;  %v2275_v6 = vrot.slane %v10908_v63, 6  ;;  %v2442_v47 = vsel %vm2155_vm4, %v2441_v29, %v10910_v20  ;;  %v10911_v16 = vld [vmem:[#allocation123_spill] sm:$0xff]  ;;  %v2359_v56 = vrot.slane %v10914_v46, 6  ;;  %v10924_v46 = vld [vmem:[#allocation141_spill] sm:$0xff] }
 0x471   :  { %v7945_v38 = vpop.permute.xlu0 %1722  ;;  %v7947_v48 = vpop.permute.xlu1 %1792  ;;  %v2248_v14 = vsel %vm2158_vm5, %v2247_v61, %v2246_v57  ;;  %v2331_v50 = vrot.slane %v10911_v16, 6  ;;  %v10912_v57 = vld [vmem:[#allocation90_spill] sm:$0xff]  ;;  %v2226_v22 = vsel %vm2167_vm8, %v10913_v24, %v2224_v37  ;;  %v10915_v20 = vld [vmem:[#allocation127_spill] sm:$0xff]  ;;  %v7987_v19 = vsel %vm2164_vm7, %v2405_v43, %v2404_v60 }
 0x472   :  { %10902 = vst [vmem:[#allocation27_spill] sm:$0xff] %v7945_v38  ;;  %10903 = vst [vmem:[#allocation28_spill] sm:$0xff] %v7947_v48  ;;  %v2303_v38 = vrot.slane %v10909_v30, 6  ;;  %v2250_v0 = vsel %vm2161_vm6, %v2249_v13, %v2248_v14  ;;  %v7970_v61 = vsel %vm2155_vm4, %v2469_v28, %v10912_v57  ;;  %v2194_v30 = vsel %vm2161_vm6, %v2193_v11, %v2192_v62  ;;  %v10916_v14 = vld [vmem:[#allocation129_spill] sm:$0xff]  ;;  %v10917_v57 = vld [vmem:[#allocation38_spill] sm:$0xff] }
 0x473   :  { %1988 = vrot.lane.b32.xlu0 %v7696_v18, %s5390_s17  ;;  %2148 = vrot.lane.b32.xlu1 %v7696_v18, %s5394_s19  ;;  %v2252_v63 = vsel %vm2164_vm7, %v2251_v17, %v2250_v0  ;;  %v2387_v13 = vrot.slane %v10915_v20, 6  ;;  %v2415_v16 = vrot.slane %v10916_v14, 6  ;;  %v2196_v28 = vsel %vm2164_vm7, %v2195_v53, %v2194_v30  ;;  %10918 = vst [vmem:[#allocation30_spill] sm:$0xff] %v7987_v19  ;;  %v10919_v0 = vld [vmem:[#allocation139_spill] sm:$0xff]  ;;  %v10925_v14 = vld [vmem:[#allocation156_spill] sm:$0xff]  ;;  %v11042_v19 = vld [vmem:[#allocation214_spill] sm:$0xff] }
 0x474   :  { %v2397_v11 = vrot.slane %v10917_v57, 1  ;;  %v2276_v37 = vsel %vm2158_vm5, %v2275_v6, %v2274_v44  ;;  %v2304_v17 = vsel %vm2158_vm5, %v2303_v38, %v2302_v42  ;;  %v2332_v62 = vsel %vm2158_vm5, %v2331_v50, %v2330_v3  ;;  %v10922_v43 = vld [vmem:[#allocation131_spill] sm:$0xff] }
 0x475   :  { %v7977_v48 = vpop.permute.xlu0 %1754  ;;  %v7979_v29 = vpop.permute.xlu1 %1824  ;;  %v2333_v24 = vrot.slane %v10919_v0, 5  ;;  %v10920_v53 = vrot.slane %v10815_v41, 2  ;;  %v10921_v60 = vrot.slane %v10811_v34, 3  ;;  %v2443_v38 = vrot.slane %v10922_v43, 6  ;;  %v10929_v43 = vld [vmem:[#allocation137_spill] sm:$0xff] }
 0x476   :  { %v10923_v42 = vrot.slane %v10809_v32, 3  ;;  %v2361_v20 = vrot.slane %v10924_v46, 5  ;;  %v2335_v3 = vrot.slane %v10925_v14, 4  ;;  %v2360_v41 = vsel %vm2158_vm5, %v2359_v56, %v2358_v25  ;;  %v10934_v14 = vld [vmem:[#allocation152_spill] sm:$0xff] }
 0x477   :  { %2052 = vrot.lane.b32.xlu0 %v7696_v18, %s5392_s3  ;;  %1622 = vrot.lane.b32.xlu1 %v10796_v26, %s5395_s20  ;;  %v2228_v30 = vsel %vm2170_vm9, %v10920_v53, %v2226_v22  ;;  %v2254_v44 = vsel %vm2167_vm8, %v10921_v60, %v2252_v63  ;;  %v2388_v34 = vsel %vm2158_vm5, %v2387_v13, %v2386_v55  ;;  %v10927_v63 = vld [vmem:[#allocation160_spill] sm:$0xff]  ;;  %v10928_v60 = vld [vmem:[#allocation135_spill] sm:$0xff]  ;;  %v10931_v25 = vrot.slane %v10833_v7, 1 }
 0x478   :  { %v2198_v6 = vsel %vm2167_vm8, %v10923_v42, %v2196_v28  ;;  %v2416_v22 = vsel %vm2158_vm5, %v2415_v16, %v2414_v58  ;;  %v2363_v53 = vrot.slane %v10927_v63, 4  ;;  %v2277_v32 = vrot.slane %v10928_v60, 5  ;;  %v10933_v16 = vld [vmem:[#allocation148_spill] sm:$0xff] }
 0x479   :  { %v8009_v50 = vpop.permute.xlu0 %1786  ;;  %v8011_v0 = vpop.permute.xlu1 %1856  ;;  %v2305_v28 = vrot.slane %v10929_v43, 5  ;;  %v10930_v42 = vrot.slane %v10817_v4, 2  ;;  %v2230_v55 = vsel %vm2173_vm10, %v10931_v25, %v2228_v30  ;;  %v10932_v58 = vrot.slane %v10813_v35, 2 }
 0x47a   :  { %10926 = vst [vmem:[#allocation45_spill] sm:$0xff] %v8011_v0  ;;  %v2334_v13 = vsel %vm2161_vm6, %v2333_v24, %v2332_v62  ;;  %v2279_v4 = vrot.slane %v10933_v16, 4  ;;  %v2444_v63 = vsel %vm2158_vm5, %v2443_v38, %v2442_v47  ;;  %v2362_v43 = vsel %vm2161_vm6, %v2361_v20, %v2360_v41  ;;  %v10938_v38 = vld [vmem:[#allocation111_spill] sm:$0xff] }
 0x47b   :  { %v2256_v46 = vsel %vm2170_vm9, %v10930_v42, %v2254_v44  ;;  %2116 = vrot.lane.b32.xlu0 %v7696_v18, %s5395_s20  ;;  %1702 = vrot.lane.b32.xlu1 %v7701_v23, %s5381_s1  ;;  %v2200_v56 = vsel %vm2170_vm9, %v10932_v58, %v2198_v6  ;;  %v2307_v44 = vrot.slane %v10934_v14, 4  ;;  %v10935_v18 = vld [vmem:[#allocation133_spill] sm:$0xff]  ;;  %v2336_v7 = vsel %vm2164_vm7, %v2335_v3, %v2334_v13 }
 0x47c   :  { %v2471_v60 = vrot.slane %v10935_v18, 6  ;;  %v2364_v35 = vsel %vm2164_vm7, %v2363_v53, %v2362_v43  ;;  %v10937_v62 = vrot.slane %v10834_v39, 1  ;;  %v3121_v6 = vcombine.low %v7774_v54, %v2230_v55  ;;  %v10940_v53 = vld [vmem:[#allocation143_spill] sm:$0xff] }
 0x47d   :  { %v8039_v42 = vpop.permute.xlu0 %1818  ;;  %v8041_v30 = vpop.permute.xlu1 %1888  ;;  %v3122_v47 = vcombine.high %v7774_v54, %v2230_v55  ;;  %v2433_v25 = vrot.slane %v10938_v38, 4  ;;  %v2278_v20 = vsel %vm2161_vm6, %v2277_v32, %v2276_v37  ;;  %v2306_v3 = vsel %vm2161_vm6, %v2305_v28, %v2304_v17  ;;  %v10942_v32 = vld [vmem:[#allocation145_spill] sm:$0xff] }
 0x47e   :  { %10936 = vst [vmem:[#allocation47_spill] sm:$0xff] %v8041_v30  ;;  %v2258_v24 = vsel %vm2173_vm10, %v10937_v62, %v2256_v46  ;;  %v10939_v39 = vrot.slane %v10831_v8, 1  ;;  %v2389_v46 = vrot.slane %v10940_v53, 5  ;;  %v2280_v54 = vsel %vm2164_vm7, %v2279_v4, %v2278_v20 }
 0x47f   :  { %1590 = vrot.lane.b32.xlu0 %v10796_v26, %s5393_s0  ;;  %1766 = vrot.lane.b32.xlu1 %v7701_v23, %s5383_s11  ;;  %v2308_v55 = vsel %vm2164_vm7, %v2307_v44, %v2306_v3  ;;  %v10941_v37 = vrot.slane %v10818_v5, 3  ;;  %v2417_v28 = vrot.slane %v10942_v32, 5  ;;  %v10943_v58 = vrot.slane %v10820_v49, 3  ;;  %v10945_v44 = vld [vmem:[#allocation147_spill] sm:$0xff] }
 0x480   :  { %v2202_v41 = vsel %vm2173_vm10, %v10939_v39, %v2200_v56  ;;  %v2472_v4 = vsel %vm2158_vm5, %v2471_v60, %v7970_v61  ;;  %v2445_v18 = vrot.slane %v10945_v44, 5  ;;  %v8077_v5 = vrot.slane %v3121_v6, %v7890_v27  ;;  %v10953_v39 = vld [vmem:[#allocation172_spill] sm:$0xff] }
 0x481   :  { %v2338_v17 = vsel %vm2167_vm8, %v10941_v37, %v2336_v7  ;;  %v2366_v13 = vsel %vm2167_vm8, %v10943_v58, %v2364_v35  ;;  %v8069_v16 = vpop.permute.xlu0 %1850  ;;  %v8071_v8 = vpop.permute.xlu1 %1920  ;;  %v3137_v56 = vcombine.low %v2202_v41, %v2258_v24  ;;  %v3138_v14 = vcombine.high %v2202_v41, %v2258_v24  ;;  %v10948_v35 = vld [vmem:[#allocation149_spill] sm:$0xff]  ;;  %v10954_v41 = vld [vmem:[#allocation176_spill] sm:$0xff] }
 0x482   :  { %10944 = vst [vmem:[#allocation49_spill] sm:$0xff] %v8071_v8  ;;  %v8080_v43 = vrot.slane %v3122_v47, %v7890_v27  ;;  %v10947_v49 = vrot.slane %v10814_v9, 3  ;;  %v2473_v62 = vrot.slane %v10948_v35, 5  ;;  %v10949_v20 = vrot.slane %v10816_v10, 3  ;;  %v10952_v47 = vld [vmem:[#allocation168_spill] sm:$0xff] }
 0x483   :  { %v10950_v61 = vrot.slane %v10823_v12, 2  ;;  %1654 = vrot.lane.b32.xlu0 %v10796_v26, %s5394_s19  ;;  %1830 = vrot.lane.b32.xlu1 %v7701_v23, %s5385_s13  ;;  %v10951_v9 = vrot.slane %v10827_v59, 2  ;;  %v2419_v3 = vrot.slane %v10952_v47, 4  ;;  %v2447_v10 = vrot.slane %v10953_v39, 4 }
 0x484   :  { %10946 = vst [vmem:[#allocation50_spill] sm:$0xff] %v8080_v43  ;;  %v2282_v7 = vsel %vm2167_vm8, %v10947_v49, %v2280_v54  ;;  %v2310_v24 = vsel %vm2167_vm8, %v10949_v20, %v2308_v55  ;;  %v2475_v53 = vrot.slane %v10954_v41, 4  ;;  %v2390_v12 = vsel %vm2161_vm6, %v2389_v46, %v2388_v34  ;;  %v10968_v41 = vld [vmem:[#allocation40_spill] sm:$0xff] }
 0x485   :  { %v2340_v60 = vsel %vm2170_vm9, %v10950_v61, %v2338_v17  ;;  %v2368_v6 = vsel %vm2170_vm9, %v10951_v9, %v2366_v13  ;;  %v2418_v54 = vsel %vm2161_vm6, %v2417_v28, %v2416_v22  ;;  %v8104_v55 = vpop.permute.xlu0 %1882  ;;  %v8106_v26 = vpop.permute.xlu1 %1952  ;;  %v3145_v37 = vrot.slane %v3137_v56, %v7890_v27  ;;  %v10959_v22 = vld [vmem:[#allocation164_spill] sm:$0xff]  ;;  %v10960_v28 = vld [vmem:[#allocation113_spill] sm:$0xff] }
 0x486   :  { %10955 = vst [vmem:[#allocation51_spill] sm:$0xff] %v8106_v26  ;;  %v8110_v59 = vrot.slane %v3138_v14, %v7890_v27  ;;  %v2446_v17 = vsel %vm2161_vm6, %v2445_v18, %v2444_v63  ;;  %v10957_v32 = vrot.slane %v10819_v33, 2  ;;  %v10958_v13 = vrot.slane %v10821_v51, 2  ;;  %v11048_v43 = vld [vmem:[#allocation220_spill] sm:$0xff]  ;;  %v11067_v26 = vld [vmem:[#allocation234_spill] sm:$0xff] }
 0x487   :  { %v2391_v46 = vrot.slane %v10959_v22, 4  ;;  %v2461_v44 = vrot.slane %v10960_v28, 4  ;;  %v2474_v49 = vsel %vm2161_vm6, %v2473_v62, %v2472_v4  ;;  %1734 = vrot.lane.b32.xlu0 %v7701_v23, %s5382_s10  ;;  %1894 = vrot.lane.b32.xlu1 %v7701_v23, %s5387_s15  ;;  %v10961_v33 = vrot.slane %v10844_v31, 1  ;;  %v10964_v62 = vld [vmem:[#allocation151_spill] sm:$0xff] }
 0x488   :  { %10956 = vst [vmem:[#allocation32_spill] sm:$0xff] %v8110_v59  ;;  %v2284_v58 = vsel %vm2170_vm9, %v10957_v32, %v2282_v7  ;;  %v2312_v34 = vsel %vm2170_vm9, %v10958_v13, %v2310_v24  ;;  %v10962_v51 = vrot.slane %v10845_v1, 1  ;;  %v2420_v14 = vsel %vm2164_vm7, %v2419_v3, %v2418_v54  ;;  %v10963_v7 = vld [vmem:[#allocation178_spill] sm:$0xff]  ;;  %v11047_v59 = vld [vmem:[#allocation219_spill] sm:$0xff] }
 0x489   :  { %v2342_v63 = vsel %vm2173_vm10, %v10961_v33, %v2340_v60  ;;  %v2448_v18 = vsel %vm2164_vm7, %v2447_v10, %v2446_v17  ;;  %v2476_v4 = vsel %vm2164_vm7, %v2475_v53, %v2474_v49  ;;  %v2479_v35 = vrot.slane %v10963_v7, 2  ;;  %v8137_v24 = vpop.permute.xlu0 %1914  ;;  %v8139_v61 = vpop.permute.xlu1 %1984  ;;  %v10979_v33 = vld [vmem:[#allocation26_spill] sm:$0xff] }
 0x48a   :  { %v2370_v56 = vsel %vm2173_vm10, %v10962_v51, %v2368_v6  ;;  %v2477_v20 = vrot.slane %v10964_v62, 3  ;;  %10965 = vst [vmem:[#allocation34_spill] sm:$0xff] %v8139_v61  ;;  %v10966_v31 = vrot.slane %v10835_v21, 1  ;;  %v10967_v60 = vrot.slane %v10843_v36, 1  ;;  %v11065_v61 = vld [vmem:[#allocation232_spill] sm:$0xff] }
 0x48b   :  { %v3185_v6 = vcombine.low %v8077_v5, %v3145_v37  ;;  %v2392_v47 = vsel %vm2164_vm7, %v2391_v46, %v2390_v12  ;;  %v3186_v10 = vcombine.high %v8077_v5, %v3145_v37  ;;  %v2425_v53 = vrot.slane %v10968_v41, 1  ;;  %1798 = vrot.lane.b32.xlu0 %v7701_v23, %s5384_s12  ;;  %1958 = vrot.lane.b32.xlu1 %v7701_v23, %s5389_s4 }
 0x48c   :  { %v2286_v1 = vsel %vm2173_vm10, %v10966_v31, %v2284_v58  ;;  %v2314_v9 = vsel %vm2173_vm10, %v10967_v60, %v2312_v34  ;;  %v10969_v54 = vrot.slane %v10824_v45, 3  ;;  %v10970_v17 = vrot.slane %v10828_v2, 3  ;;  %v10973_v58 = vld [vmem:[#allocation153_spill] sm:$0xff]  ;;  %v10987_v31 = vld [vmem:[#allocation190_spill] sm:$0xff] }
 0x48d   :  { %v3153_v3 = vcombine.low %v2286_v1, %v2342_v63  ;;  %v3169_v39 = vcombine.low %v2314_v9, %v2370_v56  ;;  %v2478_v32 = vsel %vm2167_vm8, %v2477_v20, %v2476_v4  ;;  %v8166_v5 = vsel %vm2164_vm7, %v2433_v25, %v7901_v15  ;;  %v8177_v46 = vpop.permute.xlu0 %1946  ;;  %v8179_v38 = vpop.permute.xlu1 %2016  ;;  %v10977_v25 = vld [vmem:[#allocation24_spill] sm:$0xff] }
 0x48e   :  { %v2422_v21 = vsel %vm2167_vm8, %v10969_v54, %v2420_v14  ;;  %v2450_v36 = vsel %vm2167_vm8, %v10970_v17, %v2448_v18  ;;  %10971 = vst [vmem:[#allocation36_spill] sm:$0xff] %v8166_v5  ;;  %v2480_v45 = vsel %vm2170_vm9, %v2479_v35, %v2478_v32  ;;  %v3154_v12 = vcombine.high %v2286_v1, %v2342_v63  ;;  %v10985_v35 = vld [vmem:[#allocation23_spill] sm:$0xff] }
 0x48f   :  { %v3170_v2 = vcombine.high %v2314_v9, %v2370_v56  ;;  %v8171_v37 = vsel %vm2164_vm7, %v2461_v44, %v7904_v52  ;;  %v2481_v13 = vrot.slane %v10973_v58, 1  ;;  %v10974_v34 = vrot.slane %v10822_v40, 3  ;;  %10975 = vst [vmem:[#allocation59_spill] sm:$0xff] %v8177_v46  ;;  %10976 = vst [vmem:[#allocation61_spill] sm:$0xff] %v8179_v38  ;;  %v10981_v40 = vld [vmem:[#allocation21_spill] sm:$0xff]  ;;  %v10983_v56 = vld [vmem:[#allocation42_spill] sm:$0xff]  ;;  %1862 = vrot.lane.b32.xlu0 %v7701_v23, %s5386_s14 }
 0x490   :  { %10972 = vst [vmem:[#allocation52_spill] sm:$0xff] %v8171_v37  ;;  %v10978_v28 = vrot.slane %v10977_v25, 2  ;;  %v10980_v52 = vrot.slane %v10979_v33, 2  ;;  %v3177_v63 = vrot.slane %v3169_v39, %v7890_v27  ;;  %v8191_v51 = vrot.slane %v3185_v6, %v10981_v40  ;;  %2022 = vrot.lane.b32.xlu1 %v7701_v23, %s5391_s18  ;;  %v11043_v5 = vld [vmem:[#allocation215_spill] sm:$0xff]  ;;  %v11044_v37 = vld [vmem:[#allocation370_spill] sm:$0xff]  ;;  %v11083_v46 = vld [vmem:[#allocation256_spill] sm:$0xff] }
 0x491   :  { %v2394_v22 = vsel %vm2167_vm8, %v10974_v34, %v2392_v47  ;;  %v2453_v14 = vrot.slane %v10983_v56, 1  ;;  %v2482_v18 = vsel %vm2173_vm10, %v2481_v13, %v2480_v45  ;;  %v3161_v4 = vrot.slane %v3153_v3, %v7890_v27  ;;  %v10990_v47 = vld [vmem:[#allocation183_spill] sm:$0xff]  ;;  %v10991_v3 = vld [vmem:[#allocation198_spill] sm:$0xff]  ;;  %v8218_v54 = vpop.permute.xlu1 %2048  ;;  %v10999_v56 = vld [vmem:[#allocation200_spill] sm:$0xff] }
 0x492   :  { %v2424_v49 = vsel %vm2170_vm9, %v10978_v28, %v2422_v21  ;;  %v2452_v44 = vsel %vm2170_vm9, %v10980_v52, %v2450_v36  ;;  %10982 = vst [vmem:[#allocation29_spill] sm:$0xff] %v8191_v51  ;;  %v8201_v7 = vrot.slane %v3186_v10, %v10981_v40  ;;  %v10986_v62 = vrot.slane %v10985_v35, 2  ;;  %v8216_v10 = vpop.permute.xlu0 %1978  ;;  %10993 = vst [vmem:[#allocation64_spill] sm:$0xff] %v8218_v54  ;;  %v10994_v36 = vld [vmem:[#allocation191_spill] sm:$0xff]  ;;  %v10997_v28 = vld [vmem:[#allocation196_spill] sm:$0xff] }
 0x493   :  { %v2499_v1 = vrot.slane %v10987_v31, 6  ;;  %v8208_v60 = vrot.slane %v3154_v12, %v7890_v27  ;;  %v8211_v9 = vrot.slane %v3170_v2, %v7890_v27  ;;  %v2426_v6 = vsel %vm2173_vm10, %v2425_v53, %v2424_v49  ;;  %10992 = vst [vmem:[#allocation35_spill] sm:$0xff] %v8216_v10  ;;  %v10995_v2 = vld [vmem:[#allocation188_spill] sm:$0xff]  ;;  %1926 = vrot.lane.b32.xlu0 %v7701_v23, %s5388_s16  ;;  %v10998_v52 = vld [vmem:[#allocation185_spill] sm:$0xff]  ;;  %v11064_v38 = vld [vmem:[#allocation231_spill] sm:$0xff] }
 0x494   :  { %10984 = vst [vmem:[#allocation31_spill] sm:$0xff] %v8201_v7  ;;  %v2396_v20 = vsel %vm2170_vm9, %v10986_v62, %v2394_v22  ;;  %v2497_v39 = vrot.slane %v10990_v47, 7  ;;  %v2513_v41 = vrot.slane %v10991_v3, 6  ;;  %v2454_v21 = vsel %vm2173_vm10, %v2453_v14, %v2452_v44  ;;  %2086 = vrot.lane.b32.xlu1 %v7701_v23, %s5393_s0  ;;  %v10996_v22 = vld [vmem:[#allocation192_spill] sm:$0xff]  ;;  %v11006_v3 = vld [vmem:[#allocation194_spill] sm:$0xff] }
 0x495   :  { %10988 = vst [vmem:[#allocation63_spill] sm:$0xff] %v8208_v60  ;;  %10989 = vst [vmem:[#allocation33_spill] sm:$0xff] %v8211_v9  ;;  %v3273_v17 = vcombine.low %v2426_v6, %v2482_v18  ;;  %v2511_v32 = vrot.slane %v10994_v36, 7  ;;  %v3217_v45 = vcombine.low %v3161_v4, %v3177_v63  ;;  %v3218_v12 = vcombine.high %v3161_v4, %v3177_v63  ;;  %v8240_v4 = vpop.permute.xlu1 %2080  ;;  %v11007_v36 = vld [vmem:[#allocation187_spill] sm:$0xff]  ;;  %v11050_v7 = vld [vmem:[#allocation222_spill] sm:$0xff] }
 0x496   :  { %v3274_v58 = vcombine.high %v2426_v6, %v2482_v18  ;;  %v2498_v13 = vsel %vm2155_vm4, %v2497_v39, %v10995_v2  ;;  %v2398_v53 = vsel %vm2173_vm10, %v2397_v11, %v2396_v20  ;;  %v2503_v25 = vrot.slane %v10996_v22, 4  ;;  %v8238_v18 = vpop.permute.xlu0 %2010  ;;  %11001 = vst [vmem:[#allocation67_spill] sm:$0xff] %v8240_v4  ;;  %v11002_v11 = vld [vmem:[#allocation193_spill] sm:$0xff]  ;;  %v11008_v2 = vld [vmem:[#allocation202_spill] sm:$0xff]  ;;  %v11058_v4 = vld [vmem:[#allocation227_spill] sm:$0xff] }
 0x497   :  { %v2500_v34 = vsel %vm2158_vm5, %v2499_v1, %v2498_v13  ;;  %v2512_v49 = vsel %vm2155_vm4, %v2511_v32, %v10997_v28  ;;  %v3257_v33 = vcombine.low %v2398_v53, %v2454_v21  ;;  %v2501_v44 = vrot.slane %v10998_v52, 5  ;;  %11000 = vst [vmem:[#allocation65_spill] sm:$0xff] %v8238_v18  ;;  %1990 = vrot.lane.b32.xlu0 %v7701_v23, %s5390_s17  ;;  %v11015_v52 = vld [vmem:[#allocation175_spill] sm:$0xff]  ;;  %v11059_v54 = vld [vmem:[#allocation228_spill] sm:$0xff]  ;;  %v11078_v18 = vld [vmem:[#allocation241_spill] sm:$0xff] }
 0x498   :  { %v2514_v63 = vsel %vm2158_vm5, %v2513_v41, %v2512_v49  ;;  %v2517_v14 = vrot.slane %v10999_v56, 4  ;;  %v3258_v57 = vcombine.high %v2398_v53, %v2454_v21  ;;  %v2515_v35 = vrot.slane %v11002_v11, 5  ;;  %2150 = vrot.lane.b32.xlu1 %v7701_v23, %s5394_s19  ;;  %v11016_v56 = vld [vmem:[#allocation367_spill] sm:$0xff] }
 0x499   :  { %v3281_v62 = vrot.slane %v3273_v17, %v7890_v27  ;;  %v8245_v20 = vrot.slane %v3217_v45, %v10981_v40  ;;  %v3233_v31 = vcombine.low %v8208_v60, %v8211_v9  ;;  %v2502_v1 = vsel %vm2161_vm6, %v2501_v44, %v2500_v34  ;;  %v11012_v34 = vld [vmem:[#allocation182_spill] sm:$0xff]  ;;  %v11037_v60 = vld [vmem:[#allocation209_spill] sm:$0xff] }
 0x49a   :  { %v8255_v6 = vrot.slane %v3218_v12, %v10981_v40  ;;  %v8258_v47 = vrot.slane %v3274_v58, %v7890_v27  ;;  %v2504_v39 = vsel %vm2164_vm7, %v2503_v25, %v2502_v1  ;;  %v2507_v41 = vrot.slane %v11006_v3, 2  ;;  %v8267_v53 = vpop.permute.xlu0 %2042  ;;  %v8269_v12 = vpop.permute.xlu1 %2112  ;;  %v11013_v25 = vld [vmem:[#allocation195_spill] sm:$0xff]  ;;  %v11038_v9 = vld [vmem:[#allocation210_spill] sm:$0xff] }
 0x49b   :  { %11003 = vst [vmem:[#allocation43_spill] sm:$0xff] %v8245_v20  ;;  %v2516_v21 = vsel %vm2161_vm6, %v2515_v35, %v2514_v63  ;;  %v3265_v17 = vrot.slane %v3257_v33, %v7890_v27  ;;  %v2505_v32 = vrot.slane %v11007_v36, 3  ;;  %v2521_v13 = vrot.slane %v11008_v2, 2  ;;  %11009 = vst [vmem:[#allocation46_spill] sm:$0xff] %v8267_v53  ;;  %2054 = vrot.lane.b32.xlu0 %v7701_v23, %s5392_s3  ;;  %v11022_v2 = vld [vmem:[#allocation197_spill] sm:$0xff] }
 0x49c   :  { %11004 = vst [vmem:[#allocation44_spill] sm:$0xff] %v8255_v6  ;;  %11005 = vst [vmem:[#allocation80_spill] sm:$0xff] %v8258_v47  ;;  %v2518_v45 = vsel %vm2164_vm7, %v2517_v14, %v2516_v21  ;;  %v8272_v58 = vrot.slane %v3258_v57, %v7890_v27  ;;  %v2485_v22 = vrot.slane %v11012_v34, 6  ;;  %v2519_v28 = vrot.slane %v11013_v25, 3  ;;  %4214 = vbcast.lane.b32.xlu1 %v11016_v56, 264  ;;  %v11018_v21 = vld [vmem:[#allocation189_spill] sm:$0xff] }
 0x49d   :  { %11010 = vst [vmem:[#allocation82_spill] sm:$0xff] %v8269_v12  ;;  %v3321_v49 = vcombine.low %v3265_v17, %v3281_v62  ;;  %v8277_v33 = vrot.slane %v3233_v31, %v10981_v40  ;;  %v2483_v44 = vrot.slane %v11015_v52, 7  ;;  %v2506_v63 = vsel %vm2167_vm8, %v2505_v32, %v2504_v39  ;;  %v11017_v39 = vld [vmem:[#allocation180_spill] sm:$0xff]  ;;  %v11023_v52 = vld [vmem:[#allocation199_spill] sm:$0xff]  ;;  %v11049_v6 = vld [vmem:[#allocation221_spill] sm:$0xff] }
 0x49e   :  { %11011 = vst [vmem:[#allocation84_spill] sm:$0xff] %v8272_v58  ;;  %v3322_v14 = vcombine.high %v3265_v17, %v3281_v62  ;;  %v3337_v57 = vcombine.low %v8272_v58, %v8258_v47  ;;  %v2508_v11 = vsel %vm2170_vm9, %v2507_v41, %v2506_v63  ;;  %v2520_v35 = vsel %vm2167_vm8, %v2519_v28, %v2518_v45  ;;  %v8296_v17 = vpop.permute.xlu0 %2074  ;;  %v8298_v32 = vpop.permute.xlu1 %2144  ;;  %v11032_v28 = vld [vmem:[#allocation206_spill] sm:$0xff]  ;;  %v11033_v41 = vld [vmem:[#allocation207_spill] sm:$0xff]  ;;  %v11040_v47 = vld [vmem:[#allocation212_spill] sm:$0xff] }
 0x49f   :  { %11014 = vst [vmem:[#allocation87_spill] sm:$0xff] %v8277_v33  ;;  %v2484_v3 = vsel %vm2155_vm4, %v2483_v44, %v11017_v39  ;;  %v2509_v36 = vrot.slane %v11018_v21, 1  ;;  %v2522_v62 = vsel %vm2170_vm9, %v2521_v13, %v2520_v35  ;;  %11019 = vst [vmem:[#allocation89_spill] sm:$0xff] %v8296_v17  ;;  %v2523_v34 = vrot.slane %v11022_v2, 1  ;;  %2118 = vrot.lane.b32.xlu0 %v7701_v23, %s5395_s20  ;;  %v11027_v39 = vld [vmem:[#allocation203_spill] sm:$0xff]  ;;  %v11028_v21 = vld [vmem:[#allocation217_spill] sm:$0xff] }
 0x4a0   :  { %11020 = vst [vmem:[#allocation91_spill] sm:$0xff] %v8298_v32  ;;  %v8303_v45 = vsel %vm2158_vm5, %v2485_v22, %v2484_v3  ;;  %v8307_v25 = vrot.slane %v3321_v49, %v10981_v40  ;;  %v2525_v13 = vrot.slane %v11023_v52, 7  ;;  %4222 = vbcast.lane.b32.xlu1 %v11016_v56, 280  ;;  %v8319_v22 = vrot.slane %v3322_v14, %v10981_v40  ;;  %v11026_v49 = vld [vmem:[#allocation201_spill] sm:$0xff]  ;;  %v11045_v33 = vld [vmem:[#allocation216_spill] sm:$0xff]  ;;  %v11054_v32 = vld [vmem:[#allocation223_spill] sm:$0xff] }
 0x4a1   :  { %11021 = vst [vmem:[#allocation92_spill] sm:$0xff] %v8303_v45  ;;  %v8313_v44 = vsel %vm2173_vm10, %v2509_v36, %v2508_v11  ;;  %v8322_v63 = vrot.slane %v3337_v57, %v10981_v40  ;;  %v2581_v35 = vrot.slane %v11026_v49, 7  ;;  %v2665_v3 = vrot.slane %v11027_v39, 7  ;;  %v11030_v36 = vld [vmem:[#allocation204_spill] sm:$0xff]  ;;  %v11031_v52 = vld [vmem:[#allocation205_spill] sm:$0xff]  ;;  %v11046_v45 = vld [vmem:[#allocation218_spill] sm:$0xff] }
 0x4a2   :  { %11024 = vst [vmem:[#allocation93_spill] sm:$0xff] %v8319_v22  ;;  %v2527_v2 = vrot.slane %v11028_v21, 6  ;;  %v8328_v11 = vsel %vm2173_vm10, %v2523_v34, %v2522_v62  ;;  %v2526_v23 = vsel %vm2155_vm4, %v2525_v13, %v11030_v36  ;;  %v2721_v15 = vrot.slane %v11031_v52, 7  ;;  %v8335_v57 = vpop.permute.xlu0 %2106  ;;  %v8337_v31 = vpop.permute.xlu1 %1618  ;;  %v11036_v49 = vld [vmem:[#allocation208_spill] sm:$0xff]  ;;  %v11039_v34 = vld [vmem:[#allocation211_spill] sm:$0xff]  ;;  %v11041_v36 = vld [vmem:[#allocation213_spill] sm:$0xff] }
 0x4a3   :  { %11025 = vst [vmem:[#allocation94_spill] sm:$0xff] %v8322_v63  ;;  %11029 = vst [vmem:[#allocation97_spill] sm:$0xff] %v8328_v11  ;;  %v2553_v14 = vrot.slane %v11032_v28, 7  ;;  %v2777_v1 = vrot.slane %v11033_v41, 7  ;;  %v2637_v39 = vrot.slane %v11036_v49, 7  ;;  %v2693_v62 = vrot.slane %v11038_v9, 7 }
 0x4a4   :  { %11034 = vst [vmem:[#allocation115_spill] sm:$0xff] %v8335_v57  ;;  %11035 = vst [vmem:[#allocation72_spill] sm:$0xff] %v8337_v31  ;;  %v2749_v13 = vrot.slane %v11040_v47, 7  ;;  %v2805_v28 = vrot.slane %v11042_v19, 7  ;;  %4210 = vbcast.lane.b32.xlu0 %v11016_v56, 256  ;;  %4229 = vbcast.lane.b32.xlu1 %v11044_v37, 264  ;;  %v2528_v21 = vsel %vm2158_vm5, %v2527_v2, %v2526_v23 }
 0x4a5   :  { %v2583_v58 = vrot.slane %v11047_v59, 6  ;;  %v2667_v52 = vrot.slane %v11049_v6, 6  ;;  %v11051_v11 = vld [vmem:[#allocation235_spill] sm:$0xff]  ;;  %v2723_v49 = vrot.slane %v11054_v32, 6  ;;  %v11055_v12 = vld [vmem:[#allocation224_spill] sm:$0xff]  ;;  %v11056_v23 = vld [vmem:[#allocation225_spill] sm:$0xff] }
 0x4a6   :  { %v2529_v41 = vrot.slane %v11051_v11, 5  ;;  %v8357_v20 = vpop.permute.xlu0 %2138  ;;  %v8359_v51 = vpop.permute.xlu1 %1698  ;;  %v2555_v2 = vrot.slane %v11055_v12, 6  ;;  %v2779_v9 = vrot.slane %v11056_v23, 6  ;;  %v11057_v31 = vld [vmem:[#allocation226_spill] sm:$0xff]  ;;  %v2695_v6 = vrot.slane %v11059_v54, 6  ;;  %v11061_v11 = vld [vmem:[#allocation244_spill] sm:$0xff] }
 0x4a7   :  { %11052 = vst [vmem:[#allocation74_spill] sm:$0xff] %v8357_v20  ;;  %11053 = vst [vmem:[#allocation76_spill] sm:$0xff] %v8359_v51  ;;  %v2639_v59 = vrot.slane %v11057_v31, 6  ;;  %v11060_v57 = vld [vmem:[#allocation242_spill] sm:$0xff]  ;;  %v2582_v20 = vsel %vm2155_vm4, %v2581_v35, %v11061_v11  ;;  %v11062_v32 = vld [vmem:[#allocation229_spill] sm:$0xff]  ;;  %v2807_v47 = vrot.slane %v11065_v61, 6 }
 0x4a8   :  { %v2554_v19 = vsel %vm2155_vm4, %v2553_v14, %v11060_v57  ;;  %4218 = vbcast.lane.b32.xlu0 %v11016_v56, 272  ;;  %4237 = vbcast.lane.b32.xlu1 %v11044_v37, 280  ;;  %v11063_v51 = vld [vmem:[#allocation230_spill] sm:$0xff]  ;;  %v11066_v17 = vld [vmem:[#allocation233_spill] sm:$0xff]  ;;  %v2863_v53 = vrot.slane %v11067_v26, 6  ;;  %v8380_v14 = vsel %vm2161_vm6, %v2529_v41, %v2528_v21  ;;  %v11068_v35 = vld [vmem:[#allocation236_spill] sm:$0xff]  ;;  %v2584_v61 = vsel %vm2158_vm5, %v2583_v58, %v2582_v20 }
 0x4a9   :  { %v2751_v23 = vrot.slane %v11063_v51, 6  ;;  %v11071_v12 = vld [vmem:[#allocation237_spill] sm:$0xff]  ;;  %v11072_v51 = vld [vmem:[#allocation238_spill] sm:$0xff]  ;;  %v2556_v31 = vsel %vm2158_vm5, %v2555_v2, %v2554_v19  ;;  %v11073_v54 = vld [vmem:[#allocation239_spill] sm:$0xff] }
 0x4aa   :  { %v8383_v56 = vpop.permute.xlu0 %1586  ;;  %v8385_v11 = vpop.permute.xlu1 %1762  ;;  %v2557_v8 = vrot.slane %v11071_v12, 5  ;;  %v2585_v10 = vrot.slane %v11073_v54, 5  ;;  %v11074_v26 = vld [vmem:[#allocation240_spill] sm:$0xff]  ;;  %v11075_v21 = vld [vmem:[#allocation246_spill] sm:$0xff]  ;;  %v11271_v63 = vld [vmem:[#allocation361_spill] sm:$0xff] }
 0x4ab   :  { %11069 = vst [vmem:[#allocation132_spill] sm:$0xff] %v8383_v56  ;;  %11070 = vst [vmem:[#allocation79_spill] sm:$0xff] %v8385_v11  ;;  %v2638_v41 = vsel %vm2155_vm4, %v2637_v39, %v11075_v21  ;;  %v11076_v57 = vld [vmem:[#allocation248_spill] sm:$0xff]  ;;  %v2641_v11 = vrot.slane %v11078_v18, 5  ;;  %v11079_v19 = vld [vmem:[#allocation250_spill] sm:$0xff]  ;;  %v2778_v18 = vsel %vm2155_vm4, %v2777_v1, %v11083_v46 }
 0x4ac   :  { %v2666_v56 = vsel %vm2155_vm4, %v2665_v3, %v11076_v57  ;;  %4225 = vbcast.lane.b32.xlu0 %v11044_v37, 256  ;;  %v11077_v12 = vld [vmem:[#allocation96_spill] sm:$0xff]  ;;  %v2694_v20 = vsel %vm2155_vm4, %v2693_v62, %v11079_v19  ;;  %v11081_v54 = vld [vmem:[#allocation254_spill] sm:$0xff]  ;;  %v8408_v39 = vsel %vm2161_vm6, %v2557_v8, %v2556_v31  ;;  %v11082_v3 = vld [vmem:[#allocation243_spill] sm:$0xff]  ;;  %v8412_v21 = vsel %vm2161_vm6, %v2585_v10, %v2584_v61 }
 0x4ad   :  { %1624 = vrot.lane.b32.xlu1 %v11077_v12, %s5395_s20  ;;  %v11080_v58 = vld [vmem:[#allocation252_spill] sm:$0xff]  ;;  %v2750_v30 = vsel %vm2155_vm4, %v2749_v13, %v11081_v54  ;;  %v2669_v57 = vrot.slane %v11082_v3, 5  ;;  %v11084_v19 = vld [vmem:[#allocation245_spill] sm:$0xff]  ;;  %v2668_v13 = vsel %vm2158_vm5, %v2667_v52, %v2666_v56  ;;  %v11085_v8 = vld [vmem:[#allocation258_spill] sm:$0xff]  ;;  %v2696_v10 = vsel %vm2158_vm5, %v2695_v6, %v2694_v20 }
 0x4ae   :  { %v2722_v2 = vsel %vm2155_vm4, %v2721_v15, %v11080_v58  ;;  %v8416_v0 = vpop.permute.xlu0 %1650  ;;  %v8418_v62 = vpop.permute.xlu1 %1826  ;;  %v2697_v15 = vrot.slane %v11084_v19, 5  ;;  %v2640_v58 = vsel %vm2158_vm5, %v2639_v59, %v2638_v41  ;;  %v2806_v31 = vsel %vm2155_vm4, %v2805_v28, %v11085_v8  ;;  %v11086_v54 = vld [vmem:[#allocation247_spill] sm:$0xff]  ;;  %v11088_v19 = vld [vmem:[#allocation249_spill] sm:$0xff]  ;;  %v11089_v56 = vld [vmem:[#allocation260_spill] sm:$0xff] }
 0x4af   :  { %v2725_v3 = vrot.slane %v11086_v54, 5  ;;  %v2724_v61 = vsel %vm2158_vm5, %v2723_v49, %v2722_v2  ;;  %v2752_v46 = vsel %vm2158_vm5, %v2751_v23, %v2750_v30  ;;  %v11087_v1 = vld [vmem:[#allocation391_spill] sm:$0xff]  ;;  %v2753_v59 = vrot.slane %v11088_v19, 5  ;;  %v11091_v8 = vld [vmem:[#allocation262_spill] sm:$0xff] }
 0x4b0   :  { %4233 = vbcast.lane.b32.xlu0 %v11044_v37, 272  ;;  %v2780_v52 = vsel %vm2158_vm5, %v2779_v9, %v2778_v18  ;;  %v11090_v28 = vrot.slane %v11037_v60, 7  ;;  %v11092_v6 = vrot.slane %v11045_v33, 7  ;;  %v2642_v30 = vsel %vm2161_vm6, %v2641_v11, %v2640_v58  ;;  %v11093_v23 = vld [vmem:[#allocation251_spill] sm:$0xff]  ;;  %v11094_v33 = vld [vmem:[#allocation253_spill] sm:$0xff] }
 0x4b1   :  { %1704 = vrot.lane.b32.xlu1 %v11087_v1, %s5381_s1  ;;  %v8444_v37 = vsel %vm2161_vm6, %v2669_v57, %v2668_v13  ;;  %v2781_v20 = vrot.slane %v11093_v23, 5  ;;  %v2808_v2 = vsel %vm2158_vm5, %v2807_v47, %v2806_v31  ;;  %v2698_v60 = vsel %vm2161_vm6, %v2697_v15, %v2696_v10  ;;  %v11095_v58 = vld [vmem:[#allocation255_spill] sm:$0xff]  ;;  %v11097_v15 = vld [vmem:[#allocation257_spill] sm:$0xff]  ;;  %v11105_v23 = vld [vmem:[#allocation270_spill] sm:$0xff] }
 0x4b2   :  { %v2834_v41 = vsel %vm2155_vm4, %v11090_v28, %v11089_v56  ;;  %v2862_v49 = vsel %vm2155_vm4, %v11092_v6, %v11091_v8  ;;  %v8448_v9 = vpop.permute.xlu0 %1730  ;;  %v8450_v18 = vpop.permute.xlu1 %1890  ;;  %v8454_v54 = vsel %vm2161_vm6, %v2725_v3, %v2724_v61  ;;  %v2809_v19 = vrot.slane %v11094_v33, 5  ;;  %v11098_v61 = vld [vmem:[#allocation264_spill] sm:$0xff]  ;;  %v11102_v28 = vld [vmem:[#allocation259_spill] sm:$0xff] }
 0x4b3   :  { %v2754_v11 = vsel %vm2161_vm6, %v2753_v59, %v2752_v46  ;;  %v2837_v57 = vrot.slane %v11095_v58, 5  ;;  %v8460_v13 = vsel %vm2161_vm6, %v2781_v20, %v2780_v52  ;;  %v11096_v47 = vrot.slane %v11058_v4, 6  ;;  %v11100_v59 = vld [vmem:[#allocation266_spill] sm:$0xff]  ;;  %v11103_v8 = vld [vmem:[#allocation268_spill] sm:$0xff] }
 0x4b4   :  { %v2864_v56 = vsel %vm2158_vm5, %v2863_v53, %v2862_v49  ;;  %1592 = vrot.lane.b32.xlu0 %v11077_v12, %s5393_s0  ;;  %v2865_v3 = vrot.slane %v11097_v15, 5  ;;  %v8472_v10 = vsel %vm2161_vm6, %v2809_v19, %v2808_v2  ;;  %v11099_v46 = vrot.slane %v11039_v34, 7  ;;  %v11107_v34 = vld [vmem:[#allocation272_spill] sm:$0xff] }
 0x4b5   :  { %v2836_v31 = vsel %vm2158_vm5, %v11096_v47, %v2834_v41  ;;  %1768 = vrot.lane.b32.xlu1 %v11087_v1, %s5383_s11  ;;  %v11101_v52 = vrot.slane %v11046_v45, 7  ;;  %v2893_v41 = vrot.slane %v11102_v28, 5  ;;  %v11104_v6 = vrot.slane %v11041_v36, 7  ;;  %v11109_v36 = vld [vmem:[#allocation261_spill] sm:$0xff] }
 0x4b6   :  { %v2890_v4 = vsel %vm2155_vm4, %v11099_v46, %v11098_v61  ;;  %v11106_v20 = vrot.slane %v11048_v43, 7  ;;  %v11108_v33 = vrot.slane %v11043_v5, 7  ;;  %v8495_v45 = vpop.permute.xlu0 %1794  ;;  %v8497_v58 = vpop.permute.xlu1 %1954  ;;  %v8500_v47 = vsel %vm2161_vm6, %v2837_v57, %v2836_v31  ;;  %v11110_v46 = vld [vmem:[#allocation273_spill] sm:$0xff] }
 0x4b7   :  { %v2918_v53 = vsel %vm2155_vm4, %v11101_v52, %v11100_v59  ;;  %v2946_v49 = vsel %vm2155_vm4, %v11104_v6, %v11103_v8  ;;  %v2921_v15 = vrot.slane %v11109_v36, 5  ;;  %v2866_v61 = vsel %vm2161_vm6, %v2865_v3, %v2864_v56  ;;  %v11112_v52 = vld [vmem:[#allocation263_spill] sm:$0xff]  ;;  %v11114_v6 = vld [vmem:[#allocation265_spill] sm:$0xff]  ;;  %v11121_v36 = vld [vmem:[#allocation274_spill] sm:$0xff] }
 0x4b8   :  { %v2974_v2 = vsel %vm2155_vm4, %v11106_v20, %v11105_v23  ;;  %v3002_v19 = vsel %vm2155_vm4, %v11108_v33, %v11107_v34  ;;  %v11111_v43 = vrot.slane %v11050_v7, 7  ;;  %v2949_v5 = vrot.slane %v11112_v52, 5  ;;  %1656 = vrot.lane.b32.xlu0 %v11077_v12, %s5394_s19  ;;  %v11123_v52 = vld [vmem:[#allocation276_spill] sm:$0xff] }
 0x4b9   :  { %v11113_v28 = vrot.slane %v11062_v32, 6  ;;  %v2977_v23 = vrot.slane %v11114_v6, 5  ;;  %v11115_v57 = vrot.slane %v11068_v35, 6  ;;  %1832 = vrot.lane.b32.xlu1 %v11087_v1, %s5385_s13  ;;  %v11116_v7 = vrot.slane %v11064_v38, 6  ;;  %v11126_v6 = vld [vmem:[#allocation267_spill] sm:$0xff] }
 0x4ba   :  { %v3030_v59 = vsel %vm2155_vm4, %v11111_v43, %v11110_v46  ;;  %v11117_v32 = vrot.slane %v11072_v51, 6  ;;  %v11119_v35 = vrot.slane %v11066_v17, 6  ;;  %v11120_v34 = vrot.slane %v11074_v26, 6  ;;  %v11122_v43 = vld [vmem:[#allocation275_spill] sm:$0xff]  ;;  %v8538_v51 = vpop.permute.xlu1 %2018 }
 0x4bb   :  { %v2892_v8 = vsel %vm2158_vm5, %v11113_v28, %v2890_v4  ;;  %v2920_v31 = vsel %vm2158_vm5, %v11115_v57, %v2918_v53  ;;  %v2948_v56 = vsel %vm2158_vm5, %v11116_v7, %v2946_v49  ;;  %v11118_v4 = vld [vmem:[#allocation271_spill] sm:$0xff]  ;;  %v2643_v46 = vrot.slane %v11121_v36, 4  ;;  %v8536_v28 = vpop.permute.xlu0 %1858  ;;  %11125 = vst [vmem:[#allocation101_spill] sm:$0xff] %v8538_v51  ;;  %v11127_v57 = vld [vmem:[#allocation269_spill] sm:$0xff] }
 0x4bc   :  { %v2976_v3 = vsel %vm2158_vm5, %v11117_v32, %v2974_v2  ;;  %v2559_v20 = vrot.slane %v11118_v4, 4  ;;  %v3004_v53 = vsel %vm2158_vm5, %v11119_v35, %v3002_v19  ;;  %v3032_v33 = vsel %vm2158_vm5, %v11120_v34, %v3030_v59  ;;  %11124 = vst [vmem:[#allocation99_spill] sm:$0xff] %v8536_v28  ;;  %v11128_v7 = vld [vmem:[#allocation277_spill] sm:$0xff]  ;;  %v11129_v35 = vld [vmem:[#allocation278_spill] sm:$0xff]  ;;  %1736 = vrot.lane.b32.xlu0 %v11087_v1, %s5382_s10  ;;  %s5399_s10 = smov [#allocation2]  }
 0x4bd   :  { %v2531_v38 = vrot.slane %v11122_v43, 4  ;;  %v2699_v49 = vrot.slane %v11123_v52, 4  ;;  %v2894_v2 = vsel %vm2161_vm6, %v2893_v41, %v2892_v8  ;;  %v3005_v17 = vrot.slane %v11126_v6, 5  ;;  %1896 = vrot.lane.b32.xlu1 %v11087_v1, %s5387_s15  ;;  %s5137_s11 = sshll.u32 %s5399_s10, 4  ;;  %s5138_s11 = int_to_ptr.vmem [resolvable:$true] %s5137_s11 }
 0x4be   :  { %v3033_v19 = vrot.slane %v11127_v57, 5  ;;  %v2587_v26 = vrot.slane %v11128_v7, 4  ;;  %v2922_v59 = vsel %vm2161_vm6, %v2921_v15, %v2920_v31  ;;  %v2950_v32 = vsel %vm2161_vm6, %v2949_v5, %v2948_v56  ;;  %v11130_v15 = vld [vmem:[#allocation279_spill] sm:$0xff]  ;;  %v8564_v6 = vpop.permute.xlu1 %2082  ;;  %p5361_p1 = scmp.lt.s32.totalorder %s5138_s11, %s5138_s11 }
 0x4bf   :  { %v2978_v4 = vsel %vm2161_vm6, %v2977_v23, %v2976_v3  ;;  %v2755_v34 = vrot.slane %v11129_v35, 4  ;;  %v2560_v41 = vsel %vm2164_vm7, %v2559_v20, %v8408_v39  ;;  %v3006_v8 = vsel %vm2161_vm6, %v3005_v17, %v3004_v53  ;;  %v11131_v3 = vld [vmem:[#allocation280_spill] sm:$0xff]  ;;  %v8562_v52 = vpop.permute.xlu0 %1922  ;;  %11133 = vst [vmem:[#allocation70_spill] sm:$0xff] %v8564_v6  ;;  %v11134_v20 = vld [vmem:[#allocation281_spill] sm:$0xff]  ;;  %v11136_v57 = vld [vmem:[#allocation283_spill] sm:$0xff] }
 0x4c0   :  { %v3034_v36 = vsel %vm2161_vm6, %v3033_v19, %v3032_v33  ;;  %v2671_v31 = vrot.slane %v11130_v15, 4  ;;  %v2644_v5 = vsel %vm2164_vm7, %v2643_v46, %v2642_v30  ;;  %v2532_v23 = vsel %vm2164_vm7, %v2531_v38, %v8380_v14  ;;  %11132 = vst [vmem:[#allocation140_spill] sm:$0xff] %v8562_v52  ;;  %v11135_v33 = vld [vmem:[#allocation282_spill] sm:$0xff]  ;;  %v11137_v14 = vld [vmem:[#allocation284_spill] sm:$0xff]  ;;  %1800 = vrot.lane.b32.xlu0 %v11087_v1, %s5384_s12  ;;  %s5356_s12 = scalar_lea.vmem %s5138_s11, 32 }
 0x4c1   :  { %v2700_v56 = vsel %vm2164_vm7, %v2699_v49, %v2698_v60  ;;  %v2811_v43 = vrot.slane %v11131_v3, 4  ;;  %v2588_v39 = vsel %vm2164_vm7, %v2587_v26, %v8412_v21  ;;  %v2727_v53 = vrot.slane %v11134_v20, 4  ;;  %v11138_v60 = vld [vmem:[#allocation285_spill] sm:$0xff]  ;;  %v11139_v19 = vld [vmem:[#allocation286_spill] sm:$0xff]  ;;  %1960 = vrot.lane.b32.xlu1 %v11087_v1, %s5389_s4  ;;  %v11140_v26 = vld [vmem:[#allocation287_spill] sm:$0xff]  ;;  %p5357_p0 = scmp.ne.s32.totalorder %s5138_s11, %s5356_s12  ;;  %p5362_p2 = scmp.lt.s32.totalorder %s5356_s12, %s5356_s12 }
 0x4c2   :  { %v2867_v17 = vrot.slane %v11135_v33, 4  ;;  %v2783_v30 = vrot.slane %v11136_v57, 4  ;;  %v2756_v46 = vsel %vm2164_vm7, %v2755_v34, %v2754_v11  ;;  %v2923_v38 = vrot.slane %v11137_v14, 4  ;;  %v11141_v15 = vld [vmem:[#allocation288_spill] sm:$0xff]  ;;  %v11142_v11 = vld [vmem:[#allocation289_spill] sm:$0xff]  ;;  %v11143_v33 = vld [vmem:[#allocation290_spill] sm:$0xff]  ;;  %v8591_v51 = vpop.permute.xlu1 %2146 }
 0x4c3   :  { %v2839_v49 = vrot.slane %v11138_v60, 4  ;;  %v2979_v7 = vrot.slane %v11139_v19, 4  ;;  %v2672_v21 = vsel %vm2164_vm7, %v2671_v31, %v8444_v37  ;;  %v2895_v35 = vrot.slane %v11140_v26, 4  ;;  %v11144_v14 = vld [vmem:[#allocation291_spill] sm:$0xff]  ;;  %v11145_v19 = vld [vmem:[#allocation292_spill] sm:$0xff]  ;;  %v8589_v52 = vpop.permute.xlu0 %1986  ;;  %11147 = vst [vmem:[#allocation83_spill] sm:$0xff] %v8591_v51  ;;  %p5363_p3 = por %p5362_p2, %p5361_p1 }
 0x4c4   :  { %v3035_v3 = vrot.slane %v11141_v15, 4  ;;  %v2951_v34 = vrot.slane %v11142_v11, 4  ;;  %v2812_v20 = vsel %vm2164_vm7, %v2811_v43, %v8472_v10  ;;  %v2561_v57 = vrot.slane %v11143_v33, 3  ;;  %11146 = vst [vmem:[#allocation81_spill] sm:$0xff] %v8589_v52  ;;  %v11148_v15 = vld [vmem:[#allocation293_spill] sm:$0xff]  ;;  %1864 = vrot.lane.b32.xlu0 %v11087_v1, %s5386_s14 }
 0x4c5   :  { %v3007_v60 = vrot.slane %v11144_v14, 4  ;;  %v2645_v6 = vrot.slane %v11145_v19, 3  ;;  %v2728_v37 = vsel %vm2164_vm7, %v2727_v53, %v8454_v54  ;;  %v2868_v31 = vsel %vm2164_vm7, %v2867_v17, %v2866_v61  ;;  %v11149_v14 = vld [vmem:[#allocation294_spill] sm:$0xff]  ;;  %2024 = vrot.lane.b32.xlu1 %v11087_v1, %s5391_s18  ;;  %p5364_p4 = pnand %p5363_p3, %p5357_p0 }
 0x4c6   :  { %v2784_v26 = vsel %vm2164_vm7, %v2783_v30, %v8460_v13  ;;  %v2533_v10 = vrot.slane %v11148_v15, 3  ;;  %v2924_v43 = vsel %vm2164_vm7, %v2923_v38, %v2922_v59  ;;  %v2840_v11 = vsel %vm2164_vm7, %v2839_v49, %v8500_v47  ;;  %v11150_v59 = vld [vmem:[#allocation295_spill] sm:$0xff]  ;;  %v11151_v30 = vld [vmem:[#allocation296_spill] sm:$0xff] }
 0x4c7   :  { %v2980_v33 = vsel %vm2164_vm7, %v2979_v7, %v2978_v4  ;;  %v2701_v19 = vrot.slane %v11149_v14, 3  ;;  %v2896_v54 = vsel %vm2164_vm7, %v2895_v35, %v2894_v2  ;;  %v3036_v13 = vsel %vm2164_vm7, %v3035_v3, %v3034_v36  ;;  %v8616_v49 = vpop.permute.xlu0 %2050  ;;  %v8618_v7 = vpop.permute.xlu1 %1620  ;;  %v11154_v35 = vld [vmem:[#allocation297_spill] sm:$0xff]  ;;  %v11155_v3 = vld [vmem:[#allocation298_spill] sm:$0xff] }
 0x4c8   :  { %v2952_v61 = vsel %vm2164_vm7, %v2951_v34, %v2950_v32  ;;  %v2589_v53 = vrot.slane %v11150_v59, 3  ;;  %v2562_v47 = vsel %vm2167_vm8, %v2561_v57, %v2560_v41  ;;  %v3008_v4 = vsel %vm2164_vm7, %v3007_v60, %v3006_v8  ;;  %11152 = vst [vmem:[#allocation117_spill] sm:$0xff] %v8616_v49  ;;  %11153 = vst [vmem:[#allocation103_spill] sm:$0xff] %v8618_v7  ;;  %v11156_v34 = vld [vmem:[#allocation299_spill] sm:$0xff]  ;;  %v11157_v57 = vld [vmem:[#allocation300_spill] sm:$0xff] }
 0x4c9   :  { %v2646_v17 = vsel %vm2167_vm8, %v2645_v6, %v2644_v5  ;;  %v2757_v38 = vrot.slane %v11151_v30, 3  ;;  %v2534_v2 = vsel %vm2167_vm8, %v2533_v10, %v2532_v23  ;;  %v2673_v36 = vrot.slane %v11154_v35, 3  ;;  %v11158_v60 = vld [vmem:[#allocation301_spill] sm:$0xff]  ;;  %v11159_v6 = vld [vmem:[#allocation302_spill] sm:$0xff]  ;;  %1928 = vrot.lane.b32.xlu0 %v11087_v1, %s5388_s16  ;;  %2088 = vrot.lane.b32.xlu1 %v11087_v1, %s5393_s0  ;;  %v11160_v10 = vld [vmem:[#allocation303_spill] sm:$0xff] }
 0x4ca   :  { %v2813_v32 = vrot.slane %v11155_v3, 3  ;;  %v2729_v15 = vrot.slane %v11156_v34, 3  ;;  %v2702_v41 = vsel %vm2167_vm8, %v2701_v19, %v2700_v56  ;;  %v2869_v8 = vrot.slane %v11157_v57, 3  ;;  %v11161_v30 = vld [vmem:[#allocation304_spill] sm:$0xff]  ;;  %v11162_v3 = vld [vmem:[#allocation305_spill] sm:$0xff]  ;;  %v11163_v34 = vld [vmem:[#allocation306_spill] sm:$0xff] }
 0x4cb   :  { %v2785_v5 = vrot.slane %v11158_v60, 3  ;;  %v2925_v14 = vrot.slane %v11159_v6, 3  ;;  %v2590_v23 = vsel %vm2167_vm8, %v2589_v53, %v2588_v39  ;;  %v2841_v59 = vrot.slane %v11160_v10, 3  ;;  %v11164_v60 = vld [vmem:[#allocation307_spill] sm:$0xff]  ;;  %v11165_v7 = vld [vmem:[#allocation308_spill] sm:$0xff]  ;;  %v8640_v51 = vpop.permute.xlu0 %2114  ;;  %v8642_v52 = vpop.permute.xlu1 %1700 }
 0x4cc   :  { %v2981_v35 = vrot.slane %v11161_v30, 3  ;;  %v2897_v56 = vrot.slane %v11162_v3, 3  ;;  %v2758_v19 = vsel %vm2167_vm8, %v2757_v38, %v2756_v46  ;;  %v3037_v57 = vrot.slane %v11163_v34, 3  ;;  %11166 = vst [vmem:[#allocation108_spill] sm:$0xff] %v8640_v51  ;;  %11167 = vst [vmem:[#allocation134_spill] sm:$0xff] %v8642_v52  ;;  %v11168_v30 = vld [vmem:[#allocation309_spill] sm:$0xff] }
 0x4cd   :  { %v2953_v6 = vrot.slane %v11164_v60, 3  ;;  %v2563_v49 = vrot.slane %v11165_v7, 2  ;;  %v2674_v39 = vsel %vm2167_vm8, %v2673_v36, %v2672_v21  ;;  %v2814_v53 = vsel %vm2167_vm8, %v2813_v32, %v2812_v20  ;;  %v11169_v60 = vld [vmem:[#allocation310_spill] sm:$0xff]  ;;  %1992 = vrot.lane.b32.xlu0 %v11087_v1, %s5390_s17  ;;  %2152 = vrot.lane.b32.xlu1 %v11087_v1, %s5394_s19 }
 0x4ce   :  { %v2730_v10 = vsel %vm2167_vm8, %v2729_v15, %v2728_v37  ;;  %v3009_v3 = vrot.slane %v11168_v30, 3  ;;  %v2870_v46 = vsel %vm2167_vm8, %v2869_v8, %v2868_v31  ;;  %v2786_v38 = vsel %vm2167_vm8, %v2785_v5, %v2784_v26  ;;  %v11170_v31 = vld [vmem:[#allocation311_spill] sm:$0xff]  ;;  %v11171_v15 = vld [vmem:[#allocation312_spill] sm:$0xff]  ;;  %v11179_v30 = vld [vmem:[#allocation318_spill] sm:$0xff] }
 0x4cf   :  { %v2926_v34 = vsel %vm2167_vm8, %v2925_v14, %v2924_v43  ;;  %v2647_v7 = vrot.slane %v11169_v60, 2  ;;  %v2842_v21 = vsel %vm2167_vm8, %v2841_v59, %v2840_v11  ;;  %v2982_v20 = vsel %vm2167_vm8, %v2981_v35, %v2980_v33  ;;  %v8670_v5 = vpop.permute.xlu0 %1588  ;;  %v8672_v11 = vpop.permute.xlu1 %1764  ;;  %v11175_v59 = vld [vmem:[#allocation314_spill] sm:$0xff] }
 0x4d0   :  { %v8659_v37 = vsel %vm2167_vm8, %v2897_v56, %v2896_v54  ;;  %v2535_v36 = vrot.slane %v11170_v31, 2  ;;  %v8663_v26 = vsel %vm2167_vm8, %v3037_v57, %v3036_v13  ;;  %v8666_v43 = vsel %vm2167_vm8, %v2953_v6, %v2952_v61  ;;  %11172 = vst [vmem:[#allocation105_spill] sm:$0xff] %v8670_v5  ;;  %11173 = vst [vmem:[#allocation130_spill] sm:$0xff] %v8672_v11  ;;  %v11174_v54 = vld [vmem:[#allocation313_spill] sm:$0xff]  ;;  %v11176_v13 = vld [vmem:[#allocation315_spill] sm:$0xff] }
 0x4d1   :  { %v2564_v32 = vsel %vm2170_vm9, %v2563_v49, %v2562_v47  ;;  %v2703_v8 = vrot.slane %v11171_v15, 2  ;;  %v8675_v33 = vsel %vm2167_vm8, %v3009_v3, %v3008_v4  ;;  %v2591_v14 = vrot.slane %v11174_v54, 2  ;;  %v11177_v57 = vld [vmem:[#allocation316_spill] sm:$0xff]  ;;  %v11178_v47 = vld [vmem:[#allocation317_spill] sm:$0xff]  ;;  %2056 = vrot.lane.b32.xlu0 %v11087_v1, %s5392_s3  ;;  %v11180_v31 = vld [vmem:[#allocation371_spill] sm:$0xff] }
 0x4d2   :  { %v2759_v35 = vrot.slane %v11175_v59, 2  ;;  %v2675_v56 = vrot.slane %v11176_v13, 2  ;;  %v2648_v61 = vsel %vm2170_vm9, %v2647_v7, %v2646_v17  ;;  %v2815_v6 = vrot.slane %v11177_v57, 2  ;;  %4244 = vbcast.lane.b32.xlu1 %v11180_v31, 264  ;;  %v11181_v3 = vld [vmem:[#allocation319_spill] sm:$0xff]  ;;  %v11182_v54 = vld [vmem:[#allocation326_spill] sm:$0xff] }
 0x4d3   :  { %v2731_v49 = vrot.slane %v11178_v47, 2  ;;  %v2871_v60 = vrot.slane %v11179_v30, 2  ;;  %v2536_v4 = vsel %vm2170_vm9, %v2535_v36, %v2534_v2  ;;  %v2787_v15 = vrot.slane %v11181_v3, 2  ;;  %v11183_v13 = vld [vmem:[#allocation333_spill] sm:$0xff]  ;;  %v11184_v7 = vld [vmem:[#allocation320_spill] sm:$0xff]  ;;  %v11186_v30 = vld [vmem:[#allocation331_spill] sm:$0xff]  ;;  %v8695_v51 = vpop.permute.xlu0 %1652  ;;  %v8697_v28 = vpop.permute.xlu1 %1828 }
 0x4d4   :  { %v2565_v59 = vrot.slane %v11182_v54, 1  ;;  %v2593_v11 = vrot.slane %v11183_v13, 1  ;;  %v2704_v17 = vsel %vm2170_vm9, %v2703_v8, %v2702_v41  ;;  %v2927_v57 = vrot.slane %v11184_v7, 2  ;;  %v11185_v47 = vld [vmem:[#allocation321_spill] sm:$0xff]  ;;  %11187 = vst [vmem:[#allocation144_spill] sm:$0xff] %v8695_v51  ;;  %11188 = vst [vmem:[#allocation85_spill] sm:$0xff] %v8697_v28 }
 0x4d5   :  { %v2843_v5 = vrot.slane %v11185_v47, 2  ;;  %v2705_v52 = vrot.slane %v11186_v30, 1  ;;  %v2592_v2 = vsel %vm2170_vm9, %v2591_v14, %v2590_v23  ;;  %v2760_v36 = vsel %vm2170_vm9, %v2759_v35, %v2758_v19  ;;  %v11189_v54 = vld [vmem:[#allocation330_spill] sm:$0xff]  ;;  %v11190_v47 = vld [vmem:[#allocation329_spill] sm:$0xff]  ;;  %2120 = vrot.lane.b32.xlu0 %v11087_v1, %s5395_s20  ;;  %v11192_v35 = vld [vmem:[#allocation323_spill] sm:$0xff] }
 0x4d6   :  { %v2676_v3 = vsel %vm2170_vm9, %v2675_v56, %v2674_v39  ;;  %v2537_v13 = vrot.slane %v11189_v54, 1  ;;  %v2816_v41 = vsel %vm2170_vm9, %v2815_v6, %v2814_v53  ;;  %v2732_v8 = vsel %vm2170_vm9, %v2731_v49, %v2730_v10  ;;  %4252 = vbcast.lane.b32.xlu1 %v11180_v31, 280  ;;  %v11191_v19 = vld [vmem:[#allocation322_spill] sm:$0xff]  ;;  %v11294_v28 = vld [vmem:[#allocation327_spill] sm:$0xff] }
 0x4d7   :  { %v8706_v7 = vsel %vm2170_vm9, %v2871_v60, %v2870_v46  ;;  %v2649_v30 = vrot.slane %v11190_v47, 1  ;;  %v2788_v23 = vsel %vm2170_vm9, %v2787_v15, %v2786_v38  ;;  %v2983_v39 = vrot.slane %v11191_v19, 2  ;;  %v8724_v6 = vpop.permute.xlu0 %1732  ;;  %v8726_v49 = vpop.permute.xlu1 %1892  ;;  %v11195_v38 = vld [vmem:[#allocation324_spill] sm:$0xff]  ;;  %v11196_v15 = vld [vmem:[#allocation325_spill] sm:$0xff] }
 0x4d8   :  { %v2566_v14 = vsel %vm2173_vm10, %v2565_v59, %v2564_v32  ;;  %v2594_v53 = vsel %vm2173_vm10, %v2593_v11, %v2592_v2  ;;  %v8717_v10 = vsel %vm2170_vm9, %v2927_v57, %v2926_v34  ;;  %v8720_v46 = vsel %vm2170_vm9, %v2843_v5, %v2842_v21  ;;  %11193 = vst [vmem:[#allocation86_spill] sm:$0xff] %v8724_v6  ;;  %v11197_v59 = vld [vmem:[#allocation335_spill] sm:$0xff]  ;;  %v11199_v47 = vld [vmem:[#allocation328_spill] sm:$0xff]  ;;  %v11293_v6 = vld [vmem:[#allocation390_spill] sm:$0xff] }
 0x4d9   :  { %v2899_v56 = vrot.slane %v11192_v35, 2  ;;  %v2706_v1 = vsel %vm2173_vm10, %v2705_v52, %v2704_v17  ;;  %11194 = vst [vmem:[#allocation136_spill] sm:$0xff] %v8726_v49  ;;  %v3039_v60 = vrot.slane %v11195_v38, 2  ;;  %v2955_v32 = vrot.slane %v11196_v15, 2  ;;  %4240 = vbcast.lane.b32.xlu0 %v11180_v31, 256  ;;  %v11198_v52 = vld [vmem:[#allocation372_spill] sm:$0xff] }
 0x4da   :  { %v2538_v11 = vsel %vm2173_vm10, %v2537_v13, %v2536_v4  ;;  %v2677_v34 = vrot.slane %v11197_v59, 1  ;;  %v3289_v21 = vcombine.low %v8313_v44, %v2566_v14  ;;  %v2650_v5 = vsel %vm2173_vm10, %v2649_v30, %v2648_v61  ;;  %4259 = vbcast.lane.b32.xlu1 %v11198_v52, 264  ;;  %v11200_v38 = vld [vmem:[#allocation334_spill] sm:$0xff]  ;;  %v11201_v61 = vld [vmem:[#allocation339_spill] sm:$0xff] }
 0x4db   :  { %v3305_v2 = vcombine.low %v2538_v11, %v2594_v53  ;;  %v8738_v17 = vsel %vm2170_vm9, %v2983_v39, %v2982_v20  ;;  %v3290_v54 = vcombine.high %v8313_v44, %v2566_v14  ;;  %v3011_v4 = vrot.slane %v11199_v47, 2  ;;  %v8746_v59 = vpop.permute.xlu0 %1796  ;;  %v8748_v57 = vpop.permute.xlu1 %1956  ;;  %v11204_v14 = vld [vmem:[#allocation336_spill] sm:$0xff] }
 0x4dc   :  { %v3409_v13 = vcombine.low %v2650_v5, %v2706_v1  ;;  %v2900_v19 = vsel %vm2170_vm9, %v2899_v56, %v8659_v37  ;;  %v3410_v35 = vcombine.high %v2650_v5, %v2706_v1  ;;  %v2761_v15 = vrot.slane %v11200_v38, 1  ;;  %11202 = vst [vmem:[#allocation109_spill] sm:$0xff] %v8746_v59  ;;  %11203 = vst [vmem:[#allocation119_spill] sm:$0xff] %v8748_v57  ;;  %v11205_v1 = vld [vmem:[#allocation337_spill] sm:$0xff] }
 0x4dd   :  { %v2789_v30 = vrot.slane %v11201_v61, 1  ;;  %v3040_v20 = vsel %vm2170_vm9, %v3039_v60, %v8663_v26  ;;  %v2956_v44 = vsel %vm2170_vm9, %v2955_v32, %v8666_v43  ;;  %v8755_v39 = vsel %vm2173_vm10, %v2677_v34, %v2676_v3  ;;  %4248 = vbcast.lane.b32.xlu0 %v11180_v31, 272  ;;  %v11206_v43 = vld [vmem:[#allocation347_spill] sm:$0xff]  ;;  %v11208_v31 = vld [vmem:[#allocation393_spill] sm:$0xff] }
 0x4de   :  { %v2817_v37 = vrot.slane %v11204_v14, 1  ;;  %v3306_v56 = vcombine.high %v2538_v11, %v2594_v53  ;;  %v2733_v5 = vrot.slane %v11205_v1, 1  ;;  %4267 = vbcast.lane.b32.xlu1 %v11198_v52, 280  ;;  %v3297_v47 = vrot.slane %v3289_v21, %v7890_v27  ;;  %v11214_v61 = vld [vmem:[#allocation345_spill] sm:$0xff] }
 0x4df   :  { %v3313_v38 = vrot.slane %v3305_v2, %v7890_v27  ;;  %v3012_v26 = vsel %vm2170_vm9, %v3011_v4, %v8675_v33  ;;  %v3013_v60 = vrot.slane %v11206_v43, 1  ;;  %v8767_v3 = vrot.slane %v3409_v13, %v7890_v27  ;;  %v8780_v21 = vpop.permute.xlu0 %1860  ;;  %v8782_v33 = vpop.permute.xlu1 %2020  ;;  %v11216_v43 = vld [vmem:[#allocation373_spill] sm:$0xff] }
 0x4e0   :  { %v8770_v53 = vrot.slane %v3290_v54, %v7890_v27  ;;  %v8773_v32 = vsel %vm2173_vm10, %v2761_v15, %v2760_v36  ;;  %v3393_v11 = vcombine.low %v11208_v31, %v8755_v39  ;;  %v8778_v34 = vsel %vm2173_vm10, %v2789_v30, %v2788_v23  ;;  %11209 = vst [vmem:[#allocation88_spill] sm:$0xff] %v8780_v21  ;;  %v11212_v54 = vld [vmem:[#allocation343_spill] sm:$0xff]  ;;  %v11213_v36 = vld [vmem:[#allocation344_spill] sm:$0xff] }
 0x4e1   :  { %11210 = vst [vmem:[#allocation123_spill] sm:$0xff] %v8782_v33  ;;  %v8785_v2 = vrot.slane %v3410_v35, %v7890_v27  ;;  %v8788_v4 = vsel %vm2173_vm10, %v2817_v37, %v2816_v41  ;;  %v2901_v13 = vrot.slane %v11212_v54, 1  ;;  %v3041_v15 = vrot.slane %v11213_v36, 1  ;;  %v11215_v23 = vld [vmem:[#allocation340_spill] sm:$0xff]  ;;  %4255 = vbcast.lane.b32.xlu0 %v11198_v52, 256  ;;  %v11218_v37 = vld [vmem:[#allocation341_spill] sm:$0xff] }
 0x4e2   :  { %11207 = vst [vmem:[#allocation121_spill] sm:$0xff] %v8770_v53  ;;  %v2957_v14 = vrot.slane %v11214_v61, 1  ;;  %v8794_v1 = vsel %vm2173_vm10, %v2733_v5, %v2732_v8  ;;  %v2929_v30 = vrot.slane %v11215_v23, 1  ;;  %4274 = vbcast.lane.b32.xlu1 %v11216_v43, 264  ;;  %v3353_v35 = vcombine.low %v3297_v47, %v3313_v38  ;;  %v11219_v36 = vld [vmem:[#allocation342_spill] sm:$0xff] }
 0x4e3   :  { %11211 = vst [vmem:[#allocation90_spill] sm:$0xff] %v8785_v2  ;;  %v8800_v12 = vrot.slane %v3306_v56, %v7890_v27  ;;  %v3425_v41 = vcombine.low %v8794_v1, %v8778_v34  ;;  %v2845_v54 = vrot.slane %v11218_v37, 1  ;;  %v2985_v61 = vrot.slane %v11219_v36, 1  ;;  %v11220_v2 = vld [vmem:[#allocation338_spill] sm:$0xff]  ;;  %v8814_v56 = vpop.permute.xlu0 %1924  ;;  %v8816_v21 = vpop.permute.xlu1 %2084 }
 0x4e4   :  { %v8807_v8 = vsel %vm2173_vm10, %v3013_v60, %v3012_v26  ;;  %v3394_v5 = vcombine.high %v11208_v31, %v8755_v39  ;;  %v3441_v23 = vcombine.low %v8773_v32, %v8788_v4  ;;  %v2873_v33 = vrot.slane %v11220_v2, 1  ;;  %11221 = vst [vmem:[#allocation127_spill] sm:$0xff] %v8814_v56  ;;  %11222 = vst [vmem:[#allocation129_spill] sm:$0xff] %v8816_v21 }
 0x4e5   :  { %11217 = vst [vmem:[#allocation125_spill] sm:$0xff] %v8800_v12  ;;  %v3401_v57 = vrot.slane %v3393_v11, %v7890_v27  ;;  %v2902_v37 = vsel %vm2173_vm10, %v2901_v13, %v2900_v19  ;;  %v8821_v36 = vsel %vm2173_vm10, %v3041_v15, %v3040_v20  ;;  %v2958_v26 = vsel %vm2173_vm10, %v2957_v14, %v2956_v44 }
 0x4e6   :  { %v3354_v60 = vcombine.high %v3297_v47, %v3313_v38  ;;  %v3561_v59 = vcombine.low %v2958_v26, %v8807_v8  ;;  %4263 = vbcast.lane.b32.xlu0 %v11198_v52, 272  ;;  %4282 = vbcast.lane.b32.xlu1 %v11216_v43, 280  ;;  %v8829_v2 = vrot.slane %v3353_v35, %v10981_v40 }
 0x4e7   :  { %v3369_v19 = vcombine.low %v8770_v53, %v8800_v12  ;;  %v2930_v20 = vsel %vm2173_vm10, %v2929_v30, %v8717_v10  ;;  %v2846_v44 = vsel %vm2173_vm10, %v2845_v54, %v8720_v46  ;;  %v2986_v47 = vsel %vm2173_vm10, %v2985_v61, %v8738_v17  ;;  %v8843_v15 = vpop.permute.xlu0 %1988  ;;  %v8845_v14 = vpop.permute.xlu1 %2148  ;;  %v11229_v54 = vld [vmem:[#allocation374_spill] sm:$0xff] }
 0x4e8   :  { %11224 = vst [vmem:[#allocation38_spill] sm:$0xff] %v8829_v2  ;;  %v3433_v38 = vrot.slane %v3425_v41, %v7890_v27  ;;  %v3442_v52 = vcombine.high %v8773_v32, %v8788_v4  ;;  %v3529_v11 = vcombine.low %v2846_v44, %v2902_v37  ;;  %v3577_v13 = vcombine.low %v2986_v47, %v8821_v36  ;;  %v11257_v32 = vld [vmem:[#allocation350_spill] sm:$0xff] }
 0x4e9   :  { %11225 = vst [vmem:[#allocation139_spill] sm:$0xff] %v8843_v15  ;;  %11226 = vst [vmem:[#allocation131_spill] sm:$0xff] %v8845_v14  ;;  %v3457_v10 = vcombine.low %v3401_v57, %v8767_v3  ;;  %v2874_v46 = vsel %vm2173_vm10, %v2873_v33, %v8706_v7  ;;  %v3449_v30 = vrot.slane %v3441_v23, %v7890_v27  ;;  %v11303_v2 = vld [vmem:[#allocation10_spill] sm:$0xff] }
 0x4ea   :  { %v8852_v17 = vrot.slane %v3354_v60, %v10981_v40  ;;  %v3458_v35 = vcombine.high %v3401_v57, %v8767_v3  ;;  %v3545_v41 = vcombine.low %v2874_v46, %v2930_v20  ;;  %4270 = vbcast.lane.b32.xlu0 %v11216_v43, 256  ;;  %4289 = vbcast.lane.b32.xlu1 %v11229_v54, 264 }
 0x4eb   :  { %v3569_v61 = vrot.slane %v3561_v59, %v7890_v27  ;;  %v8860_v31 = vrot.slane %v3369_v19, %v10981_v40  ;;  %v3489_v23 = vcombine.low %v3433_v38, %v3449_v30  ;;  %v8867_v57 = vrot.slane %v3394_v5, %v7890_v27  ;;  %v8869_v60 = vpop.permute.xlu0 %2052  ;;  %v8871_v4 = vpop.permute.xlu1 %1622 }
 0x4ec   :  { %11227 = vst [vmem:[#allocation141_spill] sm:$0xff] %v8852_v17  ;;  %v3530_v3 = vcombine.high %v2846_v44, %v2902_v37  ;;  %11232 = vst [vmem:[#allocation135_spill] sm:$0xff] %v8869_v60  ;;  %v3537_v59 = vrot.slane %v3529_v11, %v7890_v27  ;;  %v3585_v19 = vrot.slane %v3577_v13, %v7890_v27  ;;  %v11282_v60 = vld [vmem:[#allocation380_spill] sm:$0xff] }
 0x4ed   :  { %11230 = vst [vmem:[#allocation156_spill] sm:$0xff] %v8860_v31  ;;  %11231 = vst [vmem:[#allocation160_spill] sm:$0xff] %v8867_v57  ;;  %v8876_v53 = vrot.slane %v3457_v10, %v10981_v40  ;;  %v3426_v7 = vcombine.high %v8794_v1, %v8778_v34  ;;  %v3546_v33 = vcombine.high %v2874_v46, %v2930_v20  ;;  %v11259_v57 = vld [vmem:[#allocation351_spill] sm:$0xff]  ;;  %v11264_v31 = vld [vmem:[#allocation356_spill] sm:$0xff] }
 0x4ee   :  { %11233 = vst [vmem:[#allocation137_spill] sm:$0xff] %v8871_v4  ;;  %v3562_v12 = vcombine.high %v2958_v26, %v8807_v8  ;;  %4278 = vbcast.lane.b32.xlu0 %v11216_v43, 272  ;;  %4297 = vbcast.lane.b32.xlu1 %v11229_v54, 280  ;;  %v3553_v11 = vrot.slane %v3545_v41, %v7890_v27  ;;  %v2595_v37 = vrot.slane %v11259_v57, 7  ;;  %v2681_v57 = vrot.slane %v11282_v60, 6  ;;  %v11284_v4 = vld [vmem:[#allocation383_spill] sm:$0xff] }
 0x4ef   :  { %11234 = vst [vmem:[#allocation148_spill] sm:$0xff] %v8876_v53  ;;  %v3625_v13 = vcombine.low %v3569_v61, %v3585_v19  ;;  %v3490_v10 = vcombine.high %v3433_v38, %v3449_v30  ;;  %v3578_v39 = vcombine.high %v2986_v47, %v8821_v36  ;;  %v8889_v34 = vrot.slane %v3489_v23, %v10981_v40  ;;  %v8893_v26 = vpop.permute.xlu0 %2116  ;;  %v8895_v20 = vpop.permute.xlu1 %1702  ;;  %v11252_v38 = vld [vmem:[#allocation348_spill] sm:$0xff]  ;;  %v11286_v53 = vld [vmem:[#allocation9_spill] sm:$0xff]  ;;  %v11292_v60 = vld [vmem:[#allocation14_spill] sm:$0xff] }
 0x4f0   :  { %v3626_v1 = vcombine.high %v3569_v61, %v3585_v19  ;;  %11237 = vst [vmem:[#allocation133_spill] sm:$0xff] %v8893_v26  ;;  %11238 = vst [vmem:[#allocation111_spill] sm:$0xff] %v8895_v20  ;;  %v3593_v43 = vcombine.low %v3537_v59, %v3553_v11  ;;  %v8898_v46 = vrot.slane %v3458_v35, %v10981_v40  ;;  %v11245_v35 = vld [vmem:[#allocation377_spill] sm:$0xff]  ;;  %v11280_v26 = vld [vmem:[#allocation375_spill] sm:$0xff] }
 0x4f1   :  { %11236 = vst [vmem:[#allocation152_spill] sm:$0xff] %v8889_v34  ;;  %v8903_v36 = vrot.slane %v3530_v3, %v7890_v27  ;;  %v3594_v47 = vcombine.high %v3537_v59, %v3553_v11  ;;  %v8906_v30 = vrot.slane %v3546_v33, %v7890_v27  ;;  %v8909_v41 = vrot.slane %v3562_v12, %v7890_v27  ;;  %v11249_v12 = vld [vmem:[#allocation346_spill] sm:$0xff]  ;;  %v11283_v20 = vld [vmem:[#allocation381_spill] sm:$0xff]  ;;  %v11285_v34 = vld [vmem:[#allocation384_spill] sm:$0xff] }
 0x4f2   :  { %11239 = vst [vmem:[#allocation143_spill] sm:$0xff] %v8898_v46  ;;  %v8912_v61 = vrot.slane %v3442_v52, %v7890_v27  ;;  %4285 = vbcast.lane.b32.xlu0 %v11229_v54, 256  ;;  %4304 = vbcast.lane.b32.xlu1 %v11245_v35, 264  ;;  %v8918_v44 = vrot.slane %v3625_v13, %v10981_v40  ;;  %v2567_v59 = vrot.slane %v11249_v12, 7  ;;  %v2651_v13 = vrot.slane %v11252_v38, 7  ;;  %v11262_v12 = vld [vmem:[#allocation354_spill] sm:$0xff] }
 0x4f3   :  { %11240 = vst [vmem:[#allocation145_spill] sm:$0xff] %v8903_v36  ;;  %11241 = vst [vmem:[#allocation147_spill] sm:$0xff] %v8906_v30  ;;  %v8921_v3 = vrot.slane %v3490_v10, %v10981_v40  ;;  %v8924_v33 = vrot.slane %v3426_v7, %v7890_v27  ;;  %v8930_v11 = vrot.slane %v3626_v1, %v10981_v40  ;;  %v8936_v8 = vpop.permute.xlu0 %1590  ;;  %v8938_v10 = vpop.permute.xlu1 %1766  ;;  %v11256_v1 = vld [vmem:[#allocation349_spill] sm:$0xff]  ;;  %v11263_v30 = vld [vmem:[#allocation355_spill] sm:$0xff]  ;;  %v2597_v17 = vrot.slane %v11280_v26, 6 }
 0x4f4   :  { %11242 = vst [vmem:[#allocation149_spill] sm:$0xff] %v8909_v41  ;;  %11243 = vst [vmem:[#allocation168_spill] sm:$0xff] %v8912_v61  ;;  %v8933_v19 = vrot.slane %v3578_v39, %v7890_v27  ;;  %v8941_v7 = vrot.slane %v3593_v43, %v10981_v40  ;;  %v2539_v52 = vrot.slane %v11256_v1, 7  ;;  %v2707_v39 = vrot.slane %v11257_v32, 7  ;;  %v11260_v43 = vld [vmem:[#allocation352_spill] sm:$0xff]  ;;  %v11261_v1 = vld [vmem:[#allocation353_spill] sm:$0xff] }
 0x4f5   :  { %11246 = vst [vmem:[#allocation172_spill] sm:$0xff] %v8918_v44  ;;  %11247 = vst [vmem:[#allocation176_spill] sm:$0xff] %v8921_v3  ;;  %v8950_v23 = vrot.slane %v3594_v47, %v10981_v40  ;;  %v2679_v47 = vrot.slane %v11261_v1, 7  ;;  %v2735_v38 = vrot.slane %v11263_v30, 7  ;;  %v11266_v36 = vld [vmem:[#allocation358_spill] sm:$0xff]  ;;  %v11267_v61 = vld [vmem:[#allocation359_spill] sm:$0xff] }
 0x4f6   :  { %11248 = vst [vmem:[#allocation164_spill] sm:$0xff] %v8924_v33  ;;  %11250 = vst [vmem:[#allocation113_spill] sm:$0xff] %v8930_v11  ;;  %4293 = vbcast.lane.b32.xlu0 %v11229_v54, 272  ;;  %4312 = vbcast.lane.b32.xlu1 %v11245_v35, 280  ;;  %v11265_v54 = vld [vmem:[#allocation357_spill] sm:$0xff]  ;;  %v11270_v1 = vld [vmem:[#allocation360_spill] sm:$0xff] }
 0x4f7   :  { %11251 = vst [vmem:[#allocation178_spill] sm:$0xff] %v8933_v19  ;;  %11253 = vst [vmem:[#allocation151_spill] sm:$0xff] %v8936_v8  ;;  %v8971_v46 = vpop.permute.xlu0 %1654  ;;  %v8973_v32 = vpop.permute.xlu1 %1830  ;;  %v11272_v30 = vld [vmem:[#allocation362_spill] sm:$0xff]  ;;  %v11273_v40 = vld [vmem:[#allocation363_spill] sm:$0xff]  ;;  %v2737_v41 = vrot.slane %v11284_v4, 6 }
 0x4f8   :  { %11254 = vst [vmem:[#allocation40_spill] sm:$0xff] %v8938_v10  ;;  %11255 = vst [vmem:[#allocation153_spill] sm:$0xff] %v8941_v7  ;;  %v11274_v11 = vld [vmem:[#allocation364_spill] sm:$0xff]  ;;  %v11276_v27 = vld [vmem:[#allocation366_spill] sm:$0xff] }
 0x4f9   :  { %11258 = vst [vmem:[#allocation24_spill] sm:$0xff] %v8950_v23  ;;  %11268 = vst [vmem:[#allocation26_spill] sm:$0xff] %v8971_v46  ;;  %v2569_v19 = vrot.slane %v11274_v11, 6  ;;  %v11275_v23 = vld [vmem:[#allocation365_spill] sm:$0xff]  ;;  %v2653_v33 = vrot.slane %v11276_v27, 6  ;;  %v11277_v8 = vld [vmem:[#allocation368_spill] sm:$0xff] }
 0x4fa   :  { %11269 = vst [vmem:[#allocation42_spill] sm:$0xff] %v8973_v32  ;;  %v2541_v5 = vrot.slane %v11277_v8, 6  ;;  %4300 = vbcast.lane.b32.xlu0 %v11245_v35, 256  ;;  %v11278_v46 = vld [vmem:[#allocation378_spill] sm:$0xff]  ;;  %v11279_v32 = vld [vmem:[#allocation369_spill] sm:$0xff]  ;;  %v11281_v10 = vld [vmem:[#allocation376_spill] sm:$0xff]  ;;  %v2540_v8 = vsel %vm2155_vm4, %v2539_v52, %v11286_v53 }
 0x4fb   :  { %4319 = vbcast.lane.b32.xlu1 %v11278_v46, 264  ;;  %v2709_v3 = vrot.slane %v11279_v32, 6  ;;  %v2765_v22 = vrot.slane %v11281_v10, 6  ;;  %v2821_v11 = vrot.slane %v11283_v20, 6  ;;  %v8994_v14 = vpop.permute.xlu0 %1734  ;;  %v8996_v15 = vpop.permute.xlu1 %1894  ;;  %v11289_v32 = vld [vmem:[#allocation386_spill] sm:$0xff]  ;;  %v11290_v26 = vld [vmem:[#allocation387_spill] sm:$0xff]  ;;  %v2568_v20 = vsel %vm2155_vm4, %v2567_v59, %v11292_v60 }
 0x4fc   :  { %11287 = vst [vmem:[#allocation23_spill] sm:$0xff] %v8994_v14  ;;  %11288 = vst [vmem:[#allocation190_spill] sm:$0xff] %v8996_v15  ;;  %v2793_v21 = vrot.slane %v11289_v32, 6  ;;  %v11291_v10 = vld [vmem:[#allocation389_spill] sm:$0xff]  ;;  %v11295_v44 = vld [vmem:[#allocation48_spill] sm:$0xff] }
 0x4fd   :  { %v2849_v49 = vrot.slane %v11291_v10, 6  ;;  %v11296_v53 = vld [vmem:[#allocation18_spill] sm:$0xff]  ;;  %v2542_v10 = vsel %vm2158_vm5, %v2541_v5, %v2540_v8  ;;  %v11299_v60 = vld [vmem:[#allocation27_spill] sm:$0xff]  ;;  %v11302_v5 = vld [vmem:[#allocation8_spill] sm:$0xff] }
 0x4fe   :  { %v2596_v52 = vsel %vm2155_vm4, %v2595_v37, %v11296_v53  ;;  %4308 = vbcast.lane.b32.xlu0 %v11245_v35, 272  ;;  %v11297_v32 = vld [vmem:[#allocation394_spill] sm:$0xff]  ;;  %v2680_v4 = vsel %vm2155_vm4, %v2679_v47, %v11299_v60  ;;  %v11300_v27 = vld [vmem:[#allocation395_spill] sm:$0xff]  ;;  %v2570_v37 = vsel %vm2158_vm5, %v2569_v19, %v2568_v20  ;;  %v2708_v35 = vsel %vm2155_vm4, %v2707_v39, %v7977_v48 }
 0x4ff   :  { %4327 = vbcast.lane.b32.xlu1 %v11278_v46, 280  ;;  %v11298_v15 = vld [vmem:[#allocation22_spill] sm:$0xff]  ;;  %v2543_v14 = vrot.slane %v11300_v27, 5  ;;  %v11301_v7 = vld [vmem:[#allocation7_spill] sm:$0xff]  ;;  %v9021_v53 = vpop.permute.xlu0 %1798  ;;  %v9023_v56 = vpop.permute.xlu1 %1958  ;;  %v2571_v8 = vrot.slane %v11302_v5, 5  ;;  %v2736_v47 = vsel %vm2155_vm4, %v2735_v38, %v8009_v50  ;;  %v2682_v39 = vsel %vm2158_vm5, %v2681_v57, %v2680_v4  ;;  %v11308_v57 = vld [vmem:[#allocation25_spill] sm:$0xff] }
 0x500   :  { %v2652_v59 = vsel %vm2155_vm4, %v2651_v13, %v11298_v15  ;;  %v3017_v51 = vrot.slane %v11301_v7, 6  ;;  %v2599_v15 = vrot.slane %v11303_v2, 5  ;;  %v2598_v13 = vsel %vm2158_vm5, %v2597_v17, %v2596_v52  ;;  %v11304_v19 = vld [vmem:[#allocation15_spill] sm:$0xff] }
 0x501   :  { %v9031_v27 = vsel %vm2161_vm6, %v2543_v14, %v2542_v10  ;;  %v2655_v20 = vrot.slane %v11304_v19, 5  ;;  %v2654_v48 = vsel %vm2158_vm5, %v2653_v33, %v2652_v59  ;;  %v11305_v60 = vld [vmem:[#allocation379_spill] sm:$0xff]  ;;  %v9039_v2 = vsel %vm2161_vm6, %v2571_v8, %v2570_v37 }
 0x502   :  { %4315 = vbcast.lane.b32.xlu0 %v11278_v46, 256  ;;  %v11306_v17 = vld [vmem:[#allocation19_spill] sm:$0xff]  ;;  %v2710_v50 = vsel %vm2158_vm5, %v2709_v3, %v2708_v35  ;;  %v11307_v14 = vrot.slane %v11260_v43, 7  ;;  %v9048_v33 = vsel %vm2161_vm6, %v2599_v15, %v2598_v13  ;;  %v2711_v4 = vrot.slane %v11308_v57, 5  ;;  %v11310_v35 = vld [vmem:[#allocation28_spill] sm:$0xff] }
 0x503   :  { %4334 = vbcast.lane.b32.xlu1 %v11305_v60, 264  ;;  %v2683_v52 = vrot.slane %v11306_v17, 5  ;;  %v2738_v10 = vsel %vm2158_vm5, %v2737_v41, %v2736_v47  ;;  %v11309_v59 = vrot.slane %v11265_v54, 7  ;;  %v9056_v5 = vpop.permute.xlu0 %1862  ;;  %v9058_v3 = vpop.permute.xlu1 %2022  ;;  %v9061_v43 = vsel %vm2161_vm6, %v2655_v20, %v2654_v48  ;;  %v11316_v17 = vld [vmem:[#allocation47_spill] sm:$0xff] }
 0x504   :  { %v2764_v38 = vsel %vm2155_vm4, %v11307_v14, %v8039_v42  ;;  %v2739_v8 = vrot.slane %v11310_v35, 5  ;;  %v11311_v41 = vrot.slane %v11262_v12, 7  ;;  %v9072_v54 = vsel %vm2161_vm6, %v2711_v4, %v2710_v50  ;;  %v11319_v14 = vld [vmem:[#allocation65_spill] sm:$0xff] }
 0x505   :  { %v2792_v37 = vsel %vm2155_vm4, %v11309_v59, %v8069_v16  ;;  %v9064_v42 = vsel %vm2161_vm6, %v2683_v52, %v2682_v39  ;;  %v2767_v16 = vrot.slane %v7979_v29, 5  ;;  %v2766_v13 = vsel %vm2158_vm5, %v2765_v22, %v2764_v38  ;;  %v11314_v39 = vld [vmem:[#allocation59_spill] sm:$0xff] }
 0x506   :  { %v2820_v15 = vsel %vm2155_vm4, %v11311_v41, %v8104_v55  ;;  %v11312_v47 = vrot.slane %v11267_v61, 7  ;;  %4323 = vbcast.lane.b32.xlu0 %v11278_v46, 272  ;;  %v9083_v12 = vsel %vm2161_vm6, %v2739_v8, %v2738_v10  ;;  %v11313_v55 = vld [vmem:[#allocation45_spill] sm:$0xff]  ;;  %v2794_v48 = vsel %vm2158_vm5, %v2793_v21, %v2792_v37  ;;  %v11317_v52 = vld [vmem:[#allocation35_spill] sm:$0xff]  ;;  %v11322_v37 = vld [vmem:[#allocation46_spill] sm:$0xff] }
 0x507   :  { %4342 = vbcast.lane.b32.xlu1 %v11305_v60, 280  ;;  %v2795_v20 = vrot.slane %v11313_v55, 5  ;;  %v11315_v29 = vrot.slane %v11264_v31, 7  ;;  %v2823_v61 = vrot.slane %v11316_v17, 5  ;;  %v11318_v46 = vrot.slane %v11271_v63, 7  ;;  %v9101_v21 = vpop.permute.xlu0 %1926  ;;  %v9103_v4 = vpop.permute.xlu1 %2086  ;;  %v11321_v10 = vld [vmem:[#allocation49_spill] sm:$0xff] }
 0x508   :  { %v2848_v19 = vsel %vm2155_vm4, %v11312_v47, %v8137_v24  ;;  %v2822_v24 = vsel %vm2158_vm5, %v2821_v11, %v2820_v15  ;;  %v11320_v38 = vrot.slane %v11266_v36, 7  ;;  %v9106_v31 = vsel %vm2161_vm6, %v2767_v16, %v2766_v13  ;;  %v11324_v8 = vld [vmem:[#allocation51_spill] sm:$0xff]  ;;  %v11326_v16 = vld [vmem:[#allocation89_spill] sm:$0xff] }
 0x509   :  { %v2876_v22 = vsel %vm2155_vm4, %v11315_v29, %v11314_v39  ;;  %v2904_v50 = vsel %vm2155_vm4, %v11318_v46, %v11317_v52  ;;  %v2851_v59 = vrot.slane %v11321_v10, 5  ;;  %v2850_v11 = vsel %vm2158_vm5, %v2849_v49, %v2848_v19  ;;  %v11328_v49 = vld [vmem:[#allocation382_spill] sm:$0xff] }
 0x50a   :  { %v2932_v57 = vsel %vm2155_vm4, %v11320_v38, %v11319_v14  ;;  %v11323_v63 = vrot.slane %v11273_v40, 7  ;;  %v9115_v36 = vsel %vm2161_vm6, %v2795_v20, %v2794_v48  ;;  %v2879_v41 = vrot.slane %v11324_v8, 5  ;;  %4330 = vbcast.lane.b32.xlu0 %v11305_v60, 256  ;;  %v11329_v19 = vld [vmem:[#allocation34_spill] sm:$0xff]  ;;  %v11336_v38 = vld [vmem:[#allocation64_spill] sm:$0xff] }
 0x50b   :  { %v11325_v15 = vrot.slane %v11285_v34, 6  ;;  %v11327_v13 = vrot.slane %v11270_v1, 7  ;;  %4349 = vbcast.lane.b32.xlu1 %v11328_v49, 264  ;;  %v2824_v40 = vsel %vm2161_vm6, %v2823_v61, %v2822_v24  ;;  %v2907_v20 = vrot.slane %v11329_v19, 5  ;;  %v11334_v61 = vld [vmem:[#allocation115_spill] sm:$0xff]  ;;  %v9146_v14 = vpop.permute.xlu0 %1990 }
 0x50c   :  { %v2960_v35 = vsel %vm2155_vm4, %v11323_v63, %v11322_v37  ;;  %v11330_v48 = vrot.slane %v11294_v28, 6  ;;  %v11331_v34 = vrot.slane %v11290_v26, 6  ;;  %v9136_v1 = vsel %vm2161_vm6, %v2851_v59, %v2850_v11 }
 0x50d   :  { %v2878_v47 = vsel %vm2158_vm5, %v11325_v15, %v2876_v22  ;;  %v2988_v55 = vsel %vm2155_vm4, %v11327_v13, %v11326_v16  ;;  %v11332_v22 = vld [vmem:[#allocation61_spill] sm:$0xff]  ;;  %v11333_v52 = vrot.slane %v11297_v32, 6  ;;  %v11335_v24 = vrot.slane %v11275_v23, 7  ;;  %v11338_v32 = vld [vmem:[#allocation74_spill] sm:$0xff]  ;;  %v11341_v15 = vld [vmem:[#allocation72_spill] sm:$0xff] }
 0x50e   :  { %v2906_v39 = vsel %vm2158_vm5, %v11330_v48, %v2904_v50  ;;  %v2934_v29 = vsel %vm2158_vm5, %v11331_v34, %v2932_v57  ;;  %v2935_v17 = vrot.slane %v11332_v22, 5  ;;  %v9148_v50 = vpop.permute.xlu1 %2150  ;;  %v2880_v26 = vsel %vm2161_vm6, %v2879_v41, %v2878_v47  ;;  %4338 = vbcast.lane.b32.xlu0 %v11305_v60, 272  ;;  %v11342_v41 = vld [vmem:[#allocation82_spill] sm:$0xff]  ;;  %v11343_v13 = vld [vmem:[#allocation76_spill] sm:$0xff] }
 0x50f   :  { %v2962_v46 = vsel %vm2158_vm5, %v11333_v52, %v2960_v35  ;;  %v3016_v28 = vsel %vm2155_vm4, %v11335_v24, %v11334_v61  ;;  %v2963_v57 = vrot.slane %v11336_v38, 5  ;;  %v11337_v10 = vrot.slane %v11293_v6, 6  ;;  %v11340_v35 = vld [vmem:[#allocation67_spill] sm:$0xff]  ;;  %4357 = vbcast.lane.b32.xlu1 %v11328_v49, 280  ;;  %v11346_v34 = vld [vmem:[#allocation132_spill] sm:$0xff]  ;;  %v9177_v22 = vpop.permute.xlu0 %2054 }
 0x510   :  { %v11339_v11 = vrot.slane %v11272_v30, 7  ;;  %v2908_v23 = vsel %vm2161_vm6, %v2907_v20, %v2906_v39  ;;  %v2936_v63 = vsel %vm2161_vm6, %v2935_v17, %v2934_v29  ;;  %v2991_v8 = vrot.slane %v11340_v35, 5  ;;  %v11344_v20 = vld [vmem:[#allocation91_spill] sm:$0xff] }
 0x511   :  { %v2990_v59 = vsel %vm2158_vm5, %v11337_v10, %v2988_v55  ;;  %v2573_v16 = vrot.slane %v11341_v15, 4  ;;  %v2964_v6 = vsel %vm2161_vm6, %v2963_v57, %v2962_v46  ;;  %v3019_v47 = vrot.slane %v11342_v41, 5  ;;  %v11347_v52 = vld [vmem:[#allocation79_spill] sm:$0xff]  ;;  %v11348_v57 = vld [vmem:[#allocation385_spill] sm:$0xff] }
 0x512   :  { %v3044_v37 = vsel %vm2155_vm4, %v11339_v11, %v11338_v32  ;;  %v3018_v30 = vsel %vm2158_vm5, %v3017_v51, %v3016_v28  ;;  %v2657_v55 = vrot.slane %v11343_v13, 4  ;;  %v2992_v19 = vsel %vm2161_vm6, %v2991_v8, %v2990_v59  ;;  %v4215_v17 = vpop.permute.xlu1 %4214  ;;  %4345 = vbcast.lane.b32.xlu0 %v11328_v49, 256  ;;  %v11350_v32 = vld [vmem:[#allocation101_spill] sm:$0xff]  ;;  %v11351_v11 = vld [vmem:[#allocation140_spill] sm:$0xff] }
 0x513   :  { %v3047_v48 = vrot.slane %v11344_v20, 5  ;;  %v11345_v39 = vrot.slane %v11295_v44, 6  ;;  %v2545_v29 = vrot.slane %v11346_v34, 4  ;;  %v2713_v7 = vrot.slane %v11347_v52, 4  ;;  %4364 = vbcast.lane.b32.xlu1 %v11348_v57, 264  ;;  %v9200_v8 = vpop.permute.xlu0 %2118  ;;  %v11359_v52 = vld [vmem:[#allocation108_spill] sm:$0xff] }
 0x514   :  { %v2601_v51 = vrot.slane %v8416_v0, 4  ;;  %v2769_v46 = vrot.slane %v8418_v62, 4  ;;  %v2685_v61 = vrot.slane %v8448_v9, 4  ;;  %v3020_v24 = vsel %vm2161_vm6, %v3019_v47, %v3018_v30  ;;  %v11349_v9 = vld [vmem:[#allocation99_spill] sm:$0xff]  ;;  %v11353_v30 = vld [vmem:[#allocation81_spill] sm:$0xff] }
 0x515   :  { %v3046_v60 = vsel %vm2158_vm5, %v11345_v39, %v3044_v37  ;;  %v2574_v44 = vsel %vm2164_vm7, %v2573_v16, %v9039_v2  ;;  %v2825_v28 = vrot.slane %v8450_v18, 4  ;;  %v2741_v38 = vrot.slane %v8495_v45, 4  ;;  %v11352_v37 = vld [vmem:[#allocation70_spill] sm:$0xff] }
 0x516   :  { %v3048_v10 = vsel %vm2161_vm6, %v3047_v48, %v3046_v60  ;;  %v2658_v0 = vsel %vm2164_vm7, %v2657_v55, %v9061_v43  ;;  %v2881_v62 = vrot.slane %v8497_v58, 4  ;;  %v2797_v59 = vrot.slane %v11349_v9, 4  ;;  %v4223_v15 = vpop.permute.xlu1 %4222  ;;  %v11354_v55 = vld [vmem:[#allocation83_spill] sm:$0xff]  ;;  %4353 = vbcast.lane.b32.xlu0 %v11328_v49, 272  ;;  %v11364_v9 = vld [vmem:[#allocation144_spill] sm:$0xff] }
 0x517   :  { %v2546_v2 = vsel %vm2164_vm7, %v2545_v29, %v9031_v27  ;;  %v2937_v18 = vrot.slane %v11350_v32, 4  ;;  %v2853_v45 = vrot.slane %v11351_v11, 4  ;;  %v2993_v35 = vrot.slane %v11352_v37, 4  ;;  %4372 = vbcast.lane.b32.xlu1 %v11348_v57, 280  ;;  %v11365_v32 = vld [vmem:[#allocation388_spill] sm:$0xff] }
 0x518   :  { %v2714_v16 = vsel %vm2164_vm7, %v2713_v7, %v9072_v54  ;;  %v2602_v58 = vsel %vm2164_vm7, %v2601_v51, %v9048_v33  ;;  %v2770_v43 = vsel %vm2164_vm7, %v2769_v46, %v9106_v31  ;;  %v2686_v27 = vsel %vm2164_vm7, %v2685_v61, %v9064_v42  ;;  %v11355_v42 = vld [vmem:[#allocation117_spill] sm:$0xff]  ;;  %v11360_v51 = vld [vmem:[#allocation134_spill] sm:$0xff] }
 0x519   :  { %v2826_v41 = vsel %vm2164_vm7, %v2825_v28, %v2824_v40  ;;  %v2742_v47 = vsel %vm2164_vm7, %v2741_v38, %v9083_v12  ;;  %v2909_v13 = vrot.slane %v11353_v30, 4  ;;  %v3049_v20 = vrot.slane %v11354_v55, 4  ;;  %v11356_v40 = vld [vmem:[#allocation38_spill] sm:$0xff]  ;;  %v11361_v61 = vld [vmem:[#allocation105_spill] sm:$0xff] }
 0x51a   :  { %v2882_v33 = vsel %vm2164_vm7, %v2881_v62, %v2880_v26  ;;  %v9220_v54 = vsel %vm2164_vm7, %v2797_v59, %v9115_v36  ;;  %v2965_v31 = vrot.slane %v11355_v42, 4  ;;  %v11357_v48 = vcombine.low %v8307_v25, %v11356_v40  ;;  %v11358_v26 = vld [vmem:[#allocation103_spill] sm:$0xff]  ;;  %v4211_v36 = vpop.permute.xlu0 %4210  ;;  %v4230_v29 = vpop.permute.xlu1 %4229  ;;  %4360 = vbcast.lane.b32.xlu0 %v11348_v57, 256  ;;  %v11369_v30 = vld [vmem:[#allocation85_spill] sm:$0xff]  ;;  %v11370_v55 = vld [vmem:[#allocation86_spill] sm:$0xff] }
 0x51b   :  { %v9227_v39 = vsel %vm2164_vm7, %v2937_v18, %v2936_v63  ;;  %v9231_v49 = vsel %vm2164_vm7, %v2853_v45, %v9136_v1  ;;  %v9234_v60 = vsel %vm2164_vm7, %v2993_v35, %v2992_v19  ;;  %v2575_v34 = vrot.slane %v11358_v26, 3  ;;  %v11363_v19 = vld [vmem:[#allocation130_spill] sm:$0xff]  ;;  %4379 = vbcast.lane.b32.xlu1 %v11365_v32, 264  ;;  %v11366_v45 = vld [vmem:[#allocation153_spill] sm:$0xff] }
 0x51c   :  { %v4450_v12 = vmul.f32 %v4215_v17, %v11357_v48  ;;  %v3021_v7 = vrot.slane %v11359_v52, 4  ;;  %v2659_v46 = vrot.slane %v11360_v51, 3  ;;  %v2547_v17 = vrot.slane %v11361_v61, 3  ;;  %v11373_v51 = vld [vmem:[#allocation109_spill] sm:$0xff] }
 0x51d   :  { %v11362_v63 = vcombine.high %v8307_v25, %v11356_v40  ;;  %v2910_v1 = vsel %vm2164_vm7, %v2909_v13, %v2908_v23  ;;  %v3050_v38 = vsel %vm2164_vm7, %v3049_v20, %v3048_v10  ;;  %v2715_v62 = vrot.slane %v11363_v19, 3  ;;  %v11367_v25 = vld [vmem:[#allocation172_spill] sm:$0xff] }
 0x51e   :  { %v2603_v59 = vrot.slane %v11364_v9, 3  ;;  %v9250_v18 = vsel %vm2164_vm7, %v2965_v31, %v2964_v6  ;;  %v4545_v11 = vsel %vm4513_vm11, %v4450_v12, 0.0  ;;  %v11368_v37 = vcombine.low %v11366_v45, %v11367_v25  ;;  %v4219_v40 = vpop.permute.xlu0 %4218  ;;  %v4238_v48 = vpop.permute.xlu1 %4237  ;;  %4368 = vbcast.lane.b32.xlu0 %v11348_v57, 272  ;;  %v11378_v19 = vld [vmem:[#allocation88_spill] sm:$0xff] }
 0x51f   :  { %v4454_v28 = vmul.f32 %v4230_v29, %v11362_v63  ;;  %v2576_v10 = vsel %vm2167_vm8, %v2575_v34, %v2574_v44  ;;  %v2771_v13 = vrot.slane %v11369_v30, 3  ;;  %v2687_v20 = vrot.slane %v11370_v55, 3  ;;  %v11372_v29 = vld [vmem:[#allocation136_spill] sm:$0xff]  ;;  %4387 = vbcast.lane.b32.xlu1 %v11365_v32, 280 }
 0x520   :  { %v4452_v35 = vmul.f32 %v4223_v15, %v11368_v37  ;;  %v9263_v6 = vsel %vm2164_vm7, %v3021_v7, %v3020_v24  ;;  %v2660_v31 = vsel %vm2167_vm8, %v2659_v46, %v2658_v0  ;;  %v9267_v12 = vsel %vm2167_vm8, %v2547_v17, %v2546_v2  ;;  %v11374_v24 = vld [vmem:[#allocation119_spill] sm:$0xff]  ;;  %v11375_v7 = vld [vmem:[#allocation29_spill] sm:$0xff] }
 0x521   :  { %v4546_v23 = vsel %vm4513_vm11, %v4454_v28, 0.0  ;;  %v11371_v15 = vcombine.high %v11366_v45, %v11367_v25  ;;  %v2716_v26 = vsel %vm2167_vm8, %v2715_v62, %v2714_v16  ;;  %v9274_v34 = vsel %vm2167_vm8, %v2603_v59, %v2602_v58  ;;  %v11376_v46 = vld [vmem:[#allocation43_spill] sm:$0xff] }
 0x522   :  { %v9260_v42 = vadd.f32 %v4546_v23, %v4545_v11  ;;  %v2827_v52 = vrot.slane %v11372_v29, 3  ;;  %v2743_v61 = vrot.slane %v11373_v51, 3  ;;  %v2883_v0 = vrot.slane %v11374_v24, 3  ;;  %v4226_v9 = vpop.permute.xlu0 %4225  ;;  %v1625_v59 = vpop.permute.xlu1 %1624  ;;  %v11379_v11 = vld [vmem:[#allocation123_spill] sm:$0xff]  ;;  %4375 = vbcast.lane.b32.xlu0 %v11365_v32, 256  ;;  %v11386_v51 = vld [vmem:[#allocation148_spill] sm:$0xff] }
 0x523   :  { %v4456_v44 = vmul.f32 %v4238_v48, %v11371_v15  ;;  %v4607_v2 = vsel %vm4513_vm11, %v4452_v35, 0.0  ;;  %v11377_v17 = vcombine.low %v11375_v7, %v11376_v46  ;;  %v9287_v58 = vsel %vm2167_vm8, %v2771_v13, %v2770_v43  ;;  %v11380_v25 = vld [vmem:[#allocation127_spill] sm:$0xff]  ;;  %v11381_v35 = vld [vmem:[#allocation129_spill] sm:$0xff]  ;;  %v11387_v24 = vld [vmem:[#allocation152_spill] sm:$0xff] }
 0x524   :  { %v9290_v28 = vsel %vm2167_vm8, %v2687_v20, %v2686_v27  ;;  %v2799_v57 = vrot.slane %v11378_v19, 3  ;;  %v2939_v45 = vrot.slane %v11379_v11, 3  ;;  %v2855_v37 = vrot.slane %v11380_v25, 3  ;;  %v11383_v13 = vld [vmem:[#allocation139_spill] sm:$0xff]  ;;  %v11385_v15 = vld [vmem:[#allocation77_spill] sm:$0xff]  ;;  %v11393_v25 = vld [vmem:[#allocation40_spill] sm:$0xff] }
 0x525   :  { %v4449_v63 = vmul.f32 %v4211_v36, %v11377_v17  ;;  %v4608_v16 = vsel %vm4513_vm11, %v4456_v44, 0.0  ;;  %v2995_v36 = vrot.slane %v11381_v35, 3  ;;  %v11382_v23 = vcombine.high %v11375_v7, %v11376_v46  ;;  %v11384_v20 = vld [vmem:[#allocation131_spill] sm:$0xff]  ;;  %4394 = vbcast.lane.b32.xlu1 %v11385_v15, 264 }
 0x526   :  { %v9293_v62 = vadd.f32 %v4608_v16, %v4607_v2  ;;  %v2828_v30 = vsel %vm2167_vm8, %v2827_v52, %v2826_v41  ;;  %v9303_v27 = vsel %vm2167_vm8, %v2743_v61, %v2742_v47  ;;  %v2911_v55 = vrot.slane %v11383_v13, 3  ;;  %v11389_v52 = vld [vmem:[#allocation137_spill] sm:$0xff]  ;;  %v11390_v46 = vld [vmem:[#allocation111_spill] sm:$0xff]  ;;  %v4234_v19 = vpop.permute.xlu0 %4233  ;;  %4383 = vbcast.lane.b32.xlu0 %v11365_v32, 272 }
 0x527   :  { %v4453_v43 = vmul.f32 %v4226_v9, %v11382_v23  ;;  %v3051_v48 = vrot.slane %v11384_v20, 3  ;;  %v2884_v44 = vsel %vm2167_vm8, %v2883_v0, %v2882_v33  ;;  %v4514_v29 = vsel %vm4513_vm11, %v4449_v63, 0.0  ;;  %v1705_v33 = vpop.permute.xlu1 %1704  ;;  %v11394_v23 = vld [vmem:[#allocation133_spill] sm:$0xff] }
 0x528   :  { %v11388_v2 = vcombine.low %v11386_v51, %v11387_v24  ;;  %v9317_v47 = vsel %vm2167_vm8, %v2799_v57, %v9220_v54  ;;  %v2577_v61 = vrot.slane %v11389_v52, 2  ;;  %v2661_v17 = vrot.slane %v11390_v46, 2 }
 0x529   :  { %v4515_v41 = vsel %vm4513_vm11, %v4453_v43, 0.0  ;;  %v9325_v0 = vsel %vm2167_vm8, %v2939_v45, %v9227_v39  ;;  %v9333_v54 = vsel %vm2167_vm8, %v2995_v36, %v9234_v60  ;;  %v11391_v63 = vcombine.high %v11386_v51, %v11387_v24  ;;  %v11392_v39 = vld [vmem:[#allocation135_spill] sm:$0xff]  ;;  %4402 = vbcast.lane.b32.xlu1 %v11385_v15, 280  ;;  %v11397_v24 = vld [vmem:[#allocation42_spill] sm:$0xff] }
 0x52a   :  { %v4451_v7 = vmul.f32 %v4219_v40, %v11388_v2  ;;  %v9321_v16 = vadd.f32 %v4515_v41, %v4514_v29  ;;  %v9329_v40 = vsel %vm2167_vm8, %v2855_v37, %v9231_v49  ;;  %v9339_v9 = vsel %vm2167_vm8, %v2911_v55, %v2910_v1  ;;  %v1593_v55 = vpop.permute.xlu0 %1592  ;;  %v11396_v29 = vld [vmem:[#allocation26_spill] sm:$0xff]  ;;  %v11398_v41 = vld [vmem:[#allocation23_spill] sm:$0xff]  ;;  %4390 = vbcast.lane.b32.xlu0 %v11385_v15, 256 }
 0x52b   :  { %v4455_v57 = vmul.f32 %v4234_v19, %v11391_v63  ;;  %v9342_v11 = vsel %vm2167_vm8, %v3051_v48, %v3050_v38  ;;  %v2967_v45 = vrot.slane %v11392_v39, 3  ;;  %v2717_v35 = vrot.slane %v11393_v25, 2  ;;  %v1769_v20 = vpop.permute.xlu1 %1768  ;;  %v11395_v48 = vld [vmem:[#allocation151_spill] sm:$0xff] }
 0x52c   :  { %v4576_v49 = vsel %vm4513_vm11, %v4451_v7, 0.0  ;;  %v2579_v60 = vrot.slane %v1625_v59, 1  ;;  %v2663_v36 = vrot.slane %v1705_v33, 1  ;;  %v2578_v1 = vsel %vm2170_vm9, %v2577_v61, %v2576_v10  ;;  %v11399_v10 = vld [vmem:[#allocation190_spill] sm:$0xff] }
 0x52d   :  { %v4577_v37 = vsel %vm4513_vm11, %v4455_v57, 0.0  ;;  %v3023_v43 = vrot.slane %v11394_v23, 3  ;;  %v2662_v38 = vsel %vm2170_vm9, %v2661_v17, %v2660_v31  ;;  %v2549_v32 = vrot.slane %v11395_v48, 2  ;;  %v11400_v31 = vld [vmem:[#allocation5_spill] sm:$0xff] }
 0x52e   :  { %v9353_v13 = vadd.f32 %v4577_v37, %v4576_v49  ;;  %v2605_v51 = vrot.slane %v11396_v29, 2  ;;  %v2773_v2 = vrot.slane %v11397_v24, 2  ;;  %v2719_v59 = vrot.slane %v1769_v20, 1  ;;  %4409 = vbcast.lane.b32.xlu1 %v11400_v31, 264  ;;  %v1657_v25 = vpop.permute.xlu0 %1656  ;;  %4398 = vbcast.lane.b32.xlu0 %v11385_v15, 272  ;;  %v11402_v24 = vld [vmem:[#allocation20_spill] sm:$0xff] }
 0x52f   :  { %v2718_v7 = vsel %vm2170_vm9, %v2717_v35, %v2716_v26  ;;  %v2689_v52 = vrot.slane %v11398_v41, 2  ;;  %v2829_v61 = vrot.slane %v11399_v10, 2  ;;  %v2885_v46 = vrot.slane %v9023_v56, 2  ;;  %v1833_v35 = vpop.permute.xlu1 %1832 }
 0x530   :  { %v2580_v17 = vsel %vm2173_vm10, %v2579_v60, %v2578_v1  ;;  %v2664_v19 = vsel %vm2173_vm10, %v2663_v36, %v2662_v38  ;;  %v2551_v33 = vrot.slane %v1593_v55, 1  ;;  %v2720_v63 = vsel %vm2173_vm10, %v2719_v59, %v2718_v7  ;;  %v11401_v1 = vld [vmem:[#allocation97_spill] sm:$0xff] }
 0x531   :  { %v9369_v26 = vsel %vm2167_vm8, %v2967_v45, %v9250_v18  ;;  %v9373_v57 = vsel %vm2167_vm8, %v3023_v43, %v9263_v6  ;;  %v3953_v56 = vcombine.low %v2664_v19, %v2720_v63  ;;  %v3954_v39 = vcombine.high %v2664_v19, %v2720_v63 }
 0x532   :  { %v2550_v49 = vsel %vm2170_vm9, %v2549_v32, %v9267_v12  ;;  %v2606_v60 = vsel %vm2170_vm9, %v2605_v51, %v9274_v34  ;;  %v2774_v37 = vsel %vm2170_vm9, %v2773_v2, %v9287_v58  ;;  %v2607_v36 = vrot.slane %v1657_v25, 1  ;;  %4417 = vbcast.lane.b32.xlu1 %v11400_v31, 280  ;;  %4405 = vbcast.lane.b32.xlu0 %v11400_v31, 256 }
 0x533   :  { %v2690_v18 = vsel %vm2170_vm9, %v2689_v52, %v9290_v28  ;;  %v2830_v6 = vsel %vm2170_vm9, %v2829_v61, %v2828_v30  ;;  %v2745_v45 = vrot.slane %v9021_v53, 2  ;;  %v3833_v23 = vcombine.low %v11401_v1, %v2580_v17  ;;  %v1737_v53 = vpop.permute.xlu0 %1736  ;;  %v1897_v20 = vpop.permute.xlu1 %1896 }
 0x534   :  { %v2886_v12 = vsel %vm2170_vm9, %v2885_v46, %v2884_v44  ;;  %v2552_v34 = vsel %vm2173_vm10, %v2551_v33, %v2550_v49  ;;  %v2608_v58 = vsel %vm2173_vm10, %v2607_v36, %v2606_v60  ;;  %v2775_v43 = vrot.slane %v1833_v35, 1 }
 0x535   :  { %v2801_v38 = vrot.slane %v9056_v5, 2  ;;  %v2941_v28 = vrot.slane %v9058_v3, 2  ;;  %v3849_v30 = vcombine.low %v2552_v34, %v2608_v58  ;;  %v3850_v55 = vcombine.high %v2552_v34, %v2608_v58  ;;  %v11403_v3 = vld [vmem:[#allocation392_spill] sm:$0xff] }
 0x536   :  { %v2857_v48 = vrot.slane %v9101_v21, 2  ;;  %v3834_v15 = vcombine.high %v11401_v1, %v2580_v17  ;;  %v2691_v32 = vrot.slane %v1737_v53, 1  ;;  %v2831_v29 = vrot.slane %v1897_v20, 1  ;;  %4424 = vbcast.lane.b32.xlu1 %v11403_v3, 264  ;;  %4413 = vbcast.lane.b32.xlu0 %v11400_v31, 272 }
 0x537   :  { %v2997_v44 = vrot.slane %v9103_v4, 2  ;;  %v2913_v51 = vrot.slane %v9146_v14, 2  ;;  %v9398_v2 = vrot.slane %v3833_v23, %v11402_v24  ;;  %v9401_v5 = vrot.slane %v3849_v30, %v11402_v24  ;;  %v11404_v14 = vld [vmem:[#allocation6_spill] sm:$0xff]  ;;  %v1801_v46 = vpop.permute.xlu0 %1800  ;;  %v1961_v17 = vpop.permute.xlu1 %1960 }
 0x538   :  { %v9406_v21 = vrot.slane %v3850_v55, %v11402_v24  ;;  %v2776_v59 = vsel %vm2173_vm10, %v2775_v43, %v2774_v37  ;;  %v2692_v7 = vsel %vm2173_vm10, %v2691_v32, %v2690_v18  ;;  %v2832_v4 = vsel %vm2173_vm10, %v2831_v29, %v2830_v6 }
 0x539   :  { %v3937_v41 = vcombine.low %v11404_v14, %v2692_v7  ;;  %v3938_v52 = vcombine.high %v11404_v14, %v2692_v7  ;;  %v3985_v10 = vcombine.low %v2776_v59, %v2832_v4  ;;  %v3986_v61 = vcombine.high %v2776_v59, %v2832_v4 }
 0x53a   :  { %v9414_v19 = vrot.slane %v3834_v15, %v11402_v24  ;;  %v2887_v33 = vrot.slane %v1961_v17, 1  ;;  %v3961_v35 = vrot.slane %v3953_v56, %v11402_v24  ;;  %v9422_v49 = vrot.slane %v3954_v39, %v11402_v24  ;;  %4432 = vbcast.lane.b32.xlu1 %v11403_v3, 280  ;;  %4420 = vbcast.lane.b32.xlu0 %v11403_v3, 256 }
 0x53b   :  { %v3945_v60 = vrot.slane %v3937_v41, %v11402_v24  ;;  %v9426_v37 = vrot.slane %v3938_v52, %v11402_v24  ;;  %v2746_v36 = vsel %vm2170_vm9, %v2745_v45, %v9303_v27  ;;  %v3053_v18 = vrot.slane %v9148_v50, 2  ;;  %v1865_v56 = vpop.permute.xlu0 %1864  ;;  %v2025_v39 = vpop.permute.xlu1 %2024 }
 0x53c   :  { %v2747_v6 = vrot.slane %v1801_v46, 1  ;;  %v2888_v1 = vsel %vm2173_vm10, %v2887_v33, %v2886_v12  ;;  %v2802_v27 = vsel %vm2170_vm9, %v2801_v38, %v9317_v47  ;;  %v2969_v50 = vrot.slane %v9177_v22, 2 }
 0x53d   :  { %v4001_v23 = vcombine.low %v3945_v60, %v3961_v35  ;;  %v4002_v34 = vcombine.high %v3945_v60, %v3961_v35  ;;  %v4017_v31 = vcombine.low %v9426_v37, %v9422_v49  ;;  %v2803_v45 = vrot.slane %v1865_v56, 1  ;;  %v11406_v60 = vld [vmem:[#allocation21_spill] sm:$0xff] }
 0x53e   :  { %v2943_v43 = vrot.slane %v2025_v39, 1  ;;  %v2942_v12 = vsel %vm2170_vm9, %v2941_v28, %v9325_v0  ;;  %v2858_v30 = vsel %vm2170_vm9, %v2857_v48, %v9329_v40  ;;  %v2998_v55 = vsel %vm2170_vm9, %v2997_v44, %v9333_v54  ;;  %v11405_v28 = vld [vmem:[#allocation396_spill] sm:$0xff]  ;;  %4428 = vbcast.lane.b32.xlu0 %v11403_v3, 272 }
 0x53f   :  { %v2914_v53 = vsel %vm2170_vm9, %v2913_v51, %v9339_v9  ;;  %v3054_v47 = vsel %vm2170_vm9, %v3053_v18, %v9342_v11  ;;  %v2748_v22 = vsel %vm2173_vm10, %v2747_v6, %v2746_v36  ;;  %v2804_v38 = vsel %vm2173_vm10, %v2803_v45, %v2802_v27  ;;  %4439 = vbcast.lane.b32.xlu1 %v11405_v28, 264  ;;  %v1929_v15 = vpop.permute.xlu0 %1928  ;;  %v2089_v32 = vpop.permute.xlu1 %2088 }
 0x540   :  { %v2944_v0 = vsel %vm2173_vm10, %v2943_v43, %v2942_v12  ;;  %v3969_v40 = vcombine.low %v2748_v22, %v2804_v38  ;;  %v3970_v20 = vcombine.high %v2748_v22, %v2804_v38  ;;  %v2970_v9 = vsel %vm2170_vm9, %v2969_v50, %v9369_v26  ;;  %v11410_v22 = vld [vmem:[#allocation141_spill] sm:$0xff] }
 0x541   :  { %v4089_v48 = vcombine.low %v2888_v1, %v2944_v0  ;;  %v4090_v54 = vcombine.high %v2888_v1, %v2944_v0  ;;  %v3025_v29 = vrot.slane %v9200_v8, 2  ;;  %v2859_v11 = vrot.slane %v1929_v15, 1  ;;  %v11447_v0 = vld [vmem:[#allocation160_spill] sm:$0xff] }
 0x542   :  { %v2999_v44 = vrot.slane %v2089_v32, 1  ;;  %v3993_v51 = vrot.slane %v3985_v10, %v11402_v24  ;;  %v4000_v59 = vrot.slane %v3986_v61, %v11402_v24  ;;  %v3977_v7 = vrot.slane %v3969_v40, %v11402_v24  ;;  %4435 = vbcast.lane.b32.xlu0 %v11405_v28, 256 }
 0x543   :  { %v3984_v4 = vrot.slane %v3970_v20, %v11402_v24  ;;  %v2860_v14 = vsel %vm2173_vm10, %v2859_v11, %v2858_v30  ;;  %4447 = vbcast.lane.b32.xlu1 %v11405_v28, 280  ;;  %v4018_v26 = vcombine.high %v9426_v37, %v9422_v49  ;;  %v1993_v52 = vpop.permute.xlu0 %1992  ;;  %v2153_v10 = vpop.permute.xlu1 %2152  ;;  %v9474_v36 = vrot.slane %v4001_v23, %v11406_v60  ;;  %v11444_v11 = vld [vmem:[#allocation177_spill] sm:$0xff] }
 0x544   :  { %v9466_v41 = vsel %vm2173_vm10, %v2999_v44, %v2998_v55  ;;  %v4033_v61 = vcombine.low %v3977_v7, %v3993_v51  ;;  %v4034_v46 = vcombine.high %v3977_v7, %v3993_v51  ;;  %v2915_v3 = vrot.slane %v1993_v52, 1  ;;  %v11409_v55 = vld [vmem:[#allocation93_spill] sm:$0xff]  ;;  %v11441_v44 = vld [vmem:[#allocation32_spill] sm:$0xff] }
 0x545   :  { %v4049_v17 = vcombine.low %v3984_v4, %v4000_v59  ;;  %v4050_v33 = vcombine.high %v3984_v4, %v4000_v59  ;;  %v3055_v35 = vrot.slane %v2153_v10, 1  ;;  %v9477_v18 = vrot.slane %v4002_v34, %v11406_v60 }
 0x546   :  { %v9480_v6 = vrot.slane %v4089_v48, %v11402_v24  ;;  %v9483_v1 = vrot.slane %v4090_v54, %v11402_v24  ;;  %v9487_v49 = vrot.slane %v4033_v61, %v11406_v60  ;;  %v9490_v37 = vrot.slane %v4017_v31, %v11406_v60  ;;  %4443 = vbcast.lane.b32.xlu0 %v11405_v28, 272 }
 0x547   :  { %v2916_v56 = vsel %vm2173_vm10, %v2915_v3, %v2914_v53  ;;  %v3056_v39 = vsel %vm2173_vm10, %v3055_v35, %v3054_v47  ;;  %v9495_v23 = vrot.slane %v4034_v46, %v11406_v60  ;;  %v9498_v34 = vrot.slane %v4049_v17, %v11406_v60  ;;  %v2057_v12 = vpop.permute.xlu0 %2056  ;;  %v4245_v30 = vpop.permute.xlu1 %4244  ;;  %v11417_v17 = vld [vmem:[#allocation176_spill] sm:$0xff]  ;;  %v11451_v47 = vld [vmem:[#allocation186_spill] sm:$0xff] }
 0x548   :  { %11407 = vst [vmem:[#allocation183_spill] sm:$0xff] %v9490_v37  ;;  %v4073_v27 = vcombine.low %v2860_v14, %v2916_v56  ;;  %v4074_v50 = vcombine.high %v2860_v14, %v2916_v56  ;;  %v4121_v45 = vcombine.low %v9466_v41, %v3056_v39  ;;  %v4122_v43 = vcombine.high %v9466_v41, %v3056_v39  ;;  %v11419_v35 = vld [vmem:[#allocation168_spill] sm:$0xff] }
 0x549   :  { %11408 = vst [vmem:[#allocation198_spill] sm:$0xff] %v9498_v34  ;;  %v2971_v31 = vrot.slane %v2057_v12, 1  ;;  %v11411_v53 = vcombine.low %v11409_v55, %v11410_v22  ;;  %v9513_v48 = vrot.slane %v4018_v26, %v11406_v60  ;;  %v9516_v54 = vrot.slane %v4050_v33, %v11406_v60  ;;  %v11415_v26 = vld [vmem:[#allocation113_spill] sm:$0xff]  ;;  %v11418_v33 = vld [vmem:[#allocation143_spill] sm:$0xff] }
 0x54a   :  { %v4081_v40 = vrot.slane %v4073_v27, %v11402_v24  ;;  %v4088_v20 = vrot.slane %v4074_v50, %v11402_v24  ;;  %v3523_v3 = vcombine.low %v11418_v33, %v11417_v17  ;;  %v4136_v12 = vrot.slane %v4122_v43, %v11402_v24 }
 0x54b   :  { %v4458_v38 = vmul.f32 %v4245_v30, %v11411_v53  ;;  %11412 = vst [vmem:[#allocation191_spill] sm:$0xff] %v9513_v48  ;;  %11413 = vst [vmem:[#allocation188_spill] sm:$0xff] %v9516_v54  ;;  %v2972_v15 = vsel %vm2173_vm10, %v2971_v31, %v2970_v9  ;;  %v2121_v59 = vpop.permute.xlu0 %2120  ;;  %v4253_v28 = vpop.permute.xlu1 %4252  ;;  %v11414_v9 = vld [vmem:[#allocation24_spill] sm:$0xff]  ;;  %v2493_v25 = vrot.slane %v11451_v47, 2  ;;  %v11456_v54 = vld [vmem:[#allocation171_spill] sm:$0xff] }
 0x54c   :  { %v4137_v7 = vcombine.low %v4081_v40, %v9480_v6  ;;  %v4138_v4 = vcombine.high %v4081_v40, %v9480_v6  ;;  %v4153_v14 = vcombine.low %v4088_v20, %v9483_v1  ;;  %v3027_v41 = vrot.slane %v2121_v59, 1  ;;  %v11420_v6 = vld [vmem:[#allocation164_spill] sm:$0xff]  ;;  %v11421_v40 = vld [vmem:[#allocation145_spill] sm:$0xff]  ;;  %v11424_v59 = vld [vmem:[#allocation31_spill] sm:$0xff] }
 0x54d   :  { %v4548_v32 = vsel %vm4513_vm11, %v4458_v38, 0.0  ;;  %v11416_v52 = vcombine.low %v11414_v9, %v11415_v26  ;;  %v3505_v56 = vcombine.low %v11420_v6, %v11419_v35  ;;  %v4154_v39 = vcombine.high %v4088_v20, %v9483_v1 }
 0x54e   :  { %v4549_v51 = vadd.f32 %v4548_v32, %v9260_v42  ;;  %v3026_v42 = vsel %vm2170_vm9, %v3025_v29, %v9373_v57  ;;  %v11422_v32 = vld [vmem:[#allocation147_spill] sm:$0xff]  ;;  %v2439_v48 = vrot.slane %v11456_v54, 1 }
 0x54f   :  { %v4460_v10 = vmul.f32 %v4253_v28, %v11416_v52  ;;  %v3028_v27 = vsel %vm2173_vm10, %v3027_v41, %v3026_v42  ;;  %v4241_v53 = vpop.permute.xlu0 %4240  ;;  %v4260_v38 = vpop.permute.xlu1 %4259  ;;  %v11423_v1 = vcombine.low %v11421_v40, %v11422_v32  ;;  %v11425_v28 = vld [vmem:[#allocation44_spill] sm:$0xff] }
 0x550   :  { %v4105_v31 = vcombine.low %v2972_v15, %v3028_v27  ;;  %v4106_v57 = vcombine.high %v2972_v15, %v3028_v27  ;;  %v11426_v41 = vcombine.low %v11424_v59, %v11425_v28  ;;  %v3660_v15 = vcombine.high %v11414_v9, %v11415_v26  ;;  %v11429_v27 = vld [vmem:[#allocation178_spill] sm:$0xff] }
 0x551   :  { %v4610_v50 = vsel %vm4513_vm11, %v4460_v10, 0.0  ;;  %v9553_v20 = vrot.slane %v11423_v1, %v11406_v60  ;;  %v11427_v10 = vcombine.high %v11409_v55, %v11410_v22  ;;  %v4129_v1 = vrot.slane %v4121_v45, %v11402_v24 }
 0x552   :  { %v4611_v29 = vadd.f32 %v4610_v50, %v9293_v62  ;;  %v4457_v52 = vmul.f32 %v4241_v53, %v11426_v41  ;;  %v11428_v62 = vld [vmem:[#allocation149_spill] sm:$0xff]  ;;  %v4113_v46 = vrot.slane %v4105_v31, %v11402_v24  ;;  %v4120_v53 = vrot.slane %v4106_v57, %v11402_v24 }
 0x553   :  { %v4462_v42 = vmul.f32 %v4260_v38, %v11427_v10  ;;  %v11430_v50 = vcombine.low %v11428_v62, %v11429_v27  ;;  %v9576_v9 = vrot.slane %v4137_v7, %v11406_v60  ;;  %v9579_v26 = vrot.slane %v4138_v4, %v11406_v60  ;;  %v4249_v45 = vpop.permute.xlu0 %4248  ;;  %v4268_v10 = vpop.permute.xlu1 %4267 }
 0x554   :  { %v4517_v55 = vsel %vm4513_vm11, %v4457_v52, 0.0  ;;  %v4169_v43 = vcombine.low %v4113_v46, %v4129_v1  ;;  %v4459_v31 = vmul.f32 %v4249_v45, %v3523_v3  ;;  %v4464_v61 = vmul.f32 %v4268_v10, %v3660_v15  ;;  %v11437_v45 = vld [vmem:[#allocation156_spill] sm:$0xff] }
 0x555   :  { %v9567_v30 = vrot.slane %v11430_v50, %v11406_v60  ;;  %v4550_v22 = vsel %vm4513_vm11, %v4462_v42, 0.0  ;;  %v4518_v38 = vadd.f32 %v4517_v55, %v9321_v16  ;;  %v4170_v50 = vcombine.high %v4113_v46, %v4129_v1 }
 0x556   :  { %v4551_v41 = vadd.f32 %v4550_v22, %v4549_v51  ;;  %v4185_v57 = vcombine.low %v4120_v53, %v4136_v12  ;;  %v4186_v8 = vcombine.high %v4120_v53, %v4136_v12  ;;  %v9583_v52 = vrot.slane %v4169_v43, %v11406_v60  ;;  %v11436_v22 = vld [vmem:[#allocation94_spill] sm:$0xff] }
 0x557   :  { %v9586_v7 = vrot.slane %v4170_v50, %v11406_v60  ;;  %v9589_v4 = vrot.slane %v4153_v14, %v11406_v60  ;;  %v9592_v16 = vrot.slane %v4154_v39, %v11406_v60  ;;  %v4579_v51 = vsel %vm4513_vm11, %v4459_v31, 0.0  ;;  %v4256_v1 = vpop.permute.xlu0 %4255  ;;  %v4275_v53 = vpop.permute.xlu1 %4274  ;;  %v11452_v14 = vld [vmem:[#allocation87_spill] sm:$0xff] }
 0x558   :  { %v4612_v46 = vsel %vm4513_vm11, %v4464_v61, 0.0  ;;  %v9597_v3 = vrot.slane %v4185_v57, %v11406_v60  ;;  %v9600_v12 = vrot.slane %v4186_v8, %v11406_v60  ;;  %v4580_v42 = vadd.f32 %v4579_v51, %v9353_v13  ;;  %v11446_v13 = vld [vmem:[#allocation90_spill] sm:$0xff] }
 0x559   :  { %11431 = vst [vmem:[#allocation192_spill] sm:$0xff] %v9589_v4  ;;  %11432 = vst [vmem:[#allocation196_spill] sm:$0xff] %v9592_v16  ;;  %v4613_v15 = vadd.f32 %v4612_v46, %v4611_v29  ;;  %v11435_v61 = vcombine.high %v11424_v59, %v11425_v28  ;;  %v11438_v10 = vcombine.low %v11436_v22, %v11437_v45  ;;  %v11440_v59 = vld [vmem:[#allocation50_spill] sm:$0xff] }
 0x55a   :  { %11433 = vst [vmem:[#allocation185_spill] sm:$0xff] %v9597_v3  ;;  %11434 = vst [vmem:[#allocation200_spill] sm:$0xff] %v9600_v12  ;;  %v3524_v51 = vcombine.high %v11418_v33, %v11417_v17  ;;  %v3661_v46 = vcombine.low %v9553_v20, %v9567_v30  ;;  %v11442_v28 = vcombine.low %v11440_v59, %v11441_v44  ;;  %v11457_v12 = vld [vmem:[#allocation173_spill] sm:$0xff]  ;;  %v11482_v3 = vld [vmem:[#allocation11_spill] sm:$0xff] }
 0x55b   :  { %v4461_v55 = vmul.f32 %v4256_v1, %v11435_v61  ;;  %v4466_v8 = vmul.f32 %v4275_v53, %v11438_v10  ;;  %v11439_v1 = vld [vmem:[#allocation128_spill] sm:$0xff]  ;;  %v4264_v50 = vpop.permute.xlu0 %4263  ;;  %v4283_v43 = vpop.permute.xlu1 %4282  ;;  %v3473_v39 = vcombine.low %v11447_v0, %v11446_v13 }
 0x55c   :  { %v2463_v53 = vrot.slane %v11439_v1, 3  ;;  %v3209_v29 = vrot.slane %v11442_v28, %v11406_v60  ;;  %v4463_v17 = vmul.f32 %v4264_v50, %v3524_v51  ;;  %v4468_v33 = vmul.f32 %v4283_v43, %v3661_v46  ;;  %v11448_v1 = vld [vmem:[#allocation179_spill] sm:$0xff]  ;;  %v11453_v51 = vld [vmem:[#allocation52_spill] sm:$0xff]  ;;  %v11454_v46 = vld [vmem:[#allocation174_spill] sm:$0xff] }
 0x55d   :  { %v4519_v31 = vsel %vm4513_vm11, %v4461_v55, 0.0  ;;  %v4552_v57 = vsel %vm4513_vm11, %v4466_v8, 0.0  ;;  %v11443_v55 = vld [vmem:[#allocation92_spill] sm:$0xff]  ;;  %v11445_v8 = vrot.slane %v11444_v11, 5  ;;  %v3390_v43 = vcombine.high %v11436_v22, %v11437_v45 }
 0x55e   :  { %v4520_v61 = vadd.f32 %v4519_v31, %v4518_v38  ;;  %v4553_v10 = vadd.f32 %v4552_v57, %v4551_v41  ;;  %v2491_v38 = vrot.slane %v11448_v1, 3  ;;  %v11449_v41 = vld [vmem:[#allocation184_spill] sm:$0xff]  ;;  %v3253_v28 = vcombine.low %v3209_v29, %v11452_v14 }
 0x55f   :  { %v2488_v58 = vsel %vm2161_vm6, %v11445_v8, %v11443_v55  ;;  %v11450_v31 = vrot.slane %v11449_v41, 4  ;;  %v4581_v63 = vsel %vm4513_vm11, %v4463_v17, 0.0  ;;  %v4614_v11 = vsel %vm4513_vm11, %v4468_v33, 0.0  ;;  %v4271_v17 = vpop.permute.xlu0 %4270  ;;  %v4290_v1 = vpop.permute.xlu1 %4289 }
 0x560   :  { %v9656_v50 = vrot.slane %v3505_v56, %v11406_v60  ;;  %v2465_v47 = vrot.slane %v11454_v46, 2  ;;  %v4582_v55 = vadd.f32 %v4581_v63, %v4580_v42  ;;  %v9661_v8 = vadd.f32 %v4614_v11, %v4613_v15  ;;  %v11458_v63 = vld [vmem:[#allocation181_spill] sm:$0xff] }
 0x561   :  { %v2490_v57 = vsel %vm2164_vm7, %v11450_v31, %v2488_v58  ;;  %v2464_v58 = vsel %vm2167_vm8, %v2463_v53, %v11453_v51  ;;  %v4465_v41 = vmul.f32 %v4271_v17, %v3253_v28  ;;  %v4470_v22 = vmul.f32 %v4290_v1, %v3390_v43  ;;  %v11455_v31 = vld [vmem:[#allocation170_spill] sm:$0xff] }
 0x562   :  { %v2492_v33 = vsel %vm2167_vm8, %v2491_v38, %v2490_v57  ;;  %v9665_v45 = vrot.slane %v3473_v39, %v11406_v60  ;;  %v2437_v56 = vrot.slane %v11455_v31, 2  ;;  %v2467_v53 = vrot.slane %v11457_v12, 1  ;;  %v11459_v57 = vld [vmem:[#allocation166_spill] sm:$0xff] }
 0x563   :  { %v2494_v51 = vsel %vm2170_vm9, %v2493_v25, %v2492_v33  ;;  %v2495_v42 = vrot.slane %v11458_v63, 1  ;;  %v4521_v15 = vsel %vm4513_vm11, %v4465_v41, 0.0  ;;  %v4554_v11 = vsel %vm4513_vm11, %v4470_v22, 0.0  ;;  %v4279_v54 = vpop.permute.xlu0 %4278  ;;  %v9680_v12 = vpop.permute.xlu1 %4297  ;;  %v11460_v25 = vld [vmem:[#allocation36_spill] sm:$0xff]  ;;  %v11461_v17 = vld [vmem:[#allocation126_spill] sm:$0xff]  ;;  %v11463_v41 = vld [vmem:[#allocation169_spill] sm:$0xff] }
 0x564   :  { %v3525_v38 = vcombine.low %v9665_v45, %v9656_v50  ;;  %v2409_v39 = vrot.slane %v11459_v57, 2  ;;  %v2466_v28 = vsel %vm2170_vm9, %v2465_v47, %v2464_v58  ;;  %v4522_v43 = vadd.f32 %v4521_v15, %v4520_v61  ;;  %v11464_v57 = vld [vmem:[#allocation53_spill] sm:$0xff]  ;;  %v11465_v58 = vld [vmem:[#allocation30_spill] sm:$0xff]  ;;  %v11466_v61 = vld [vmem:[#allocation124_spill] sm:$0xff] }
 0x565   :  { %v9678_v46 = vadd.f32 %v4554_v11, %v4553_v10  ;;  %v11462_v1 = vrot.slane %v11461_v17, 3  ;;  %v2411_v22 = vrot.slane %v11463_v41, 1  ;;  %v9688_v31 = vsel %vm2173_vm10, %v2495_v42, %v2494_v51  ;;  %v11468_v42 = vld [vmem:[#allocation125_spill] sm:$0xff] }
 0x566   :  { %v4467_v63 = vmul.f32 %v4279_v54, %v3525_v38  ;;  %v2315_v16 = vrot.slane %v11464_v57, 7  ;;  %v11467_v10 = vrot.slane %v11466_v61, 3  ;;  %v3254_v11 = vcombine.high %v3209_v29, %v11452_v14  ;;  %v11469_v38 = vld [vmem:[#allocation121_spill] sm:$0xff]  ;;  %v11471_v29 = vld [vmem:[#allocation55_spill] sm:$0xff]  ;;  %v11473_v61 = vld [vmem:[#allocation84_spill] sm:$0xff] }
 0x567   :  { %v2436_v33 = vsel %vm2167_vm8, %v11462_v1, %v11460_v25  ;;  %v9701_v25 = vsel %vm2173_vm10, %v2467_v53, %v2466_v28  ;;  %v3370_v54 = vcombine.high %v11469_v38, %v11468_v42  ;;  %v11470_v1 = vld [vmem:[#allocation54_spill] sm:$0xff]  ;;  %v4286_v14 = vpop.permute.xlu0 %4285  ;;  %v11475_v38 = vld [vmem:[#allocation57_spill] sm:$0xff] }
 0x568   :  { %v2408_v47 = vsel %vm2167_vm8, %v11467_v10, %v11465_v58  ;;  %v2438_v15 = vsel %vm2170_vm9, %v2437_v56, %v2436_v33  ;;  %v4583_v51 = vsel %vm4513_vm11, %v4467_v63, 0.0  ;;  %v2261_v41 = vrot.slane %v11470_v1, 6  ;;  %v11472_v63 = vld [vmem:[#allocation80_spill] sm:$0xff] }
 0x569   :  { %v9698_v17 = vsel %vm2173_vm10, %v2439_v48, %v2438_v15  ;;  %v2410_v57 = vsel %vm2170_vm9, %v2409_v39, %v2408_v47  ;;  %v9710_v33 = vadd.f32 %v4583_v51, %v4582_v55  ;;  %v4305_v48 = vpop.permute.xlu1 %4304  ;;  %v2343_v58 = vrot.slane %v11471_v29, 7  ;;  %v11474_v15 = vld [vmem:[#allocation56_spill] sm:$0xff]  ;;  %v11476_v47 = vld [vmem:[#allocation58_spill] sm:$0xff] }
 0x56a   :  { %v3817_v56 = vcombine.low %v9698_v17, %v9688_v31  ;;  %v9714_v53 = vsel %vm2173_vm10, %v2411_v22, %v2410_v57  ;;  %v4469_v28 = vmul.f32 %v4286_v14, %v3254_v11  ;;  %v3338_v10 = vcombine.high %v11473_v61, %v11472_v63  ;;  %v11477_v51 = vld [vmem:[#allocation60_spill] sm:$0xff]  ;;  %v11478_v57 = vld [vmem:[#allocation62_spill] sm:$0xff] }
 0x56b   :  { %v2289_v42 = vrot.slane %v11474_v15, 6  ;;  %v2371_v39 = vrot.slane %v11475_v38, 7  ;;  %v2317_v1 = vrot.slane %v11476_v47, 6  ;;  %v3801_v55 = vcombine.low %v9714_v53, %v9701_v25  ;;  %v11479_v63 = vld [vmem:[#allocation66_spill] sm:$0xff]  ;;  %v9732_v38 = vpop.permute.xlu0 %4293 }
 0x56c   :  { %v2345_v34 = vrot.slane %v11477_v51, 6  ;;  %v4523_v29 = vsel %vm4513_vm11, %v4469_v28, 0.0  ;;  %v3384_v22 = vrot.slane %v3370_v54, %v11406_v60  ;;  %v3642_v11 = vcombine.high %v11428_v62, %v11429_v27  ;;  %v11481_v51 = vld [vmem:[#allocation37_spill] sm:$0xff] }
 0x56d   :  { %v2373_v14 = vrot.slane %v11478_v57, 6  ;;  %v2207_v61 = vrot.slane %v11479_v63, 5  ;;  %v9730_v15 = vadd.f32 %v4523_v29, %v4522_v43  ;;  %v4313_v47 = vpop.permute.xlu1 %4312  ;;  %v9735_v37 = vrot.slane %v3817_v56, %v11402_v24  ;;  %v11483_v57 = vld [vmem:[#allocation39_spill] sm:$0xff]  ;;  %v11484_v29 = vld [vmem:[#allocation13_spill] sm:$0xff] }
 0x56e   :  { %v2316_v28 = vsel %vm2155_vm4, %v2315_v16, %v11481_v51  ;;  %v2262_v54 = vsel %vm2158_vm5, %v2261_v41, %v11482_v3  ;;  %v3352_v62 = vrot.slane %v3338_v10, %v11406_v60  ;;  %v3610_v27 = vcombine.high %v11421_v40, %v11422_v32  ;;  %v11486_v32 = vld [vmem:[#allocation12_spill] sm:$0xff] }
 0x56f   :  { %11480 = vst [vmem:[#allocation193_spill] sm:$0xff] %v9730_v15  ;;  %v2344_v43 = vsel %vm2155_vm4, %v2343_v58, %v11483_v57  ;;  %v2290_v63 = vsel %vm2158_vm5, %v2289_v42, %v11484_v29  ;;  %v11485_v15 = vld [vmem:[#allocation41_spill] sm:$0xff]  ;;  %v9751_v4 = vrot.slane %v3801_v55, %v11402_v24  ;;  %v2318_v16 = vsel %vm2158_vm5, %v2317_v1, %v2316_v28  ;;  %v11487_v42 = vld [vmem:[#allocation68_spill] sm:$0xff]  ;;  %v9762_v57 = vpop.permute.xlu0 %4300 }
 0x570   :  { %v2372_v56 = vsel %vm2155_vm4, %v2371_v39, %v11485_v15  ;;  %v2346_v3 = vsel %vm2158_vm5, %v2345_v34, %v2344_v43  ;;  %v3391_v41 = vcombine.low %v3352_v62, %v3384_v22  ;;  %v3656_v10 = vrot.slane %v3642_v11, %v11406_v60  ;;  %11488 = vst [vmem:[#allocation194_spill] sm:$0xff] %v9762_v57  ;;  %v11490_v43 = vld [vmem:[#allocation71_spill] sm:$0xff]  ;;  %v11491_v29 = vld [vmem:[#allocation73_spill] sm:$0xff] }
 0x571   :  { %v2374_v40 = vsel %vm2158_vm5, %v2373_v14, %v2372_v56  ;;  %v9759_v58 = vsel %vm2161_vm6, %v2207_v61, %v11486_v32  ;;  %v2235_v51 = vrot.slane %v11487_v42, 5  ;;  %v4320_v39 = vpop.permute.xlu1 %4319  ;;  %v3865_v55 = vcombine.low %v9751_v4, %v9735_v37  ;;  %v11489_v14 = vld [vmem:[#allocation69_spill] sm:$0xff] }
 0x572   :  { %v3662_v34 = vcombine.high %v9553_v20, %v9567_v30  ;;  %v4474_v1 = vmul.f32 %v4305_v48, %v3391_v41  ;;  %v3624_v11 = vrot.slane %v3610_v27, %v11406_v60  ;;  %v3392_v15 = vcombine.high %v3352_v62, %v3384_v22  ;;  %v11493_v48 = vld [vmem:[#allocation17_spill] sm:$0xff]  ;;  %v11494_v62 = vld [vmem:[#allocation75_spill] sm:$0xff]  ;;  %v11495_v41 = vld [vmem:[#allocation78_spill] sm:$0xff] }
 0x573   :  { %v2263_v28 = vrot.slane %v11489_v14, 5  ;;  %v2291_v61 = vrot.slane %v11490_v43, 5  ;;  %v2319_v56 = vrot.slane %v11491_v29, 5  ;;  %v3506_v32 = vcombine.high %v11420_v6, %v11419_v35  ;;  %v4309_v43 = vpop.permute.xlu0 %4308 }
 0x574   :  { %v4472_v42 = vmul.f32 %v9680_v12, %v3662_v34  ;;  %v3663_v57 = vcombine.low %v3624_v11, %v3656_v10  ;;  %v4478_v59 = vmul.f32 %v4320_v39, %v3392_v15  ;;  %v11492_v30 = vcombine.low %v9398_v2, %v9401_v5 }
 0x575   :  { %v2236_v22 = vsel %vm2161_vm6, %v2235_v51, %v11493_v48  ;;  %v2347_v27 = vrot.slane %v11494_v62, 5  ;;  %v2375_v14 = vrot.slane %v11495_v41, 5  ;;  %v4328_v29 = vpop.permute.xlu1 %4327  ;;  %v3873_v35 = vrot.slane %v3865_v55, %v11406_v60 }
 0x576   :  { %v9779_v20 = vrot.slane %v11492_v30, %v11406_v60  ;;  %v4556_v6 = vsel %vm4513_vm11, %v4474_v1, 0.0  ;;  %v4476_v12 = vmul.f32 %v4313_v47, %v3663_v57  ;;  %v3474_v39 = vcombine.high %v11447_v0, %v11446_v13  ;;  %v11496_v13 = vld [vmem:[#allocation95_spill] sm:$0xff] }
 0x577   :  { %v3664_v34 = vcombine.high %v3624_v11, %v3656_v10  ;;  %v2264_v15 = vsel %vm2161_vm6, %v2263_v28, %v2262_v54  ;;  %v2292_v30 = vsel %vm2161_vm6, %v2291_v61, %v2290_v63  ;;  %v2320_v51 = vsel %vm2161_vm6, %v2319_v56, %v2318_v16  ;;  %v9800_v63 = vpop.permute.xlu0 %4315  ;;  %v11497_v61 = vld [vmem:[#allocation98_spill] sm:$0xff] }
 0x578   :  { %v3520_v48 = vrot.slane %v3506_v32, %v11406_v60  ;;  %v4616_v62 = vsel %vm4513_vm11, %v4472_v42, 0.0  ;;  %v4558_v41 = vsel %vm4513_vm11, %v4478_v59, 0.0  ;;  %v3929_v1 = vcombine.low %v3873_v35, %v9779_v20 }
 0x579   :  { %v4480_v55 = vmul.f32 %v4328_v29, %v3664_v34  ;;  %v2348_v47 = vsel %vm2161_vm6, %v2347_v27, %v2346_v3  ;;  %v2376_v0 = vsel %vm2161_vm6, %v2375_v14, %v2374_v40  ;;  %v2209_v10 = vrot.slane %v11496_v13, 4  ;;  %v4335_v16 = vpop.permute.xlu1 %4334  ;;  %v11498_v3 = vld [vmem:[#allocation100_spill] sm:$0xff] }
 0x57a   :  { %v4557_v54 = vadd.f32 %v4556_v6, %v9678_v46  ;;  %v3526_v57 = vcombine.high %v9665_v45, %v9656_v50  ;;  %v4618_v11 = vsel %vm4513_vm11, %v4476_v12, 0.0  ;;  %v3488_v59 = vrot.slane %v3474_v39, %v11406_v60  ;;  %v11499_v50 = vld [vmem:[#allocation102_spill] sm:$0xff]  ;;  %v11500_v6 = vld [vmem:[#allocation104_spill] sm:$0xff] }
 0x57b   :  { %v4482_v28 = vmul.f32 %v4335_v16, %v3929_v1  ;;  %v2237_v56 = vrot.slane %v11497_v61, 4  ;;  %v2265_v32 = vrot.slane %v11498_v3, 4  ;;  %v4617_v40 = vadd.f32 %v4616_v62, %v9661_v8  ;;  %v4324_v1 = vpop.permute.xlu0 %4323  ;;  %v11501_v16 = vld [vmem:[#allocation106_spill] sm:$0xff] }
 0x57c   :  { %v4559_v42 = vadd.f32 %v4558_v41, %v4557_v54  ;;  %v4471_v46 = vmul.f32 %v9732_v38, %v3526_v57  ;;  %v3527_v27 = vcombine.low %v3488_v59, %v3520_v48  ;;  %v4620_v14 = vsel %vm4513_vm11, %v4480_v55, 0.0  ;;  %v11503_v54 = vld [vmem:[#allocation107_spill] sm:$0xff] }
 0x57d   :  { %v4560_v29 = vsel %vm4513_vm11, %v4482_v28, 0.0  ;;  %v2293_v45 = vrot.slane %v11499_v50, 4  ;;  %v2321_v12 = vrot.slane %v11500_v6, 4  ;;  %v4619_v39 = vadd.f32 %v4618_v11, %v4617_v40  ;;  %v4343_v13 = vpop.permute.xlu1 %4342  ;;  %v11506_v50 = vld [vmem:[#allocation114_spill] sm:$0xff] }
 0x57e   :  { %v4561_v34 = vadd.f32 %v4560_v29, %v4559_v42  ;;  %v2349_v61 = vrot.slane %v11501_v16, 4  ;;  %v4475_v3 = vmul.f32 %v4309_v43, %v3527_v27  ;;  %v3528_v8 = vcombine.high %v3488_v59, %v3520_v48 }
 0x57f   :  { %v11502_v38 = vcombine.low %v9576_v9, %v9583_v52  ;;  %v2210_v41 = vsel %vm2164_vm7, %v2209_v10, %v9759_v58  ;;  %v2238_v55 = vsel %vm2164_vm7, %v2237_v56, %v2236_v22  ;;  %v2377_v57 = vrot.slane %v11503_v54, 4  ;;  %v9828_v58 = vpop.permute.xlu0 %4330 }
 0x580   :  { %v4621_v28 = vadd.f32 %v4620_v14, %v4619_v39  ;;  %v4585_v11 = vsel %vm4513_vm11, %v4471_v46, 0.0  ;;  %v4479_v40 = vmul.f32 %v4324_v1, %v3528_v8  ;;  %v3930_v43 = vcombine.high %v3873_v35, %v9779_v20  ;;  %v11504_v35 = vld [vmem:[#allocation110_spill] sm:$0xff] }
 0x581   :  { %v4484_v62 = vmul.f32 %v4343_v13, %v11502_v38  ;;  %v2266_v48 = vsel %vm2164_vm7, %v2265_v32, %v2264_v15  ;;  %v2294_v59 = vsel %vm2164_vm7, %v2293_v45, %v2292_v30  ;;  %v2322_v27 = vsel %vm2164_vm7, %v2321_v12, %v2320_v51  ;;  %v4350_v22 = vpop.permute.xlu1 %4349  ;;  %v11505_v32 = vld [vmem:[#allocation112_spill] sm:$0xff] }
 0x582   :  { %v2350_v10 = vsel %vm2164_vm7, %v2349_v61, %v2348_v47  ;;  %v4587_v56 = vsel %vm4513_vm11, %v4475_v3, 0.0  ;;  %v4486_v46 = vmul.f32 %v4350_v22, %v3930_v43  ;;  %v3866_v14 = vcombine.high %v9751_v4, %v9735_v37  ;;  %v11508_v37 = vld [vmem:[#allocation116_spill] sm:$0xff]  ;;  %v11516_v22 = vld [vmem:[#allocation146_spill] sm:$0xff] }
 0x583   :  { %v4622_v42 = vsel %vm4513_vm11, %v4484_v62, 0.0  ;;  %v2378_v20 = vsel %vm2164_vm7, %v2377_v57, %v2376_v0  ;;  %v2211_v15 = vrot.slane %v11504_v35, 3  ;;  %v2239_v30 = vrot.slane %v11505_v32, 3  ;;  %v11509_v0 = vld [vmem:[#allocation118_spill] sm:$0xff]  ;;  %v4339_v61 = vpop.permute.xlu0 %4338  ;;  %v11510_v3 = vld [vmem:[#allocation120_spill] sm:$0xff] }
 0x584   :  { %v4623_v29 = vadd.f32 %v4622_v42, %v4621_v28  ;;  %v4586_v51 = vadd.f32 %v4585_v11, %v9710_v33  ;;  %v2267_v45 = vrot.slane %v11506_v50, 3  ;;  %v4589_v6 = vsel %vm4513_vm11, %v4479_v40, 0.0  ;;  %v11513_v57 = vld [vmem:[#allocation122_spill] sm:$0xff] }
 0x585   :  { %v4562_v47 = vsel %vm4513_vm11, %v4486_v46, 0.0  ;;  %v11507_v12 = vcombine.high %v9398_v2, %v9401_v5  ;;  %v2295_v4 = vrot.slane %v11508_v37, 3  ;;  %v2323_v1 = vrot.slane %v11509_v0, 3  ;;  %v4358_v33 = vpop.permute.xlu1 %4357  ;;  %v11514_v11 = vld [vmem:[#allocation138_spill] sm:$0xff] }
 0x586   :  { %v4588_v13 = vadd.f32 %v4587_v56, %v4586_v51  ;;  %v4563_v16 = vadd.f32 %v4562_v47, %v4561_v34  ;;  %v2351_v8 = vrot.slane %v11510_v3, 3  ;;  %v11511_v38 = vcombine.low %v9474_v36, %v9487_v49  ;;  %v11515_v42 = vld [vmem:[#allocation142_spill] sm:$0xff] }
 0x587   :  { %v9845_v39 = vrot.slane %v11507_v12, %v11406_v60  ;;  %v11512_v54 = vcombine.high %v9576_v9, %v9583_v52  ;;  %v3880_v5 = vrot.slane %v3866_v14, %v11406_v60  ;;  %v2379_v28 = vrot.slane %v11513_v57, 3  ;;  %v9866_v50 = vpop.permute.xlu0 %4345  ;;  %v11524_v57 = vld [vmem:[#allocation158_spill] sm:$0xff] }
 0x588   :  { %v4483_v62 = vmul.f32 %v4339_v61, %v11511_v38  ;;  %v2213_v40 = vrot.slane %v11514_v11, 2  ;;  %v2241_v34 = vrot.slane %v11515_v42, 2  ;;  %v4590_v43 = vadd.f32 %v4589_v6, %v4588_v13 }
 0x589   :  { %v4488_v2 = vmul.f32 %v4358_v33, %v11512_v54  ;;  %v2269_v56 = vrot.slane %v11516_v22, 2  ;;  %v3931_v32 = vcombine.low %v3880_v5, %v9845_v39  ;;  %v2212_v9 = vsel %vm2167_vm8, %v2211_v15, %v2210_v41  ;;  %v4365_v47 = vpop.permute.xlu1 %4364  ;;  %v11520_v33 = vld [vmem:[#allocation162_spill] sm:$0xff]  ;;  %v11523_v54 = vld [vmem:[#allocation157_spill] sm:$0xff]  ;;  %v11527_v22 = vld [vmem:[#allocation163_spill] sm:$0xff] }
 0x58a   :  { %v4591_v46 = vsel %vm4513_vm11, %v4483_v62, 0.0  ;;  %v2240_v52 = vsel %vm2167_vm8, %v2239_v30, %v2238_v55  ;;  %v2268_v12 = vsel %vm2167_vm8, %v2267_v45, %v2266_v48  ;;  %v2296_v6 = vsel %vm2167_vm8, %v2295_v4, %v2294_v59  ;;  %v11517_v30 = vld [vmem:[#allocation150_spill] sm:$0xff] }
 0x58b   :  { %v4624_v35 = vsel %vm4513_vm11, %v4488_v2, 0.0  ;;  %v4592_v14 = vadd.f32 %v4591_v46, %v4590_v43  ;;  %v3818_v37 = vcombine.high %v9698_v17, %v9688_v31  ;;  %v4490_v0 = vmul.f32 %v4365_v47, %v3931_v32  ;;  %v11518_v17 = vld [vmem:[#allocation154_spill] sm:$0xff]  ;;  %v11528_v46 = vld [vmem:[#allocation165_spill] sm:$0xff] }
 0x58c   :  { %v4625_v51 = vadd.f32 %v4624_v35, %v4623_v29  ;;  %v2324_v13 = vsel %vm2167_vm8, %v2323_v1, %v2322_v27  ;;  %v2352_v61 = vsel %vm2167_vm8, %v2351_v8, %v2350_v10  ;;  %v2380_v41 = vsel %vm2167_vm8, %v2379_v28, %v2378_v20  ;;  %v11519_v27 = vld [vmem:[#allocation155_spill] sm:$0xff]  ;;  %v4354_v1 = vpop.permute.xlu0 %4353 }
 0x58d   :  { %v2214_v55 = vsel %vm2170_vm9, %v2213_v40, %v2212_v9  ;;  %v2242_v29 = vsel %vm2170_vm9, %v2241_v34, %v2240_v52  ;;  %v2270_v15 = vsel %vm2170_vm9, %v2269_v56, %v2268_v12  ;;  %v3802_v48 = vcombine.high %v9714_v53, %v9701_v25  ;;  %v4373_v20 = vpop.permute.xlu1 %4372  ;;  %v11526_v40 = vld [vmem:[#allocation167_spill] sm:$0xff] }
 0x58e   :  { %v4564_v59 = vsel %vm4513_vm11, %v4490_v0, 0.0  ;;  %v2297_v31 = vrot.slane %v11517_v30, 2  ;;  %v2325_v45 = vrot.slane %v11518_v17, 2  ;;  %v2215_v4 = vrot.slane %v11519_v27, 1 }
 0x58f   :  { %v4565_v10 = vadd.f32 %v4564_v59, %v4563_v16  ;;  %v2381_v3 = vrot.slane %v11520_v33, 2  ;;  %v11521_v8 = vcombine.high %v9474_v36, %v9487_v49  ;;  %v11522_v25 = vcombine.low %v9579_v26, %v9586_v7  ;;  %v11525_v16 = vld [vmem:[#allocation159_spill] sm:$0xff]  ;;  %v11529_v59 = vld [vmem:[#allocation161_spill] sm:$0xff] }
 0x590   :  { %v9892_v62 = vrot.slane %v3818_v37, %v11402_v24  ;;  %v2243_v2 = vrot.slane %v11523_v54, 1  ;;  %v2353_v28 = vrot.slane %v11524_v57, 2  ;;  %v2271_v11 = vrot.slane %v11525_v16, 1  ;;  %v9906_v52 = vpop.permute.xlu0 %4360 }
 0x591   :  { %v4487_v38 = vmul.f32 %v4354_v1, %v11521_v8  ;;  %v4492_v53 = vmul.f32 %v4373_v20, %v11522_v25  ;;  %v2383_v42 = vrot.slane %v11526_v40, 1  ;;  %v3932_v49 = vcombine.high %v3880_v5, %v9845_v39  ;;  %v4380_v47 = vpop.permute.xlu1 %4379 }
 0x592   :  { %v9902_v43 = vrot.slane %v3802_v48, %v11402_v24  ;;  %v2327_v56 = vrot.slane %v11527_v22, 1  ;;  %v2355_v35 = vrot.slane %v11528_v46, 1  ;;  %v2298_v12 = vsel %vm2170_vm9, %v2297_v31, %v2296_v6  ;;  %v11538_v46 = vld [vmem:[#allocation50_spill] sm:$0xff] }
 0x593   :  { %v4593_v34 = vsel %vm4513_vm11, %v4487_v38, 0.0  ;;  %v4626_v36 = vsel %vm4513_vm11, %v4492_v53, 0.0  ;;  %v2382_v37 = vsel %vm2170_vm9, %v2381_v3, %v2380_v41  ;;  %v4494_v0 = vmul.f32 %v4380_v47, %v3932_v49  ;;  %v11533_v38 = vld [vmem:[#allocation332_spill] sm:$0xff] }
 0x594   :  { %v4594_v32 = vadd.f32 %v4593_v34, %v4592_v14  ;;  %v4627_v9 = vadd.f32 %v4626_v36, %v4625_v51  ;;  %v3881_v39 = vcombine.low %v9902_v43, %v9892_v62  ;;  %v2326_v5 = vsel %vm2170_vm9, %v2325_v45, %v2324_v13  ;;  %v11536_v34 = vld [vmem:[#allocation33_spill] sm:$0xff]  ;;  %v11537_v36 = vld [vmem:[#allocation63_spill] sm:$0xff] }
 0x595   :  { %v9914_v48 = vsel %vm2173_vm10, %v2215_v4, %v2214_v55  ;;  %v2299_v30 = vrot.slane %v11529_v59, 1  ;;  %v2384_v14 = vsel %vm2173_vm10, %v2383_v42, %v2382_v37  ;;  %v2354_v51 = vsel %vm2170_vm9, %v2353_v28, %v2352_v61  ;;  %v4369_v4 = vpop.permute.xlu0 %4368  ;;  %v4388_v1 = vpop.permute.xlu1 %4387 }
 0x596   :  { %v2272_v17 = vsel %vm2173_vm10, %v2271_v11, %v2270_v15  ;;  %v4566_v6 = vsel %vm4513_vm11, %v4494_v0, 0.0  ;;  %v11530_v41 = vcombine.low %v9414_v19, %v9406_v21  ;;  %v2244_v13 = vsel %vm2173_vm10, %v2243_v2, %v2242_v29  ;;  %v11534_v29 = vld [vmem:[#allocation96_spill] sm:$0xff] }
 0x597   :  { %v2328_v55 = vsel %vm2173_vm10, %v2327_v56, %v2326_v5  ;;  %v2356_v45 = vsel %vm2173_vm10, %v2355_v35, %v2354_v51  ;;  %v4567_v27 = vadd.f32 %v4566_v6, %v4565_v10  ;;  %v11531_v61 = vcombine.low %v9477_v18, %v9495_v23 }
 0x598   :  { %v3921_v31 = vrot.slane %v11530_v41, %v11406_v60  ;;  %v3713_v20 = vcombine.low %v2328_v55, %v2384_v14  ;;  %v11532_v33 = vcombine.high %v9579_v26, %v9586_v7  ;;  %v3889_v8 = vrot.slane %v3881_v39, %v11406_v60  ;;  %v11540_v41 = vld [vmem:[#allocation192_spill] sm:$0xff] }
 0x599   :  { %v4491_v15 = vmul.f32 %v4369_v4, %v11531_v61  ;;  %v11535_v25 = vrot.slane %v11534_v29, 1  ;;  %v3681_v10 = vcombine.low %v9914_v48, %v2272_v17  ;;  %v2300_v54 = vsel %vm2173_vm10, %v2299_v30, %v2298_v12  ;;  %v9943_v40 = vpop.permute.xlu0 %4375  ;;  %v4395_v42 = vpop.permute.xlu1 %4394  ;;  %v11541_v4 = vld [vmem:[#allocation185_spill] sm:$0xff] }
 0x59a   :  { %v4496_v3 = vmul.f32 %v4388_v1, %v11532_v33  ;;  %v3697_v2 = vcombine.low %v2300_v54, %v2356_v45  ;;  %v3933_v16 = vcombine.low %v3889_v8, %v3921_v31  ;;  %v3234_v49 = vcombine.high %v11537_v36, %v11536_v34 }
 0x59b   :  { %v2188_v53 = vsel %vm2173_vm10, %v11535_v25, %v11533_v38  ;;  %v4595_v57 = vsel %vm4513_vm11, %v4491_v15, 0.0  ;;  %v3721_v22 = vrot.slane %v3713_v20, %v11402_v24  ;;  %v3202_v35 = vcombine.high %v11538_v46, %v11441_v44 }
 0x59c   :  { %v4628_v28 = vsel %vm4513_vm11, %v4496_v3, 0.0  ;;  %v3665_v11 = vcombine.low %v2188_v53, %v2244_v13  ;;  %v4596_v26 = vadd.f32 %v4595_v57, %v4594_v32  ;;  %v4498_v56 = vmul.f32 %v4395_v42, %v3933_v16 }
 0x59d   :  { %v4629_v7 = vadd.f32 %v4628_v28, %v4627_v9  ;;  %v3689_v47 = vrot.slane %v3681_v10, %v11402_v24  ;;  %v3714_v12 = vcombine.high %v2328_v55, %v2384_v14  ;;  %v3705_v37 = vrot.slane %v3697_v2, %v11402_v24  ;;  %v4384_v5 = vpop.permute.xlu0 %4383  ;;  %v4403_v59 = vpop.permute.xlu1 %4402  ;;  %v11544_v28 = vld [vmem:[#allocation194_spill] sm:$0xff] }
 0x59e   :  { %v4568_v32 = vsel %vm4513_vm11, %v4498_v56, 0.0  ;;  %v3666_v9 = vcombine.high %v2188_v53, %v2244_v13  ;;  %v3673_v0 = vrot.slane %v3665_v11, %v11402_v24  ;;  %v3248_v30 = vrot.slane %v3234_v49, %v11406_v60 }
 0x59f   :  { %v4569_v39 = vadd.f32 %v4568_v32, %v4567_v27  ;;  %v3761_v51 = vcombine.low %v3705_v37, %v3721_v22  ;;  %v11539_v6 = vcombine.high %v9477_v18, %v9495_v23  ;;  %v11542_v14 = vcombine.low %v11540_v41, %v11541_v4 }
 0x5a0   :  { %v3682_v1 = vcombine.high %v9914_v48, %v2272_v17  ;;  %v3698_v20 = vcombine.high %v2300_v54, %v2356_v45  ;;  %v3216_v13 = vrot.slane %v3202_v35, %v11406_v60  ;;  %v3729_v61 = vcombine.low %v3673_v0, %v3689_v47 }
 0x5a1   :  { %v4495_v44 = vmul.f32 %v4384_v5, %v11539_v6  ;;  %v4500_v55 = vmul.f32 %v4403_v59, %v11542_v14  ;;  %v3728_v33 = vrot.slane %v3714_v12, %v11402_v24  ;;  %v3934_v3 = vcombine.high %v3889_v8, %v3921_v31  ;;  %v9966_v29 = vpop.permute.xlu0 %4390  ;;  %v4410_v25 = vpop.permute.xlu1 %4409 }
 0x5a2   :  { %v3762_v38 = vcombine.high %v3705_v37, %v3721_v22  ;;  %v3882_v48 = vcombine.high %v9902_v43, %v9892_v62  ;;  %v3255_v17 = vcombine.low %v3216_v13, %v3248_v30  ;;  %v3769_v45 = vrot.slane %v3761_v51, %v11406_v60  ;;  %v11546_v22 = vld [vmem:[#allocation198_spill] sm:$0xff] }
 0x5a3   :  { %v4597_v27 = vsel %vm4513_vm11, %v4495_v44, 0.0  ;;  %v4630_v15 = vsel %vm4513_vm11, %v4500_v55, 0.0  ;;  %v3680_v53 = vrot.slane %v3666_v9, %v11402_v24  ;;  %v4502_v10 = vmul.f32 %v4410_v25, %v3934_v3 }
 0x5a4   :  { %v4598_v18 = vadd.f32 %v4597_v27, %v4596_v26  ;;  %v4631_v23 = vadd.f32 %v4630_v15, %v4629_v7  ;;  %v3730_v54 = vcombine.high %v3673_v0, %v3689_v47  ;;  %v3696_v2 = vrot.slane %v3682_v1, %v11402_v24 }
 0x5a5   :  { %v3712_v31 = vrot.slane %v3698_v20, %v11402_v24  ;;  %v11543_v8 = vcombine.high %v9414_v19, %v9406_v21  ;;  %v4473_v16 = vmul.f32 %v11544_v28, %v3255_v17  ;;  %v3256_v62 = vcombine.high %v3216_v13, %v3248_v30  ;;  %v4399_v34 = vpop.permute.xlu0 %4398  ;;  %v4418_v36 = vpop.permute.xlu1 %4417  ;;  %v11545_v19 = vld [vmem:[#allocation183_spill] sm:$0xff]  ;;  %v11549_v20 = vld [vmem:[#allocation193_spill] sm:$0xff] }
 0x5a6   :  { %v3737_v43 = vrot.slane %v3729_v61, %v11406_v60  ;;  %v4570_v11 = vsel %vm4513_vm11, %v4502_v10, 0.0  ;;  %v3776_v26 = vrot.slane %v3762_v38, %v11406_v60  ;;  %v3896_v24 = vrot.slane %v3882_v48, %v11406_v60 }
 0x5a7   :  { %v9978_v57 = vrot.slane %v11543_v8, %v11406_v60  ;;  %v3777_v7 = vcombine.low %v3712_v31, %v3728_v33  ;;  %v4571_v42 = vadd.f32 %v4570_v11, %v4569_v39  ;;  %v4477_v49 = vmul.f32 %v9800_v63, %v3256_v62 }
 0x5a8   :  { %v3793_v21 = vcombine.low %v3737_v43, %v3769_v45  ;;  %v11547_v56 = vcombine.low %v11545_v19, %v11546_v22  ;;  %v11548_v35 = vcombine.high %v11540_v41, %v11541_v4  ;;  %v3794_v12 = vcombine.high %v3737_v43, %v3769_v45 }
 0x5a9   :  { %v3744_v37 = vrot.slane %v3730_v54, %v11406_v60  ;;  %v3745_v32 = vcombine.low %v3680_v53, %v3696_v2  ;;  %v3935_v9 = vcombine.low %v3896_v24, %v9978_v57  ;;  %v4525_v0 = vsel %vm4513_vm11, %v4473_v16, 0.0  ;;  %v4406_v6 = vpop.permute.xlu0 %4405  ;;  %v4425_v44 = vpop.permute.xlu1 %4424 }
 0x5aa   :  { %v4499_v46 = vmul.f32 %v4399_v34, %v11547_v56  ;;  %v4504_v47 = vmul.f32 %v4418_v36, %v11548_v35  ;;  %v4481_v39 = vmul.f32 %v9828_v58, %v3793_v21  ;;  %v3785_v59 = vrot.slane %v3777_v7, %v11406_v60 }
 0x5ab   :  { %v3778_v41 = vcombine.high %v3712_v31, %v3728_v33  ;;  %v4527_v4 = vsel %vm4513_vm11, %v4477_v49, 0.0  ;;  %v4485_v14 = vmul.f32 %v9866_v50, %v3794_v12  ;;  %v3795_v55 = vcombine.low %v3744_v37, %v3776_v26 }
 0x5ac   :  { %v4599_v63 = vsel %vm4513_vm11, %v4499_v46, 0.0  ;;  %v4632_v5 = vsel %vm4513_vm11, %v4504_v47, 0.0  ;;  %v4506_v1 = vmul.f32 %v4425_v44, %v3935_v9  ;;  %v4526_v13 = vadd.f32 %v4525_v0, %v11549_v20  ;;  %v11554_v9 = vld [vmem:[#allocation191_spill] sm:$0xff] }
 0x5ad   :  { %v4600_v30 = vadd.f32 %v4599_v63, %v4598_v18  ;;  %v4633_v51 = vadd.f32 %v4632_v5, %v4631_v23  ;;  %v3753_v58 = vrot.slane %v3745_v32, %v11406_v60  ;;  %v3746_v61 = vcombine.high %v3680_v53, %v3696_v2  ;;  %v4414_v23 = vpop.permute.xlu0 %4413  ;;  %v4433_v10 = vpop.permute.xlu1 %4432  ;;  %v11552_v2 = vld [vmem:[#allocation200_spill] sm:$0xff] }
 0x5ae   :  { %v4529_v27 = vsel %vm4513_vm11, %v4481_v39, 0.0  ;;  %v4489_v15 = vmul.f32 %v9906_v52, %v3795_v55  ;;  %v3796_v3 = vcombine.high %v3744_v37, %v3776_v26  ;;  %v4572_v38 = vsel %vm4513_vm11, %v4506_v1, 0.0  ;;  %v11551_v52 = vld [vmem:[#allocation196_spill] sm:$0xff] }
 0x5af   :  { %v4528_v18 = vadd.f32 %v4527_v4, %v4526_v13  ;;  %v4573_v33 = vadd.f32 %v4572_v38, %v4571_v42  ;;  %v3792_v25 = vrot.slane %v3778_v41, %v11406_v60  ;;  %v4531_v50 = vsel %vm4513_vm11, %v4485_v14, 0.0 }
 0x5b0   :  { %v4493_v48 = vmul.f32 %v9943_v40, %v3796_v3  ;;  %v3797_v17 = vcombine.low %v3753_v58, %v3785_v59  ;;  %v11550_v45 = vcombine.high %v11545_v19, %v11546_v22  ;;  %v11553_v31 = vcombine.low %v11551_v52, %v11552_v2 }
 0x5b1   :  { %v4530_v54 = vadd.f32 %v4529_v27, %v4528_v18  ;;  %v3760_v28 = vrot.slane %v3746_v61, %v11406_v60  ;;  %v4533_v16 = vsel %vm4513_vm11, %v4489_v15, 0.0  ;;  %v3798_v43 = vcombine.high %v3753_v58, %v3785_v59  ;;  %v4421_v42 = vpop.permute.xlu0 %4420  ;;  %v4440_v60 = vpop.permute.xlu1 %4439 }
 0x5b2   :  { %v4503_v53 = vmul.f32 %v4414_v23, %v11550_v45  ;;  %v4508_v8 = vmul.f32 %v4433_v10, %v11553_v31  ;;  %v4497_v62 = vmul.f32 %v9966_v29, %v3797_v17  ;;  %v3936_v34 = vcombine.high %v3896_v24, %v9978_v57  ;;  %v11555_v57 = vld [vmem:[#allocation188_spill] sm:$0xff] }
 0x5b3   :  { %v4532_v11 = vadd.f32 %v4531_v50, %v4530_v54  ;;  %v4535_v36 = vsel %vm4513_vm11, %v4493_v48, 0.0  ;;  %v4501_v49 = vmul.f32 %v4406_v6, %v3798_v43  ;;  %v3799_v19 = vcombine.low %v3760_v28, %v3792_v25 }
 0x5b4   :  { %v4601_v40 = vsel %vm4513_vm11, %v4503_v53, 0.0  ;;  %v4634_v7 = vsel %vm4513_vm11, %v4508_v8, 0.0  ;;  %v4510_v56 = vmul.f32 %v4440_v60, %v3936_v34  ;;  %v4537_v29 = vsel %vm4513_vm11, %v4497_v62, 0.0 }
 0x5b5   :  { %v4602_v26 = vadd.f32 %v4601_v40, %v4600_v30  ;;  %v4635_v21 = vadd.f32 %v4634_v7, %v4633_v51  ;;  %v4534_v22 = vadd.f32 %v4533_v16, %v4532_v11  ;;  %v4505_v46 = vmul.f32 %v4421_v42, %v3799_v19  ;;  %v4429_v12 = vpop.permute.xlu0 %4428  ;;  %v4448_v39 = vpop.permute.xlu1 %4447 }
 0x5b6   :  { %v4574_v47 = vsel %vm4513_vm11, %v4510_v56, 0.0  ;;  %v4539_v37 = vsel %vm4513_vm11, %v4501_v49, 0.0  ;;  %v11556_v24 = vcombine.low %v11554_v9, %v11555_v57  ;;  %v11557_v5 = vcombine.high %v11551_v52, %v11552_v2 }
 0x5b7   :  { %v4536_v35 = vadd.f32 %v4535_v36, %v4534_v22  ;;  %v4575_v32 = vadd.f32 %v4574_v47, %v4573_v33  ;;  %v4541_v30 = vsel %vm4513_vm11, %v4505_v46, 0.0  ;;  %v3800_v6 = vcombine.high %v3760_v28, %v3792_v25  ;;  %v11559_v47 = vld [vmem:[#allocation16_spill] sm:$0xff] }
 0x5b8   :  { %v4507_v0 = vmul.f32 %v4429_v12, %v11556_v24  ;;  %v4512_v59 = vmul.f32 %v4448_v39, %v11557_v5  ;;  %v11558_v27 = vcombine.high %v11554_v9, %v11555_v57  ;;  %v4716_v12 = vsub.s32 0, %v11559_v47  ;;  %v4699_v5 = vld [vmem:[%s10226_s2 + $0x8] sm:$0xff] }
 0x5b9   :  { %v4538_v63 = vadd.f32 %v4537_v29, %v4536_v35  ;;  %v4436_v14 = vpop.permute.xlu0 %4435  ;;  %v4639_v3 = vsel %vm4513_vm11, %v4575_v32, 0.0 }
 0x5ba   :  { %v4603_v51 = vsel %vm4513_vm11, %v4507_v0, 0.0  ;;  %v4636_v4 = vsel %vm4513_vm11, %v4512_v59, 0.0  ;;  %v4509_v1 = vmul.f32 %v4436_v14, %v3800_v6  ;;  %v4701_v59 = vld [vmem:[%s10226_s2 + $0x18] sm:$0xff]  ;;  %v4707_v6 = vld [vmem:[%s10226_s2 + $0x48] sm:$0xff] }
 0x5bb   :  { %v4540_v44 = vadd.f32 %v4539_v37, %v4538_v63  ;;  %v4604_v41 = vadd.f32 %v4603_v51, %v4602_v26  ;;  %v4637_v55 = vadd.f32 %v4636_v4, %v4635_v21  ;;  %v4705_v51 = vld [vmem:[%s10226_s2 + $0x38] sm:$0xff] }
 0x5bc   :  { %v4543_v13 = vsel %vm4513_vm11, %v4509_v1, 0.0  ;;  %v4713_v4 = vld [vmem:[%s10226_s2 + $0x78] sm:$0xff] }
 0x5bd   :  { %v4542_v20 = vadd.f32 %v4541_v30, %v4540_v44  ;;  %v4444_v61 = vpop.permute.xlu0 %4443  ;;  %v4648_v50 = vsel %vm4513_vm11, %v4637_v55, 0.0  ;;  %v4703_v30 = vld [vmem:[%s10226_s2 + $0x28] sm:$0xff]  ;;  %v4709_v44 = vld [vmem:[%s10226_s2 + $0x58] sm:$0xff] }
 0x5be   :  { %v4511_v15 = vmul.f32 %v4444_v61, %v11558_v27 }
 0x5bf   :  { %v4544_v58 = vadd.f32 %v4543_v13, %v4542_v20 }
 0x5c0   :  { %v4605_v33 = vsel %vm4513_vm11, %v4511_v15, 0.0 }
 0x5c1   :  { %v4638_v38 = vsel %vm4513_vm11, %v4544_v58, 0.0  ;;  %v4606_v23 = vadd.f32 %v4605_v33, %v4604_v41  ;;  %v4711_v41 = vld [vmem:[%s10226_s2 + $0x68] sm:$0xff] }
 0x5c2   :  { %v4640_v18 = vadd.f32 %v4639_v3, %v4638_v38 }
 0x5c3   :  { %v4647_v48 = vsel %vm4513_vm11, %v4606_v23, 0.0 }
 0x5c4   :  { %v4641_v25 = vrot.slane %v4640_v18, 4  ;;  %v4649_v45 = vadd.f32 %v4648_v50, %v4647_v48 }
 0x5c6   :  { %v4642_v17 = vadd.f32 %v4641_v25, %v4640_v18  ;;  %v4650_v10 = vrot.slane %v4649_v45, 4 }
 0x5c8   :  { %v4643_v53 = vrot.slane %v4642_v17, 2  ;;  %v4651_v54 = vadd.f32 %v4650_v10, %v4649_v45 }
 0x5ca   :  { %v4644_v52 = vadd.f32 %v4643_v53, %v4642_v17  ;;  %v4652_v2 = vrot.slane %v4651_v54, 2 }
 0x5cc   :  { %v4645_v31 = vrot.slane %v4644_v52, 1  ;;  %v4653_v8 = vadd.f32 %v4652_v2, %v4651_v54 }
 0x5ce   :  { %v4646_v28 = vadd.f32 %v4645_v31, %v4644_v52  ;;  %v4654_v16 = vrot.slane %v4653_v8, 1 }
 0x5d0   :  { %v4655_v62 = vadd.f32 %v4654_v16, %v4653_v8  ;;  %v4656_v43 = vmul.f32 0.0625, %v4646_v28 }
 0x5d2   :  { %v4657_v40 = vmul.f32 0.0625, %v4655_v62 }
 0x5d4   :  { %v4660_v11 = vsel %vm2155_vm4, %v4657_v40, %v4656_v43 }
 0x5d5   :  { %v4663_v26 = vsel %vm4662_vm12, %v4660_v11, -inf }
 0x5d6   :  { %4664 = vmax.xlane.f32.xlu0 %v4663_v26 }
 0x663   :  { %v4665_v7 = vpop.xlane.xlu0 %4664 }
 0x664   :  { %v4667_v42 = vrot.slane %v4665_v7, 1  ;;  %v4670_v34 = vsub.f32 %v4656_v43, %v4665_v7 }
 0x666   :  { %v4671_v36 = vsub.f32 %v4657_v40, %v4667_v42  ;;  %v4672_v49 = vmul.f32 1.442695, %v4670_v34 }
 0x668   :  { %v4674_v21 = vmul.f32 1.442695, %v4671_v36 }
 0x66a   :  { %5346 = vpow2.f32 %v4674_v21 }
 0x66b   :  { %5348 = vpow2.f32 %v4672_v49 }
 0x674   :  { %v5347_v19 = vpop.eup %5346 }
 0x675   :  { %v4678_v60 = vrot.slane %v5347_v19, 7  ;;  %v5349_v22 = vpop.eup %5348 }
 0x677   :  { %v4679_v56 = vsel %vm2155_vm4, %v4678_v60, %v5349_v22 }
 0x678   :  { %v4681_v29 = vsel %vm4662_vm12, %v4679_v56, 0.0 }
 0x679   :  { %4682 = vadd.xlane.f32.xlu1 %v4681_v29 }
 0x706   :  { %v4683_v46 = vpop.xlane.xlu1 %4682 }
 0x707   :  { %v4685_v35 = vrot.slane %v4683_v46, 1  ;;  %5350 = vrcp.f32 %v4683_v46 }
 0x709   :  { %5352 = vrcp.f32 %v4685_v35 }
 0x711   :  { %v5351_v37 = vpop.eup %5350 }
 0x712   :  { %v4689_v32 = vmul.f32 %v5351_v37, %v5349_v22 }
 0x713   :  { %v5353_v9 = vpop.eup %5352 }
 0x714   :  { %v4717_v57 = vrot.slane %v4689_v32, %v4716_v12  ;;  %v4691_v24 = vmul.f32 %v5353_v9, %v5347_v19 }
 0x716   :  { %4719 = vbcast.lane.b32.xlu0 %v4717_v57, 256  ;;  %v4724_v0 = vrot.slane %v4691_v24, %v4716_v12  ;;  %v4694_v39 = vrot.slane %v4691_v24, 7 }
 0x718   :  { %4726 = vbcast.lane.b32.xlu1 %v4724_v0, 256  ;;  %v4695_v63 = vsel %vm2155_vm4, %v4694_v39, %v4689_v32 }
 0x719   :  { %4697 = vst.msk [vmem:[#allocation2] sm:$0x3] %vm4662_vm12, %v4695_v63 }
 0x788   :  { %v10074_v14 = vpop.permute.xlu0 %4719 }
 0x789   :  { %v4729_v55 = vmul.f32 %v10074_v14, %v4699_v5  ;;  %v4731_v1 = vmul.f32 %v10074_v14, %v4701_v59  ;;  %v4733_v20 = vmul.f32 %v10074_v14, %v4703_v30  ;;  %v4735_v13 = vmul.f32 %v10074_v14, %v4705_v51 }
 0x78a   :  { %v10080_v58 = vpop.permute.xlu1 %4726  ;;  %v4737_v61 = vmul.f32 %v10074_v14, %v4707_v6  ;;  %v4739_v27 = vmul.f32 %v10074_v14, %v4709_v44  ;;  %v4741_v15 = vmul.f32 %v10074_v14, %v4711_v41  ;;  %v4743_v3 = vmul.f32 %v10074_v14, %v4713_v4 }
 0x78b   :  { %v4745_v38 = vmul.f32 %v10080_v58, %v4699_v5  ;;  %v4747_v18 = vmul.f32 %v10080_v58, %v4701_v59  ;;  %v4749_v33 = vmul.f32 %v10080_v58, %v4703_v30  ;;  %v4751_v23 = vmul.f32 %v10080_v58, %v4705_v51 }
 0x78c   :  { %v4766_v25 = vrot.slane %v4729_v55, 4  ;;  %v4778_v50 = vrot.slane %v4731_v1, 4  ;;  %v4790_v48 = vrot.slane %v4733_v20, 4  ;;  %v4802_v17 = vrot.slane %v4735_v13, 4 }
 0x78d   :  { %v4814_v45 = vrot.slane %v4737_v61, 4  ;;  %v4826_v53 = vrot.slane %v4739_v27, 4  ;;  %v4838_v10 = vrot.slane %v4741_v15, 4  ;;  %v4850_v54 = vrot.slane %v4743_v3, 4 }
 0x78e   :  { %v4767_v52 = vadd.f32 %v4766_v25, %v4729_v55  ;;  %v4779_v2 = vadd.f32 %v4778_v50, %v4731_v1  ;;  %v4791_v31 = vadd.f32 %v4790_v48, %v4733_v20  ;;  %v4803_v8 = vadd.f32 %v4802_v17, %v4735_v13 }
 0x78f   :  { %v4815_v28 = vadd.f32 %v4814_v45, %v4737_v61  ;;  %v4827_v16 = vadd.f32 %v4826_v53, %v4739_v27  ;;  %v4839_v62 = vadd.f32 %v4838_v10, %v4741_v15  ;;  %v4851_v43 = vadd.f32 %v4850_v54, %v4743_v3 }
 0x790   :  { %v4768_v40 = vrot.slane %v4767_v52, 2  ;;  %v4780_v11 = vrot.slane %v4779_v2, 2  ;;  %v4792_v26 = vrot.slane %v4791_v31, 2  ;;  %v4804_v7 = vrot.slane %v4803_v8, 2 }
 0x791   :  { %v4816_v42 = vrot.slane %v4815_v28, 2  ;;  %v4828_v34 = vrot.slane %v4827_v16, 2  ;;  %v4840_v36 = vrot.slane %v4839_v62, 2  ;;  %v4852_v49 = vrot.slane %v4851_v43, 2 }
 0x792   :  { %v4769_v21 = vadd.f32 %v4768_v40, %v4767_v52  ;;  %v4781_v19 = vadd.f32 %v4780_v11, %v4779_v2  ;;  %v4793_v60 = vadd.f32 %v4792_v26, %v4791_v31  ;;  %v4805_v22 = vadd.f32 %v4804_v7, %v4803_v8 }
 0x793   :  { %v4817_v56 = vadd.f32 %v4816_v42, %v4815_v28  ;;  %v10090_v29 = vadd.f32 %v4828_v34, %v4827_v16  ;;  %v10092_v46 = vadd.f32 %v4840_v36, %v4839_v62  ;;  %v10094_v35 = vadd.f32 %v4852_v49, %v4851_v43 }
 0x794   :  { %v4770_v47 = vrot.slane %v4769_v21, 1  ;;  %v4782_v12 = vrot.slane %v4781_v19, 1  ;;  %v4794_v37 = vrot.slane %v4793_v60, 1  ;;  %v4806_v32 = vrot.slane %v4805_v22, 1 }
 0x795   :  { %v4753_v9 = vmul.f32 %v10080_v58, %v4707_v6  ;;  %v4755_v57 = vmul.f32 %v10080_v58, %v4709_v44  ;;  %v4757_v24 = vmul.f32 %v10080_v58, %v4711_v41  ;;  %v4759_v0 = vmul.f32 %v10080_v58, %v4713_v4 }
 0x796   :  { %v4818_v39 = vrot.slane %v4817_v56, 1  ;;  %v4830_v63 = vrot.slane %v10090_v29, 1  ;;  %v4842_v5 = vrot.slane %v10092_v46, 1  ;;  %v4854_v59 = vrot.slane %v10094_v35, 1 }
 0x797   :  { %v4771_v30 = vadd.f32 %v4770_v47, %v4769_v21  ;;  %v4783_v51 = vadd.f32 %v4782_v12, %v4781_v19  ;;  %v4795_v55 = vadd.f32 %v4794_v37, %v4793_v60  ;;  %v10103_v1 = vadd.f32 %v4806_v32, %v4805_v22 }
 0x798   :  { %v4862_v20 = vrot.slane %v4745_v38, 4  ;;  %v4874_v6 = vrot.slane %v4747_v18, 4  ;;  %v4886_v13 = vrot.slane %v4749_v33, 4  ;;  %v4898_v44 = vrot.slane %v4751_v23, 4 }
 0x799   :  { %v4910_v61 = vrot.slane %v4753_v9, 4  ;;  %v4922_v41 = vrot.slane %v4755_v57, 4  ;;  %v4934_v27 = vrot.slane %v4757_v24, 4  ;;  %v4946_v4 = vrot.slane %v4759_v0, 4 }
 0x79a   :  { %v4863_v15 = vadd.f32 %v4862_v20, %v4745_v38  ;;  %v4875_v3 = vadd.f32 %v4874_v6, %v4747_v18  ;;  %v4887_v25 = vadd.f32 %v4886_v13, %v4749_v33  ;;  %v4899_v50 = vadd.f32 %v4898_v44, %v4751_v23 }
 0x79b   :  { %v4911_v48 = vadd.f32 %v4910_v61, %v4753_v9  ;;  %v4923_v17 = vadd.f32 %v4922_v41, %v4755_v57  ;;  %v4935_v45 = vadd.f32 %v4934_v27, %v4757_v24  ;;  %v4947_v53 = vadd.f32 %v4946_v4, %v4759_v0  ;;  %v10111_v24 = vld [vmem:[%s10226_s2] sm:$0xff]  ;;  %v10116_v0 = vld [vmem:[%s10226_s2 + $0x10] sm:$0xff] }
 0x79c   :  { %v4864_v10 = vrot.slane %v4863_v15, 2  ;;  %v4876_v54 = vrot.slane %v4875_v3, 2  ;;  %v4888_v52 = vrot.slane %v4887_v25, 2  ;;  %v4900_v2 = vrot.slane %v4899_v50, 2  ;;  %v4710_v61 = vld [vmem:[%s10226_s2 + $0x60] sm:$0xff] }
 0x79d   :  { %v4912_v31 = vrot.slane %v4911_v48, 2  ;;  %v4924_v8 = vrot.slane %v4923_v17, 2  ;;  %v4936_v28 = vrot.slane %v4935_v45, 2  ;;  %v4948_v16 = vrot.slane %v4947_v53, 2 }
 0x79e   :  { %v4865_v62 = vadd.f32 %v4864_v10, %v4863_v15  ;;  %v4877_v43 = vadd.f32 %v4876_v54, %v4875_v3  ;;  %v4889_v40 = vadd.f32 %v4888_v52, %v4887_v25  ;;  %v4901_v11 = vadd.f32 %v4900_v2, %v4899_v50 }
 0x79f   :  { %v4913_v38 = vadd.f32 %v4912_v31, %v4911_v48  ;;  %v4925_v18 = vadd.f32 %v4924_v8, %v4923_v17  ;;  %v4937_v33 = vadd.f32 %v4936_v28, %v4935_v45  ;;  %v4949_v23 = vadd.f32 %v4948_v16, %v4947_v53 }
 0x7a0   :  { %v4866_v26 = vrot.slane %v4865_v62, 1  ;;  %v4878_v7 = vrot.slane %v4877_v43, 1  ;;  %v4890_v42 = vrot.slane %v4889_v40, 1  ;;  %v4902_v34 = vrot.slane %v4901_v11, 1 }
 0x7a1   :  { %v4914_v36 = vrot.slane %v4913_v38, 1  ;;  %v4926_v49 = vrot.slane %v4925_v18, 1  ;;  %v4938_v21 = vrot.slane %v4937_v33, 1  ;;  %v4950_v19 = vrot.slane %v4949_v23, 1 }
 0x7a2   :  { %v4819_v60 = vadd.f32 %v4818_v39, %v4817_v56  ;;  %v4867_v22 = vadd.f32 %v4866_v26, %v4865_v62  ;;  %v4879_v47 = vadd.f32 %v4878_v7, %v4877_v43  ;;  %v4891_v12 = vadd.f32 %v4890_v42, %v4889_v40 }
 0x7a3   :  { %v4831_v37 = vadd.f32 %v4830_v63, %v10090_v29  ;;  %v4843_v32 = vadd.f32 %v4842_v5, %v10092_v46  ;;  %v4855_v9 = vadd.f32 %v4854_v59, %v10094_v35  ;;  %v4903_v57 = vadd.f32 %v4902_v34, %v4901_v11  ;;  %v4702_v46 = vld [vmem:[%s10226_s2 + $0x20] sm:$0xff]  ;;  %v4704_v35 = vld [vmem:[%s10226_s2 + $0x30] sm:$0xff] }
 0x7a4   :  { %v4915_v56 = vadd.f32 %v4914_v36, %v4913_v38  ;;  %v4927_v39 = vadd.f32 %v4926_v49, %v4925_v18  ;;  %v4992_v20 = vsel %vm2155_vm4, %v4783_v51, %v4771_v30  ;;  %v5006_v29 = vsel %vm2155_vm4, %v4879_v47, %v4867_v22  ;;  %v4706_v30 = vld [vmem:[%s10226_s2 + $0x40] sm:$0xff]  ;;  %v4708_v51 = vld [vmem:[%s10226_s2 + $0x50] sm:$0xff] }
 0x7a5   :  { %v4939_v63 = vadd.f32 %v4938_v21, %v4937_v33  ;;  %v4951_v5 = vadd.f32 %v4950_v19, %v4949_v23  ;;  %v4993_v59 = vsel %vm2158_vm5, %v4795_v55, %v4992_v20  ;;  %v5007_v6 = vsel %vm2158_vm5, %v4891_v12, %v5006_v29  ;;  %v4712_v55 = vld [vmem:[%s10226_s2 + $0x70] sm:$0xff] }
 0x7a6   :  { %v4994_v13 = vsel %vm2161_vm6, %v10103_v1, %v4993_v59  ;;  %v5008_v44 = vsel %vm2161_vm6, %v4903_v57, %v5007_v6  ;;  %v4728_v41 = vmul.f32 %v10074_v14, %v10111_v24  ;;  %v4730_v27 = vmul.f32 %v10074_v14, %v10116_v0 }
 0x7a7   :  { %v4995_v4 = vsel %vm2164_vm7, %v4819_v60, %v4994_v13  ;;  %v5009_v1 = vsel %vm2164_vm7, %v4915_v56, %v5008_v44  ;;  %v4732_v15 = vmul.f32 %v10074_v14, %v4702_v46  ;;  %v4734_v3 = vmul.f32 %v10074_v14, %v4704_v35 }
 0x7a8   :  { %v4996_v25 = vsel %vm2167_vm8, %v4831_v37, %v4995_v4  ;;  %v5010_v50 = vsel %vm2167_vm8, %v4927_v39, %v5009_v1  ;;  %v4736_v48 = vmul.f32 %v10074_v14, %v4706_v30  ;;  %v4738_v17 = vmul.f32 %v10074_v14, %v4708_v51 }
 0x7a9   :  { %v4997_v45 = vsel %vm2170_vm9, %v4843_v32, %v4996_v25  ;;  %v5011_v53 = vsel %vm2170_vm9, %v4939_v63, %v5010_v50  ;;  %v4740_v10 = vmul.f32 %v10074_v14, %v4710_v61  ;;  %v4742_v54 = vmul.f32 %v10074_v14, %v4712_v55 }
 0x7aa   :  { %v4998_v52 = vsel %vm2173_vm10, %v4855_v9, %v4997_v45  ;;  %v5012_v2 = vsel %vm2173_vm10, %v4951_v5, %v5011_v53  ;;  %v4760_v8 = vrot.slane %v4728_v41, 4  ;;  %v4772_v28 = vrot.slane %v4730_v27, 4 }
 0x7ab   :  { %v5312_v31 = vpack.c.bf16 %v5012_v2, %v4998_v52  ;;  %v4784_v16 = vrot.slane %v4732_v15, 4  ;;  %v4796_v62 = vrot.slane %v4734_v3, 4  ;;  %v4808_v43 = vrot.slane %v4736_v48, 4 }
 0x7ac   :  { %v4761_v40 = vadd.f32 %v4760_v8, %v4728_v41  ;;  %v4820_v11 = vrot.slane %v4738_v17, 4  ;;  %v4832_v38 = vrot.slane %v4740_v10, 4  ;;  %v4844_v18 = vrot.slane %v4742_v54, 4 }
 0x7ad   :  { %5313 = vmatprep.subr.bf16.mxu0 %v5312_v31  ;;  %v4773_v33 = vadd.f32 %v4772_v28, %v4730_v27  ;;  %v4785_v23 = vadd.f32 %v4784_v16, %v4732_v15  ;;  %v4797_v26 = vadd.f32 %v4796_v62, %v4734_v3  ;;  %v4809_v7 = vadd.f32 %v4808_v43, %v4736_v48 }
 0x7ae   :  { %v4762_v14 = vrot.slane %v4761_v40, 2  ;;  %v4821_v42 = vadd.f32 %v4820_v11, %v4738_v17  ;;  %v4833_v34 = vadd.f32 %v4832_v38, %v4740_v10  ;;  %v4845_v36 = vadd.f32 %v4844_v18, %v4742_v54 }
 0x7af   :  { %v4774_v49 = vrot.slane %v4773_v33, 2  ;;  %v4786_v21 = vrot.slane %v4785_v23, 2  ;;  %v4798_v19 = vrot.slane %v4797_v26, 2  ;;  %v4810_v60 = vrot.slane %v4809_v7, 2 }
 0x7b0   :  { %v4763_v22 = vadd.f32 %v4762_v14, %v4761_v40  ;;  %v4822_v47 = vrot.slane %v4821_v42, 2  ;;  %v4834_v12 = vrot.slane %v4833_v34, 2  ;;  %v4846_v57 = vrot.slane %v4845_v36, 2 }
 0x7b1   :  { %v4775_v37 = vadd.f32 %v4774_v49, %v4773_v33  ;;  %v4787_v32 = vadd.f32 %v4786_v21, %v4785_v23  ;;  %v10161_v9 = vadd.f32 %v4798_v19, %v4797_v26  ;;  %v4744_v56 = vmul.f32 %v10080_v58, %v10111_v24 }
 0x7b2   :  { %v4746_v39 = vmul.f32 %v10080_v58, %v10116_v0  ;;  %v4764_v20 = vrot.slane %v4763_v22, 1  ;;  %v4811_v29 = vadd.f32 %v4810_v60, %v4809_v7  ;;  %v4748_v63 = vmul.f32 %v10080_v58, %v4702_v46 }
 0x7b3   :  { %v4750_v5 = vmul.f32 %v10080_v58, %v4704_v35  ;;  %v4752_v59 = vmul.f32 %v10080_v58, %v4706_v30  ;;  %v4776_v6 = vrot.slane %v4775_v37, 1  ;;  %v4754_v13 = vmul.f32 %v10080_v58, %v4708_v51 }
 0x7b4   :  { %v4756_v44 = vmul.f32 %v10080_v58, %v4710_v61  ;;  %v4758_v41 = vmul.f32 %v10080_v58, %v4712_v55  ;;  %v4823_v27 = vadd.f32 %v4822_v47, %v4821_v42  ;;  %v4788_v24 = vrot.slane %v4787_v32, 1 }
 0x7b5   :  { %v4800_v4 = vrot.slane %v10161_v9, 1  ;;  %v10174_v0 = vadd.f32 %v4834_v12, %v4833_v34  ;;  %v10176_v1 = vadd.f32 %v4846_v57, %v4845_v36  ;;  %v4765_v46 = vadd.f32 %v4764_v20, %v4763_v22 }
 0x7b6   :  { %v4777_v15 = vadd.f32 %v4776_v6, %v4775_v37  ;;  %v4812_v35 = vrot.slane %v4811_v29, 1  ;;  %v4856_v3 = vrot.slane %v4744_v56, 4  ;;  %v4868_v30 = vrot.slane %v4746_v39, 4 }
 0x7b7   :  { %v4880_v25 = vrot.slane %v4748_v63, 4  ;;  %v4892_v50 = vrot.slane %v4750_v5, 4  ;;  %v4904_v51 = vrot.slane %v4752_v59, 4  ;;  %v4916_v61 = vrot.slane %v4754_v13, 4 }
 0x7b8   :  { %v4857_v48 = vadd.f32 %v4856_v3, %v4744_v56  ;;  %v4928_v17 = vrot.slane %v4756_v44, 4  ;;  %v4940_v58 = vrot.slane %v4758_v41, 4  ;;  %v4869_v55 = vadd.f32 %v4868_v30, %v4746_v39 }
 0x7b9   :  { %v4881_v45 = vadd.f32 %v4880_v25, %v4748_v63  ;;  %v4893_v53 = vadd.f32 %v4892_v50, %v4750_v5  ;;  %v4905_v10 = vadd.f32 %v4904_v51, %v4752_v59  ;;  %v4917_v52 = vadd.f32 %v4916_v61, %v4754_v13 }
 0x7ba   :  { %v4858_v54 = vrot.slane %v4857_v48, 2  ;;  %v4929_v2 = vadd.f32 %v4928_v17, %v4756_v44  ;;  %v4941_v31 = vadd.f32 %v4940_v58, %v4758_v41  ;;  %v4870_v8 = vrot.slane %v4869_v55, 2 }
 0x7bb   :  { %v4882_v28 = vrot.slane %v4881_v45, 2  ;;  %v4894_v16 = vrot.slane %v4893_v53, 2  ;;  %v4906_v62 = vrot.slane %v4905_v10, 2  ;;  %v4918_v40 = vrot.slane %v4917_v52, 2 }
 0x7bc   :  { %v4859_v43 = vadd.f32 %v4858_v54, %v4857_v48  ;;  %v4930_v11 = vrot.slane %v4929_v2, 2  ;;  %v4942_v38 = vrot.slane %v4941_v31, 2  ;;  %v4871_v18 = vadd.f32 %v4870_v8, %v4869_v55  ;;  %v4952_v55 = vld [vmem:[%s10229_s5] sm:$0xff] }
 0x7bd   :  { %v4883_v33 = vadd.f32 %v4882_v28, %v4881_v45  ;;  %v4895_v23 = vadd.f32 %v4894_v16, %v4893_v53  ;;  %v4907_v26 = vadd.f32 %v4906_v62, %v4905_v10  ;;  %v4789_v7 = vadd.f32 %v4788_v24, %v4787_v32 }
 0x7be   :  { %v4860_v14 = vrot.slane %v4859_v43, 1  ;;  %v4919_v42 = vadd.f32 %v4918_v40, %v4917_v52  ;;  %v4931_v34 = vadd.f32 %v4930_v11, %v4929_v2  ;;  %v4872_v36 = vrot.slane %v4871_v18, 1  ;;  %v5104_v11 = vld [vmem:[%s10230_s6] sm:$0xff] }
 0x7bf   :  { %v4884_v49 = vrot.slane %v4883_v33, 1  ;;  %v4896_v21 = vrot.slane %v4895_v23, 1  ;;  %v4943_v19 = vadd.f32 %v4942_v38, %v4941_v31  ;;  %v4824_v60 = vrot.slane %v4823_v27, 1 }
 0x7c0   :  { %v4836_v22 = vrot.slane %v10174_v0, 1  ;;  %v4861_v47 = vadd.f32 %v4860_v14, %v4859_v43  ;;  %v4908_v12 = vrot.slane %v4907_v26, 1  ;;  %v4848_v37 = vrot.slane %v10176_v1, 1 }
 0x7c1   :  { %v4873_v57 = vadd.f32 %v4872_v36, %v4871_v18  ;;  %v4885_v56 = vadd.f32 %v4884_v49, %v4883_v33  ;;  %v4920_v39 = vrot.slane %v4919_v42, 1  ;;  %v4801_v20 = vadd.f32 %v4800_v4, %v10161_v9  ;;  %v5108_v33 = vld [vmem:[%s10231_s7] sm:$0xff] }
 0x7c2   :  { %v4813_v32 = vadd.f32 %v4812_v35, %v4811_v29  ;;  %v4932_v63 = vrot.slane %v4931_v34, 1  ;;  %v4985_v5 = vsel %vm2155_vm4, %v4777_v15, %v4765_v46  ;;  %v4897_v59 = vadd.f32 %v4896_v21, %v4895_v23 }
 0x7c3   :  { %v4944_v6 = vrot.slane %v4943_v19, 1  ;;  %v4986_v13 = vsel %vm2158_vm5, %v4789_v7, %v4985_v5  ;;  %v4999_v44 = vsel %vm2155_vm4, %v4873_v57, %v4861_v47  ;;  %v4825_v41 = vadd.f32 %v4824_v60, %v4823_v27 }
 0x7c4   :  { %v4909_v24 = vadd.f32 %v4908_v12, %v4907_v26  ;;  %v4987_v3 = vsel %vm2161_vm6, %v4801_v20, %v4986_v13  ;;  %v5000_v30 = vsel %vm2158_vm5, %v4885_v56, %v4999_v44  ;;  %v4837_v25 = vadd.f32 %v4836_v22, %v10174_v0 }
 0x7c5   :  { %v4921_v50 = vadd.f32 %v4920_v39, %v4919_v42  ;;  %v4988_v9 = vsel %vm2164_vm7, %v4813_v32, %v4987_v3  ;;  %v5001_v29 = vsel %vm2161_vm6, %v4897_v59, %v5000_v30  ;;  %v4933_v4 = vadd.f32 %v4932_v63, %v4931_v34 }
 0x7c6   :  { %v4989_v46 = vsel %vm2167_vm8, %v4825_v41, %v4988_v9  ;;  %v5002_v15 = vsel %vm2164_vm7, %v4909_v24, %v5001_v29  ;;  %v4849_v35 = vadd.f32 %v4848_v37, %v10176_v1  ;;  %v4945_v27 = vadd.f32 %v4944_v6, %v4943_v19 }
 0x7c7   :  { %v4990_v51 = vsel %vm2170_vm9, %v4837_v25, %v4989_v46  ;;  %v5003_v48 = vsel %vm2167_vm8, %v4921_v50, %v5002_v15  ;;  %v5398_v2 = vmov 0  }
 0x7c8   :  { %v5004_v61 = vsel %vm2170_vm9, %v4933_v4, %v5003_v48  ;;  %v4991_v0 = vsel %vm2173_vm10, %v4849_v35, %v4990_v51  ;;  %5344 = vset.pattern.permute.xlu0 %v5398_v2  ;;  %5345 = vset.pattern.permute.xlu1 %v5398_v2 }
 0x7c9   :  { %v5005_v17 = vsel %vm2173_vm10, %v4945_v27, %v5004_v61 }
 0x7ca   :  { %v5314_v58 = vpack.c.bf16 %v5005_v17, %v4991_v0 }
 0x7cc   :  { %5315 = vmatpush1.bf16.msra.mxu0 %v5314_v58 }
 0x7cf   :  { %5212 = vmatmul.mubr.msk.f32.vlgmr.msra.gmra.mrb[50].mxu0 %vm5017_vm13, %v4952_v55 }
 0x8a2   :  { %v5087_v1 = vpop.f32.mrb[50].mxu0 }
 0x8a3   :  { %v5095_v45 = vmul.f32 %v5087_v1, %v5087_v1  ;;  %v5089_v53 = vpop.f32.mrb[51].mxu0 }
 0x8a4   :  { %v5092_v10 = vadd.f32 %v5089_v53, %v5087_v1  ;;  %v5096_v54 = vmul.f32 %v5089_v53, %v5089_v53 }
 0x8a6   :  { %v5097_v52 = vadd.f32 %v5096_v54, %v5095_v45  ;;  %5093 = vadd.xlane.f32.xlu0 %v5092_v10 }
 0x8a8   :  { %5098 = vadd.xlane.f32.xlu1 %v5097_v52 }
 0x933   :  { %v5094_v31 = vpop.xlane.xlu0 %5093 }
 0x934   :  { %v5100_v8 = vmul.f32 0.00390625, %v5094_v31 }
 0x935   :  { %v5099_v28 = vpop.xlane.xlu1 %5098 }
 0x936   :  { %v5102_v16 = vmul.f32 %v5100_v8, %v5100_v8  ;;  %v5101_v62 = vmul.f32 0.00390625, %v5099_v28 }
 0x938   :  { %v5103_v43 = vsub.f32 %v5101_v62, %v5102_v16 }
 0x93a   :  { %v5105_v40 = vadd.f32 1e-05, %v5103_v43 }
 0x93c   :  { %5354 = vrsqrt.f32 %v5105_v40 }
 0x946   :  { %v5355_v38 = vpop.eup %5354 }
 0x947   :  { %v5107_v18 = vmul.f32 %v5355_v38, %v5104_v11 }
 0x949   :  { %5113 = vperm.xlu0 %5344, %v5107_v18   ;;  %v5109_v23 = vmul.f32 %v5107_v18, %v5100_v8 }
 0x94b   :  { %v5110_v26 = vsub.f32 %v5108_v33, %v5109_v23 }
 0x94d   :  { %5120 = vperm.xlu1 %5345, %v5110_v26  }
 0x94e   :  { %5367 = shalt.err (!%p5364_p4)
}
 0x94f   :  { %s5368_s14 = scalar_lea.hbm %s10233_s9, 32 }
 0x950   :  { %p5369_p5 = scmp.ne.s32.totalorder %s10233_s9, %s5368_s14  ;;  %p5372_p6 = scmp.lt.u32.totalorder %s5368_s14, %s10233_s9 }
 0x952   :  { %p5374_p7 = pnand %p5372_p6, %p5369_p5 }
 0x954   :  { %5377 = shalt.err (!%p5374_p7)
}
 0x955   :  { %5140 = dma.vmem_to_hbm [thread:$0]  %s5138_s11, 32, %s10233_s9, [#allocation3]  }
 0x9c8   :  { %v5114_v7 = vpop.permute.xlu0 %5113 }
 0x9c9   :  { %v5116_v14 = vmul.f32 %v5114_v7, %v5087_v1  ;;  %v5117_v42 = vmul.f32 %v5114_v7, %v5089_v53 }
 0x9cc   :  { %v5121_v34 = vpop.permute.xlu1 %5120 }
 0x9cd   :  { %v5123_v36 = vadd.f32 %v5121_v34, %v5116_v14  ;;  %v5124_v49 = vadd.f32 %v5121_v34, %v5117_v42 }
 0x9cf   :  { %v5125_v21 = vmax.f32 %v5123_v36, 0.0  ;;  %v5126_v19 = vmax.f32 %v5124_v49, 0.0 }
 0x9d1   :  { %5127 = vst [vmem:[%s10232_s8] sm:$0xff] %v5125_v21  ;;  %5128 = vst [vmem:[%s10232_s8 + $0x8] sm:$0xff] %v5126_v19 }
 0x9d2   :  { %5378 = dma.done.wait [#allocation3], 32  }
 0x9d3   :  { %5379 = vsyncadd [#allocation3], 4294967264 }
 0x9d4   :  { %5146 = vsyncpa [#allocation3], 1 }

</bundles_post_ra>
